<compile_context>
chip_gen: v6e
topology: v6e:2x2x1
jax: 0.10.0
libtpu: 0.0.40
codegen_flags: <defaults>
</compile_context>

<pallas_src>
import math
import functools

import jax
import jax.numpy as jnp
from jax.experimental import pallas as pl
from jax.experimental.pallas import tpu as pltpu


# ----------------------------- Pallas kernel --------------------------------

def btb_kernel(gate_ref,                                   # SMEM (2,)  [tanh(a_attn), tanh(a_dense)]
               x_ref,                                      # (TB, S, C) f32
               ln_g_ref, ln_b_ref,                         # (5, C) f32  LayerNorm gammas / betas
               wqkv1_ref, wo1_ref, bo1_ref,                # GSA cross-attn (bf16 W, f32 bias)
               wg1_ref, bg1_ref, wg2_ref, bg2_ref,         # GSA GEGLU feed-forward
               wqkv2_ref, wo2_ref, bo2_ref,                # attn2 (self-attention)
               wf1_ref, bf1_ref, wf2_ref, bf2_ref,         # block GEGLU feed-forward
               o_ref,                                      # (TB, S, C)
               *, heads, dim_head, eps):
    TB, S, C = x_ref.shape
    M = TB * S
    inner = heads * dim_head
    scale = dim_head ** -0.5
    bf16 = jnp.bfloat16

    def layer_norm(t, idx):                                # t: (M, C) f32
        g = ln_g_ref[idx:idx + 1, :]
        b = ln_b_ref[idx:idx + 1, :]
        mu = jnp.mean(t, axis=-1, keepdims=True)
        var = jnp.mean(jnp.square(t - mu), axis=-1, keepdims=True)
        return (t - mu) * jax.lax.rsqrt(var + eps) * g + b

    def self_attention(tn, wqkv_ref, wo_ref, bo_ref):
        # Fused QKV projection: one (M, C) @ (C, 3*inner) bf16 MXU matmul, f32 accumulation.
        qkv = jnp.dot(tn.astype(bf16), wqkv_ref[...],
                      preferred_element_type=jnp.float32)          # (M, 3*inner) f32
        proj = jnp.zeros((M, C), jnp.float32)
        for h in range(heads):                                     # heads is small & static
            lo = h * dim_head
            q_h = (qkv[:, lo:lo + dim_head] * scale).reshape(TB, S, dim_head).astype(bf16)
            k_h = qkv[:, inner + lo:inner + lo + dim_head].reshape(TB, S, dim_head).astype(bf16)
            v_h = qkv[:, 2 * inner + lo:2 * inner + lo + dim_head].reshape(TB, S, dim_head).astype(bf16)
            sim = jnp.einsum('bid,bjd->bij', q_h, k_h,
                             preferred_element_type=jnp.float32)   # (TB, S, S) f32
            sim = sim - jnp.max(sim, axis=-1, keepdims=True)       # stable softmax
            p = jnp.exp(sim)
            p = p * pl.reciprocal(jnp.sum(p, axis=-1, keepdims=True), approx=True)
            o_h = jnp.einsum('bij,bjd->bid', p.astype(bf16), v_h,
                             preferred_element_type=jnp.float32)   # (TB, S, D) f32
            # Project this head through its slice of Wo and accumulate: no lane-concat relayout.
            proj = proj + jnp.dot(o_h.reshape(M, dim_head).astype(bf16),
                                  wo_ref[lo:lo + dim_head, :],
                                  preferred_element_type=jnp.float32)
        return proj + bo_ref[0:1, :]

    def geglu_ff(tn, w1_ref, b1_ref, w2_ref, b2_ref):
        hproj = jnp.dot(tn.astype(bf16), w1_ref[...],
                        preferred_element_type=jnp.float32) + b1_ref[0:1, :]   # (M, 2*ffd)
        half = w1_ref.shape[1] // 2
        a = hproj[:, :half]
        gate = hproj[:, half:]
        # TODO(synk): torch uses exact erf-GELU; tanh approximation used here (|diff| < ~1e-3).
        g = 0.5 * gate * (1.0 + jnp.tanh(0.7978845608028654 * (gate + 0.044715 * gate * gate * gate)))
        return jnp.dot((a * g).astype(bf16), w2_ref[...],
                       preferred_element_type=jnp.float32) + b2_ref[0:1, :]

    g_attn = gate_ref[0]       # tanh(alpha_attn)
    g_dense = gate_ref[1]      # tanh(alpha_dense)

    x = x_ref[...].reshape(M, C)                # f32 activations for LN / residual math

    # ---- x = attn1(block.norm1(x)) + x  (GatedSelfAttention, objs=None) ----
    z = layer_norm(x, 0)                                                         # block.norm1
    z = z + g_attn * self_attention(layer_norm(z, 1), wqkv1_ref, wo1_ref, bo1_ref)   # gsa.norm1 + attn
    z = z + g_dense * geglu_ff(layer_norm(z, 2), wg1_ref, bg1_ref, wg2_ref, bg2_ref)  # gsa.norm2 + ff
    x = x + z

    # ---- x = attn2(block.norm2(x)) + x  (context=None -> self-attention) ----
    x = x + self_attention(layer_norm(x, 3), wqkv2_ref, wo2_ref, bo2_ref)

    # ---- x = ff(block.norm3(x)) + x  (GEGLU) ----
    x = x + geglu_ff(layer_norm(x, 4), wf1_ref, bf1_ref, wf2_ref, bf2_ref)

    o_ref[...] = x.reshape(TB, S, C).astype(o_ref.dtype)


# ------------------------------- wrapper -------------------------------------

def _cdiv(a, b):
    return -(-a // b)


def basic_transformer_block(x, params, *, movie_len, height, width, heads, dim_head,
                            block_b=256, eps=1e-5):
    BHW, N, C = x.shape
    assert N == movie_len and BHW % (height * width) == 0
    b = BHW // (height * width)
    S = height * width
    inner = heads * dim_head
    ffd = 4 * C

    # rearrange '(b h w) n c -> (b n) (h w) c' (plain-JAX glue, same as the torch forward)
    xr = x.reshape(b, height, width, N, C).transpose(0, 3, 1, 2, 4).reshape(b * N, S, C)
    B_total = b * N

    # Tile the batch axis; pad (zeros are LN/softmax-safe) instead of asserting divisibility.
    block_b = max(1, min(block_b, B_total))
    n_blocks = _cdiv(B_total, block_b)
    B_pad = n_blocks * block_b
    if B_pad != B_total:
        xr = jnp.pad(xr, ((0, B_pad - B_total), (0, 0), (0, 0)))

    wdt = jnp.bfloat16   # MXU-native operand dtype; accumulation stays f32 in-kernel
    gates = jnp.tanh(jnp.stack([params["alpha_attn"], params["alpha_dense"]]).astype(jnp.float32))

    kernel = functools.partial(btb_kernel, heads=heads, dim_head=dim_head, eps=eps)
    rep2 = lambda i: (0, 0)      # replicated (whole-array) 2-D blocks

    out = pl.pallas_call(
        kernel,
        out_shape=jax.ShapeDtypeStruct((B_pad, S, C), x.dtype),
        grid=(n_blocks,),
        in_specs=[
            pl.BlockSpec(memory_space=pltpu.MemorySpace.SMEM),             # gates (scalars)
            pl.BlockSpec((block_b, S, C), lambda i: (i, 0, 0)),            # x
            pl.BlockSpec((5, C), rep2), pl.BlockSpec((5, C), rep2),        # LN gamma / beta
            pl.BlockSpec((C, 3 * inner), rep2), pl.BlockSpec((inner, C), rep2), pl.BlockSpec((1, C), rep2),
            pl.BlockSpec((C, 2 * ffd), rep2), pl.BlockSpec((1, 2 * ffd), rep2),
            pl.BlockSpec((ffd, C), rep2), pl.BlockSpec((1, C), rep2),
            pl.BlockSpec((C, 3 * inner), rep2), pl.BlockSpec((inner, C), rep2), pl.BlockSpec((1, C), rep2),
            pl.BlockSpec((C, 2 * ffd), rep2), pl.BlockSpec((1, 2 * ffd), rep2),
            pl.BlockSpec((ffd, C), rep2), pl.BlockSpec((1, C), rep2),
        ],
        out_specs=pl.BlockSpec((block_b, S, C), lambda i: (i, 0, 0)),
        compiler_params=pltpu.CompilerParams(
            dimension_semantics=("parallel",),
            vmem_limit_bytes=32 * 1024 * 1024),   # safe on v5e/v6e/v7x; re-budget for big block_b
    )(gates, xr,
      params["ln_g"], params["ln_b"],
      params["wqkv1"].astype(wdt), params["wo1"].astype(wdt), params["bo1"],
      params["wg1"].astype(wdt), params["bg1"], params["wg2"].astype(wdt), params["bg2"],
      params["wqkv2"].astype(wdt), params["wo2"].astype(wdt), params["bo2"],
      params["wf1"].astype(wdt), params["bf1"], params["wf2"].astype(wdt), params["bf2"])

    return out[:B_total]


# --------------------------- params / reference ------------------------------

def make_params(key, dim, heads, dim_head):
    inner = heads * dim_head
    ffd = 4 * dim
    ks = jax.random.split(key, 16)
    u = lambda k, shape, fan_in: jax.random.uniform(
        k, shape, jnp.float32, -1.0 / math.sqrt(fan_in), 1.0 / math.sqrt(fan_in))
    return {
        # LayerNorms: [0]=block.norm1, [1]=gsa.norm1, [2]=gsa.norm2, [3]=block.norm2, [4]=block.norm3
        "ln_g": 1.0 + 0.05 * jax.random.normal(ks[14], (5, dim), jnp.float32),
        "ln_b": 0.05 * jax.random.normal(ks[15], (5, dim), jnp.float32),
        "alpha_attn": jnp.float32(0.7),
        "alpha_dense": jnp.float32(0.5),
        # weights stored as (in, out) == torch Linear weight.T; Wq/Wk/Wv fused along out dim
        "wqkv1": u(ks[0], (dim, 3 * inner), dim),
        "wo1": u(ks[1], (inner, dim), inner), "bo1": u(ks[2], (1, dim), inner),
        "wg1": u(ks[3], (dim, 2 * ffd), dim), "bg1": u(ks[4], (1, 2 * ffd), dim),
        "wg2": u(ks[5], (ffd, dim), ffd), "bg2": u(ks[6], (1, dim), ffd),
        "wqkv2": u(ks[7], (dim, 3 * inner), dim),
        "wo2": u(ks[8], (inner, dim), inner), "bo2": u(ks[9], (1, dim), inner),
        "wf1": u(ks[10], (dim, 2 * ffd), dim), "bf1": u(ks[11], (1, 2 * ffd), dim),
        "wf2": u(ks[12], (ffd, dim), ffd), "bf2": u(ks[13], (1, dim), ffd),
    }


def reference_forward(x, params, *, movie_len, height, width, heads, dim_head, eps=1e-5):
    BHW, N, C = x.shape
    b = BHW // (height * width)
    S = height * width
    inner = heads * dim_head
    y = x.reshape(b, height, width, N, C).transpose(0, 3, 1, 2, 4).reshape(b * N, S, C)

    def ln(t, g, bt):
        mu = jnp.mean(t, -1, keepdims=True)
        var = jnp.mean((t - mu) ** 2, -1, keepdims=True)
        return (t - mu) / jnp.sqrt(var + eps) * g + bt

    def attn(t, wqkv, wo, bo):
        B_, S_, _ = t.shape
        qkv = t @ wqkv
        q, k, v = qkv[..., :inner], qkv[..., inner:2 * inner], qkv[..., 2 * inner:]
        split = lambda u: u.reshape(B_, S_, heads, dim_head).transpose(0, 2, 1, 3)
        qh, kh, vh = split(q), split(k), split(v)
        sim = jnp.einsum('bhid,bhjd->bhij', qh, kh) * (dim_head ** -0.5)
        p = jax.nn.softmax(sim, axis=-1)
        o = jnp.einsum('bhij,bhjd->bhid', p, vh)
        o = o.transpose(0, 2, 1, 3).reshape(B_, S_, inner)
        return o @ wo + bo[0]

    def geglu(t, w1, b1, w2, b2):
        h = t @ w1 + b1[0]
        a, gate = jnp.split(h, 2, axis=-1)
        return (a * jax.nn.gelu(gate, approximate=False)) @ w2 + b2[0]

    ga = jnp.tanh(params["alpha_attn"])
    gd = jnp.tanh(params["alpha_dense"])
    G, B = params["ln_g"], params["ln_b"]

    z = ln(y, G[0], B[0])                                                   # block.norm1
    z = z + ga * attn(ln(z, G[1], B[1]), params["wqkv1"], params["wo1"], params["bo1"])
    z = z + gd * geglu(ln(z, G[2], B[2]), params["wg1"], params["bg1"], params["wg2"], params["bg2"])
    y = y + z
    y = y + attn(ln(y, G[3], B[3]), params["wqkv2"], params["wo2"], params["bo2"])
    y = y + geglu(ln(y, G[4], B[4]), params["wf1"], params["bf1"], params["wf2"], params["bf2"])
    return y


# ---------------------------------- main -------------------------------------

if __name__ == "__main__":
    batch, height, width = 2, 4, 4
    movie_len, dim = 8, 32
    n_heads, d_head = 2, 16          # inner_dim = 32 == dim

    key = jax.random.PRNGKey(0)
    kx, kp = jax.random.split(key)
    # module input layout: '(b h w) n c'
    x = jax.random.normal(kx, (batch * height * width, movie_len, dim), jnp.float32)
    params = make_params(kp, dim, n_heads, d_head)

    # block_b=8 -> grid of 2 "parallel" steps even at these toy shapes (keeps both v7x TCs busy);
    # for real shapes leave the default (large, clamped) block_b and sweep.
    out = basic_transformer_block(x, params, movie_len=movie_len, height=height, width=width,
                                  heads=n_heads, dim_head=d_head, block_b=8)
    out = jax.block_until_ready(out)

    ref = reference_forward(x, params, movie_len=movie_len, height=height, width=width,
                            heads=n_heads, dim_head=d_head)
    assert out.shape == (batch * movie_len, height * width, dim)
    # bf16 MXU operands with f32 accumulation vs the all-f32 reference -> relaxed tolerance.
    assert jnp.allclose(out, ref, rtol=5e-2, atol=5e-2), "mismatch vs reference"
    print("KERNEL_OK")
</pallas_src>

<mosaic_0001>
module attributes {stable_mosaic.version = 11 : i64} {
  func.func @btb_kernel(%arg0: i32, %arg1: memref<2xf32, #tpu.memory_space<smem>>, %arg2: memref<8x16x32xf32, #tpu.memory_space<vmem>>, %arg3: memref<5x32xf32, #tpu.memory_space<vmem>>, %arg4: memref<5x32xf32, #tpu.memory_space<vmem>>, %arg5: memref<32x96xbf16, #tpu.memory_space<vmem>>, %arg6: memref<32x32xbf16, #tpu.memory_space<vmem>>, %arg7: memref<1x32xf32, #tpu.memory_space<vmem>>, %arg8: memref<32x256xbf16, #tpu.memory_space<vmem>>, %arg9: memref<1x256xf32, #tpu.memory_space<vmem>>, %arg10: memref<128x32xbf16, #tpu.memory_space<vmem>>, %arg11: memref<1x32xf32, #tpu.memory_space<vmem>>, %arg12: memref<32x96xbf16, #tpu.memory_space<vmem>>, %arg13: memref<32x32xbf16, #tpu.memory_space<vmem>>, %arg14: memref<1x32xf32, #tpu.memory_space<vmem>>, %arg15: memref<32x256xbf16, #tpu.memory_space<vmem>>, %arg16: memref<1x256xf32, #tpu.memory_space<vmem>>, %arg17: memref<128x32xbf16, #tpu.memory_space<vmem>>, %arg18: memref<1x32xf32, #tpu.memory_space<vmem>>, %arg19: memref<8x16x32xf32, #tpu.memory_space<vmem>>) attributes {dimension_semantics = [#tpu.dimension_semantics<parallel>], iteration_bounds = array<i64: 2>, scalar_prefetch = 0 : i64, scratch_operands = 0 : i64, tpu.core_type = #tpu.core_type<tc>, window_params = [{transform_indices = @transform_0, window_bounds = array<i64: 2>}, {transform_indices = @transform_1, window_bounds = array<i64: 8, 16, 32>}, {pipeline_mode = #tpu.pipeline_mode<synchronous>, transform_indices = @transform_2, window_bounds = array<i64: 5, 32>}, {pipeline_mode = #tpu.pipeline_mode<synchronous>, transform_indices = @transform_3, window_bounds = array<i64: 5, 32>}, {pipeline_mode = #tpu.pipeline_mode<synchronous>, transform_indices = @transform_4, window_bounds = array<i64: 32, 96>}, {pipeline_mode = #tpu.pipeline_mode<synchronous>, transform_indices = @transform_5, window_bounds = array<i64: 32, 32>}, {pipeline_mode = #tpu.pipeline_mode<synchronous>, transform_indices = @transform_6, window_bounds = array<i64: 1, 32>}, {pipeline_mode = #tpu.pipeline_mode<synchronous>, transform_indices = @transform_7, window_bounds = array<i64: 32, 256>}, {pipeline_mode = #tpu.pipeline_mode<synchronous>, transform_indices = @transform_8, window_bounds = array<i64: 1, 256>}, {pipeline_mode = #tpu.pipeline_mode<synchronous>, transform_indices = @transform_9, window_bounds = array<i64: 128, 32>}, {pipeline_mode = #tpu.pipeline_mode<synchronous>, transform_indices = @transform_10, window_bounds = array<i64: 1, 32>}, {pipeline_mode = #tpu.pipeline_mode<synchronous>, transform_indices = @transform_11, window_bounds = array<i64: 32, 96>}, {pipeline_mode = #tpu.pipeline_mode<synchronous>, transform_indices = @transform_12, window_bounds = array<i64: 32, 32>}, {pipeline_mode = #tpu.pipeline_mode<synchronous>, transform_indices = @transform_13, window_bounds = array<i64: 1, 32>}, {pipeline_mode = #tpu.pipeline_mode<synchronous>, transform_indices = @transform_14, window_bounds = array<i64: 32, 256>}, {pipeline_mode = #tpu.pipeline_mode<synchronous>, transform_indices = @transform_15, window_bounds = array<i64: 1, 256>}, {pipeline_mode = #tpu.pipeline_mode<synchronous>, transform_indices = @transform_16, window_bounds = array<i64: 128, 32>}, {pipeline_mode = #tpu.pipeline_mode<synchronous>, transform_indices = @transform_17, window_bounds = array<i64: 1, 32>}, {transform_indices = @transform_18, window_bounds = array<i64: 8, 16, 32>}]} {
    %c0 = arith.constant 0 : index
    %0 = memref.load %arg1[%c0] : memref<2xf32, #tpu.memory_space<smem>>
    %c1 = arith.constant 1 : index
    %1 = memref.load %arg1[%c1] : memref<2xf32, #tpu.memory_space<smem>>
    %c0_0 = arith.constant 0 : index
    %c0_1 = arith.constant 0 : index
    %c0_2 = arith.constant 0 : index
    %2 = vector.load %arg2[%c0_0, %c0_1, %c0_2] : memref<8x16x32xf32, #tpu.memory_space<vmem>>, vector<8x16x32xf32>
    %3 = vector.shape_cast %2 : vector<8x16x32xf32> to vector<128x32xf32>
    %c0_3 = arith.constant 0 : index
    %c0_4 = arith.constant 0 : index
    %4 = vector.load %arg3[%c0_3, %c0_4] : memref<5x32xf32, #tpu.memory_space<vmem>>, vector<1x32xf32>
    %c0_5 = arith.constant 0 : index
    %c0_6 = arith.constant 0 : index
    %5 = vector.load %arg4[%c0_5, %c0_6] : memref<5x32xf32, #tpu.memory_space<vmem>>, vector<1x32xf32>
    %cst = arith.constant dense<0.000000e+00> : vector<128xf32>
    %6 = vector.multi_reduction <add>, %3, %cst [1] : vector<128x32xf32> to vector<128xf32>
    %7 = vector.shape_cast %6 : vector<128xf32> to vector<128x1xf32>
    %cst_7 = arith.constant 3.200000e+01 : f32
    %8 = vector.broadcast %cst_7 : f32 to vector<128x1xf32>
    %9 = arith.divf %7, %8 : vector<128x1xf32>
    %10 = vector.broadcast %9 : vector<128x1xf32> to vector<128x32xf32>
    %11 = arith.subf %3, %10 : vector<128x32xf32>
    %12 = arith.mulf %11, %11 : vector<128x32xf32>
    %cst_8 = arith.constant dense<0.000000e+00> : vector<128xf32>
    %13 = vector.multi_reduction <add>, %12, %cst_8 [1] : vector<128x32xf32> to vector<128xf32>
    %14 = vector.shape_cast %13 : vector<128xf32> to vector<128x1xf32>
    %cst_9 = arith.constant 3.200000e+01 : f32
    %15 = vector.broadcast %cst_9 : f32 to vector<128x1xf32>
    %16 = arith.divf %14, %15 : vector<128x1xf32>
    %17 = vector.broadcast %9 : vector<128x1xf32> to vector<128x32xf32>
    %18 = arith.subf %3, %17 : vector<128x32xf32>
    %cst_10 = arith.constant 9.99999974E-6 : f32
    %19 = vector.broadcast %cst_10 : f32 to vector<128x1xf32>
    %20 = arith.addf %16, %19 : vector<128x1xf32>
    %21 = math.rsqrt %20 : vector<128x1xf32>
    %22 = vector.broadcast %21 : vector<128x1xf32> to vector<128x32xf32>
    %23 = arith.mulf %18, %22 : vector<128x32xf32>
    %24 = vector.broadcast %4 : vector<1x32xf32> to vector<128x32xf32>
    %25 = arith.mulf %23, %24 : vector<128x32xf32>
    %26 = vector.broadcast %5 : vector<1x32xf32> to vector<128x32xf32>
    %27 = arith.addf %25, %26 : vector<128x32xf32>
    %c1_11 = arith.constant 1 : index
    %c0_12 = arith.constant 0 : index
    %28 = vector.load %arg3[%c1_11, %c0_12] : memref<5x32xf32, #tpu.memory_space<vmem>>, vector<1x32xf32>
    %c1_13 = arith.constant 1 : index
    %c0_14 = arith.constant 0 : index
    %29 = vector.load %arg4[%c1_13, %c0_14] : memref<5x32xf32, #tpu.memory_space<vmem>>, vector<1x32xf32>
    %cst_15 = arith.constant dense<0.000000e+00> : vector<128xf32>
    %30 = vector.multi_reduction <add>, %27, %cst_15 [1] : vector<128x32xf32> to vector<128xf32>
    %31 = vector.shape_cast %30 : vector<128xf32> to vector<128x1xf32>
    %cst_16 = arith.constant 3.200000e+01 : f32
    %32 = vector.broadcast %cst_16 : f32 to vector<128x1xf32>
    %33 = arith.divf %31, %32 : vector<128x1xf32>
    %34 = vector.broadcast %33 : vector<128x1xf32> to vector<128x32xf32>
    %35 = arith.subf %27, %34 : vector<128x32xf32>
    %36 = arith.mulf %35, %35 : vector<128x32xf32>
    %cst_17 = arith.constant dense<0.000000e+00> : vector<128xf32>
    %37 = vector.multi_reduction <add>, %36, %cst_17 [1] : vector<128x32xf32> to vector<128xf32>
    %38 = vector.shape_cast %37 : vector<128xf32> to vector<128x1xf32>
    %cst_18 = arith.constant 3.200000e+01 : f32
    %39 = vector.broadcast %cst_18 : f32 to vector<128x1xf32>
    %40 = arith.divf %38, %39 : vector<128x1xf32>
    %41 = vector.broadcast %33 : vector<128x1xf32> to vector<128x32xf32>
    %42 = arith.subf %27, %41 : vector<128x32xf32>
    %cst_19 = arith.constant 9.99999974E-6 : f32
    %43 = vector.broadcast %cst_19 : f32 to vector<128x1xf32>
    %44 = arith.addf %40, %43 : vector<128x1xf32>
    %45 = math.rsqrt %44 : vector<128x1xf32>
    %46 = vector.broadcast %45 : vector<128x1xf32> to vector<128x32xf32>
    %47 = arith.mulf %42, %46 : vector<128x32xf32>
    %48 = vector.broadcast %28 : vector<1x32xf32> to vector<128x32xf32>
    %49 = arith.mulf %47, %48 : vector<128x32xf32>
    %50 = vector.broadcast %29 : vector<1x32xf32> to vector<128x32xf32>
    %51 = arith.addf %49, %50 : vector<128x32xf32>
    %52 = arith.truncf %51 : vector<128x32xf32> to vector<128x32xbf16>
    %c0_20 = arith.constant 0 : index
    %c0_21 = arith.constant 0 : index
    %53 = vector.load %arg5[%c0_20, %c0_21] : memref<32x96xbf16, #tpu.memory_space<vmem>>, vector<32x96xbf16>
    %cst_22 = arith.constant dense<0.000000e+00> : vector<128x96xf32>
    %54 = tpu.matmul %52, %53, %cst_22 {dimension_numbers = #tpu.dot_dimension_numbers<[1], [0], [0], [1], [0, 0, 1, 1], [], []>} : vector<128x32xbf16>, vector<32x96xbf16>, vector<128x96xf32> -> vector<128x96xf32>
    %cst_23 = arith.constant 0.000000e+00 : f32
    %55 = vector.broadcast %cst_23 : f32 to vector<128x32xf32>
    %56 = vector.extract_strided_slice %54 {offsets = [0, 0], sizes = [128, 16], strides = [1, 1]} : vector<128x96xf32> to vector<128x16xf32>
    %cst_24 = arith.constant 2.500000e-01 : f32
    %57 = vector.broadcast %cst_24 : f32 to vector<128x16xf32>
    %58 = arith.mulf %56, %57 : vector<128x16xf32>
    %59 = vector.shape_cast %58 : vector<128x16xf32> to vector<8x16x16xf32>
    %60 = arith.truncf %59 : vector<8x16x16xf32> to vector<8x16x16xbf16>
    %61 = vector.extract_strided_slice %54 {offsets = [0, 32], sizes = [128, 16], strides = [1, 1]} : vector<128x96xf32> to vector<128x16xf32>
    %62 = vector.shape_cast %61 : vector<128x16xf32> to vector<8x16x16xf32>
    %63 = arith.truncf %62 : vector<8x16x16xf32> to vector<8x16x16xbf16>
    %64 = vector.extract_strided_slice %54 {offsets = [0, 64], sizes = [128, 16], strides = [1, 1]} : vector<128x96xf32> to vector<128x16xf32>
    %65 = vector.shape_cast %64 : vector<128x16xf32> to vector<8x16x16xf32>
    %66 = arith.truncf %65 : vector<8x16x16xf32> to vector<8x16x16xbf16>
    "tpu.trace_start"() <{level = 10 : i32, message = "bid,bjd->bij"}> : () -> ()
    %cst_25 = arith.constant dense<0.000000e+00> : vector<8x16x16xf32>
    %67 = tpu.matmul %60, %63, %cst_25 {dimension_numbers = #tpu.dot_dimension_numbers<[2], [2], [1], [1], [0, 0, 0, 1, 1, 1], [0], [0]>} : vector<8x16x16xbf16>, vector<8x16x16xbf16>, vector<8x16x16xf32> -> vector<8x16x16xf32>
    "tpu.trace_stop"() : () -> ()
    %cst_26 = arith.constant dense<0xFF800000> : vector<8x16xf32>
    %68 = vector.multi_reduction <maximumf>, %67, %cst_26 [2] : vector<8x16x16xf32> to vector<8x16xf32>
    %69 = vector.shape_cast %68 : vector<8x16xf32> to vector<8x16x1xf32>
    %70 = vector.broadcast %69 : vector<8x16x1xf32> to vector<8x16x16xf32>
    %71 = arith.subf %67, %70 : vector<8x16x16xf32>
    %72 = math.exp %71 : vector<8x16x16xf32>
    %cst_27 = arith.constant dense<0.000000e+00> : vector<8x16xf32>
    %73 = vector.multi_reduction <add>, %72, %cst_27 [2] : vector<8x16x16xf32> to vector<8x16xf32>
    %74 = vector.shape_cast %73 : vector<8x16xf32> to vector<8x16x1xf32>
    %75 = tpu.reciprocal %74 {approx = true} : vector<8x16x1xf32> -> vector<8x16x1xf32>
    %76 = vector.broadcast %75 : vector<8x16x1xf32> to vector<8x16x16xf32>
    %77 = arith.mulf %72, %76 : vector<8x16x16xf32>
    %78 = arith.truncf %77 : vector<8x16x16xf32> to vector<8x16x16xbf16>
    "tpu.trace_start"() <{level = 10 : i32, message = "bij,bjd->bid"}> : () -> ()
    %cst_28 = arith.constant dense<0.000000e+00> : vector<8x16x16xf32>
    %79 = tpu.matmul %78, %66, %cst_28 {dimension_numbers = #tpu.dot_dimension_numbers<[2], [1], [1], [2], [0, 0, 0, 1, 1, 2], [0], [0]>} : vector<8x16x16xbf16>, vector<8x16x16xbf16>, vector<8x16x16xf32> -> vector<8x16x16xf32>
    "tpu.trace_stop"() : () -> ()
    %80 = vector.shape_cast %79 : vector<8x16x16xf32> to vector<128x16xf32>
    %81 = arith.truncf %80 : vector<128x16xf32> to vector<128x16xbf16>
    %c0_29 = arith.constant 0 : index
    %c0_30 = arith.constant 0 : index
    %82 = vector.load %arg6[%c0_29, %c0_30] : memref<32x32xbf16, #tpu.memory_space<vmem>>, vector<16x32xbf16>
    %cst_31 = arith.constant dense<0.000000e+00> : vector<128x32xf32>
    %83 = tpu.matmul %81, %82, %cst_31 {dimension_numbers = #tpu.dot_dimension_numbers<[1], [0], [0], [1], [0, 0, 1, 1], [], []>} : vector<128x16xbf16>, vector<16x32xbf16>, vector<128x32xf32> -> vector<128x32xf32>
    %84 = arith.addf %55, %83 : vector<128x32xf32>
    %85 = vector.extract_strided_slice %54 {offsets = [0, 16], sizes = [128, 16], strides = [1, 1]} : vector<128x96xf32> to vector<128x16xf32>
    %cst_32 = arith.constant 2.500000e-01 : f32
    %86 = vector.broadcast %cst_32 : f32 to vector<128x16xf32>
    %87 = arith.mulf %85, %86 : vector<128x16xf32>
    %88 = vector.shape_cast %87 : vector<128x16xf32> to vector<8x16x16xf32>
    %89 = arith.truncf %88 : vector<8x16x16xf32> to vector<8x16x16xbf16>
    %90 = vector.extract_strided_slice %54 {offsets = [0, 48], sizes = [128, 16], strides = [1, 1]} : vector<128x96xf32> to vector<128x16xf32>
    %91 = vector.shape_cast %90 : vector<128x16xf32> to vector<8x16x16xf32>
    %92 = arith.truncf %91 : vector<8x16x16xf32> to vector<8x16x16xbf16>
    %93 = vector.extract_strided_slice %54 {offsets = [0, 80], sizes = [128, 16], strides = [1, 1]} : vector<128x96xf32> to vector<128x16xf32>
    %94 = vector.shape_cast %93 : vector<128x16xf32> to vector<8x16x16xf32>
    %95 = arith.truncf %94 : vector<8x16x16xf32> to vector<8x16x16xbf16>
    "tpu.trace_start"() <{level = 10 : i32, message = "bid,bjd->bij"}> : () -> ()
    %cst_33 = arith.constant dense<0.000000e+00> : vector<8x16x16xf32>
    %96 = tpu.matmul %89, %92, %cst_33 {dimension_numbers = #tpu.dot_dimension_numbers<[2], [2], [1], [1], [0, 0, 0, 1, 1, 1], [0], [0]>} : vector<8x16x16xbf16>, vector<8x16x16xbf16>, vector<8x16x16xf32> -> vector<8x16x16xf32>
    "tpu.trace_stop"() : () -> ()
    %cst_34 = arith.constant dense<0xFF800000> : vector<8x16xf32>
    %97 = vector.multi_reduction <maximumf>, %96, %cst_34 [2] : vector<8x16x16xf32> to vector<8x16xf32>
    %98 = vector.shape_cast %97 : vector<8x16xf32> to vector<8x16x1xf32>
    %99 = vector.broadcast %98 : vector<8x16x1xf32> to vector<8x16x16xf32>
    %100 = arith.subf %96, %99 : vector<8x16x16xf32>
    %101 = math.exp %100 : vector<8x16x16xf32>
    %cst_35 = arith.constant dense<0.000000e+00> : vector<8x16xf32>
    %102 = vector.multi_reduction <add>, %101, %cst_35 [2] : vector<8x16x16xf32> to vector<8x16xf32>
    %103 = vector.shape_cast %102 : vector<8x16xf32> to vector<8x16x1xf32>
    %104 = tpu.reciprocal %103 {approx = true} : vector<8x16x1xf32> -> vector<8x16x1xf32>
    %105 = vector.broadcast %104 : vector<8x16x1xf32> to vector<8x16x16xf32>
    %106 = arith.mulf %101, %105 : vector<8x16x16xf32>
    %107 = arith.truncf %106 : vector<8x16x16xf32> to vector<8x16x16xbf16>
    "tpu.trace_start"() <{level = 10 : i32, message = "bij,bjd->bid"}> : () -> ()
    %cst_36 = arith.constant dense<0.000000e+00> : vector<8x16x16xf32>
    %108 = tpu.matmul %107, %95, %cst_36 {dimension_numbers = #tpu.dot_dimension_numbers<[2], [1], [1], [2], [0, 0, 0, 1, 1, 2], [0], [0]>} : vector<8x16x16xbf16>, vector<8x16x16xbf16>, vector<8x16x16xf32> -> vector<8x16x16xf32>
    "tpu.trace_stop"() : () -> ()
    %109 = vector.shape_cast %108 : vector<8x16x16xf32> to vector<128x16xf32>
    %110 = arith.truncf %109 : vector<128x16xf32> to vector<128x16xbf16>
    %c16 = arith.constant 16 : index
    %c0_37 = arith.constant 0 : index
    %111 = vector.load %arg6[%c16, %c0_37] : memref<32x32xbf16, #tpu.memory_space<vmem>>, vector<16x32xbf16>
    %cst_38 = arith.constant dense<0.000000e+00> : vector<128x32xf32>
    %112 = tpu.matmul %110, %111, %cst_38 {dimension_numbers = #tpu.dot_dimension_numbers<[1], [0], [0], [1], [0, 0, 1, 1], [], []>} : vector<128x16xbf16>, vector<16x32xbf16>, vector<128x32xf32> -> vector<128x32xf32>
    %113 = arith.addf %84, %112 : vector<128x32xf32>
    %c0_39 = arith.constant 0 : index
    %c0_40 = arith.constant 0 : index
    %114 = vector.load %arg7[%c0_39, %c0_40] : memref<1x32xf32, #tpu.memory_space<vmem>>, vector<1x32xf32>
    %115 = vector.broadcast %114 : vector<1x32xf32> to vector<128x32xf32>
    %116 = arith.addf %113, %115 : vector<128x32xf32>
    %117 = vector.broadcast %0 : f32 to vector<128x32xf32>
    %118 = arith.mulf %117, %116 : vector<128x32xf32>
    %119 = arith.addf %27, %118 : vector<128x32xf32>
    %c2 = arith.constant 2 : index
    %c0_41 = arith.constant 0 : index
    %120 = vector.load %arg3[%c2, %c0_41] : memref<5x32xf32, #tpu.memory_space<vmem>>, vector<1x32xf32>
    %c2_42 = arith.constant 2 : index
    %c0_43 = arith.constant 0 : index
    %121 = vector.load %arg4[%c2_42, %c0_43] : memref<5x32xf32, #tpu.memory_space<vmem>>, vector<1x32xf32>
    %cst_44 = arith.constant dense<0.000000e+00> : vector<128xf32>
    %122 = vector.multi_reduction <add>, %119, %cst_44 [1] : vector<128x32xf32> to vector<128xf32>
    %123 = vector.shape_cast %122 : vector<128xf32> to vector<128x1xf32>
    %cst_45 = arith.constant 3.200000e+01 : f32
    %124 = vector.broadcast %cst_45 : f32 to vector<128x1xf32>
    %125 = arith.divf %123, %124 : vector<128x1xf32>
    %126 = vector.broadcast %125 : vector<128x1xf32> to vector<128x32xf32>
    %127 = arith.subf %119, %126 : vector<128x32xf32>
    %128 = arith.mulf %127, %127 : vector<128x32xf32>
    %cst_46 = arith.constant dense<0.000000e+00> : vector<128xf32>
    %129 = vector.multi_reduction <add>, %128, %cst_46 [1] : vector<128x32xf32> to vector<128xf32>
    %130 = vector.shape_cast %129 : vector<128xf32> to vector<128x1xf32>
    %cst_47 = arith.constant 3.200000e+01 : f32
    %131 = vector.broadcast %cst_47 : f32 to vector<128x1xf32>
    %132 = arith.divf %130, %131 : vector<128x1xf32>
    %133 = vector.broadcast %125 : vector<128x1xf32> to vector<128x32xf32>
    %134 = arith.subf %119, %133 : vector<128x32xf32>
    %cst_48 = arith.constant 9.99999974E-6 : f32
    %135 = vector.broadcast %cst_48 : f32 to vector<128x1xf32>
    %136 = arith.addf %132, %135 : vector<128x1xf32>
    %137 = math.rsqrt %136 : vector<128x1xf32>
    %138 = vector.broadcast %137 : vector<128x1xf32> to vector<128x32xf32>
    %139 = arith.mulf %134, %138 : vector<128x32xf32>
    %140 = vector.broadcast %120 : vector<1x32xf32> to vector<128x32xf32>
    %141 = arith.mulf %139, %140 : vector<128x32xf32>
    %142 = vector.broadcast %121 : vector<1x32xf32> to vector<128x32xf32>
    %143 = arith.addf %141, %142 : vector<128x32xf32>
    %144 = arith.truncf %143 : vector<128x32xf32> to vector<128x32xbf16>
    %c0_49 = arith.constant 0 : index
    %c0_50 = arith.constant 0 : index
    %145 = vector.load %arg8[%c0_49, %c0_50] : memref<32x256xbf16, #tpu.memory_space<vmem>>, vector<32x256xbf16>
    %cst_51 = arith.constant dense<0.000000e+00> : vector<128x256xf32>
    %146 = tpu.matmul %144, %145, %cst_51 {dimension_numbers = #tpu.dot_dimension_numbers<[1], [0], [0], [1], [0, 0, 1, 1], [], []>} : vector<128x32xbf16>, vector<32x256xbf16>, vector<128x256xf32> -> vector<128x256xf32>
    %c0_52 = arith.constant 0 : index
    %c0_53 = arith.constant 0 : index
    %147 = vector.load %arg9[%c0_52, %c0_53] : memref<1x256xf32, #tpu.memory_space<vmem>>, vector<1x256xf32>
    %148 = vector.broadcast %147 : vector<1x256xf32> to vector<128x256xf32>
    %149 = arith.addf %146, %148 : vector<128x256xf32>
    %150 = vector.extract_strided_slice %149 {offsets = [0, 0], sizes = [128, 128], strides = [1, 1]} : vector<128x256xf32> to vector<128x128xf32>
    %151 = vector.extract_strided_slice %149 {offsets = [0, 128], sizes = [128, 128], strides = [1, 1]} : vector<128x256xf32> to vector<128x128xf32>
    %cst_54 = arith.constant 5.000000e-01 : f32
    %152 = vector.broadcast %cst_54 : f32 to vector<128x128xf32>
    %153 = arith.mulf %152, %151 : vector<128x128xf32>
    %cst_55 = arith.constant 4.471500e-02 : f32
    %154 = vector.broadcast %cst_55 : f32 to vector<128x128xf32>
    %155 = arith.mulf %154, %151 : vector<128x128xf32>
    %156 = arith.mulf %155, %151 : vector<128x128xf32>
    %157 = arith.mulf %156, %151 : vector<128x128xf32>
    %158 = arith.addf %151, %157 : vector<128x128xf32>
    %cst_56 = arith.constant 0.797884583 : f32
    %159 = vector.broadcast %cst_56 : f32 to vector<128x128xf32>
    %160 = arith.mulf %159, %158 : vector<128x128xf32>
    %161 = math.tanh %160 : vector<128x128xf32>
    %cst_57 = arith.constant 1.000000e+00 : f32
    %162 = vector.broadcast %cst_57 : f32 to vector<128x128xf32>
    %163 = arith.addf %162, %161 : vector<128x128xf32>
    %164 = arith.mulf %153, %163 : vector<128x128xf32>
    %165 = arith.mulf %150, %164 : vector<128x128xf32>
    %166 = arith.truncf %165 : vector<128x128xf32> to vector<128x128xbf16>
    %c0_58 = arith.constant 0 : index
    %c0_59 = arith.constant 0 : index
    %167 = vector.load %arg10[%c0_58, %c0_59] : memref<128x32xbf16, #tpu.memory_space<vmem>>, vector<128x32xbf16>
    %cst_60 = arith.constant dense<0.000000e+00> : vector<128x32xf32>
    %168 = tpu.matmul %166, %167, %cst_60 {dimension_numbers = #tpu.dot_dimension_numbers<[1], [0], [0], [1], [0, 0, 1, 1], [], []>} : vector<128x128xbf16>, vector<128x32xbf16>, vector<128x32xf32> -> vector<128x32xf32>
    %c0_61 = arith.constant 0 : index
    %c0_62 = arith.constant 0 : index
    %169 = vector.load %arg11[%c0_61, %c0_62] : memref<1x32xf32, #tpu.memory_space<vmem>>, vector<1x32xf32>
    %170 = vector.broadcast %169 : vector<1x32xf32> to vector<128x32xf32>
    %171 = arith.addf %168, %170 : vector<128x32xf32>
    %172 = vector.broadcast %1 : f32 to vector<128x32xf32>
    %173 = arith.mulf %172, %171 : vector<128x32xf32>
    %174 = arith.addf %119, %173 : vector<128x32xf32>
    %175 = arith.addf %3, %174 : vector<128x32xf32>
    %c3 = arith.constant 3 : index
    %c0_63 = arith.constant 0 : index
    %176 = vector.load %arg3[%c3, %c0_63] : memref<5x32xf32, #tpu.memory_space<vmem>>, vector<1x32xf32>
    %c3_64 = arith.constant 3 : index
    %c0_65 = arith.constant 0 : index
    %177 = vector.load %arg4[%c3_64, %c0_65] : memref<5x32xf32, #tpu.memory_space<vmem>>, vector<1x32xf32>
    %cst_66 = arith.constant dense<0.000000e+00> : vector<128xf32>
    %178 = vector.multi_reduction <add>, %175, %cst_66 [1] : vector<128x32xf32> to vector<128xf32>
    %179 = vector.shape_cast %178 : vector<128xf32> to vector<128x1xf32>
    %cst_67 = arith.constant 3.200000e+01 : f32
    %180 = vector.broadcast %cst_67 : f32 to vector<128x1xf32>
    %181 = arith.divf %179, %180 : vector<128x1xf32>
    %182 = vector.broadcast %181 : vector<128x1xf32> to vector<128x32xf32>
    %183 = arith.subf %175, %182 : vector<128x32xf32>
    %184 = arith.mulf %183, %183 : vector<128x32xf32>
    %cst_68 = arith.constant dense<0.000000e+00> : vector<128xf32>
    %185 = vector.multi_reduction <add>, %184, %cst_68 [1] : vector<128x32xf32> to vector<128xf32>
    %186 = vector.shape_cast %185 : vector<128xf32> to vector<128x1xf32>
    %cst_69 = arith.constant 3.200000e+01 : f32
    %187 = vector.broadcast %cst_69 : f32 to vector<128x1xf32>
    %188 = arith.divf %186, %187 : vector<128x1xf32>
    %189 = vector.broadcast %181 : vector<128x1xf32> to vector<128x32xf32>
    %190 = arith.subf %175, %189 : vector<128x32xf32>
    %cst_70 = arith.constant 9.99999974E-6 : f32
    %191 = vector.broadcast %cst_70 : f32 to vector<128x1xf32>
    %192 = arith.addf %188, %191 : vector<128x1xf32>
    %193 = math.rsqrt %192 : vector<128x1xf32>
    %194 = vector.broadcast %193 : vector<128x1xf32> to vector<128x32xf32>
    %195 = arith.mulf %190, %194 : vector<128x32xf32>
    %196 = vector.broadcast %176 : vector<1x32xf32> to vector<128x32xf32>
    %197 = arith.mulf %195, %196 : vector<128x32xf32>
    %198 = vector.broadcast %177 : vector<1x32xf32> to vector<128x32xf32>
    %199 = arith.addf %197, %198 : vector<128x32xf32>
    %200 = arith.truncf %199 : vector<128x32xf32> to vector<128x32xbf16>
    %c0_71 = arith.constant 0 : index
    %c0_72 = arith.constant 0 : index
    %201 = vector.load %arg12[%c0_71, %c0_72] : memref<32x96xbf16, #tpu.memory_space<vmem>>, vector<32x96xbf16>
    %cst_73 = arith.constant dense<0.000000e+00> : vector<128x96xf32>
    %202 = tpu.matmul %200, %201, %cst_73 {dimension_numbers = #tpu.dot_dimension_numbers<[1], [0], [0], [1], [0, 0, 1, 1], [], []>} : vector<128x32xbf16>, vector<32x96xbf16>, vector<128x96xf32> -> vector<128x96xf32>
    %cst_74 = arith.constant 0.000000e+00 : f32
    %203 = vector.broadcast %cst_74 : f32 to vector<128x32xf32>
    %204 = vector.extract_strided_slice %202 {offsets = [0, 0], sizes = [128, 16], strides = [1, 1]} : vector<128x96xf32> to vector<128x16xf32>
    %cst_75 = arith.constant 2.500000e-01 : f32
    %205 = vector.broadcast %cst_75 : f32 to vector<128x16xf32>
    %206 = arith.mulf %204, %205 : vector<128x16xf32>
    %207 = vector.shape_cast %206 : vector<128x16xf32> to vector<8x16x16xf32>
    %208 = arith.truncf %207 : vector<8x16x16xf32> to vector<8x16x16xbf16>
    %209 = vector.extract_strided_slice %202 {offsets = [0, 32], sizes = [128, 16], strides = [1, 1]} : vector<128x96xf32> to vector<128x16xf32>
    %210 = vector.shape_cast %209 : vector<128x16xf32> to vector<8x16x16xf32>
    %211 = arith.truncf %210 : vector<8x16x16xf32> to vector<8x16x16xbf16>
    %212 = vector.extract_strided_slice %202 {offsets = [0, 64], sizes = [128, 16], strides = [1, 1]} : vector<128x96xf32> to vector<128x16xf32>
    %213 = vector.shape_cast %212 : vector<128x16xf32> to vector<8x16x16xf32>
    %214 = arith.truncf %213 : vector<8x16x16xf32> to vector<8x16x16xbf16>
    "tpu.trace_start"() <{level = 10 : i32, message = "bid,bjd->bij"}> : () -> ()
    %cst_76 = arith.constant dense<0.000000e+00> : vector<8x16x16xf32>
    %215 = tpu.matmul %208, %211, %cst_76 {dimension_numbers = #tpu.dot_dimension_numbers<[2], [2], [1], [1], [0, 0, 0, 1, 1, 1], [0], [0]>} : vector<8x16x16xbf16>, vector<8x16x16xbf16>, vector<8x16x16xf32> -> vector<8x16x16xf32>
    "tpu.trace_stop"() : () -> ()
    %cst_77 = arith.constant dense<0xFF800000> : vector<8x16xf32>
    %216 = vector.multi_reduction <maximumf>, %215, %cst_77 [2] : vector<8x16x16xf32> to vector<8x16xf32>
    %217 = vector.shape_cast %216 : vector<8x16xf32> to vector<8x16x1xf32>
    %218 = vector.broadcast %217 : vector<8x16x1xf32> to vector<8x16x16xf32>
    %219 = arith.subf %215, %218 : vector<8x16x16xf32>
    %220 = math.exp %219 : vector<8x16x16xf32>
    %cst_78 = arith.constant dense<0.000000e+00> : vector<8x16xf32>
    %221 = vector.multi_reduction <add>, %220, %cst_78 [2] : vector<8x16x16xf32> to vector<8x16xf32>
    %222 = vector.shape_cast %221 : vector<8x16xf32> to vector<8x16x1xf32>
    %223 = tpu.reciprocal %222 {approx = true} : vector<8x16x1xf32> -> vector<8x16x1xf32>
    %224 = vector.broadcast %223 : vector<8x16x1xf32> to vector<8x16x16xf32>
    %225 = arith.mulf %220, %224 : vector<8x16x16xf32>
    %226 = arith.truncf %225 : vector<8x16x16xf32> to vector<8x16x16xbf16>
    "tpu.trace_start"() <{level = 10 : i32, message = "bij,bjd->bid"}> : () -> ()
    %cst_79 = arith.constant dense<0.000000e+00> : vector<8x16x16xf32>
    %227 = tpu.matmul %226, %214, %cst_79 {dimension_numbers = #tpu.dot_dimension_numbers<[2], [1], [1], [2], [0, 0, 0, 1, 1, 2], [0], [0]>} : vector<8x16x16xbf16>, vector<8x16x16xbf16>, vector<8x16x16xf32> -> vector<8x16x16xf32>
    "tpu.trace_stop"() : () -> ()
    %228 = vector.shape_cast %227 : vector<8x16x16xf32> to vector<128x16xf32>
    %229 = arith.truncf %228 : vector<128x16xf32> to vector<128x16xbf16>
    %c0_80 = arith.constant 0 : index
    %c0_81 = arith.constant 0 : index
    %230 = vector.load %arg13[%c0_80, %c0_81] : memref<32x32xbf16, #tpu.memory_space<vmem>>, vector<16x32xbf16>
    %cst_82 = arith.constant dense<0.000000e+00> : vector<128x32xf32>
    %231 = tpu.matmul %229, %230, %cst_82 {dimension_numbers = #tpu.dot_dimension_numbers<[1], [0], [0], [1], [0, 0, 1, 1], [], []>} : vector<128x16xbf16>, vector<16x32xbf16>, vector<128x32xf32> -> vector<128x32xf32>
    %232 = arith.addf %203, %231 : vector<128x32xf32>
    %233 = vector.extract_strided_slice %202 {offsets = [0, 16], sizes = [128, 16], strides = [1, 1]} : vector<128x96xf32> to vector<128x16xf32>
    %cst_83 = arith.constant 2.500000e-01 : f32
    %234 = vector.broadcast %cst_83 : f32 to vector<128x16xf32>
    %235 = arith.mulf %233, %234 : vector<128x16xf32>
    %236 = vector.shape_cast %235 : vector<128x16xf32> to vector<8x16x16xf32>
    %237 = arith.truncf %236 : vector<8x16x16xf32> to vector<8x16x16xbf16>
    %238 = vector.extract_strided_slice %202 {offsets = [0, 48], sizes = [128, 16], strides = [1, 1]} : vector<128x96xf32> to vector<128x16xf32>
    %239 = vector.shape_cast %238 : vector<128x16xf32> to vector<8x16x16xf32>
    %240 = arith.truncf %239 : vector<8x16x16xf32> to vector<8x16x16xbf16>
    %241 = vector.extract_strided_slice %202 {offsets = [0, 80], sizes = [128, 16], strides = [1, 1]} : vector<128x96xf32> to vector<128x16xf32>
    %242 = vector.shape_cast %241 : vector<128x16xf32> to vector<8x16x16xf32>
    %243 = arith.truncf %242 : vector<8x16x16xf32> to vector<8x16x16xbf16>
    "tpu.trace_start"() <{level = 10 : i32, message = "bid,bjd->bij"}> : () -> ()
    %cst_84 = arith.constant dense<0.000000e+00> : vector<8x16x16xf32>
    %244 = tpu.matmul %237, %240, %cst_84 {dimension_numbers = #tpu.dot_dimension_numbers<[2], [2], [1], [1], [0, 0, 0, 1, 1, 1], [0], [0]>} : vector<8x16x16xbf16>, vector<8x16x16xbf16>, vector<8x16x16xf32> -> vector<8x16x16xf32>
    "tpu.trace_stop"() : () -> ()
    %cst_85 = arith.constant dense<0xFF800000> : vector<8x16xf32>
    %245 = vector.multi_reduction <maximumf>, %244, %cst_85 [2] : vector<8x16x16xf32> to vector<8x16xf32>
    %246 = vector.shape_cast %245 : vector<8x16xf32> to vector<8x16x1xf32>
    %247 = vector.broadcast %246 : vector<8x16x1xf32> to vector<8x16x16xf32>
    %248 = arith.subf %244, %247 : vector<8x16x16xf32>
    %249 = math.exp %248 : vector<8x16x16xf32>
    %cst_86 = arith.constant dense<0.000000e+00> : vector<8x16xf32>
    %250 = vector.multi_reduction <add>, %249, %cst_86 [2] : vector<8x16x16xf32> to vector<8x16xf32>
    %251 = vector.shape_cast %250 : vector<8x16xf32> to vector<8x16x1xf32>
    %252 = tpu.reciprocal %251 {approx = true} : vector<8x16x1xf32> -> vector<8x16x1xf32>
    %253 = vector.broadcast %252 : vector<8x16x1xf32> to vector<8x16x16xf32>
    %254 = arith.mulf %249, %253 : vector<8x16x16xf32>
    %255 = arith.truncf %254 : vector<8x16x16xf32> to vector<8x16x16xbf16>
    "tpu.trace_start"() <{level = 10 : i32, message = "bij,bjd->bid"}> : () -> ()
    %cst_87 = arith.constant dense<0.000000e+00> : vector<8x16x16xf32>
    %256 = tpu.matmul %255, %243, %cst_87 {dimension_numbers = #tpu.dot_dimension_numbers<[2], [1], [1], [2], [0, 0, 0, 1, 1, 2], [0], [0]>} : vector<8x16x16xbf16>, vector<8x16x16xbf16>, vector<8x16x16xf32> -> vector<8x16x16xf32>
    "tpu.trace_stop"() : () -> ()
    %257 = vector.shape_cast %256 : vector<8x16x16xf32> to vector<128x16xf32>
    %258 = arith.truncf %257 : vector<128x16xf32> to vector<128x16xbf16>
    %c16_88 = arith.constant 16 : index
    %c0_89 = arith.constant 0 : index
    %259 = vector.load %arg13[%c16_88, %c0_89] : memref<32x32xbf16, #tpu.memory_space<vmem>>, vector<16x32xbf16>
    %cst_90 = arith.constant dense<0.000000e+00> : vector<128x32xf32>
    %260 = tpu.matmul %258, %259, %cst_90 {dimension_numbers = #tpu.dot_dimension_numbers<[1], [0], [0], [1], [0, 0, 1, 1], [], []>} : vector<128x16xbf16>, vector<16x32xbf16>, vector<128x32xf32> -> vector<128x32xf32>
    %261 = arith.addf %232, %260 : vector<128x32xf32>
    %c0_91 = arith.constant 0 : index
    %c0_92 = arith.constant 0 : index
    %262 = vector.load %arg14[%c0_91, %c0_92] : memref<1x32xf32, #tpu.memory_space<vmem>>, vector<1x32xf32>
    %263 = vector.broadcast %262 : vector<1x32xf32> to vector<128x32xf32>
    %264 = arith.addf %261, %263 : vector<128x32xf32>
    %265 = arith.addf %175, %264 : vector<128x32xf32>
    %c4 = arith.constant 4 : index
    %c0_93 = arith.constant 0 : index
    %266 = vector.load %arg3[%c4, %c0_93] : memref<5x32xf32, #tpu.memory_space<vmem>>, vector<1x32xf32>
    %c4_94 = arith.constant 4 : index
    %c0_95 = arith.constant 0 : index
    %267 = vector.load %arg4[%c4_94, %c0_95] : memref<5x32xf32, #tpu.memory_space<vmem>>, vector<1x32xf32>
    %cst_96 = arith.constant dense<0.000000e+00> : vector<128xf32>
    %268 = vector.multi_reduction <add>, %265, %cst_96 [1] : vector<128x32xf32> to vector<128xf32>
    %269 = vector.shape_cast %268 : vector<128xf32> to vector<128x1xf32>
    %cst_97 = arith.constant 3.200000e+01 : f32
    %270 = vector.broadcast %cst_97 : f32 to vector<128x1xf32>
    %271 = arith.divf %269, %270 : vector<128x1xf32>
    %272 = vector.broadcast %271 : vector<128x1xf32> to vector<128x32xf32>
    %273 = arith.subf %265, %272 : vector<128x32xf32>
    %274 = arith.mulf %273, %273 : vector<128x32xf32>
    %cst_98 = arith.constant dense<0.000000e+00> : vector<128xf32>
    %275 = vector.multi_reduction <add>, %274, %cst_98 [1] : vector<128x32xf32> to vector<128xf32>
    %276 = vector.shape_cast %275 : vector<128xf32> to vector<128x1xf32>
    %cst_99 = arith.constant 3.200000e+01 : f32
    %277 = vector.broadcast %cst_99 : f32 to vector<128x1xf32>
    %278 = arith.divf %276, %277 : vector<128x1xf32>
    %279 = vector.broadcast %271 : vector<128x1xf32> to vector<128x32xf32>
    %280 = arith.subf %265, %279 : vector<128x32xf32>
    %cst_100 = arith.constant 9.99999974E-6 : f32
    %281 = vector.broadcast %cst_100 : f32 to vector<128x1xf32>
    %282 = arith.addf %278, %281 : vector<128x1xf32>
    %283 = math.rsqrt %282 : vector<128x1xf32>
    %284 = vector.broadcast %283 : vector<128x1xf32> to vector<128x32xf32>
    %285 = arith.mulf %280, %284 : vector<128x32xf32>
    %286 = vector.broadcast %266 : vector<1x32xf32> to vector<128x32xf32>
    %287 = arith.mulf %285, %286 : vector<128x32xf32>
    %288 = vector.broadcast %267 : vector<1x32xf32> to vector<128x32xf32>
    %289 = arith.addf %287, %288 : vector<128x32xf32>
    %290 = arith.truncf %289 : vector<128x32xf32> to vector<128x32xbf16>
    %c0_101 = arith.constant 0 : index
    %c0_102 = arith.constant 0 : index
    %291 = vector.load %arg15[%c0_101, %c0_102] : memref<32x256xbf16, #tpu.memory_space<vmem>>, vector<32x256xbf16>
    %cst_103 = arith.constant dense<0.000000e+00> : vector<128x256xf32>
    %292 = tpu.matmul %290, %291, %cst_103 {dimension_numbers = #tpu.dot_dimension_numbers<[1], [0], [0], [1], [0, 0, 1, 1], [], []>} : vector<128x32xbf16>, vector<32x256xbf16>, vector<128x256xf32> -> vector<128x256xf32>
    %c0_104 = arith.constant 0 : index
    %c0_105 = arith.constant 0 : index
    %293 = vector.load %arg16[%c0_104, %c0_105] : memref<1x256xf32, #tpu.memory_space<vmem>>, vector<1x256xf32>
    %294 = vector.broadcast %293 : vector<1x256xf32> to vector<128x256xf32>
    %295 = arith.addf %292, %294 : vector<128x256xf32>
    %296 = vector.extract_strided_slice %295 {offsets = [0, 0], sizes = [128, 128], strides = [1, 1]} : vector<128x256xf32> to vector<128x128xf32>
    %297 = vector.extract_strided_slice %295 {offsets = [0, 128], sizes = [128, 128], strides = [1, 1]} : vector<128x256xf32> to vector<128x128xf32>
    %cst_106 = arith.constant 5.000000e-01 : f32
    %298 = vector.broadcast %cst_106 : f32 to vector<128x128xf32>
    %299 = arith.mulf %298, %297 : vector<128x128xf32>
    %cst_107 = arith.constant 4.471500e-02 : f32
    %300 = vector.broadcast %cst_107 : f32 to vector<128x128xf32>
    %301 = arith.mulf %300, %297 : vector<128x128xf32>
    %302 = arith.mulf %301, %297 : vector<128x128xf32>
    %303 = arith.mulf %302, %297 : vector<128x128xf32>
    %304 = arith.addf %297, %303 : vector<128x128xf32>
    %cst_108 = arith.constant 0.797884583 : f32
    %305 = vector.broadcast %cst_108 : f32 to vector<128x128xf32>
    %306 = arith.mulf %305, %304 : vector<128x128xf32>
    %307 = math.tanh %306 : vector<128x128xf32>
    %cst_109 = arith.constant 1.000000e+00 : f32
    %308 = vector.broadcast %cst_109 : f32 to vector<128x128xf32>
    %309 = arith.addf %308, %307 : vector<128x128xf32>
    %310 = arith.mulf %299, %309 : vector<128x128xf32>
    %311 = arith.mulf %296, %310 : vector<128x128xf32>
    %312 = arith.truncf %311 : vector<128x128xf32> to vector<128x128xbf16>
    %c0_110 = arith.constant 0 : index
    %c0_111 = arith.constant 0 : index
    %313 = vector.load %arg17[%c0_110, %c0_111] : memref<128x32xbf16, #tpu.memory_space<vmem>>, vector<128x32xbf16>
    %cst_112 = arith.constant dense<0.000000e+00> : vector<128x32xf32>
    %314 = tpu.matmul %312, %313, %cst_112 {dimension_numbers = #tpu.dot_dimension_numbers<[1], [0], [0], [1], [0, 0, 1, 1], [], []>} : vector<128x128xbf16>, vector<128x32xbf16>, vector<128x32xf32> -> vector<128x32xf32>
    %c0_113 = arith.constant 0 : index
    %c0_114 = arith.constant 0 : index
    %315 = vector.load %arg18[%c0_113, %c0_114] : memref<1x32xf32, #tpu.memory_space<vmem>>, vector<1x32xf32>
    %316 = vector.broadcast %315 : vector<1x32xf32> to vector<128x32xf32>
    %317 = arith.addf %314, %316 : vector<128x32xf32>
    %318 = arith.addf %265, %317 : vector<128x32xf32>
    %319 = vector.shape_cast %318 : vector<128x32xf32> to vector<8x16x32xf32>
    %c0_115 = arith.constant 0 : index
    %c0_116 = arith.constant 0 : index
    %c0_117 = arith.constant 0 : index
    %320 = vector.load %arg19[%c0_115, %c0_116, %c0_117] : memref<8x16x32xf32, #tpu.memory_space<vmem>>, vector<8x16x32xf32>
    tpu.vector_store %arg19[%c0_115, %c0_116, %c0_117], %319 {strides = array<i32>} : memref<8x16x32xf32, #tpu.memory_space<vmem>>, vector<8x16x32xf32>,
    return
  }
  func.func @transform_0(%arg0: i32) -> i32 {
    %c0_i32 = arith.constant 0 : i32
    %c0_i32_0 = arith.constant 0 : i32
    return %c0_i32 : i32
  }
  func.func @transform_1(%arg0: i32) -> (i32, i32, i32) {
    %c0_i32 = arith.constant 0 : i32
    %c0_i32_0 = arith.constant 0 : i32
    %c0_i32_1 = arith.constant 0 : i32
    return %arg0, %c0_i32, %c0_i32_0 : i32, i32, i32
  }
  func.func @transform_2(%arg0: i32) -> (i32, i32) {
    %c0_i32 = arith.constant 0 : i32
    %c0_i32_0 = arith.constant 0 : i32
    %c0_i32_1 = arith.constant 0 : i32
    return %c0_i32, %c0_i32_0 : i32, i32
  }
  func.func @transform_3(%arg0: i32) -> (i32, i32) {
    %c0_i32 = arith.constant 0 : i32
    %c0_i32_0 = arith.constant 0 : i32
    %c0_i32_1 = arith.constant 0 : i32
    return %c0_i32, %c0_i32_0 : i32, i32
  }
  func.func @transform_4(%arg0: i32) -> (i32, i32) {
    %c0_i32 = arith.constant 0 : i32
    %c0_i32_0 = arith.constant 0 : i32
    %c0_i32_1 = arith.constant 0 : i32
    return %c0_i32, %c0_i32_0 : i32, i32
  }
  func.func @transform_5(%arg0: i32) -> (i32, i32) {
    %c0_i32 = arith.constant 0 : i32
    %c0_i32_0 = arith.constant 0 : i32
    %c0_i32_1 = arith.constant 0 : i32
    return %c0_i32, %c0_i32_0 : i32, i32
  }
  func.func @transform_6(%arg0: i32) -> (i32, i32) {
    %c0_i32 = arith.constant 0 : i32
    %c0_i32_0 = arith.constant 0 : i32
    %c0_i32_1 = arith.constant 0 : i32
    return %c0_i32, %c0_i32_0 : i32, i32
  }
  func.func @transform_7(%arg0: i32) -> (i32, i32) {
    %c0_i32 = arith.constant 0 : i32
    %c0_i32_0 = arith.constant 0 : i32
    %c0_i32_1 = arith.constant 0 : i32
    return %c0_i32, %c0_i32_0 : i32, i32
  }
  func.func @transform_8(%arg0: i32) -> (i32, i32) {
    %c0_i32 = arith.constant 0 : i32
    %c0_i32_0 = arith.constant 0 : i32
    %c0_i32_1 = arith.constant 0 : i32
    return %c0_i32, %c0_i32_0 : i32, i32
  }
  func.func @transform_9(%arg0: i32) -> (i32, i32) {
    %c0_i32 = arith.constant 0 : i32
    %c0_i32_0 = arith.constant 0 : i32
    %c0_i32_1 = arith.constant 0 : i32
    return %c0_i32, %c0_i32_0 : i32, i32
  }
  func.func @transform_10(%arg0: i32) -> (i32, i32) {
    %c0_i32 = arith.constant 0 : i32
    %c0_i32_0 = arith.constant 0 : i32
    %c0_i32_1 = arith.constant 0 : i32
    return %c0_i32, %c0_i32_0 : i32, i32
  }
  func.func @transform_11(%arg0: i32) -> (i32, i32) {
    %c0_i32 = arith.constant 0 : i32
    %c0_i32_0 = arith.constant 0 : i32
    %c0_i32_1 = arith.constant 0 : i32
    return %c0_i32, %c0_i32_0 : i32, i32
  }
  func.func @transform_12(%arg0: i32) -> (i32, i32) {
    %c0_i32 = arith.constant 0 : i32
    %c0_i32_0 = arith.constant 0 : i32
    %c0_i32_1 = arith.constant 0 : i32
    return %c0_i32, %c0_i32_0 : i32, i32
  }
  func.func @transform_13(%arg0: i32) -> (i32, i32) {
    %c0_i32 = arith.constant 0 : i32
    %c0_i32_0 = arith.constant 0 : i32
    %c0_i32_1 = arith.constant 0 : i32
    return %c0_i32, %c0_i32_0 : i32, i32
  }
  func.func @transform_14(%arg0: i32) -> (i32, i32) {
    %c0_i32 = arith.constant 0 : i32
    %c0_i32_0 = arith.constant 0 : i32
    %c0_i32_1 = arith.constant 0 : i32
    return %c0_i32, %c0_i32_0 : i32, i32
  }
  func.func @transform_15(%arg0: i32) -> (i32, i32) {
    %c0_i32 = arith.constant 0 : i32
    %c0_i32_0 = arith.constant 0 : i32
    %c0_i32_1 = arith.constant 0 : i32
    return %c0_i32, %c0_i32_0 : i32, i32
  }
  func.func @transform_16(%arg0: i32) -> (i32, i32) {
    %c0_i32 = arith.constant 0 : i32
    %c0_i32_0 = arith.constant 0 : i32
    %c0_i32_1 = arith.constant 0 : i32
    return %c0_i32, %c0_i32_0 : i32, i32
  }
  func.func @transform_17(%arg0: i32) -> (i32, i32) {
    %c0_i32 = arith.constant 0 : i32
    %c0_i32_0 = arith.constant 0 : i32
    %c0_i32_1 = arith.constant 0 : i32
    return %c0_i32, %c0_i32_0 : i32, i32
  }
  func.func @transform_18(%arg0: i32) -> (i32, i32, i32) {
    %c0_i32 = arith.constant 0 : i32
    %c0_i32_0 = arith.constant 0 : i32
    %c0_i32_1 = arith.constant 0 : i32
    return %arg0, %c0_i32, %c0_i32_0 : i32, i32, i32
  }
}

</mosaic_0001>

<bundles_post_ra>
// kernel: tpu_custom_call.1
= control target key start
LH: loop header
LB: loop body
LE: loop exit
PB: predicated region body
PF: predicated region fallthrough
CT: control target
= control target key end

     0   :  { %s13271_s0 = inlined_call_operand.hbm [shape: f32[2], index: 0, kind: input, shape index: {}]   ;;  %s13272_s1 = inlined_call_operand.hbm [shape: f32[16,16,32], index: 1, kind: input, shape index: {}]   ;;  %s13273_s2 = inlined_call_operand.vmem [shape: f32[5,32], index: 2, kind: input, shape index: {}]   ;;  %s13274_s3 = inlined_call_operand.vmem [shape: f32[5,32], index: 3, kind: input, shape index: {}]   ;;  %s13275_s4 = inlined_call_operand.vmem [shape: bf16[32,96], index: 4, kind: input, shape index: {}]   ;;  %s13276_s5 = inlined_call_operand.vmem [shape: bf16[32,32], index: 5, kind: input, shape index: {}]   ;;  %s13277_s6 = inlined_call_operand.hbm [shape: f32[1,32], index: 6, kind: input, shape index: {}]   ;;  %s13278_s7 = inlined_call_operand.vmem [shape: bf16[32,256], index: 7, kind: input, shape index: {}]   ;;  %s13279_s8 = inlined_call_operand.hbm [shape: f32[1,256], index: 8, kind: input, shape index: {}]   ;;  %s13280_s9 = inlined_call_operand.vmem [shape: bf16[128,32], index: 9, kind: input, shape index: {}]   ;;  %s13281_s10 = inlined_call_operand.hbm [shape: f32[1,32], index: 10, kind: input, shape index: {}]   ;;  %s13282_s11 = inlined_call_operand.vmem [shape: bf16[32,96], index: 11, kind: input, shape index: {}]   ;;  %s13283_s12 = inlined_call_operand.vmem [shape: bf16[32,32], index: 12, kind: input, shape index: {}]   ;;  %s13284_s13 = inlined_call_operand.vmem [shape: f32[1,32], index: 13, kind: input, shape index: {}]   ;;  %s13285_s14 = inlined_call_operand.vmem [shape: bf16[32,256], index: 14, kind: input, shape index: {}]   ;;  %s13286_s15 = inlined_call_operand.vmem [shape: f32[1,256], index: 15, kind: input, shape index: {}]   ;;  %s13287_s16 = inlined_call_operand.vmem [shape: bf16[128,32], index: 16, kind: input, shape index: {}]   ;;  %s13288_s17 = inlined_call_operand.vmem [shape: f32[1,32], index: 17, kind: input, shape index: {}]   ;;  %s13289_s18 = inlined_call_operand.hbm [shape: f32[16,16,32], index: 18, kind: output, shape index: {}]  }
   0x1   :  { %13316 = sst [smem:[#allocation26_spill]] %s13271_s0 }
   0x2   :  { %13317 = sst [smem:[#allocation27_spill]] %s13272_s1 }
   0x3   :  { %13318 = sst [smem:[#allocation28_spill]] %s13273_s2 }
   0x4   :  { %13319 = sst [smem:[#allocation29_spill]] %s13277_s6 }
   0x5   :  { %13320 = sst [smem:[#allocation30_spill]] %s13279_s8 }
   0x6   :  { %13321 = sst [smem:[#allocation31_spill]] %s13281_s10 }
   0x7   :  { %13322 = sst [smem:[#allocation32_spill]] %s13286_s15 }
   0x8   :  { %13323 = sst [smem:[#allocation33_spill]] %s13287_s16 }
   0x9   :  { %13324 = sst [smem:[#allocation34_spill]] %s13288_s17 }
   0xa   :  { %13325 = sst [smem:[#allocation35_spill]] %s13289_s18 }
   0xb   :  { %23 = vsyncpa [#allocation5], 0 }
   0xc   :  { %24 = vsyncpa [#allocation3], 0 }
   0xd   :  { %26 = vsyncpa [#allocation3 + $0x1], 0 }
   0xe   :  { %27 = vsyncpa [#allocation8], 0 }
   0xf   :  { %28 = vsyncpa [#allocation11], 0 }
  0x10   :  { %29 = vsyncpa [#allocation4], 0 }
  0x11   :  { %31 = vsyncpa [#allocation4 + $0x1], 0  ;;  %s9954_s27 = smov 0   ;;  %s9956_s28 = smov 0  }
  0x12   :  { %s9958_s29 = smov 0   ;;  %s9960_s30 = smov 0  }
  0x13 LB: > { %13326 = sst [smem:[#allocation18_spill]] %s9827_s27  ;;  %s9975_s0 = sadd.s32 4294967295, %s9839_s30   ;;  %s9839_s30 = sphi %s9960_s30, %s13401_s30   ;;  %s9835_s29 = sphi %s9958_s29, %s13400_s29   ;;  %s9831_s28 = sphi %s9956_s28, %s13399_s28   ;;  %s9827_s27 = sphi %s9954_s27, %s13398_s27  }
  0x14   : > { %s8032_s19 = sadd.s32 4294967294, %s9839_s30   ;;  %p78_p0 = scmp.ne.s32.totalorder %s9831_s28, %s9827_s27 }
  0x15   : > { %p13296_p1 = scmp.eq.s32.totalorder %s9975_s0, 0  ;;  %p438_p2 = scmp.eq.s32.totalorder %s9975_s0, 1 }
  0x16   : > { %p444_p3 = scmp.eq.s32.totalorder %s8032_s19, 1  ;;  %p8033_p5 = scmp.ge.s32.totalorder %s9839_s30, 1 }
  0x17   : > { %p9984_p4 = por %p13296_p1, %p78_p0  ;;  %p451_p7 = scmp.lt.s32.totalorder %s9839_s30, 3 }
  0x18   : > { %p9989_p6 = por %p444_p3, %p78_p0  ;;  %s9841_s22 = smov [#allocation7]  }
  0x19   : > { %s13327_s1 = scalar_select %p9984_p4, 1, 0 }
  0x1a   : > { %s13328_s20 = scalar_select %p9989_p6, 1, 0 }
  0x1b   : > { %p9994_p8 = pnand %p8033_p5, %p451_p7  ;;  %s485_s2 = sshll.u32 %s9841_s22, 4  ;;  %s486_s2 = int_to_ptr.vmem [resolvable:$true] %s485_s2 }
  0x1c   : > { %13329 = sst [smem:[#allocation19_spill]] %s13328_s20  ;;  %s9842_s24 = smov [#allocation9]  }
  0x1d   : > { %s13330_s21 = scalar_select %p9994_p8, 1, 0 }
  0x1e   : > { %p9035_p10 = pneg %p9994_p8  ;;  %s499_s25 = sshll.u32 %s9842_s24, 4  ;;  %s500_s25 = int_to_ptr.vmem [resolvable:$true] %s499_s25 }
  0x1f   : > { %s9843_s26 = smov [#allocation10]   ;;  %s9657_s22 = scalar_lea.vmem %s486_s2, 16 }
  0x20   : > { %p10003_p11 = pnand %p9035_p10, %p13296_p1  ;;  %s513_s19 = sshll.u32 %s9843_s26, 4  ;;  %s10007_s19 = int_to_ptr.vmem [resolvable:$true] %s513_s19 }
  0x21   : > { %p9658_p13 = scmp.ne.s32.totalorder %s486_s2, %s9657_s22  ;;  %s9664_s20 = scalar_lea.vmem %s486_s2, 32 }
  0x22   : > { %p9648_p12 = pneg %p10003_p11  ;;  %p9665_p5 = scmp.lt.s32.totalorder %s486_s2, %s486_s2 }
  0x23   : > { %p9666_p7 = scmp.lt.s32.totalorder %s9664_s20, %s9657_s22 }
  0x24   : > { %p9660_p0 = pnand %p9658_p13, %p9648_p12 }
  0x25   : > { %p9667_p10 = por %p9666_p7, %p9665_p5 }
  0x26   : > { %p9661_p3 = pneg %p9660_p0 }
  0x28   : > { %p9668_p9 = pnand %p9667_p10, %p9661_p3 }
  0x2a   : > { %9671 = shalt.err (!%p9668_p9)
}
  0x2b   : > { %s13332_s6 = sld [smem:[#allocation29_spill]]  ;;  %s9844_s27 = smov [#allocation2]  }
  0x2c   : > { %s13333_s15 = sld [smem:[#allocation26_spill]]  ;;  %s9694_s16 = scalar_lea.vmem %s500_s25, 32 }
  0x2d   : > { %p9695_p13 = scmp.ne.s32.totalorder %s500_s25, %s9694_s16  ;;  %p9702_p3 = scmp.lt.s32.totalorder %s500_s25, %s500_s25 }
  0x2e   : > { %p9703_p5 = scmp.lt.s32.totalorder %s9694_s16, %s9694_s16 }
  0x2f   : > { %p9697_p0 = pnand %p9695_p13, %p9648_p12 }
  0x30   : > { %p9704_p7 = por %p9703_p5, %p9702_p3 }
  0x31   : > { %9041 = dma.hbm_to_vmem [thread:$0]  (!%p10003_p11), %s13332_s6, 16, %s486_s2, [#allocation8]  }
  0x32   : > { %9038 = dma.hbm_to_smem (!%p10003_p11), %s13333_s15, 16, %s9844_s27, [#allocation5]  }
  0x33   : > { %p9698_p9 = pneg %p9697_p0 }
  0x35   : > { %p9705_p10 = pnand %p9704_p7, %p9698_p9 }
  0x37   : > { %9708 = shalt.err (!%p9705_p10)
}
  0x38   : > { %s13334_s8 = sld [smem:[#allocation30_spill]]  ;;  %s9720_s15 = scalar_lea.vmem %s10007_s19, 16 }
  0x39   : > { %p9721_p1 = scmp.ne.s32.totalorder %s10007_s19, %s9720_s15  ;;  %s9727_s16 = scalar_lea.vmem %s10007_s19, 32 }
  0x3a   : > { %p9728_p9 = scmp.lt.s32.totalorder %s10007_s19, %s10007_s19  ;;  %p9729_p3 = scmp.lt.s32.totalorder %s9727_s16, %s9720_s15 }
  0x3b   : > { %p9723_p13 = pnand %p9721_p1, %p9648_p12 }
  0x3c   : > { %p9730_p5 = por %p9729_p3, %p9728_p9 }
  0x3d   : > { %p9724_p0 = pneg %p9723_p13 }
  0x3e   : > { %9044 = dma.hbm_to_vmem [thread:$0]  (!%p10003_p11), %s13334_s8, 32, %s500_s25, [#allocation8]  }
  0x3f   : > { %p9731_p7 = pnand %p9730_p5, %p9724_p0 }
  0x41   : > { %9734 = shalt.err (!%p9731_p7)
}
  0x42   : > { %s13335_s10 = sld [smem:[#allocation31_spill]]  ;;  %s10047_s27 = sadd.s32 1, %s9839_s30  }
  0x43   : > { %s62_s23 = ssub.s32 %s9839_s30, %s10047_s27  ;;  %s65_s25 = sadd.s32 1, %s9835_s29 }
  0x44   : > { %p63_p1 = scmp.eq.s32.totalorder %s62_s23, 0  ;;  %p72_p12 = scmp.ne.s32.totalorder %s9835_s29, %s9831_s28 }
  0x45   : > { %p73_p10 = scmp.eq.s32.totalorder %s9839_s30, 0  ;;  %p9060_p9 = scmp.lt.s32.totalorder %s9839_s30, 2 }
  0x46   : > { %s10056_s22 = scalar_select %p63_p1, %s9835_s29, %s65_s25  }
  0x47   : > { %p74_p13 = por %p73_p10, %p72_p12  ;;  %p10060_p0 = por %p438_p2, %p72_p12 }
  0x48   : > { %9047 = dma.hbm_to_vmem [thread:$0]  (!%p10003_p11), %s13335_s10, 16, %s10007_s19, [#allocation11]  }
  0x49   : > { %13336 = sst [smem:[#allocation20_spill]] %s10056_s22  ;;  %s545_s26 = sand.u32 1, %s9835_s29  }
  0x4a   : > { %s13337_s24 = scalar_select %p10060_p0, 1, 0 }
  0x4b   : > { %s8039_s20 = sshll.u32 %s545_s26, 7  ;;  %s8232_s19 = sshll.u32 %s9839_s30, 11 }
  0x4c   : > { %s13338_s16 = sld [smem:[#allocation27_spill]]  ;;  %s549_s18 = scalar_lea.vmem [#allocation6], %s8039_s20 }
  0x4d   : > { %s557_s23 = sshll.u32 %s549_s18, 4  ;;  %p10074_p2 = pnand %p9060_p9, %p74_p13  ;;  %s10072_s23 = int_to_ptr.vmem [resolvable:$true] %s557_s23 }
  0x4e   : > { %s10078_s6 = scalar_lea.sflag [#allocation3], %s545_s26 }
  0x4f   : > { %p9737_p3 = pneg %p10074_p2 }
  0x52   : > { %s10070_s17 = scalar_lea.hbm %s13338_s16, %s8232_s19  ;;  %s9740_s20 = scalar_lea.hbm %s13338_s16, 4096 }
  0x53   : > { %s9735_s8 = scalar_lea.hbm %s10070_s17, 2048  ;;  %p9741_p1 = scmp.lt.s32.totalorder %s10070_s17, %s13338_s16 }
  0x54   : > { %p9736_p11 = scmp.ne.s32.totalorder %s10070_s17, %s9735_s8  ;;  %p9742_p12 = scmp.lt.s32.totalorder %s9740_s20, %s9735_s8 }
  0x56   : > { %p9738_p5 = pnand %p9737_p3, %p9736_p11  ;;  %p9743_p10 = por %p9742_p12, %p9741_p1 }
  0x58   : > { %p9739_p7 = pneg %p9738_p5 }
  0x5a   : > { %p9744_p13 = pnand %p9743_p10, %p9739_p7 }
  0x5c   : > { %9747 = shalt.err (!%p9744_p13)
}
  0x5d   : > { %s9748_s26 = scalar_lea.vmem %s10072_s23, 2048  ;;  %s9845_s10 = smov [#allocation6]  }
  0x5e   : > { %p9749_p9 = scmp.ne.s32.totalorder %s10072_s23, %s9748_s26  ;;  %s9753_s22 = sshll.u32 %s9845_s10, 4  ;;  %s9754_s22 = int_to_ptr.vmem [resolvable:$false] %s9753_s22 }
  0x5f   : > { %s9755_s19 = scalar_lea.vmem %s9754_s22, 4096  ;;  %p9756_p5 = scmp.lt.s32.totalorder %s10072_s23, %s9754_s22 }
  0x60   : > { %p9751_p6 = pnand %p9749_p9, %p9737_p3  ;;  %p9757_p0 = scmp.lt.s32.totalorder %s9755_s19, %s9748_s26 }
  0x62   : > { %p9752_p11 = pneg %p9751_p6  ;;  %p9758_p4 = por %p9757_p0, %p9756_p5 }
  0x64   : > { %p9759_p8 = pnand %p9758_p4, %p9752_p11 }
  0x66   : > { %9762 = shalt.err (!%p9759_p8)
}
  0x67   : > { %s9846_s8 = smov 128   ;;  %s9847_s2 = smov 8  }
  0x68   : > { %9051 = dma.hbm_to_vmem [thread:$0]  (!%p10074_p2), %s10070_s17, 2048, %s10072_s23, %s10078_s6, %s9846_s8, %s9846_s8, %s9847_s2  }
  0x69   : > { %p13340_p3 = scmp.ne.s32.totalorder %s13330_s21, 0 }
  0x6b   : > { %569 = sbr.rel (%p13340_p3) target bundleno = 6448 (0x1930), region = 92 }
  0x70   : > { %p13341_p6 = scmp.eq.s32.totalorder %s9975_s0, 0 }
  0x72   : > { %9806 = dma.done.wait (%p13341_p6), [#allocation5], 16   ;;  %p13342_p7 = pmov %p13341_p6 }
  0x73   : > { %s10106_s10 = sand.u32 1, %s9831_s28   ;;  %p13343_p4 = scmp.ne.s32.totalorder %s13327_s1, 0 }
  0x74   : > { %9808 = vsyncadd (%p13342_p7), [#allocation5], 4294967280  ;;  %s8045_s22 = sshll.u32 %s10106_s10, 7  ;;  %s576_s20 = scalar_lea.sflag [#allocation3], %s10106_s10 }
  0x75   : > { %s10112_s6 = scalar_lea.vmem [#allocation6], %s8045_s22 }
  0x76   : > { %9810 = dma.done.wait (%p13343_p4), %s576_s20, 2048  }
  0x77   : > { %9812 = vsyncadd (%p13343_p4), %s576_s20, 4294965248  ;;  %p13344_p8 = pmov %p13341_p6 }
  0x78   : > { %p13345_p0 = pmov %p13341_p6 }
  0x79   : > { %9814 = dma.done.wait (%p13344_p8), [#allocation8], 48  }
  0x7a   : > { %9816 = vsyncadd (%p13345_p0), [#allocation8], 4294967248  ;;  %p13346_p2 = pmov %p13345_p0 }
  0x7b   : > { %p13347_p1 = pmov %p13345_p0 }
  0x7c   : > { %9818 = dma.done.wait (%p13346_p2), [#allocation11], 16  }
  0x7d   : > { %9820 = vsyncadd (%p13347_p1), [#allocation11], 4294967280 }
  0x7e   : > { %596 = sfence }
  0x7f   : > { %v650_v0 = vld [vmem:[%s10112_s6] sm:$0xff]  ;;  %vm668_vm0 = vcmask 261120   ;;  %v652_v1 = vld [vmem:[%s10112_s6 + $0x10] sm:$0xff]  ;;  %v651_v2 = vld [vmem:[%s10112_s6 + $0x8] sm:$0xff]  ;;  %s13348_s17 = sld [smem:[#allocation28_spill]]  ;;  %vm9849_vm1 = vmmov 0  }
  0x80   : > { %v669_v3 = vsel %vm668_vm0, %v650_v0, 0.0  ;;  %v675_v4 = vsel %vm668_vm0, %v652_v1, 0.0  ;;  %v653_v5 = vld [vmem:[%s10112_s6 + $0x18] sm:$0xff]  ;;  %v10133_v6 = vld [vmem:[%s10112_s6 + $0x20] sm:$0xff]  ;;  %v10136_v7 = vld [vmem:[%s10112_s6 + $0x28] sm:$0xff]  ;;  %v672_v8 = vsel %vm668_vm0, %v651_v2, 0.0 }
  0x81   : > { %670 = vadd.xlane.f32.xlu0 %v669_v3  ;;  %676 = vadd.xlane.f32.xlu1 %v675_v4  ;;  %v678_v9 = vsel %vm668_vm0, %v653_v5, 0.0  ;;  %v10141_v10 = vld [vmem:[%s10112_s6 + $0x30] sm:$0xff]  ;;  %v10144_v11 = vld [vmem:[%s10112_s6 + $0x38] sm:$0xff]  ;;  %v681_v12 = vsel %vm668_vm0, %v10133_v6, 0.0  ;;  %v684_v13 = vsel %vm668_vm0, %v10136_v7, 0.0  ;;  %v10151_v14 = vld [vmem:[%s10112_s6 + $0x40] sm:$0xff] }
  0x82   : > { %v10154_v15 = vld [vmem:[%s10112_s6 + $0x48] sm:$0xff]  ;;  %v687_v16 = vsel %vm668_vm0, %v10141_v10, 0.0  ;;  %v690_v17 = vsel %vm668_vm0, %v10144_v11, 0.0  ;;  %v693_v18 = vsel %vm668_vm0, %v10151_v14, 0.0  ;;  %v10165_v20 = vld [vmem:[%s10112_s6 + $0x50] sm:$0xff]  ;;  %v10168_v21 = vld [vmem:[%s10112_s6 + $0x58] sm:$0xff] }
  0x83   : > { %v696_v19 = vsel %vm668_vm0, %v10154_v15, 0.0  ;;  %v10171_v22 = vld [vmem:[%s10112_s6 + $0x60] sm:$0xff]  ;;  %v10174_v23 = vld [vmem:[%s10112_s6 + $0x68] sm:$0xff]  ;;  %v699_v24 = vsel %vm668_vm0, %v10165_v20, 0.0  ;;  %v702_v25 = vsel %vm668_vm0, %v10168_v21, 0.0  ;;  %v10185_v28 = vld [vmem:[%s10112_s6 + $0x70] sm:$0xff] }
  0x84   : > { %v705_v26 = vsel %vm668_vm0, %v10171_v22, 0.0  ;;  %v708_v27 = vsel %vm668_vm0, %v10174_v23, 0.0  ;;  %v10188_v29 = vld [vmem:[%s10112_s6 + $0x78] sm:$0xff]  ;;  %v711_v30 = vsel %vm668_vm0, %v10185_v28, 0.0  ;;  %s9850_s21 = smov 96   ;;  %s9851_s23 = smov 64  }
  0x85   : > { %673 = vadd.xlane.f32.xlu0 %v672_v8  ;;  %679 = vadd.xlane.f32.xlu1 %v678_v9  ;;  %v714_v31 = vsel %vm668_vm0, %v10188_v29, 0.0  ;;  %vm1348_vm2 = vcmask 130048   ;;  %s9852_s25 = smov 80   ;;  %s9853_s15 = smov 112  }
  0x86   : > { %s9854_s18 = smov 48   ;;  %s648_s20 = sld [smem:[#allocation2]] }
  0x87   : > { %s8050_s2 = sld [smem:[#allocation2 + $0x1]]  ;;  %s13158_s1 = scalar_lea.vmem [#allocation12], %s8045_s22 }
  0x88   : > { %s13384_s19 = sld [smem:[#allocation33_spill]]  ;;  %s8234_s22 = sshll.u32 %s9975_s0, 11 }
  0x89   : > { %682 = vadd.xlane.f32.xlu0 %v681_v12  ;;  %685 = vadd.xlane.f32.xlu1 %v684_v13  ;;  %s7918_s26 = sshll.u32 %s13158_s1, 4  ;;  %s7904_s0 = scalar_lea.sflag [#allocation4], %s10106_s10  ;;  %s13223_s26 = int_to_ptr.vmem [resolvable:$true] %s7918_s26 }
  0x8a   : > { %p13391_p10 = scmp.ne.s32.totalorder %s13337_s24, 0 }
  0x8d   : > { %688 = vadd.xlane.f32.xlu0 %v687_v16  ;;  %691 = vadd.xlane.f32.xlu1 %v690_v17 }
  0x91   : > { %694 = vadd.xlane.f32.xlu0 %v693_v18  ;;  %697 = vadd.xlane.f32.xlu1 %v696_v19 }
  0x95   : > { %700 = vadd.xlane.f32.xlu0 %v699_v24  ;;  %703 = vadd.xlane.f32.xlu1 %v702_v25 }
  0x99   : > { %706 = vadd.xlane.f32.xlu0 %v705_v26  ;;  %709 = vadd.xlane.f32.xlu1 %v708_v27 }
  0x9d   : > { %712 = vadd.xlane.f32.xlu0 %v711_v30  ;;  %715 = vadd.xlane.f32.xlu1 %v714_v31 }
 0x10a   : > { %v671_v32 = vpop.xlane.xlu0 %670  ;;  %v677_v33 = vpop.xlane.xlu1 %676 }
 0x10b   : > { %v718_v34 = vmul.f32 0.03125, %v671_v32  ;;  %v720_v35 = vmul.f32 0.03125, %v677_v33 }
 0x10d   : > { %v10194_v36 = vsub.f32 %v650_v0, %v718_v34  ;;  %v10196_v37 = vsub.f32 %v652_v1, %v720_v35 }
 0x10e   : > { %v674_v38 = vpop.xlane.xlu0 %673  ;;  %v680_v39 = vpop.xlane.xlu1 %679 }
 0x10f   : > { %v719_v40 = vmul.f32 0.03125, %v674_v38  ;;  %v721_v41 = vmul.f32 0.03125, %v680_v39  ;;  %v750_v42 = vmul.f32 %v10194_v36, %v10194_v36  ;;  %v752_v43 = vmul.f32 %v10196_v37, %v10196_v37 }
 0x111   : > { %v10202_v44 = vsub.f32 %v651_v2, %v719_v40  ;;  %v10204_v45 = vsub.f32 %v653_v5, %v721_v41  ;;  %v766_v46 = vsel %vm668_vm0, %v750_v42, 0.0  ;;  %v772_v49 = vsel %vm668_vm0, %v752_v43, 0.0 }
 0x112   : > { %767 = vadd.xlane.f32.xlu0 %v766_v46  ;;  %v683_v47 = vpop.xlane.xlu0 %682  ;;  %v686_v48 = vpop.xlane.xlu1 %685 }
 0x113   : > { %v722_v50 = vmul.f32 0.03125, %v683_v47  ;;  %v723_v51 = vmul.f32 0.03125, %v686_v48  ;;  %v751_v52 = vmul.f32 %v10202_v44, %v10202_v44  ;;  %v753_v53 = vmul.f32 %v10204_v45, %v10204_v45 }
 0x115   : > { %v10213_v54 = vsub.f32 %v10133_v6, %v722_v50  ;;  %v10216_v55 = vsub.f32 %v10136_v7, %v723_v51  ;;  %v769_v56 = vsel %vm668_vm0, %v751_v52, 0.0  ;;  %v775_v59 = vsel %vm668_vm0, %v753_v53, 0.0 }
 0x116   : > { %773 = vadd.xlane.f32.xlu0 %v772_v49  ;;  %770 = vadd.xlane.f32.xlu1 %v769_v56  ;;  %v689_v57 = vpop.xlane.xlu0 %688  ;;  %v692_v58 = vpop.xlane.xlu1 %691 }
 0x117   : > { %v724_v60 = vmul.f32 0.03125, %v689_v57  ;;  %v725_v61 = vmul.f32 0.03125, %v692_v58  ;;  %v754_v62 = vmul.f32 %v10213_v54, %v10213_v54  ;;  %v755_v63 = vmul.f32 %v10216_v55, %v10216_v55 }
 0x119   : > { %v10225_v0 = vsub.f32 %v10141_v10, %v724_v60  ;;  %v10228_v1 = vsub.f32 %v10144_v11, %v725_v61  ;;  %v778_v2 = vsel %vm668_vm0, %v754_v62, 0.0  ;;  %v781_v5 = vsel %vm668_vm0, %v755_v63, 0.0 }
 0x11a   : > { %776 = vadd.xlane.f32.xlu1 %v775_v59  ;;  %779 = vadd.xlane.f32.xlu0 %v778_v2  ;;  %v695_v3 = vpop.xlane.xlu0 %694  ;;  %v698_v4 = vpop.xlane.xlu1 %697 }
 0x11b   : > { %v726_v6 = vmul.f32 0.03125, %v695_v3  ;;  %v727_v7 = vmul.f32 0.03125, %v698_v4  ;;  %v756_v8 = vmul.f32 %v10225_v0, %v10225_v0  ;;  %v757_v9 = vmul.f32 %v10228_v1, %v10228_v1 }
 0x11d   : > { %v10237_v10 = vsub.f32 %v10151_v14, %v726_v6  ;;  %v10240_v11 = vsub.f32 %v10154_v15, %v727_v7  ;;  %v784_v12 = vsel %vm668_vm0, %v756_v8, 0.0  ;;  %v787_v17 = vsel %vm668_vm0, %v757_v9, 0.0 }
 0x11e   : > { %782 = vadd.xlane.f32.xlu1 %v781_v5  ;;  %785 = vadd.xlane.f32.xlu0 %v784_v12  ;;  %v701_v13 = vpop.xlane.xlu0 %700  ;;  %v704_v16 = vpop.xlane.xlu1 %703 }
 0x11f   : > { %v728_v18 = vmul.f32 0.03125, %v701_v13  ;;  %v729_v19 = vmul.f32 0.03125, %v704_v16  ;;  %v758_v24 = vmul.f32 %v10237_v10, %v10237_v10  ;;  %v759_v14 = vmul.f32 %v10240_v11, %v10240_v11 }
 0x121   : > { %v10249_v25 = vsub.f32 %v10165_v20, %v728_v18  ;;  %v10252_v15 = vsub.f32 %v10168_v21, %v729_v19  ;;  %v790_v26 = vsel %vm668_vm0, %v758_v24, 0.0  ;;  %v793_v31 = vsel %vm668_vm0, %v759_v14, 0.0 }
 0x122   : > { %788 = vadd.xlane.f32.xlu1 %v787_v17  ;;  %791 = vadd.xlane.f32.xlu0 %v790_v26  ;;  %v707_v27 = vpop.xlane.xlu0 %706  ;;  %v710_v30 = vpop.xlane.xlu1 %709  ;;  %v10289_v26 = vld [vmem:[%s13348_s17] ss:$0 sm:$0xff] }
 0x123   : > { %v730_v32 = vmul.f32 0.03125, %v707_v27  ;;  %v731_v33 = vmul.f32 0.03125, %v710_v30  ;;  %v760_v34 = vmul.f32 %v10249_v25, %v10249_v25  ;;  %v761_v20 = vmul.f32 %v10252_v15, %v10252_v15 }
 0x125   : > { %v10261_v35 = vsub.f32 %v10171_v22, %v730_v32  ;;  %v10264_v21 = vsub.f32 %v10174_v23, %v731_v33  ;;  %v796_v38 = vsel %vm668_vm0, %v760_v34, 0.0  ;;  %v799_v41 = vsel %vm668_vm0, %v761_v20, 0.0  ;;  %v10295_v34 = vld [vmem:[%s13274_s3] ss:$0 sm:$0xff] }
 0x126   : > { %794 = vadd.xlane.f32.xlu1 %v793_v31  ;;  %797 = vadd.xlane.f32.xlu0 %v796_v38  ;;  %v713_v39 = vpop.xlane.xlu0 %712  ;;  %v716_v40 = vpop.xlane.xlu1 %715 }
 0x127   : > { %v732_v42 = vmul.f32 0.03125, %v713_v39  ;;  %v733_v43 = vmul.f32 0.03125, %v716_v40  ;;  %v762_v46 = vmul.f32 %v10261_v35, %v10261_v35  ;;  %v763_v22 = vmul.f32 %v10264_v21, %v10264_v21 }
 0x129   : > { %v10273_v47 = vsub.f32 %v10185_v28, %v732_v42  ;;  %v10276_v23 = vsub.f32 %v10188_v29, %v733_v43  ;;  %v802_v48 = vsel %vm668_vm0, %v762_v46, 0.0  ;;  %v805_v49 = vsel %vm668_vm0, %v763_v22, 0.0 }
 0x12a   : > { %800 = vadd.xlane.f32.xlu1 %v799_v41  ;;  %803 = vadd.xlane.f32.xlu0 %v802_v48 }
 0x12b   : > { %v764_v50 = vmul.f32 %v10273_v47, %v10273_v47  ;;  %v765_v51 = vmul.f32 %v10276_v23, %v10276_v23 }
 0x12d   : > { %v808_v52 = vsel %vm668_vm0, %v764_v50, 0.0  ;;  %v811_v28 = vsel %vm668_vm0, %v765_v51, 0.0 }
 0x12e   : > { %806 = vadd.xlane.f32.xlu1 %v805_v49  ;;  %809 = vadd.xlane.f32.xlu0 %v808_v52 }
 0x132   : > { %812 = vadd.xlane.f32.xlu1 %v811_v28 }
 0x19b   : > { %v768_v29 = vpop.xlane.xlu0 %767 }
 0x19c   : > { %v814_v53 = vmul.f32 0.03125, %v768_v29 }
 0x19e   : > { %v830_v56 = vadd.f32 1e-05, %v814_v53 }
 0x19f   : > { %v771_v57 = vpop.xlane.xlu1 %770  ;;  %v774_v58 = vpop.xlane.xlu0 %773 }
 0x1a0   : > { %9150 = vrsqrt.f32 %v830_v56  ;;  %v815_v59 = vmul.f32 0.03125, %v771_v57  ;;  %v816_v60 = vmul.f32 0.03125, %v774_v58 }
 0x1a2   : > { %v831_v61 = vadd.f32 1e-05, %v815_v59  ;;  %v832_v62 = vadd.f32 1e-05, %v816_v60 }
 0x1a3   : > { %v777_v63 = vpop.xlane.xlu1 %776  ;;  %v780_v2 = vpop.xlane.xlu0 %779 }
 0x1a4   : > { %9152 = vrsqrt.f32 %v831_v61  ;;  %v817_v3 = vmul.f32 0.03125, %v777_v63  ;;  %v818_v4 = vmul.f32 0.03125, %v780_v2 }
 0x1a5   : > { %9154 = vrsqrt.f32 %v832_v62 }
 0x1a6   : > { %v833_v5 = vadd.f32 1e-05, %v817_v3  ;;  %v834_v6 = vadd.f32 1e-05, %v818_v4 }
 0x1a7   : > { %v783_v7 = vpop.xlane.xlu1 %782  ;;  %v786_v8 = vpop.xlane.xlu0 %785 }
 0x1a8   : > { %9156 = vrsqrt.f32 %v833_v5  ;;  %v819_v9 = vmul.f32 0.03125, %v783_v7  ;;  %v820_v12 = vmul.f32 0.03125, %v786_v8 }
 0x1a9   : > { %9158 = vrsqrt.f32 %v834_v6 }
 0x1aa   : > { %v835_v13 = vadd.f32 1e-05, %v819_v9  ;;  %v836_v16 = vadd.f32 1e-05, %v820_v12 }
 0x1ab   : > { %v789_v17 = vpop.xlane.xlu1 %788  ;;  %v792_v18 = vpop.xlane.xlu0 %791 }
 0x1ac   : > { %9160 = vrsqrt.f32 %v835_v13  ;;  %v821_v19 = vmul.f32 0.03125, %v789_v17  ;;  %v822_v24 = vmul.f32 0.03125, %v792_v18 }
 0x1ad   : > { %v9151_v14 = vpop.eup %9150  ;;  %9162 = vrsqrt.f32 %v836_v16 }
 0x1ae   : > { %v837_v27 = vadd.f32 1e-05, %v821_v19  ;;  %v838_v30 = vadd.f32 1e-05, %v822_v24  ;;  %v862_v31 = vmul.f32 %v9151_v14, %v10194_v36 }
 0x1af   : > { %v795_v32 = vpop.xlane.xlu1 %794  ;;  %v798_v33 = vpop.xlane.xlu0 %797 }
 0x1b0   : > { %9164 = vrsqrt.f32 %v837_v27  ;;  %v823_v20 = vmul.f32 0.03125, %v795_v32  ;;  %v824_v38 = vmul.f32 0.03125, %v798_v33  ;;  %v882_v39 = vmul.f32 %v10289_v26, %v862_v31 }
 0x1b1   : > { %v9153_v40 = vpop.eup %9152  ;;  %9166 = vrsqrt.f32 %v838_v30 }
 0x1b2   : > { %v9155_v41 = vpop.eup %9154  ;;  %v839_v42 = vadd.f32 1e-05, %v823_v20  ;;  %v840_v43 = vadd.f32 1e-05, %v824_v38  ;;  %v10299_v46 = vadd.f32 %v10295_v34, %v882_v39  ;;  %v863_v36 = vmul.f32 %v9153_v40, %v10202_v44 }
 0x1b3   : > { %v801_v22 = vpop.xlane.xlu1 %800  ;;  %v804_v48 = vpop.xlane.xlu0 %803  ;;  %v864_v49 = vmul.f32 %v9155_v41, %v10196_v37 }
 0x1b4   : > { %9168 = vrsqrt.f32 %v839_v42  ;;  %v825_v50 = vmul.f32 0.03125, %v801_v22  ;;  %v826_v51 = vmul.f32 0.03125, %v804_v48  ;;  %v920_v52 = vsel %vm668_vm0, %v10299_v46, 0.0 }
 0x1b5   : > { %v9157_v28 = vpop.eup %9156  ;;  %9170 = vrsqrt.f32 %v840_v43  ;;  %921 = vadd.xlane.f32.xlu0 %v920_v52  ;;  %v883_v29 = vmul.f32 %v10289_v26, %v863_v36  ;;  %v884_v53 = vmul.f32 %v10289_v26, %v864_v49 }
 0x1b6   : > { %v9159_v56 = vpop.eup %9158  ;;  %v841_v57 = vadd.f32 1e-05, %v825_v50  ;;  %v842_v44 = vadd.f32 1e-05, %v826_v51  ;;  %v865_v58 = vmul.f32 %v9157_v28, %v10204_v45 }
 0x1b7   : > { %v807_v59 = vpop.xlane.xlu1 %806  ;;  %v810_v37 = vpop.xlane.xlu0 %809  ;;  %v10309_v60 = vadd.f32 %v10295_v34, %v883_v29  ;;  %v10312_v61 = vadd.f32 %v10295_v34, %v884_v53  ;;  %v866_v62 = vmul.f32 %v9159_v56, %v10213_v54 }
 0x1b8   : > { %9172 = vrsqrt.f32 %v841_v57  ;;  %v827_v63 = vmul.f32 0.03125, %v807_v59  ;;  %v828_v2 = vmul.f32 0.03125, %v810_v37  ;;  %v885_v3 = vmul.f32 %v10289_v26, %v865_v58 }
 0x1b9   : > { %v9161_v4 = vpop.eup %9160  ;;  %9174 = vrsqrt.f32 %v842_v44  ;;  %v923_v45 = vsel %vm668_vm0, %v10309_v60, 0.0  ;;  %v926_v5 = vsel %vm668_vm0, %v10312_v61, 0.0  ;;  %v886_v6 = vmul.f32 %v10289_v26, %v866_v62 }
 0x1ba   : > { %v9163_v7 = vpop.eup %9162  ;;  %v843_v8 = vadd.f32 1e-05, %v827_v63  ;;  %v844_v9 = vadd.f32 1e-05, %v828_v2  ;;  %924 = vadd.xlane.f32.xlu1 %v923_v45  ;;  %927 = vadd.xlane.f32.xlu0 %v926_v5  ;;  %v10322_v54 = vadd.f32 %v10295_v34, %v885_v3  ;;  %v867_v12 = vmul.f32 %v9161_v4, %v10216_v55 }
 0x1bb   : > { %v813_v13 = vpop.xlane.xlu1 %812  ;;  %v10326_v16 = vadd.f32 %v10295_v34, %v886_v6  ;;  %v868_v17 = vmul.f32 %v9163_v7, %v10225_v0 }
 0x1bc   : > { %9176 = vrsqrt.f32 %v843_v8  ;;  %v829_v18 = vmul.f32 0.03125, %v813_v13  ;;  %v929_v19 = vsel %vm668_vm0, %v10322_v54, 0.0  ;;  %v887_v24 = vmul.f32 %v10289_v26, %v867_v12 }
 0x1bd   : > { %v9165_v14 = vpop.eup %9164  ;;  %9178 = vrsqrt.f32 %v844_v9  ;;  %v932_v27 = vsel %vm668_vm0, %v10326_v16, 0.0  ;;  %v888_v55 = vmul.f32 %v10289_v26, %v868_v17 }
 0x1be   : > { %v9167_v30 = vpop.eup %9166  ;;  %v845_v31 = vadd.f32 1e-05, %v829_v18  ;;  %930 = vadd.xlane.f32.xlu1 %v929_v19  ;;  %933 = vadd.xlane.f32.xlu0 %v932_v27  ;;  %v10336_v0 = vadd.f32 %v10295_v34, %v887_v24  ;;  %v869_v32 = vmul.f32 %v9165_v14, %v10228_v1 }
 0x1bf   : > { %v10340_v33 = vadd.f32 %v10295_v34, %v888_v55  ;;  %v870_v20 = vmul.f32 %v9167_v30, %v10237_v10 }
 0x1c0   : > { %9180 = vrsqrt.f32 %v845_v31  ;;  %v935_v38 = vsel %vm668_vm0, %v10336_v0, 0.0  ;;  %v889_v39 = vmul.f32 %v10289_v26, %v869_v32 }
 0x1c1   : > { %v9169_v40 = vpop.eup %9168  ;;  %v938_v41 = vsel %vm668_vm0, %v10340_v33, 0.0  ;;  %v890_v42 = vmul.f32 %v10289_v26, %v870_v20 }
 0x1c2   : > { %v9171_v43 = vpop.eup %9170  ;;  %936 = vadd.xlane.f32.xlu1 %v935_v38  ;;  %939 = vadd.xlane.f32.xlu0 %v938_v41  ;;  %v10350_v1 = vadd.f32 %v10295_v34, %v889_v39  ;;  %v871_v10 = vmul.f32 %v9169_v40, %v10240_v11 }
 0x1c3   : > { %v10354_v36 = vadd.f32 %v10295_v34, %v890_v42  ;;  %v872_v22 = vmul.f32 %v9171_v43, %v10249_v25 }
 0x1c4   : > { %v941_v48 = vsel %vm668_vm0, %v10350_v1, 0.0  ;;  %v891_v49 = vmul.f32 %v10289_v26, %v871_v10 }
 0x1c5   : > { %v9173_v50 = vpop.eup %9172  ;;  %v944_v51 = vsel %vm668_vm0, %v10354_v36, 0.0  ;;  %v892_v52 = vmul.f32 %v10289_v26, %v872_v22 }
 0x1c6   : > { %v9175_v28 = vpop.eup %9174  ;;  %942 = vadd.xlane.f32.xlu1 %v941_v48  ;;  %945 = vadd.xlane.f32.xlu0 %v944_v51  ;;  %v10364_v11 = vadd.f32 %v10295_v34, %v891_v49  ;;  %v873_v29 = vmul.f32 %v9173_v50, %v10252_v15 }
 0x1c7   : > { %v10368_v25 = vadd.f32 %v10295_v34, %v892_v52  ;;  %v874_v53 = vmul.f32 %v9175_v28, %v10261_v35 }
 0x1c8   : > { %v947_v56 = vsel %vm668_vm0, %v10364_v11, 0.0  ;;  %v893_v57 = vmul.f32 %v10289_v26, %v873_v29 }
 0x1c9   : > { %v9177_v44 = vpop.eup %9176  ;;  %v950_v58 = vsel %vm668_vm0, %v10368_v25, 0.0  ;;  %v894_v59 = vmul.f32 %v10289_v26, %v874_v53 }
 0x1ca   : > { %v9179_v37 = vpop.eup %9178  ;;  %948 = vadd.xlane.f32.xlu1 %v947_v56  ;;  %951 = vadd.xlane.f32.xlu0 %v950_v58  ;;  %v10378_v15 = vadd.f32 %v10295_v34, %v893_v57  ;;  %v875_v62 = vmul.f32 %v9177_v44, %v10264_v21 }
 0x1cb   : > { %v10382_v35 = vadd.f32 %v10295_v34, %v894_v59  ;;  %v876_v63 = vmul.f32 %v9179_v37, %v10273_v47 }
 0x1cc   : > { %v953_v2 = vsel %vm668_vm0, %v10378_v15, 0.0  ;;  %v895_v3 = vmul.f32 %v10289_v26, %v875_v62 }
 0x1cd   : > { %13349 = vst [vmem:[#allocation21_spill] sm:$0xff] %v10382_v35  ;;  %v9181_v4 = vpop.eup %9180  ;;  %v956_v45 = vsel %vm668_vm0, %v10382_v35, 0.0  ;;  %v896_v5 = vmul.f32 %v10289_v26, %v876_v63 }
 0x1ce   : > { %954 = vadd.xlane.f32.xlu1 %v953_v2  ;;  %957 = vadd.xlane.f32.xlu0 %v956_v45  ;;  %v10392_v21 = vadd.f32 %v10295_v34, %v895_v3  ;;  %v877_v6 = vmul.f32 %v9181_v4, %v10276_v23 }
 0x1cf   : > { %v10396_v47 = vadd.f32 %v10295_v34, %v896_v5 }
 0x1d0   : > { %13350 = vst [vmem:[#allocation22_spill] sm:$0xff] %v10392_v21  ;;  %v959_v7 = vsel %vm668_vm0, %v10392_v21, 0.0  ;;  %v897_v8 = vmul.f32 %v10289_v26, %v877_v6 }
 0x1d1   : > { %13351 = vst [vmem:[#allocation23_spill] sm:$0xff] %v10396_v47  ;;  %v962_v9 = vsel %vm668_vm0, %v10396_v47, 0.0 }
 0x1d2   : > { %960 = vadd.xlane.f32.xlu1 %v959_v7  ;;  %963 = vadd.xlane.f32.xlu0 %v962_v9  ;;  %v10404_v12 = vadd.f32 %v10295_v34, %v897_v8 }
 0x1d4   : > { %13352 = vst [vmem:[#allocation24_spill] sm:$0xff] %v10404_v12  ;;  %v965_v13 = vsel %vm668_vm0, %v10404_v12, 0.0 }
 0x1d6   : > { %966 = vadd.xlane.f32.xlu1 %v965_v13 }
 0x23e   : > { %v922_v23 = vpop.xlane.xlu0 %921 }
 0x23f   : > { %v968_v17 = vmul.f32 0.03125, %v922_v23 }
 0x241   : > { %v10409_v18 = vsub.f32 %v10299_v46, %v968_v17 }
 0x243   : > { %v925_v19 = vpop.xlane.xlu1 %924  ;;  %v928_v24 = vpop.xlane.xlu0 %927  ;;  %v1000_v26 = vmul.f32 %v10409_v18, %v10409_v18 }
 0x244   : > { %v969_v14 = vmul.f32 0.03125, %v925_v19  ;;  %v970_v27 = vmul.f32 0.03125, %v928_v24 }
 0x245   : > { %v1016_v55 = vsel %vm668_vm0, %v1000_v26, 0.0 }
 0x246   : > { %v10415_v34 = vsub.f32 %v10309_v60, %v969_v14  ;;  %v10418_v30 = vsub.f32 %v10312_v61, %v970_v27  ;;  %1017 = vadd.xlane.f32.xlu0 %v1016_v55 }
 0x247   : > { %v931_v31 = vpop.xlane.xlu1 %930  ;;  %v934_v32 = vpop.xlane.xlu0 %933 }
 0x248   : > { %v971_v20 = vmul.f32 0.03125, %v931_v31  ;;  %v972_v38 = vmul.f32 0.03125, %v934_v32  ;;  %v1001_v39 = vmul.f32 %v10415_v34, %v10415_v34  ;;  %v1002_v40 = vmul.f32 %v10418_v30, %v10418_v30 }
 0x24a   : > { %v10425_v41 = vsub.f32 %v10322_v54, %v971_v20  ;;  %v10428_v42 = vsub.f32 %v10326_v16, %v972_v38  ;;  %v1019_v43 = vsel %vm668_vm0, %v1001_v39, 0.0  ;;  %v1022_v10 = vsel %vm668_vm0, %v1002_v40, 0.0 }
 0x24b   : > { %1020 = vadd.xlane.f32.xlu1 %v1019_v43  ;;  %v937_v22 = vpop.xlane.xlu1 %936  ;;  %1023 = vadd.xlane.f32.xlu0 %v1022_v10  ;;  %v940_v48 = vpop.xlane.xlu0 %939 }
 0x24c   : > { %v973_v49 = vmul.f32 0.03125, %v937_v22  ;;  %v974_v50 = vmul.f32 0.03125, %v940_v48  ;;  %v1003_v51 = vmul.f32 %v10425_v41, %v10425_v41  ;;  %v1004_v52 = vmul.f32 %v10428_v42, %v10428_v42 }
 0x24e   : > { %v10437_v28 = vsub.f32 %v10336_v0, %v973_v49  ;;  %v10440_v29 = vsub.f32 %v10340_v33, %v974_v50  ;;  %v1025_v53 = vsel %vm668_vm0, %v1003_v51, 0.0  ;;  %v1028_v56 = vsel %vm668_vm0, %v1004_v52, 0.0 }
 0x24f   : > { %1026 = vadd.xlane.f32.xlu1 %v1025_v53  ;;  %v943_v57 = vpop.xlane.xlu1 %942  ;;  %1029 = vadd.xlane.f32.xlu0 %v1028_v56  ;;  %v946_v44 = vpop.xlane.xlu0 %945 }
 0x250   : > { %v975_v58 = vmul.f32 0.03125, %v943_v57  ;;  %v976_v59 = vmul.f32 0.03125, %v946_v44  ;;  %v1005_v37 = vmul.f32 %v10437_v28, %v10437_v28  ;;  %v1006_v62 = vmul.f32 %v10440_v29, %v10440_v29 }
 0x252   : > { %v10449_v63 = vsub.f32 %v10350_v1, %v975_v58  ;;  %v10452_v2 = vsub.f32 %v10354_v36, %v976_v59  ;;  %v1031_v3 = vsel %vm668_vm0, %v1005_v37, 0.0  ;;  %v1034_v4 = vsel %vm668_vm0, %v1006_v62, 0.0 }
 0x253   : > { %1032 = vadd.xlane.f32.xlu1 %v1031_v3  ;;  %v949_v45 = vpop.xlane.xlu1 %948  ;;  %1035 = vadd.xlane.f32.xlu0 %v1034_v4  ;;  %v952_v5 = vpop.xlane.xlu0 %951 }
 0x254   : > { %v977_v6 = vmul.f32 0.03125, %v949_v45  ;;  %v978_v7 = vmul.f32 0.03125, %v952_v5  ;;  %v1007_v8 = vmul.f32 %v10449_v63, %v10449_v63  ;;  %v1008_v9 = vmul.f32 %v10452_v2, %v10452_v2  ;;  %v9114_v45 = vld [vmem:[%s13275_s4 + $0x8] sm:$0xff]   ;;  %v9115_v5 = vld [vmem:[%s13275_s4] sm:$0xff]  }
 0x255   : > { %8451 = vmatprep.subr.bf16.mxu0 %v9114_v45  ;;  %9011 = vmatprep.subr.bf16.mxu1 %v9114_v45 }
 0x256   : > { %v10461_v13 = vsub.f32 %v10364_v11, %v977_v6  ;;  %v10464_v23 = vsub.f32 %v10368_v25, %v978_v7  ;;  %v1037_v17 = vsel %vm668_vm0, %v1007_v8, 0.0  ;;  %v1040_v19 = vsel %vm668_vm0, %v1008_v9, 0.0  ;;  %8452 = vmatpush3.bf16.msra.mxu0 %v9114_v45  ;;  %9013 = vmatpush3.bf16.msra.mxu1 %v9114_v45 }
 0x257   : > { %1038 = vadd.xlane.f32.xlu1 %v1037_v17  ;;  %v955_v24 = vpop.xlane.xlu1 %954  ;;  %1041 = vadd.xlane.f32.xlu0 %v1040_v19  ;;  %v958_v26 = vpop.xlane.xlu0 %957 }
 0x258   : > { %v979_v14 = vmul.f32 0.03125, %v955_v24  ;;  %v980_v27 = vmul.f32 0.03125, %v958_v26  ;;  %v1009_v55 = vmul.f32 %v10461_v13, %v10461_v13  ;;  %v1010_v31 = vmul.f32 %v10464_v23, %v10464_v23  ;;  %8453 = vmatprep.subr.bf16.mxu0 %v9115_v5  ;;  %9012 = vmatprep.subr.bf16.mxu1 %v9115_v5 }
 0x25a   : > { %v10473_v32 = vsub.f32 %v10378_v15, %v979_v14  ;;  %v10476_v20 = vsub.f32 %v10382_v35, %v980_v27  ;;  %v1043_v38 = vsel %vm668_vm0, %v1009_v55, 0.0  ;;  %v1046_v39 = vsel %vm668_vm0, %v1010_v31, 0.0  ;;  %8454 = vmatpush3.bf16.msra.mxu0 %v9115_v5  ;;  %9014 = vmatpush3.bf16.msra.mxu1 %v9115_v5 }
 0x25b   : > { %1044 = vadd.xlane.f32.xlu1 %v1043_v38  ;;  %v961_v40 = vpop.xlane.xlu1 %960  ;;  %1047 = vadd.xlane.f32.xlu0 %v1046_v39  ;;  %v964_v43 = vpop.xlane.xlu0 %963 }
 0x25c   : > { %v981_v10 = vmul.f32 0.03125, %v961_v40  ;;  %v982_v22 = vmul.f32 0.03125, %v964_v43  ;;  %v1011_v48 = vmul.f32 %v10473_v32, %v10473_v32  ;;  %v1012_v49 = vmul.f32 %v10476_v20, %v10476_v20 }
 0x25e   : > { %v10485_v50 = vsub.f32 %v10392_v21, %v981_v10  ;;  %v10488_v51 = vsub.f32 %v10396_v47, %v982_v22  ;;  %v1049_v52 = vsel %vm668_vm0, %v1011_v48, 0.0  ;;  %v1052_v53 = vsel %vm668_vm0, %v1012_v49, 0.0 }
 0x25f   : > { %1050 = vadd.xlane.f32.xlu1 %v1049_v52  ;;  %v967_v56 = vpop.xlane.xlu1 %966  ;;  %1053 = vadd.xlane.f32.xlu0 %v1052_v53 }
 0x260   : > { %v983_v57 = vmul.f32 0.03125, %v967_v56  ;;  %v1013_v44 = vmul.f32 %v10485_v50, %v10485_v50  ;;  %v1014_v58 = vmul.f32 %v10488_v51, %v10488_v51 }
 0x262   : > { %v10497_v59 = vsub.f32 %v10404_v12, %v983_v57  ;;  %v1055_v37 = vsel %vm668_vm0, %v1013_v44, 0.0  ;;  %v1058_v62 = vsel %vm668_vm0, %v1014_v58, 0.0 }
 0x263   : > { %1056 = vadd.xlane.f32.xlu1 %v1055_v37  ;;  %1059 = vadd.xlane.f32.xlu0 %v1058_v62 }
 0x264   : > { %v1015_v3 = vmul.f32 %v10497_v59, %v10497_v59 }
 0x266   : > { %v1061_v4 = vsel %vm668_vm0, %v1015_v3, 0.0 }
 0x267   : > { %1062 = vadd.xlane.f32.xlu1 %v1061_v4  ;;  %v10514_v4 = vld [vmem:[%s13348_s17 + $0x1] ss:$0 sm:$0xff] }
 0x2cf   : > { %v1018_v6 = vpop.xlane.xlu0 %1017 }
 0x2d0   : > { %v1064_v7 = vmul.f32 0.03125, %v1018_v6 }
 0x2d2   : > { %v1080_v8 = vadd.f32 1e-05, %v1064_v7 }
 0x2d4   : > { %9182 = vrsqrt.f32 %v1080_v8  ;;  %v1021_v9 = vpop.xlane.xlu1 %1020  ;;  %v1024_v17 = vpop.xlane.xlu0 %1023 }
 0x2d5   : > { %v1065_v19 = vmul.f32 0.03125, %v1021_v9  ;;  %v1066_v24 = vmul.f32 0.03125, %v1024_v17 }
 0x2d7   : > { %v1081_v26 = vadd.f32 1e-05, %v1065_v19  ;;  %v1082_v14 = vadd.f32 1e-05, %v1066_v24 }
 0x2d8   : > { %v1027_v27 = vpop.xlane.xlu1 %1026  ;;  %v1030_v55 = vpop.xlane.xlu0 %1029 }
 0x2d9   : > { %9184 = vrsqrt.f32 %v1081_v26  ;;  %v1067_v31 = vmul.f32 0.03125, %v1027_v27  ;;  %v1068_v38 = vmul.f32 0.03125, %v1030_v55 }
 0x2da   : > { %9186 = vrsqrt.f32 %v1082_v14 }
 0x2db   : > { %v1083_v39 = vadd.f32 1e-05, %v1067_v31  ;;  %v1084_v40 = vadd.f32 1e-05, %v1068_v38 }
 0x2dc   : > { %v1033_v43 = vpop.xlane.xlu1 %1032  ;;  %v1036_v10 = vpop.xlane.xlu0 %1035 }
 0x2dd   : > { %9188 = vrsqrt.f32 %v1083_v39  ;;  %v1069_v22 = vmul.f32 0.03125, %v1033_v43  ;;  %v1070_v48 = vmul.f32 0.03125, %v1036_v10 }
 0x2de   : > { %9190 = vrsqrt.f32 %v1084_v40 }
 0x2df   : > { %v1085_v49 = vadd.f32 1e-05, %v1069_v22  ;;  %v1086_v52 = vadd.f32 1e-05, %v1070_v48 }
 0x2e0   : > { %v1039_v53 = vpop.xlane.xlu1 %1038  ;;  %v1042_v56 = vpop.xlane.xlu0 %1041 }
 0x2e1   : > { %v9183_v57 = vpop.eup %9182  ;;  %9192 = vrsqrt.f32 %v1085_v49  ;;  %v1071_v44 = vmul.f32 0.03125, %v1039_v53  ;;  %v1072_v58 = vmul.f32 0.03125, %v1042_v56 }
 0x2e2   : > { %9194 = vrsqrt.f32 %v1086_v52  ;;  %v1112_v37 = vmul.f32 %v9183_v57, %v10409_v18  ;;  %v10520_v18 = vld [vmem:[%s13274_s3 + $0x1] ss:$0 sm:$0xff] }
 0x2e3   : > { %v1087_v62 = vadd.f32 1e-05, %v1071_v44  ;;  %v1088_v3 = vadd.f32 1e-05, %v1072_v58 }
 0x2e4   : > { %v1045_v45 = vpop.xlane.xlu1 %1044  ;;  %v1048_v5 = vpop.xlane.xlu0 %1047  ;;  %v1132_v9 = vmul.f32 %v10514_v4, %v1112_v37 }
 0x2e5   : > { %9196 = vrsqrt.f32 %v1087_v62  ;;  %v1073_v6 = vmul.f32 0.03125, %v1045_v45  ;;  %v1074_v7 = vmul.f32 0.03125, %v1048_v5 }
 0x2e6   : > { %v9185_v8 = vpop.eup %9184  ;;  %9198 = vrsqrt.f32 %v1088_v3  ;;  %v1152_v43 = vadd.f32 %v10520_v18, %v1132_v9 }
 0x2e7   : > { %v9187_v17 = vpop.eup %9186  ;;  %v1089_v19 = vadd.f32 1e-05, %v1073_v6  ;;  %v1090_v24 = vadd.f32 1e-05, %v1074_v7  ;;  %v1113_v26 = vmul.f32 %v9185_v8, %v10415_v34 }
 0x2e8   : > { %v1051_v14 = vpop.xlane.xlu1 %1050  ;;  %v1054_v27 = vpop.xlane.xlu0 %1053  ;;  %v1114_v55 = vmul.f32 %v9187_v17, %v10418_v30 }
 0x2e9   : > { %9200 = vrsqrt.f32 %v1089_v19  ;;  %v1075_v31 = vmul.f32 0.03125, %v1051_v14  ;;  %v1076_v38 = vmul.f32 0.03125, %v1054_v27  ;;  %v1133_v39 = vmul.f32 %v10514_v4, %v1113_v26 }
 0x2ea   : > { %v9189_v40 = vpop.eup %9188  ;;  %9202 = vrsqrt.f32 %v1090_v24  ;;  %v1134_v30 = vmul.f32 %v10514_v4, %v1114_v55 }
 0x2eb   : > { %v9191_v10 = vpop.eup %9190  ;;  %v1091_v22 = vadd.f32 1e-05, %v1075_v31  ;;  %v1092_v48 = vadd.f32 1e-05, %v1076_v38  ;;  %v1153_v49 = vadd.f32 %v10520_v18, %v1133_v39  ;;  %v1115_v34 = vmul.f32 %v9189_v40, %v10425_v41 }
 0x2ec   : > { %v1057_v52 = vpop.xlane.xlu1 %1056  ;;  %v1060_v53 = vpop.xlane.xlu0 %1059  ;;  %v1116_v56 = vmul.f32 %v9191_v10, %v10428_v42  ;;  %v1154_v42 = vadd.f32 %v10520_v18, %v1134_v30 }
 0x2ed   : > { %9204 = vrsqrt.f32 %v1091_v22  ;;  %v1077_v57 = vmul.f32 0.03125, %v1057_v52  ;;  %v1078_v44 = vmul.f32 0.03125, %v1060_v53  ;;  %v1168_v58 = vpack.c.bf16 %v1153_v49, %v1152_v43 }
 0x2ee   : > { %v9193_v37 = vpop.eup %9192  ;;  %9206 = vrsqrt.f32 %v1092_v48  ;;  %v1135_v62 = vmul.f32 %v10514_v4, %v1115_v34  ;;  %v1136_v3 = vmul.f32 %v10514_v4, %v1116_v56 }
 0x2ef   : > { %v9195_v45 = vpop.eup %9194  ;;  %v1093_v5 = vadd.f32 1e-05, %v1077_v57  ;;  %v1094_v6 = vadd.f32 1e-05, %v1078_v44  ;;  %8455 = vmatprep.mubr.msk.bf16.mxu0 %vm668_vm0, %v1168_v58  ;;  %v1117_v41 = vmul.f32 %v9193_v37, %v10437_v28 }
 0x2f0   : > { %v1063_v7 = vpop.xlane.xlu1 %1062  ;;  %v1155_v8 = vadd.f32 %v10520_v18, %v1135_v62  ;;  %v1118_v9 = vmul.f32 %v9195_v45, %v10440_v29  ;;  %v1156_v14 = vadd.f32 %v10520_v18, %v1136_v3 }
 0x2f1   : > { %9208 = vrsqrt.f32 %v1093_v5  ;;  %v1079_v17 = vmul.f32 0.03125, %v1063_v7  ;;  %v1137_v19 = vmul.f32 %v10514_v4, %v1117_v41 }
 0x2f2   : > { %v9197_v24 = vpop.eup %9196  ;;  %9210 = vrsqrt.f32 %v1094_v6  ;;  %v1169_v26 = vpack.c.bf16 %v1155_v8, %v1154_v42  ;;  %v1138_v38 = vmul.f32 %v10514_v4, %v1118_v9 }
 0x2f3   : > { %v9199_v27 = vpop.eup %9198  ;;  %v1095_v55 = vadd.f32 1e-05, %v1079_v17  ;;  %v1157_v28 = vadd.f32 %v10520_v18, %v1137_v19  ;;  %v1119_v31 = vmul.f32 %v9197_v24, %v10449_v63 }
 0x2f4   : > { %8456 = vmatmul.mubr.msk.bf16.vlgmr.msra.gmra.mxu0 %vm668_vm0, %v1169_v26  ;;  %v1120_v29 = vmul.f32 %v9199_v27, %v10452_v2  ;;  %v1158_v22 = vadd.f32 %v10520_v18, %v1138_v38  ;;  %v13300_v27 = vmov 0.0  }
 0x2f5   : > { %9212 = vrsqrt.f32 %v1095_v55  ;;  %v1170_v39 = vpack.c.bf16 %v1157_v28, %v1156_v14  ;;  %v1139_v40 = vmul.f32 %v10514_v4, %v1119_v31  ;;  %8471 = vmatprep.subr.bf16.mxu1 %v13300_v27  ;;  %8495 = vmatprep.subr.bf16.mxu0 %v13300_v27 }
 0x2f6   : > { %v9201_v43 = vpop.eup %9200  ;;  %v1140_v49 = vmul.f32 %v10514_v4, %v1120_v29 }
 0x2f7   : > { %v9203_v10 = vpop.eup %9202  ;;  %8459 = vmatprep.mubr.msk.bf16.mxu0 %vm668_vm0, %v1170_v39  ;;  %v1159_v48 = vadd.f32 %v10520_v18, %v1139_v40  ;;  %v1121_v63 = vmul.f32 %v9201_v43, %v10461_v13 }
 0x2f8   : > { %v1122_v34 = vmul.f32 %v9203_v10, %v10464_v23  ;;  %v1160_v56 = vadd.f32 %v10520_v18, %v1140_v49 }
 0x2f9   : > { %v1171_v52 = vpack.c.bf16 %v1159_v48, %v1158_v22  ;;  %v1141_v2 = vmul.f32 %v10514_v4, %v1121_v63 }
 0x2fa   : > { %v9205_v53 = vpop.eup %9204  ;;  %v1142_v58 = vmul.f32 %v10514_v4, %v1122_v34 }
 0x2fb   : > { %v9207_v30 = vpop.eup %9206  ;;  %v1161_v57 = vadd.f32 %v10520_v18, %v1141_v2  ;;  %v1123_v44 = vmul.f32 %v9205_v53, %v10473_v32 }
 0x2fc   : > { %8460 = vmatmul.mubr.msk.bf16.gmra.mxu0 %vm668_vm0, %v1171_v52  ;;  %v1124_v13 = vmul.f32 %v9207_v30, %v10476_v20  ;;  %v1162_v45 = vadd.f32 %v10520_v18, %v1142_v58 }
 0x2fd   : > { %v1172_v37 = vpack.c.bf16 %v1161_v57, %v1160_v56  ;;  %v1143_v23 = vmul.f32 %v10514_v4, %v1123_v44  ;;  %8497 = vmatprep.mubr.msk.bf16.mxu0 %vm9849_vm1, %v13300_v27 }
 0x2fe   : > { %v9209_v62 = vpop.eup %9208  ;;  %v1144_v32 = vmul.f32 %v10514_v4, %v1124_v13 }
 0x2ff   : > { %v9211_v3 = vpop.eup %9210  ;;  %8463 = vmatprep.mubr.msk.bf16.mxu1 %vm668_vm0, %v1172_v37  ;;  %v1163_v5 = vadd.f32 %v10520_v18, %v1143_v23  ;;  %v1125_v6 = vmul.f32 %v9209_v62, %v10485_v50 }
 0x300   : > { %v1126_v41 = vmul.f32 %v9211_v3, %v10488_v51  ;;  %v1164_v8 = vadd.f32 %v10520_v18, %v1144_v32 }
 0x301   : > { %v1173_v7 = vpack.c.bf16 %v1163_v5, %v1162_v45  ;;  %v1145_v20 = vmul.f32 %v10514_v4, %v1125_v6 }
 0x302   : > { %v9213_v42 = vpop.eup %9212  ;;  %v1146_v19 = vmul.f32 %v10514_v4, %v1126_v41 }
 0x303   : > { %8464 = vmatmul.mubr.msk.bf16.vlgmr.msra.gmra.mxu1 %vm668_vm0, %v1173_v7  ;;  %v1165_v9 = vadd.f32 %v10520_v18, %v1145_v20  ;;  %v1127_v17 = vmul.f32 %v9213_v42, %v10497_v59 }
 0x304   : > { %v1166_v51 = vadd.f32 %v10520_v18, %v1146_v19 }
 0x305   : > { %v1174_v24 = vpack.c.bf16 %v1165_v9, %v1164_v8  ;;  %v1147_v50 = vmul.f32 %v10514_v4, %v1127_v17 }
 0x307   : > { %8467 = vmatprep.mubr.msk.bf16.mxu1 %vm668_vm0, %v1174_v24  ;;  %v1167_v26 = vadd.f32 %v10520_v18, %v1147_v50 }
 0x309   : > { %v1175_v14 = vpack.c.bf16 %v1167_v26, %v1166_v51 }
 0x30b   : > { %8468 = vmatmul.mubr.msk.bf16.gmra.mxu1 %vm668_vm0, %v1175_v14 }
 0x30c   : > { %8473 = vmatprep.mubr.msk.bf16.mxu1 %vm9849_vm1, %v13300_v27 }
 0x3b4   : > { %v8457_v59 = vpop.f32.mrf.mxu0 }
 0x3b5   : > { %v1315_v28 = vmul.f32 0.25, %v8457_v59 }
 0x3b6   : > { %v1250_v55 = vpop.f32.mrf.mxu0 }
 0x3b7   : > { %v1313_v9 = vmul.f32 0.25, %v1250_v55 }
 0x3b8   : > { %v8458_v4 = vpop.f32.mrf.mxu0 }
 0x3b9   : > { %v1316_v18 = vmul.f32 0.25, %v8458_v4  ;;  %v10582_v31 = vpack.c.bf16 %v8458_v4, %v8457_v59 }
 0x3ba   : > { %v1253_v38 = vpop.f32.mrf.mxu0 }
 0x3bb   : > { %v10584_v29 = vpack.c.bf16 %v1316_v18, %v1315_v28  ;;  %v10586_v39 = vpack.c.bf16 %v1253_v38, %v1250_v55  ;;  %1397 = vrot.lane.b32.xlu1 %v10582_v31, %s9850_s21  ;;  %v1314_v8 = vmul.f32 0.25, %v1253_v38 }
 0x3bc   : > { %v8461_v40 = vpop.f32.mrf.mxu0 }
 0x3bd   : > { %1346 = vrot.lane.b32.xlu0 %v10586_v39, %s9850_s21  ;;  %v1319_v22 = vmul.f32 0.25, %v8461_v40  ;;  %v10635_v19 = vpack.c.bf16 %v1314_v8, %v1313_v9 }
 0x3be   : > { %v10592_v43 = vpop.f32.mrf.mxu0 }
 0x3bf   : > { %v1317_v28 = vmul.f32 0.25, %v10592_v43 }
 0x3c0   : > { %v8462_v10 = vpop.f32.mrf.mxu0 }
 0x3c1   : > { %v1320_v48 = vmul.f32 0.25, %v8462_v10  ;;  %v10601_v53 = vpack.c.bf16 %v8462_v10, %v8461_v40 }
 0x3c2   : > { %v1269_v63 = vpop.f32.mrf.mxu0 }
 0x3c3   : > { %v10594_v49 = vpack.c.bf16 %v1320_v48, %v1319_v22  ;;  %v10597_v34 = vpack.c.bf16 %v1269_v63, %v10592_v43  ;;  %v8465_v52 = vpop.f32.mrf.mxu1  ;;  %v1318_v55 = vmul.f32 0.25, %v1269_v63 }
 0x3c4   : > { %v1323_v56 = vmul.f32 0.25, %v8465_v52 }
 0x3c5   : > { %1447 = vrot.lane.b32.xlu1 %v10597_v34, %s9850_s21  ;;  %v1282_v2 = vpop.f32.mrf.mxu1  ;;  %v10654_v40 = vpack.c.bf16 %v1318_v55, %v1317_v28 }
 0x3c6   : > { %v1321_v4 = vmul.f32 0.25, %v1282_v2 }
 0x3c7   : > { %v8466_v30 = vpop.f32.mrf.mxu1 }
 0x3c8   : > { %v1324_v57 = vmul.f32 0.25, %v8466_v30  ;;  %v10609_v37 = vpack.c.bf16 %v8466_v30, %v8465_v52 }
 0x3c9   : > { %1497 = vrot.lane.b32.xlu1 %v10601_v53, %s9850_s21  ;;  %v1285_v44 = vpop.f32.mrf.mxu1 }
 0x3ca   : > { %v10605_v58 = vpack.c.bf16 %v1324_v57, %v1323_v56  ;;  %v10607_v13 = vpack.c.bf16 %v1285_v44, %v1282_v2  ;;  %v1322_v59 = vmul.f32 0.25, %v1285_v44 }
 0x3cb   : > { %v8469_v23 = vpop.f32.mrf.mxu1 }
 0x3cc   : > { %1547 = vrot.lane.b32.xlu0 %v10607_v13, %s9850_s21  ;;  %v1327_v45 = vmul.f32 0.25, %v8469_v23  ;;  %v10652_v18 = vpack.c.bf16 %v1322_v59, %v1321_v4 }
 0x3cd   : > { %1597 = vrot.lane.b32.xlu1 %v10609_v37, %s9850_s21  ;;  %v1298_v62 = vpop.f32.mrf.mxu1 }
 0x3ce   : > { %v1325_v43 = vmul.f32 0.25, %v1298_v62 }
 0x3cf   : > { %v8470_v3 = vpop.f32.mrf.mxu1 }
 0x3d0   : > { %v1328_v5 = vmul.f32 0.25, %v8470_v3  ;;  %v10615_v6 = vpack.c.bf16 %v8470_v3, %v8469_v23 }
 0x3d1   : > { %v1301_v32 = vpop.f32.mrf.mxu1 }
 0x3d2   : > { %v10617_v41 = vpack.c.bf16 %v1328_v5, %v1327_v45  ;;  %v10619_v7 = vpack.c.bf16 %v1301_v32, %v1298_v62  ;;  %1697 = vrot.lane.b32.xlu1 %v10615_v6, %s9850_s21  ;;  %v1326_v63 = vmul.f32 0.25, %v1301_v32 }
 0x3d4   : > { %1647 = vrot.lane.b32.xlu0 %v10619_v7, %s9850_s21  ;;  %v10668_v52 = vpack.c.bf16 %v1326_v63, %v1325_v43 }
 0x3d6   : > { %1977 = vrot.lane.b32.xlu1 %v10582_v31, %s9851_s23 }
 0x3d8   : > { %1930 = vrot.lane.b32.xlu0 %v10586_v39, %s9851_s23 }
 0x3da   : > { %2071 = vrot.lane.b32.xlu1 %v10601_v53, %s9851_s23 }
 0x3de   : > { %2024 = vrot.lane.b32.xlu1 %v10597_v34, %s9851_s23 }
 0x42d   : > { %v1398_v17 = vpop.permute.xlu1 %1397 }
 0x42e   : > { %v1403_v24 = vsel %vm1348_vm2, %v1398_v17, 0 }
 0x42f   : > { %v1347_v20 = vpop.permute.xlu0 %1346 }
 0x430   : > { %v1353_v42 = vsel %vm1348_vm2, %v1347_v20, 0 }
 0x431   : > { %8472 = vmatpush3.bf16.xpose.msra.mxu1 %v1353_v42 }
 0x432   : > { %8477 = vmatprep.subr.bf16.mxu1 %v13300_v27 }
 0x437   : > { %v1448_v50 = vpop.permute.xlu1 %1447 }
 0x438   : > { %8474 = vmatmul.mubr.msk.bf16.vlgmr.msra.gmra.mxu1 %vm1348_vm2, %v10635_v19  ;;  %v1453_v14 = vsel %vm1348_vm2, %v1448_v50, 0 }
 0x439   : > { %8478 = vmatpush3.bf16.xpose.msra.mxu1 %v1403_v24  ;;  %8479 = vmatprep.mubr.msk.bf16.mxu1 %vm9849_vm1, %v13300_v27 }
 0x43a   : > { %8483 = vmatprep.subr.bf16.mxu1 %v13300_v27 }
 0x43b   : > { %v1498_v38 = vpop.permute.xlu1 %1497 }
 0x43c   : > { %v1503_v48 = vsel %vm1348_vm2, %v1498_v38, 0 }
 0x43e   : > { %v1548_v51 = vpop.permute.xlu0 %1547 }
 0x43f   : > { %v1553_v26 = vsel %vm1348_vm2, %v1548_v51, 0  ;;  %v1598_v2 = vpop.permute.xlu1 %1597 }
 0x440   : > { %8480 = vmatmul.mubr.msk.bf16.vlgmr.msra.gmra.mxu1 %vm1348_vm2, %v10584_v29  ;;  %8496 = vmatpush3.bf16.xpose.msra.mxu0 %v1553_v26  ;;  %v1603_v56 = vsel %vm1348_vm2, %v1598_v2, 0 }
 0x441   : > { %8484 = vmatpush3.bf16.xpose.msra.mxu1 %v1453_v14  ;;  %8485 = vmatprep.mubr.msk.bf16.mxu1 %vm9849_vm1, %v13300_v27 }
 0x442   : > { %8489 = vmatprep.subr.bf16.mxu1 %v13300_v27  ;;  %8507 = vmatprep.subr.bf16.mxu0 %v13300_v27 }
 0x444   : > { %v1698_v57 = vpop.permute.xlu1 %1697 }
 0x445   : > { %v1703_v44 = vsel %vm1348_vm2, %v1698_v57, 0 }
 0x446   : > { %v1648_v10 = vpop.permute.xlu0 %1647 }
 0x447   : > { %v1653_v22 = vsel %vm1348_vm2, %v1648_v10, 0  ;;  %8498 = vmatmul.mubr.msk.bf16.vlgmr.msra.gmra.mxu0 %vm1348_vm2, %v10652_v18 }
 0x448   : > { %8486 = vmatmul.mubr.msk.bf16.vlgmr.msra.gmra.mxu1 %vm1348_vm2, %v10654_v40  ;;  %8508 = vmatpush3.bf16.xpose.msra.mxu0 %v1653_v22  ;;  %v1978_v23 = vpop.permute.xlu1 %1977 }
 0x449   : > { %8490 = vmatpush3.bf16.xpose.msra.mxu1 %v1503_v48  ;;  %8491 = vmatprep.mubr.msk.bf16.mxu1 %vm9849_vm1, %v13300_v27 }
 0x44a   : > { %8509 = vmatprep.mubr.msk.bf16.mxu0 %vm9849_vm1, %v13300_v27  ;;  %8501 = vmatprep.subr.bf16.mxu1 %v13300_v27  ;;  %v1931_v30 = vpop.permute.xlu0 %1930 }
 0x44b   : > { %8519 = vmatprep.subr.bf16.mxu0 %v13300_v27 }
 0x44f   : > { %8510 = vmatmul.mubr.msk.bf16.vlgmr.msra.gmra.mxu0 %vm1348_vm2, %v10668_v52 }
 0x450   : > { %8492 = vmatmul.mubr.msk.bf16.vlgmr.msra.gmra.mxu1 %vm1348_vm2, %v10594_v49  ;;  %8520 = vmatpush3.bf16.msra.mxu0 %v1931_v30 }
 0x451   : > { %8502 = vmatpush3.bf16.xpose.msra.mxu1 %v1603_v56  ;;  %8503 = vmatprep.mubr.msk.bf16.mxu1 %vm9849_vm1, %v13300_v27 }
 0x452   : > { %8513 = vmatprep.subr.bf16.mxu1 %v13300_v27  ;;  %8521 = vmatprep.mubr.msk.bf16.mxu0 %vm9849_vm1, %v13300_v27 }
 0x453   : > { %8531 = vmatprep.subr.bf16.mxu0 %v13300_v27 }
 0x458   : > { %8504 = vmatmul.mubr.msk.bf16.vlgmr.msra.gmra.mxu1 %vm1348_vm2, %v10605_v58 }
 0x459   : > { %8514 = vmatpush3.bf16.xpose.msra.mxu1 %v1703_v44  ;;  %8515 = vmatprep.mubr.msk.bf16.mxu1 %vm9849_vm1, %v13300_v27 }
 0x45a   : > { %8525 = vmatprep.subr.bf16.mxu1 %v13300_v27 }
 0x460   : > { %8516 = vmatmul.mubr.msk.bf16.vlgmr.msra.gmra.mxu1 %vm1348_vm2, %v10617_v41 }
 0x461   : > { %8526 = vmatpush3.bf16.msra.mxu1 %v1978_v23  ;;  %8527 = vmatprep.mubr.msk.bf16.mxu1 %vm9849_vm1, %v13300_v27 }
 0x462   : > { %8537 = vmatprep.subr.bf16.mxu1 %v13300_v27 }
 0x4f8   : > { %v10692_v62 = vpop.f32.mrf.mxu1 }
 0x4f9   : > { %v1746_v3 = vsel %vm1348_vm2, %v10692_v62, -inf }
 0x4fa   : > { %1747 = vmax.xlane.f32.xlu0 %v1746_v3  ;;  %v8475_v45 = vpop.f32.mrf.mxu1 }
 0x4fc   : > { %v10696_v5 = vpop.f32.mrf.mxu1 }
 0x4fd   : > { %v1749_v32 = vsel %vm1348_vm2, %v10696_v5, -inf }
 0x4fe   : > { %1750 = vmax.xlane.f32.xlu1 %v1749_v32  ;;  %v8476_v20 = vpop.f32.mrf.mxu1 }
 0x500   : > { %v10700_v42 = vpop.f32.mrf.mxu1 }
 0x501   : > { %v1752_v4 = vsel %vm1348_vm2, %v10700_v42, -inf }
 0x502   : > { %v8481_v8 = vpop.f32.mrf.mxu1 }
 0x504   : > { %v10702_v9 = vpop.f32.mrf.mxu1 }
 0x505   : > { %v1755_v57 = vsel %vm1348_vm2, %v10702_v9, -inf }
 0x506   : > { %v8482_v17 = vpop.f32.mrf.mxu1 }
 0x507   : > { %v10704_v24 = vpop.f32.mrf.mxu0 }
 0x508   : > { %v10706_v50 = vpop.f32.mrf.mxu1  ;;  %v1770_v51 = vsel %vm1348_vm2, %v10704_v24, -inf }
 0x509   : > { %1771 = vmax.xlane.f32.xlu0 %v1770_v51  ;;  %v8499_v26 = vpop.f32.mrf.mxu0  ;;  %v1758_v32 = vsel %vm1348_vm2, %v10706_v50, -inf }
 0x50a   : > { %v8487_v14 = vpop.f32.mrf.mxu1 }
 0x50b   : > { %v10710_v59 = vpop.f32.mrf.mxu0 }
 0x50c   : > { %v10712_v55 = vpop.f32.mrf.mxu1  ;;  %v1773_v28 = vsel %vm1348_vm2, %v10710_v59, -inf }
 0x50d   : > { %1753 = vmax.xlane.f32.xlu0 %v1752_v4  ;;  %1774 = vmax.xlane.f32.xlu1 %v1773_v28  ;;  %v8500_v38 = vpop.f32.mrf.mxu0  ;;  %v1761_v20 = vsel %vm1348_vm2, %v10712_v55, -inf }
 0x50e   : > { %v8488_v10 = vpop.f32.mrf.mxu1 }
 0x50f   : > { %v10718_v22 = vpop.f32.mrf.mxu0 }
 0x510   : > { %v10720_v48 = vpop.f32.mrf.mxu1  ;;  %v1782_v63 = vsel %vm1348_vm2, %v10718_v22, -inf }
 0x511   : > { %1783 = vmax.xlane.f32.xlu0 %v1782_v63  ;;  %v8511_v43 = vpop.f32.mrf.mxu0  ;;  %v1764_v51 = vsel %vm1348_vm2, %v10720_v48, -inf }
 0x512   : > { %v8493_v2 = vpop.f32.mrf.mxu1 }
 0x513   : > { %v10724_v30 = vpop.f32.mrf.mxu0 }
 0x514   : > { %v10726_v56 = vpop.f32.mrf.mxu1  ;;  %v1785_v44 = vsel %vm1348_vm2, %v10724_v30, -inf }
 0x515   : > { %1756 = vmax.xlane.f32.xlu0 %v1755_v57  ;;  %1786 = vmax.xlane.f32.xlu1 %v1785_v44  ;;  %v8512_v23 = vpop.f32.mrf.mxu0  ;;  %v1767_v26 = vsel %vm1348_vm2, %v10726_v56, -inf  ;;  %v10760_v44 = vpop.permute.xlu1 %2071 }
 0x516   : > { %v8494_v3 = vpop.f32.mrf.mxu1 }
 0x518   : > { %v10732_v45 = vpop.f32.mrf.mxu1 }
 0x519   : > { %1759 = vmax.xlane.f32.xlu0 %v1758_v32  ;;  %1762 = vmax.xlane.f32.xlu1 %v1761_v20  ;;  %v1776_v28 = vsel %vm1348_vm2, %v10732_v45, -inf  ;;  %v10762_v23 = vpop.permute.xlu1 %2024 }
 0x51a   : > { %v8505_v8 = vpop.f32.mrf.mxu1 }
 0x51c   : > { %v10738_v17 = vpop.f32.mrf.mxu1 }
 0x51d   : > { %1765 = vmax.xlane.f32.xlu0 %v1764_v51  ;;  %1768 = vmax.xlane.f32.xlu1 %v1767_v26  ;;  %v1779_v38 = vsel %vm1348_vm2, %v10738_v17, -inf }
 0x51e   : > { %v8506_v14 = vpop.f32.mrf.mxu1 }
 0x520   : > { %v10744_v4 = vpop.f32.mrf.mxu1 }
 0x521   : > { %1777 = vmax.xlane.f32.xlu0 %v1776_v28  ;;  %1780 = vmax.xlane.f32.xlu1 %v1779_v38  ;;  %v1788_v43 = vsel %vm1348_vm2, %v10744_v4, -inf }
 0x522   : > { %v8517_v10 = vpop.f32.mrf.mxu1 }
 0x524   : > { %v10750_v63 = vpop.f32.mrf.mxu1 }
 0x525   : > { %1789 = vmax.xlane.f32.xlu0 %v1788_v43  ;;  %v1791_v2 = vsel %vm1348_vm2, %v10750_v63, -inf }
 0x526   : > { %v8518_v57 = vpop.f32.mrf.mxu1  ;;  %1792 = vmax.xlane.f32.xlu1 %v1791_v2 }
 0x537   : > { %2165 = vrot.lane.b32.xlu1 %v10609_v37, %s9851_s23 }
 0x53b   : > { %2118 = vrot.lane.b32.xlu0 %v10607_v13, %s9851_s23 }
 0x583   : > { %v1748_v3 = vpop.xlane.xlu0 %1747 }
 0x584   : > { %v1794_v32 = vsub.f32 %v10692_v62, %v1748_v3 }
 0x586   : > { %v1810_v20 = vmul.f32 1.442695, %v1794_v32 }
 0x587   : > { %v1751_v8 = vpop.xlane.xlu1 %1750 }
 0x588   : > { %9214 = vpow2.f32 %v1810_v20  ;;  %v1795_v51 = vsub.f32 %v10696_v5, %v1751_v8 }
 0x58a   : > { %v1812_v26 = vmul.f32 1.442695, %v1795_v51 }
 0x58c   : > { %9216 = vpow2.f32 %v1812_v26 }
 0x592   : > { %v1772_v14 = vpop.xlane.xlu0 %1771 }
 0x593   : > { %v1802_v28 = vsub.f32 %v10704_v24, %v1772_v14 }
 0x595   : > { %v10767_v38 = vpop.eup %9214  ;;  %v1826_v10 = vmul.f32 1.442695, %v1802_v28 }
 0x596   : > { %v1775_v43 = vpop.xlane.xlu1 %1774  ;;  %v1842_v2 = vsel %vm1348_vm2, %v10767_v38, 0.0  ;;  %v1754_v57 = vpop.xlane.xlu0 %1753 }
 0x597   : > { %9218 = vpow2.f32 %v1826_v10  ;;  %v1803_v62 = vsub.f32 %v10710_v59, %v1775_v43  ;;  %1843 = vadd.xlane.f32.xlu0 %v1842_v2  ;;  %v1796_v3 = vsub.f32 %v10700_v42, %v1754_v57 }
 0x599   : > { %v10773_v5 = vpop.eup %9216  ;;  %v1828_v32 = vmul.f32 1.442695, %v1803_v62  ;;  %v1814_v20 = vmul.f32 1.442695, %v1796_v3 }
 0x59a   : > { %v1845_v24 = vsel %vm1348_vm2, %v10773_v5, 0.0  ;;  %v1784_v8 = vpop.xlane.xlu0 %1783 }
 0x59b   : > { %9220 = vpow2.f32 %v1828_v32  ;;  %1846 = vadd.xlane.f32.xlu1 %v1845_v24  ;;  %v1806_v51 = vsub.f32 %v10718_v22, %v1784_v8 }
 0x59c   : > { %9222 = vpow2.f32 %v1814_v20 }
 0x59d   : > { %v1834_v26 = vmul.f32 1.442695, %v1806_v51 }
 0x59e   : > { %v1787_v14 = vpop.xlane.xlu1 %1786  ;;  %v1757_v28 = vpop.xlane.xlu0 %1756 }
 0x59f   : > { %9224 = vpow2.f32 %v1834_v26  ;;  %v1807_v59 = vsub.f32 %v10724_v30, %v1787_v14  ;;  %v1797_v42 = vsub.f32 %v10702_v9, %v1757_v28 }
 0x5a1   : > { %v1816_v10 = vmul.f32 1.442695, %v1797_v42  ;;  %v1836_v43 = vmul.f32 1.442695, %v1807_v59 }
 0x5a2   : > { %v1763_v2 = vpop.xlane.xlu1 %1762  ;;  %v1760_v57 = vpop.xlane.xlu0 %1759 }
 0x5a3   : > { %v1799_v62 = vsub.f32 %v10712_v55, %v1763_v2  ;;  %v1798_v3 = vsub.f32 %v10706_v50, %v1760_v57  ;;  %9226 = vpow2.f32 %v1816_v10 }
 0x5a4   : > { %v10782_v32 = vpop.eup %9218  ;;  %9228 = vpow2.f32 %v1836_v43 }
 0x5a5   : > { %v1818_v22 = vmul.f32 1.442695, %v1798_v3  ;;  %v1866_v20 = vsel %vm1348_vm2, %v10782_v32, 0.0  ;;  %v1820_v24 = vmul.f32 1.442695, %v1799_v62 }
 0x5a6   : > { %v1769_v30 = vpop.xlane.xlu1 %1768  ;;  %1867 = vadd.xlane.f32.xlu0 %v1866_v20  ;;  %v1766_v9 = vpop.xlane.xlu0 %1765 }
 0x5a7   : > { %v1801_v8 = vsub.f32 %v10726_v56, %v1769_v30  ;;  %v1800_v51 = vsub.f32 %v10720_v48, %v1766_v9  ;;  %9230 = vpow2.f32 %v1818_v22 }
 0x5a8   : > { %v10788_v26 = vpop.eup %9220  ;;  %9232 = vpow2.f32 %v1820_v24 }
 0x5a9   : > { %v10790_v50 = vpop.eup %9222  ;;  %v1822_v55 = vmul.f32 1.442695, %v1800_v51  ;;  %v1869_v14 = vsel %vm1348_vm2, %v10788_v26, 0.0  ;;  %v1824_v28 = vmul.f32 1.442695, %v1801_v8 }
 0x5aa   : > { %1870 = vadd.xlane.f32.xlu1 %v1869_v14  ;;  %v1848_v59 = vsel %vm1348_vm2, %v10790_v50, 0.0  ;;  %v1778_v42 = vpop.xlane.xlu0 %1777 }
 0x5ab   : > { %1849 = vadd.xlane.f32.xlu0 %v1848_v59  ;;  %v1804_v56 = vsub.f32 %v10732_v45, %v1778_v42  ;;  %9234 = vpow2.f32 %v1822_v55 }
 0x5ac   : > { %v10797_v48 = vpop.eup %9224  ;;  %9236 = vpow2.f32 %v1824_v28  ;;  %v1781_v28 = vpop.xlane.xlu1 %1780 }
 0x5ad   : > { %v1830_v10 = vmul.f32 1.442695, %v1804_v56  ;;  %v1878_v43 = vsel %vm1348_vm2, %v10797_v48, 0.0  ;;  %v1805_v42 = vsub.f32 %v10738_v17, %v1781_v28 }
 0x5ae   : > { %v1790_v59 = vpop.xlane.xlu0 %1789 }
 0x5af   : > { %1879 = vadd.xlane.f32.xlu0 %v1878_v43  ;;  %9238 = vpow2.f32 %v1830_v10  ;;  %v1808_v56 = vsub.f32 %v10744_v4, %v1790_v59  ;;  %v1832_v43 = vmul.f32 1.442695, %v1805_v42 }
 0x5b0   : > { %v10801_v2 = vpop.eup %9226  ;;  %v1793_v10 = vpop.xlane.xlu1 %1792 }
 0x5b1   : > { %v1851_v57 = vsel %vm1348_vm2, %v10801_v2, 0.0  ;;  %v10805_v62 = vpop.eup %9228  ;;  %9240 = vpow2.f32 %v1832_v43 }
 0x5b2   : > { %1852 = vadd.xlane.f32.xlu1 %v1851_v57  ;;  %v1881_v45 = vsel %vm1348_vm2, %v10805_v62, 0.0  ;;  %v1809_v57 = vsub.f32 %v10750_v63, %v1793_v10 }
 0x5b4   : > { %v10807_v3 = vpop.eup %9230 }
 0x5b5   : > { %v1854_v22 = vsel %vm1348_vm2, %v10807_v3, 0.0  ;;  %v10813_v20 = vpop.eup %9232 }
 0x5b6   : > { %1882 = vadd.xlane.f32.xlu1 %v1881_v45  ;;  %1855 = vadd.xlane.f32.xlu0 %v1854_v22  ;;  %v1857_v30 = vsel %vm1348_vm2, %v10813_v20, 0.0  ;;  %v1838_v45 = vmul.f32 1.442695, %v1808_v56  ;;  %v1840_v22 = vmul.f32 1.442695, %v1809_v57 }
 0x5b8   : > { %v10815_v24 = vpop.eup %9234  ;;  %9242 = vpow2.f32 %v1838_v45 }
 0x5b9   : > { %v1860_v9 = vsel %vm1348_vm2, %v10815_v24, 0.0  ;;  %v10821_v8 = vpop.eup %9236  ;;  %9244 = vpow2.f32 %v1840_v22 }
 0x5ba   : > { %1858 = vadd.xlane.f32.xlu1 %v1857_v30  ;;  %1861 = vadd.xlane.f32.xlu0 %v1860_v9  ;;  %v1863_v55 = vsel %vm1348_vm2, %v10821_v8, 0.0 }
 0x5bc   : > { %v10823_v51 = vpop.eup %9238 }
 0x5bd   : > { %v1872_v14 = vsel %vm1348_vm2, %v10823_v51, 0.0 }
 0x5be   : > { %1864 = vadd.xlane.f32.xlu1 %v1863_v55  ;;  %1873 = vadd.xlane.f32.xlu0 %v1872_v14  ;;  %v10836_v30 = vpop.eup %9240 }
 0x5bf   : > { %v1875_v55 = vsel %vm1348_vm2, %v10836_v30, 0.0 }
 0x5c5   : > { %v10838_v9 = vpop.eup %9242 }
 0x5c6   : > { %v1884_v17 = vsel %vm1348_vm2, %v10838_v9, 0.0  ;;  %v10844_v4 = vpop.eup %9244 }
 0x5c7   : > { %v1887_v63 = vsel %vm1348_vm2, %v10844_v4, 0.0 }
 0x5cf   : > { %2259 = vrot.lane.b32.xlu1 %v10615_v6, %s9851_s23 }
 0x5d4   : > { %2212 = vrot.lane.b32.xlu0 %v10619_v7, %s9851_s23 }
 0x5f3   : > { %1876 = vadd.xlane.f32.xlu1 %v1875_v55  ;;  %1885 = vadd.xlane.f32.xlu0 %v1884_v17 }
 0x5f7   : > { %1888 = vadd.xlane.f32.xlu1 %v1887_v63 }
 0x608   : > { %2371 = vrot.lane.b32.xlu1 %v10582_v31, %s9852_s25 }
 0x609   : > { %2319 = vrot.lane.b32.xlu0 %v10586_v39, %s9852_s25 }
 0x60c   : > { %2369 = vrot.lane.b32.xlu1 %v10584_v29, %s9853_s15  ;;  %v2119_v29 = vpop.permute.xlu0 %2118 }
 0x60d   : > { %2317 = vrot.lane.b32.xlu0 %v10635_v19, %s9853_s15  ;;  %v10872_v19 = vpop.permute.xlu1 %2165 }
 0x610   : > { %2475 = vrot.lane.b32.xlu1 %v10601_v53, %s9852_s25 }
 0x611   : > { %2423 = vrot.lane.b32.xlu0 %v10597_v34, %s9852_s25 }
 0x614   : > { %2473 = vrot.lane.b32.xlu1 %v10594_v49, %s9853_s15 }
 0x615   : > { %2421 = vrot.lane.b32.xlu0 %v10654_v40, %s9853_s15 }
 0x618   : > { %2579 = vrot.lane.b32.xlu1 %v10609_v37, %s9852_s25 }
 0x619   : > { %2527 = vrot.lane.b32.xlu0 %v10607_v13, %s9852_s25 }
 0x61c   : > { %2577 = vrot.lane.b32.xlu1 %v10605_v58, %s9853_s15 }
 0x61d   : > { %2525 = vrot.lane.b32.xlu0 %v10652_v18, %s9853_s15 }
 0x620   : > { %v1844_v14 = vpop.xlane.xlu0 %1843  ;;  %2683 = vrot.lane.b32.xlu1 %v10615_v6, %s9852_s25 }
 0x621   : > { %2631 = vrot.lane.b32.xlu0 %v10619_v7, %s9852_s25  ;;  %9246 = vrcp.f32 %v1844_v14 }
 0x624   : > { %v1847_v49 = vpop.xlane.xlu1 %1846  ;;  %2681 = vrot.lane.b32.xlu1 %v10617_v41, %s9853_s15 }
 0x625   : > { %9248 = vrcp.f32 %v1847_v49  ;;  %2629 = vrot.lane.b32.xlu0 %v10668_v52, %s9853_s15 }
 0x62e   : > { %v9247_v58 = vpop.eup %9246 }
 0x62f   : > { %v1868_v18 = vpop.xlane.xlu0 %1867  ;;  %v1906_v28 = vmul.f32 %v9247_v58, %v10767_v38 }
 0x632   : > { %v9249_v40 = vpop.eup %9248 }
 0x633   : > { %v1907_v59 = vmul.f32 %v9249_v40, %v10773_v5  ;;  %v1871_v10 = vpop.xlane.xlu1 %1870 }
 0x634   : > { %v1850_v56 = vpop.xlane.xlu0 %1849 }
 0x635   : > { %v1922_v42 = vpack.c.bf16 %v1907_v59, %v1906_v28  ;;  %9250 = vrcp.f32 %v1850_v56 }
 0x637   : > { %8522 = vmatmul.mubr.msk.bf16.vlgmr.msra.gmra.mxu0 %vm1348_vm2, %v1922_v42 }
 0x638   : > { %8532 = vmatpush3.bf16.msra.mxu0 %v10762_v23  ;;  %8533 = vmatprep.mubr.msk.bf16.mxu0 %vm9849_vm1, %v13300_v27  ;;  %v1880_v41 = vpop.xlane.xlu0 %1879 }
 0x639   : > { %8543 = vmatprep.subr.bf16.mxu0 %v13300_v27 }
 0x63b   : > { %v1853_v52 = vpop.xlane.xlu1 %1852 }
 0x63c   : > { %9252 = vrcp.f32 %v1853_v52 }
 0x63f   : > { %v1883_v43 = vpop.xlane.xlu1 %1882  ;;  %v1856_v38 = vpop.xlane.xlu0 %1855 }
 0x640   : > { %9254 = vrcp.f32 %v1856_v38 }
 0x642   : > { %v9251_v45 = vpop.eup %9250 }
 0x643   : > { %v1859_v5 = vpop.xlane.xlu1 %1858  ;;  %v1862_v57 = vpop.xlane.xlu0 %1861  ;;  %v1908_v55 = vmul.f32 %v9251_v45, %v10790_v50 }
 0x644   : > { %9256 = vrcp.f32 %v1859_v5 }
 0x645   : > { %9258 = vrcp.f32 %v1862_v57 }
 0x646   : > { %9260 = vrcp.f32 %v1871_v10 }
 0x647   : > { %v1865_v22 = vpop.xlane.xlu1 %1864  ;;  %v1874_v56 = vpop.xlane.xlu0 %1873 }
 0x648   : > { %9262 = vrcp.f32 %v1865_v22 }
 0x649   : > { %v9253_v23 = vpop.eup %9252  ;;  %9264 = vrcp.f32 %v1868_v18 }
 0x64a   : > { %v1909_v17 = vmul.f32 %v9253_v23, %v10801_v2  ;;  %9266 = vrcp.f32 %v1883_v43 }
 0x64b   : > { %9268 = vrcp.f32 %v1880_v41  ;;  %v2260_v52 = vpop.permute.xlu1 %2259 }
 0x64c   : > { %v1923_v63 = vpack.c.bf16 %v1909_v17, %v1908_v55  ;;  %9270 = vrcp.f32 %v1874_v56 }
 0x64d   : > { %v9255_v14 = vpop.eup %9254 }
 0x64e   : > { %8528 = vmatmul.mubr.msk.bf16.vlgmr.msra.gmra.mxu1 %vm1348_vm2, %v1923_v63  ;;  %v1910_v58 = vmul.f32 %v9255_v14, %v10807_v3 }
 0x64f   : > { %8538 = vmatpush3.bf16.msra.mxu1 %v10760_v44  ;;  %8539 = vmatprep.mubr.msk.bf16.mxu1 %vm9849_vm1, %v13300_v27 }
 0x650   : > { %8549 = vmatprep.subr.bf16.mxu1 %v13300_v27 }
 0x651   : > { %v9257_v49 = vpop.eup %9256 }
 0x652   : > { %v1911_v50 = vmul.f32 %v9257_v49, %v10813_v20  ;;  %v9259_v18 = vpop.eup %9258 }
 0x653   : > { %v9261_v2 = vpop.eup %9260  ;;  %v1912_v44 = vmul.f32 %v9259_v18, %v10815_v24 }
 0x654   : > { %v1924_v40 = vpack.c.bf16 %v1911_v50, %v1910_v58  ;;  %v1915_v3 = vmul.f32 %v9261_v2, %v10788_v26 }
 0x655   : > { %v9263_v28 = vpop.eup %9262 }
 0x656   : > { %8534 = vmatmul.mubr.msk.bf16.vlgmr.msra.gmra.mxu0 %vm1348_vm2, %v1924_v40  ;;  %v1913_v59 = vmul.f32 %v9263_v28, %v10821_v8  ;;  %v9265_v42 = vpop.eup %9264 }
 0x657   : > { %8544 = vmatpush3.bf16.msra.mxu0 %v2119_v29  ;;  %8545 = vmatprep.mubr.msk.bf16.mxu0 %vm9849_vm1, %v13300_v27  ;;  %v1914_v20 = vmul.f32 %v9265_v42, %v10782_v32  ;;  %v9267_v8 = vpop.eup %9266  ;;  %v2213_v29 = vpop.permute.xlu0 %2212 }
 0x658   : > { %v1925_v10 = vpack.c.bf16 %v1913_v59, %v1912_v44  ;;  %8555 = vmatprep.subr.bf16.mxu0 %v13300_v27  ;;  %v9269_v41 = vpop.eup %9268  ;;  %v1919_v26 = vmul.f32 %v9267_v8, %v10805_v62 }
 0x659   : > { %v1926_v24 = vpack.c.bf16 %v1915_v3, %v1914_v20  ;;  %v1918_v32 = vmul.f32 %v9269_v41, %v10797_v48  ;;  %v9271_v45 = vpop.eup %9270 }
 0x65a   : > { %8540 = vmatmul.mubr.msk.bf16.vlgmr.msra.gmra.mxu1 %vm1348_vm2, %v1925_v10  ;;  %v1916_v63 = vmul.f32 %v9271_v45, %v10823_v51 }
 0x65b   : > { %8550 = vmatpush3.bf16.msra.mxu1 %v10872_v19  ;;  %8551 = vmatprep.mubr.msk.bf16.mxu1 %vm9849_vm1, %v13300_v27  ;;  %v1928_v19 = vpack.c.bf16 %v1919_v26, %v1918_v32 }
 0x65c   : > { %8561 = vmatprep.subr.bf16.mxu1 %v13300_v27 }
 0x65e   : > { %8546 = vmatmul.mubr.msk.bf16.vlgmr.msra.gmra.mxu0 %vm1348_vm2, %v1926_v24 }
 0x65f   : > { %8556 = vmatpush3.bf16.msra.mxu0 %v2213_v29  ;;  %8557 = vmatprep.mubr.msk.bf16.mxu0 %vm9849_vm1, %v13300_v27 }
 0x660   : > { %8567 = vmatprep.subr.bf16.mxu0 %v13300_v27 }
 0x666   : > { %8558 = vmatmul.mubr.msk.bf16.vlgmr.msra.gmra.mxu0 %vm1348_vm2, %v1928_v19 }
 0x667   : > { %8569 = vmatprep.mubr.msk.bf16.mxu0 %vm9849_vm1, %v13300_v27 }
 0x67c   : > { %v1877_v43 = vpop.xlane.xlu1 %1876  ;;  %v1886_v38 = vpop.xlane.xlu0 %1885 }
 0x67d   : > { %9272 = vrcp.f32 %v1877_v43 }
 0x680   : > { %v1889_v5 = vpop.xlane.xlu1 %1888  ;;  %v2320_v57 = vpop.permute.xlu0 %2319 }
 0x681   : > { %9274 = vrcp.f32 %v1889_v5  ;;  %v2325_v62 = vsel %vm1348_vm2, %v2320_v57, 0 }
 0x682   : > { %8568 = vmatpush3.bf16.xpose.msra.mxu0 %v2325_v62  ;;  %9276 = vrcp.f32 %v1886_v38 }
 0x683   : > { %8579 = vmatprep.subr.bf16.mxu0 %v13300_v27 }
 0x684   : > { %v2318_v48 = vpop.permute.xlu0 %2317  ;;  %v2372_v22 = vpop.permute.xlu1 %2371 }
 0x685   : > { %v2377_v56 = vsel %vm1348_vm2, %v2372_v22, 0 }
 0x688   : > { %v2424_v23 = vpop.permute.xlu0 %2423  ;;  %v2370_v18 = vpop.permute.xlu1 %2369 }
 0x689   : > { %v2429_v55 = vsel %vm1348_vm2, %v2424_v23, 0  ;;  %8570 = vmatmul.mubr.msk.bf16.vlgmr.msra.gmra.mxu0 %vm1348_vm2, %v2318_v48 }
 0x68a   : > { %v9273_v17 = vpop.eup %9272  ;;  %8580 = vmatpush3.bf16.xpose.msra.mxu0 %v2429_v55  ;;  %8581 = vmatprep.mubr.msk.bf16.mxu0 %vm9849_vm1, %v13300_v27 }
 0x68b   : > { %v1917_v14 = vmul.f32 %v9273_v17, %v10836_v30  ;;  %8591 = vmatprep.subr.bf16.mxu0 %v13300_v27 }
 0x68c   : > { %v2422_v49 = vpop.permute.xlu0 %2421  ;;  %v2476_v44 = vpop.permute.xlu1 %2475 }
 0x68d   : > { %v1927_v58 = vpack.c.bf16 %v1917_v14, %v1916_v63  ;;  %v2481_v3 = vsel %vm1348_vm2, %v2476_v44, 0 }
 0x68e   : > { %v9275_v50 = vpop.eup %9274 }
 0x68f   : > { %8552 = vmatmul.mubr.msk.bf16.vlgmr.msra.gmra.mxu1 %vm1348_vm2, %v1927_v58  ;;  %v9277_v2 = vpop.eup %9276  ;;  %v1921_v51 = vmul.f32 %v9275_v50, %v10844_v4 }
 0x690   : > { %8562 = vmatpush3.bf16.msra.mxu1 %v2260_v52  ;;  %v2528_v40 = vpop.permute.xlu0 %2527  ;;  %8563 = vmatprep.mubr.msk.bf16.mxu1 %vm9849_vm1, %v13300_v27  ;;  %v1920_v30 = vmul.f32 %v9277_v2, %v10838_v9  ;;  %v2474_v9 = vpop.permute.xlu1 %2473 }
 0x691   : > { %v2533_v28 = vsel %vm1348_vm2, %v2528_v40, 0  ;;  %8582 = vmatmul.mubr.msk.bf16.vlgmr.msra.gmra.mxu0 %vm1348_vm2, %v2422_v49  ;;  %8573 = vmatprep.subr.bf16.mxu1 %v13300_v27 }
 0x692   : > { %8592 = vmatpush3.bf16.xpose.msra.mxu0 %v2533_v28  ;;  %8593 = vmatprep.mubr.msk.bf16.mxu0 %vm9849_vm1, %v13300_v27  ;;  %v1929_v42 = vpack.c.bf16 %v1921_v51, %v1920_v30 }
 0x693   : > { %8603 = vmatprep.subr.bf16.mxu0 %v13300_v27 }
 0x694   : > { %v2526_v59 = vpop.permute.xlu0 %2525  ;;  %v2580_v20 = vpop.permute.xlu1 %2579 }
 0x695   : > { %v2585_v29 = vsel %vm1348_vm2, %v2580_v20, 0 }
 0x697   : > { %8564 = vmatmul.mubr.msk.bf16.vlgmr.msra.gmra.mxu1 %vm1348_vm2, %v1929_v42 }
 0x698   : > { %8574 = vmatpush3.bf16.xpose.msra.mxu1 %v2377_v56  ;;  %v2632_v10 = vpop.permute.xlu0 %2631  ;;  %8575 = vmatprep.mubr.msk.bf16.mxu1 %vm9849_vm1, %v13300_v27  ;;  %v2578_v8 = vpop.permute.xlu1 %2577 }
 0x699   : > { %v2637_v4 = vsel %vm1348_vm2, %v2632_v10, 0  ;;  %8594 = vmatmul.mubr.msk.bf16.vlgmr.msra.gmra.mxu0 %vm1348_vm2, %v2526_v59  ;;  %8585 = vmatprep.subr.bf16.mxu1 %v13300_v27 }
 0x69a   : > { %8604 = vmatpush3.bf16.xpose.msra.mxu0 %v2637_v4  ;;  %8605 = vmatprep.mubr.msk.bf16.mxu0 %vm9849_vm1, %v13300_v27 }
 0x69b   : > { %8615 = vmatprep.subr.bf16.mxu0 %v13300_v27 }
 0x69c   : > { %v2630_v24 = vpop.permute.xlu0 %2629  ;;  %v2684_v41 = vpop.permute.xlu1 %2683 }
 0x69d   : > { %v2689_v26 = vsel %vm1348_vm2, %v2684_v41, 0 }
 0x69f   : > { %8576 = vmatmul.mubr.msk.bf16.vlgmr.msra.gmra.mxu1 %vm1348_vm2, %v2370_v18 }
 0x6a0   : > { %8586 = vmatpush3.bf16.xpose.msra.mxu1 %v2481_v3  ;;  %8587 = vmatprep.mubr.msk.bf16.mxu1 %vm9849_vm1, %v13300_v27  ;;  %v2682_v32 = vpop.permute.xlu1 %2681 }
 0x6a1   : > { %8606 = vmatmul.mubr.msk.bf16.vlgmr.msra.gmra.mxu0 %vm1348_vm2, %v2630_v24  ;;  %8597 = vmatprep.subr.bf16.mxu1 %v13300_v27 }
 0x6a2   : > { %8617 = vmatprep.mubr.msk.bf16.mxu0 %vm9849_vm1, %v13300_v27 }
 0x6a7   : > { %8588 = vmatmul.mubr.msk.bf16.vlgmr.msra.gmra.mxu1 %vm1348_vm2, %v2474_v9 }
 0x6a8   : > { %8598 = vmatpush3.bf16.xpose.msra.mxu1 %v2585_v29  ;;  %8599 = vmatprep.mubr.msk.bf16.mxu1 %vm9849_vm1, %v13300_v27 }
 0x6a9   : > { %8609 = vmatprep.subr.bf16.mxu1 %v13300_v27 }
 0x6af   : > { %8600 = vmatmul.mubr.msk.bf16.vlgmr.msra.gmra.mxu1 %vm1348_vm2, %v2578_v8 }
 0x6b0   : > { %8610 = vmatpush3.bf16.xpose.msra.mxu1 %v2689_v26  ;;  %8611 = vmatprep.mubr.msk.bf16.mxu1 %vm9849_vm1, %v13300_v27 }
 0x6b1   : > { %8621 = vmatprep.subr.bf16.mxu1 %v13300_v27 }
 0x6b7   : > { %8612 = vmatmul.mubr.msk.bf16.vlgmr.msra.gmra.mxu1 %vm1348_vm2, %v2682_v32 }
 0x6b8   : > { %8623 = vmatprep.mubr.msk.bf16.mxu1 %vm9849_vm1, %v13300_v27 }
 0x6f7   : > { %v10971_v19 = vpop.f32.mrf.mxu0 }
 0x6f9   : > { %v8523_v52 = vpop.f32.mrf.mxu0 }
 0x6fb   : > { %v10973_v43 = vpop.f32.mrf.mxu0 }
 0x6fd   : > { %v8524_v5 = vpop.f32.mrf.mxu0 }
 0x70e   : > { %v10977_v57 = vpop.f32.mrf.mxu1 }
 0x710   : > { %v8529_v62 = vpop.f32.mrf.mxu1 }
 0x712   : > { %v10979_v48 = vpop.f32.mrf.mxu1 }
 0x714   : > { %v8530_v22 = vpop.f32.mrf.mxu1 }
 0x716   : > { %v10983_v23 = vpop.f32.mrf.mxu0 }
 0x718   : > { %v8535_v55 = vpop.f32.mrf.mxu0 }
 0x71a   : > { %v10985_v17 = vpop.f32.mrf.mxu0  ;;  %v10987_v63 = vpop.f32.mrf.mxu1 }
 0x71c   : > { %v8536_v49 = vpop.f32.mrf.mxu0  ;;  %v8541_v58 = vpop.f32.mrf.mxu1 }
 0x71e   : > { %v10991_v50 = vpop.f32.mrf.mxu1  ;;  %v10993_v18 = vpop.f32.mrf.mxu0 }
 0x720   : > { %v8542_v40 = vpop.f32.mrf.mxu1  ;;  %v8547_v28 = vpop.f32.mrf.mxu0 }
 0x722   : > { %v10997_v51 = vpop.f32.mrf.mxu0 }
 0x724   : > { %v8548_v44 = vpop.f32.mrf.mxu0 }
 0x726   : > { %v11001_v59 = vpop.f32.mrf.mxu0 }
 0x728   : > { %v8559_v42 = vpop.f32.mrf.mxu0 }
 0x72a   : > { %v11003_v56 = vpop.f32.mrf.mxu0 }
 0x72c   : > { %v8560_v4 = vpop.f32.mrf.mxu0 }
 0x749   : > { %v11007_v9 = vpop.f32.mrf.mxu0 }
 0x74a   : > { %v2732_v3 = vsel %vm1348_vm2, %v11007_v9, -inf }
 0x74b   : > { %2733 = vmax.xlane.f32.xlu0 %v2732_v3  ;;  %v8571_v20 = vpop.f32.mrf.mxu0 }
 0x74d   : > { %v11011_v24 = vpop.f32.mrf.mxu0 }
 0x74e   : > { %v2735_v8 = vsel %vm1348_vm2, %v11011_v24, -inf }
 0x74f   : > { %v11015_v29 = vpop.f32.mrf.mxu1  ;;  %2736 = vmax.xlane.f32.xlu1 %v2735_v8  ;;  %v8572_v41 = vpop.f32.mrf.mxu0 }
 0x751   : > { %v8553_v26 = vpop.f32.mrf.mxu1  ;;  %v11017_v32 = vpop.f32.mrf.mxu0 }
 0x753   : > { %v11019_v52 = vpop.f32.mrf.mxu1  ;;  %v8583_v5 = vpop.f32.mrf.mxu0 }
 0x755   : > { %v8554_v22 = vpop.f32.mrf.mxu1  ;;  %v11023_v55 = vpop.f32.mrf.mxu0 }
 0x756   : > { %v2747_v49 = vsel %vm1348_vm2, %v11023_v55, -inf }
 0x757   : > { %v11027_v58 = vpop.f32.mrf.mxu1  ;;  %2748 = vmax.xlane.f32.xlu1 %v2747_v49  ;;  %v8584_v40 = vpop.f32.mrf.mxu0 }
 0x759   : > { %v8565_v28 = vpop.f32.mrf.mxu1  ;;  %v11029_v44 = vpop.f32.mrf.mxu0 }
 0x75b   : > { %v11031_v42 = vpop.f32.mrf.mxu1  ;;  %v8595_v4 = vpop.f32.mrf.mxu0 }
 0x75c   : > { %v2744_v4 = vsel %vm1348_vm2, %v11017_v32, -inf }
 0x75d   : > { %v8566_v20 = vpop.f32.mrf.mxu1  ;;  %v11035_v8 = vpop.f32.mrf.mxu0 }
 0x75f   : > { %v11037_v41 = vpop.f32.mrf.mxu1  ;;  %v8596_v26 = vpop.f32.mrf.mxu0 }
 0x760   : > { %v2738_v5 = vsel %vm1348_vm2, %v11037_v41, -inf }
 0x761   : > { %v8577_v22 = vpop.f32.mrf.mxu1  ;;  %2739 = vmax.xlane.f32.xlu0 %v2738_v5  ;;  %v11041_v49 = vpop.f32.mrf.mxu0 }
 0x763   : > { %v11043_v40 = vpop.f32.mrf.mxu1  ;;  %v8607_v28 = vpop.f32.mrf.mxu0 }
 0x764   : > { %v2741_v5 = vsel %vm1348_vm2, %v11043_v40, -inf }
 0x765   : > { %v8578_v3 = vpop.f32.mrf.mxu1  ;;  %2745 = vmax.xlane.f32.xlu0 %v2744_v4  ;;  %v11047_v20 = vpop.f32.mrf.mxu0 }
 0x767   : > { %v11049_v10 = vpop.f32.mrf.mxu1  ;;  %v8608_v26 = vpop.f32.mrf.mxu0 }
 0x768   : > { %2963 = vrot.lane.b32.xlu1 %v10582_v31, %s9854_s18  ;;  %v2750_v3 = vsel %vm1348_vm2, %v11049_v10, -inf }
 0x769   : > { %v8589_v22 = vpop.f32.mrf.mxu1  ;;  %2742 = vmax.xlane.f32.xlu0 %v2741_v5 }
 0x76b   : > { %v11055_v28 = vpop.f32.mrf.mxu1 }
 0x76c   : > { %v2753_v5 = vsel %vm1348_vm2, %v11055_v28, -inf }
 0x76d   : > { %v8590_v4 = vpop.f32.mrf.mxu1  ;;  %2751 = vmax.xlane.f32.xlu0 %v2750_v3  ;;  %v2759_v3 = vsel %vm1348_vm2, %v11035_v8, -inf }
 0x76f   : > { %v11059_v62 = vpop.f32.mrf.mxu1 }
 0x771   : > { %v8601_v30 = vpop.f32.mrf.mxu1 }
 0x772   : > { %v2771_v30 = vsel %vm1348_vm2, %v11047_v20, -inf }
 0x773   : > { %v11061_v26 = vpop.f32.mrf.mxu1 }
 0x775   : > { %v8602_v2 = vpop.f32.mrf.mxu1 }
 0x776   : > { %v2765_v2 = vsel %vm1348_vm2, %v11061_v26, -inf }
 0x777   : > { %v11063_v14 = vpop.f32.mrf.mxu1 }
 0x779   : > { %v8613_v31 = vpop.f32.mrf.mxu1 }
 0x77a   : > { %v2762_v31 = vsel %vm1348_vm2, %v11059_v62, -inf }
 0x77b   : > { %v11065_v45 = vpop.f32.mrf.mxu1 }
 0x77c   : > { %v2777_v4 = vsel %vm1348_vm2, %v11065_v45, -inf }
 0x77d   : > { %v8614_v22 = vpop.f32.mrf.mxu1 }
 0x77e   : > { %v2768_v22 = vsel %vm1348_vm2, %v11041_v49, -inf }
 0x783   : > { %2916 = vrot.lane.b32.xlu0 %v10586_v39, %s9854_s18  ;;  %v2756_v39 = vsel %vm1348_vm2, %v11029_v44, -inf }
 0x78c   : > { %2754 = vmax.xlane.f32.xlu1 %v2753_v5  ;;  %v2774_v5 = vsel %vm1348_vm2, %v11063_v14, -inf }
 0x790   : > { %2760 = vmax.xlane.f32.xlu1 %v2759_v3 }
 0x794   : > { %2766 = vmax.xlane.f32.xlu1 %v2765_v2 }
 0x798   : > { %2772 = vmax.xlane.f32.xlu1 %v2771_v30 }
 0x79c   : > { %2778 = vmax.xlane.f32.xlu1 %v2777_v4 }
 0x7a2   : > { %2757 = vmax.xlane.f32.xlu0 %v2756_v39 }
 0x7a6   : > { %2763 = vmax.xlane.f32.xlu0 %v2762_v31 }
 0x7aa   : > { %2769 = vmax.xlane.f32.xlu0 %v2768_v22  ;;  %v13353_v22 = vmov 0.0  }
 0x7ae   : > { %2775 = vmax.xlane.f32.xlu0 %v2774_v5 }
 0x7d4   : > { %v2734_v3 = vpop.xlane.xlu0 %2733 }
 0x7d5   : > { %v2780_v2 = vsub.f32 %v11007_v9, %v2734_v3 }
 0x7d7   : > { %v2796_v30 = vmul.f32 1.442695, %v2780_v2 }
 0x7d8   : > { %v2737_v4 = vpop.xlane.xlu1 %2736 }
 0x7d9   : > { %9278 = vpow2.f32 %v2796_v30  ;;  %v2781_v39 = vsub.f32 %v11011_v24, %v2737_v4 }
 0x7db   : > { %v2798_v38 = vmul.f32 1.442695, %v2781_v39 }
 0x7dd   : > { %9280 = vpow2.f32 %v2798_v38 }
 0x7e0   : > { %v2749_v27 = vpop.xlane.xlu1 %2748 }
 0x7e4   : > { %v2964_v31 = vpop.permute.xlu1 %2963 }
 0x7e5   : > { %8622 = vmatpush3.bf16.msra.mxu1 %v2964_v31 }
 0x7e6   : > { %v11089_v12 = vpop.eup %9278  ;;  %8633 = vmatprep.subr.bf16.mxu1 %v13353_v22 }
 0x7e7   : > { %v2828_v5 = vsel %vm1348_vm2, %v11089_v12, 0.0 }
 0x7e8   : > { %2829 = vadd.xlane.f32.xlu0 %v2828_v5 }
 0x7ea   : > { %v11094_v21 = vpop.eup %9280  ;;  %v2740_v9 = vpop.xlane.xlu0 %2739 }
 0x7eb   : > { %v2782_v3 = vsub.f32 %v11037_v41, %v2740_v9  ;;  %v2831_v24 = vsel %vm1348_vm2, %v11094_v21, 0.0  ;;  %v2785_v9 = vsub.f32 %v11023_v55, %v2749_v27 }
 0x7ec   : > { %2832 = vadd.xlane.f32.xlu1 %v2831_v24 }
 0x7ed   : > { %v2800_v38 = vmul.f32 1.442695, %v2782_v3  ;;  %v2806_v24 = vmul.f32 1.442695, %v2785_v9 }
 0x7ee   : > { %v2746_v2 = vpop.xlane.xlu0 %2745 }
 0x7ef   : > { %9282 = vpow2.f32 %v2800_v38  ;;  %v2784_v38 = vsub.f32 %v11017_v32, %v2746_v2 }
 0x7f2   : > { %v2743_v30 = vpop.xlane.xlu0 %2742 }
 0x7f3   : > { %v2783_v5 = vsub.f32 %v11043_v40, %v2743_v30 }
 0x7f5   : > { %v2802_v3 = vmul.f32 1.442695, %v2783_v5 }
 0x7f6   : > { %v2752_v4 = vpop.xlane.xlu0 %2751 }
 0x7f7   : > { %9284 = vpow2.f32 %v2802_v3  ;;  %v2786_v35 = vsub.f32 %v11049_v10, %v2752_v4 }
 0x7f8   : > { %9286 = vpow2.f32 %v2806_v24 }
 0x7f9   : > { %v2808_v55 = vmul.f32 1.442695, %v2786_v35 }
 0x7fa   : > { %v2917_v39 = vpop.permute.xlu0 %2916 }
 0x7fb   : > { %8616 = vmatpush3.bf16.msra.mxu0 %v2917_v39 }
 0x7fc   : > { %v11099_v31 = vpop.eup %9282  ;;  %8627 = vmatprep.subr.bf16.mxu0 %v13353_v22 }
 0x7fd   : > { %3057 = vrot.lane.b32.xlu1 %v10601_v53, %s9854_s18  ;;  %v2834_v41 = vsel %vm1348_vm2, %v11099_v31, 0.0  ;;  %v2804_v53 = vmul.f32 1.442695, %v2784_v38 }
 0x7fe   : > { %2835 = vadd.xlane.f32.xlu0 %v2834_v41 }
 0x7ff   : > { %9288 = vpow2.f32 %v2804_v53 }
 0x800   : > { %9290 = vpow2.f32 %v2808_v55 }
 0x804   : > { %v11111_v47 = vpop.eup %9284 }
 0x805   : > { %v2837_v40 = vsel %vm1348_vm2, %v11111_v47, 0.0  ;;  %v11116_v27 = vpop.eup %9286 }
 0x80c   : > { %v11123_v3 = vpop.eup %9288 }
 0x80d   : > { %v11130_v55 = vpop.eup %9290 }
 0x814   : > { %3010 = vrot.lane.b32.xlu0 %v10597_v34, %s9854_s18  ;;  %v2843_v34 = vsel %vm1348_vm2, %v11116_v27, 0.0 }
 0x815   : > { %v2755_v39 = vpop.xlane.xlu1 %2754 }
 0x816   : > { %v2787_v10 = vsub.f32 %v11055_v28, %v2755_v39 }
 0x818   : > { %v2810_v24 = vmul.f32 1.442695, %v2787_v10 }
 0x819   : > { %v2761_v41 = vpop.xlane.xlu1 %2760 }
 0x81a   : > { %v2789_v30 = vsub.f32 %v11035_v8, %v2761_v41  ;;  %v2840_v41 = vsel %vm1348_vm2, %v11123_v3, 0.0 }
 0x81c   : > { %v2814_v2 = vmul.f32 1.442695, %v2789_v30 }
 0x81d   : > { %v2767_v32 = vpop.xlane.xlu1 %2766 }
 0x81e   : > { %9292 = vpow2.f32 %v2814_v2  ;;  %v2791_v28 = vsub.f32 %v11061_v26, %v2767_v32 }
 0x820   : > { %v2818_v30 = vmul.f32 1.442695, %v2791_v28 }
 0x821   : > { %2838 = vadd.xlane.f32.xlu1 %v2837_v40  ;;  %v2773_v4 = vpop.xlane.xlu1 %2772 }
 0x822   : > { %v2793_v35 = vsub.f32 %v11047_v20, %v2773_v4 }
 0x824   : > { %v2822_v39 = vmul.f32 1.442695, %v2793_v35 }
 0x825   : > { %2844 = vadd.xlane.f32.xlu1 %v2843_v34 }
 0x82b   : > { %v2758_v5 = vpop.xlane.xlu0 %2757  ;;  %v11135_v2 = vpop.eup %9292 }
 0x82c   : > { %v2788_v9 = vsub.f32 %v11029_v44, %v2758_v5  ;;  %v2855_v4 = vsel %vm1348_vm2, %v11135_v2, 0.0 }
 0x82e   : > { %v2812_v8 = vmul.f32 1.442695, %v2788_v9 }
 0x82f   : > { %v2764_v38 = vpop.xlane.xlu0 %2763 }
 0x830   : > { %9294 = vpow2.f32 %v2812_v8  ;;  %v2790_v53 = vsub.f32 %v11059_v62, %v2764_v38  ;;  %v2846_v62 = vsel %vm1348_vm2, %v11130_v55, 0.0 }
 0x831   : > { %9296 = vpow2.f32 %v2810_v24 }
 0x832   : > { %v2816_v40 = vmul.f32 1.442695, %v2790_v53 }
 0x833   : > { %2841 = vadd.xlane.f32.xlu0 %v2840_v41  ;;  %v2770_v44 = vpop.xlane.xlu0 %2769 }
 0x834   : > { %9298 = vpow2.f32 %v2816_v40  ;;  %v2792_v20 = vsub.f32 %v11041_v49, %v2770_v44 }
 0x835   : > { %9300 = vpow2.f32 %v2822_v39 }
 0x836   : > { %v2820_v34 = vmul.f32 1.442695, %v2792_v20  ;;  %v2779_v20 = vpop.xlane.xlu1 %2778 }
 0x837   : > { %2847 = vadd.xlane.f32.xlu0 %v2846_v62  ;;  %v2776_v10 = vpop.xlane.xlu0 %2775 }
 0x838   : > { %9302 = vpow2.f32 %v2820_v34  ;;  %v2794_v26 = vsub.f32 %v11063_v14, %v2776_v10 }
 0x839   : > { %9304 = vpow2.f32 %v2818_v30  ;;  %v2795_v30 = vsub.f32 %v11065_v45, %v2779_v20 }
 0x83a   : > { %v2824_v32 = vmul.f32 1.442695, %v2794_v26 }
 0x83b   : > { %2856 = vadd.xlane.f32.xlu0 %v2855_v4  ;;  %v2826_v34 = vmul.f32 1.442695, %v2795_v30 }
 0x83c   : > { %9306 = vpow2.f32 %v2824_v32 }
 0x83d   : > { %v11140_v49 = vpop.eup %9294  ;;  %9308 = vpow2.f32 %v2826_v34 }
 0x83e   : > { %v2852_v5 = vsel %vm1348_vm2, %v11140_v49, 0.0  ;;  %v11144_v9 = vpop.eup %9296 }
 0x83f   : > { %2853 = vadd.xlane.f32.xlu1 %v2852_v5  ;;  %v2849_v14 = vsel %vm1348_vm2, %v11144_v9, 0.0 }
 0x841   : > { %v11146_v24 = vpop.eup %9298 }
 0x842   : > { %v2858_v35 = vsel %vm1348_vm2, %v11146_v24, 0.0  ;;  %v11152_v8 = vpop.eup %9300 }
 0x843   : > { %2850 = vadd.xlane.f32.xlu1 %v2849_v14  ;;  %2859 = vadd.xlane.f32.xlu0 %v2858_v35  ;;  %v2867_v53 = vsel %vm1348_vm2, %v11152_v8, 0.0 }
 0x845   : > { %v11154_v38 = vpop.eup %9302 }
 0x846   : > { %v2864_v41 = vsel %vm1348_vm2, %v11154_v38, 0.0  ;;  %v11160_v28 = vpop.eup %9304 }
 0x847   : > { %2868 = vadd.xlane.f32.xlu0 %v2867_v53  ;;  %2865 = vadd.xlane.f32.xlu1 %v2864_v41  ;;  %v2861_v40 = vsel %vm1348_vm2, %v11160_v28, 0.0 }
 0x849   : > { %v11162_v39 = vpop.eup %9306 }
 0x84a   : > { %v2870_v44 = vsel %vm1348_vm2, %v11162_v39, 0.0  ;;  %v11175_v26 = vpop.eup %9308 }
 0x84b   : > { %2862 = vadd.xlane.f32.xlu1 %v2861_v40  ;;  %2871 = vadd.xlane.f32.xlu0 %v2870_v44 }
 0x85c   : > { %3151 = vrot.lane.b32.xlu1 %v10609_v37, %s9854_s18  ;;  %v2873_v37 = vsel %vm1348_vm2, %v11175_v26, 0.0 }
 0x860   : > { %3198 = vrot.lane.b32.xlu1 %v10619_v7, %s9854_s18 }
 0x861   : > { %3104 = vrot.lane.b32.xlu0 %v10607_v13, %s9854_s18 }
 0x871   : > { %v2830_v62 = vpop.xlane.xlu0 %2829 }
 0x872   : > { %9310 = vrcp.f32 %v2830_v62 }
 0x875   : > { %v2833_v10 = vpop.xlane.xlu1 %2832 }
 0x876   : > { %9312 = vrcp.f32 %v2833_v10 }
 0x879   : > { %v3058_v35 = vpop.permute.xlu1 %3057 }
 0x87f   : > { %v9311_v32 = vpop.eup %9310 }
 0x880   : > { %v2892_v7 = vmul.f32 %v9311_v32, %v11089_v12 }
 0x883   : > { %v9313_v4 = vpop.eup %9312 }
 0x884   : > { %2874 = vadd.xlane.f32.xlu1 %v2873_v37  ;;  %v2893_v13 = vmul.f32 %v9313_v4, %v11094_v21 }
 0x886   : > { %v2908_v5 = vpack.c.bf16 %v2893_v13, %v2892_v7 }
 0x887   : > { %v2836_v45 = vpop.xlane.xlu0 %2835 }
 0x888   : > { %8618 = vmatmul.mubr.msk.bf16.vlgmr.msra.gmra.mxu0 %vm1348_vm2, %v2908_v5  ;;  %9314 = vrcp.f32 %v2836_v45 }
 0x889   : > { %8629 = vmatprep.mubr.msk.bf16.mxu0 %vm9849_vm1, %v13353_v22 }
 0x88b   : > { %v3011_v14 = vpop.permute.xlu0 %3010 }
 0x88c   : > { %8628 = vmatpush3.bf16.msra.mxu0 %v3011_v14 }
 0x88d   : > { %8639 = vmatprep.subr.bf16.mxu0 %v13353_v22 }
 0x895   : > { %3245 = vrot.lane.b32.xlu1 %v10615_v6, %s9854_s18  ;;  %v9315_v12 = vpop.eup %9314 }
 0x896   : > { %v2894_v40 = vmul.f32 %v9315_v12, %v11099_v31 }
 0x8aa   : > { %v2839_v53 = vpop.xlane.xlu1 %2838 }
 0x8ab   : > { %9316 = vrcp.f32 %v2839_v53 }
 0x8ae   : > { %v2845_v41 = vpop.xlane.xlu1 %2844 }
 0x8af   : > { %9318 = vrcp.f32 %v2845_v41 }
 0x8b8   : > { %v9317_v21 = vpop.eup %9316 }
 0x8b9   : > { %v2895_v44 = vmul.f32 %v9317_v21, %v11111_v47 }
 0x8bb   : > { %v2909_v20 = vpack.c.bf16 %v2895_v44, %v2894_v40 }
 0x8bc   : > { %v2842_v30 = vpop.xlane.xlu0 %2841  ;;  %v9319_v62 = vpop.eup %9318 }
 0x8bd   : > { %9320 = vrcp.f32 %v2842_v30  ;;  %8624 = vmatmul.mubr.msk.bf16.vlgmr.msra.gmra.mxu1 %vm1348_vm2, %v2909_v20  ;;  %v2897_v32 = vmul.f32 %v9319_v62, %v11116_v27 }
 0x8be   : > { %8634 = vmatpush3.bf16.msra.mxu1 %v3058_v35  ;;  %8635 = vmatprep.mubr.msk.bf16.mxu1 %vm9849_vm1, %v13353_v22 }
 0x8bf   : > { %8645 = vmatprep.subr.bf16.mxu1 %v13353_v22 }
 0x8c0   : > { %v2848_v6 = vpop.xlane.xlu0 %2847 }
 0x8c4   : > { %v2857_v34 = vpop.xlane.xlu0 %2856 }
 0x8c5   : > { %9322 = vrcp.f32 %v2857_v34 }
 0x8c8   : > { %v2854_v10 = vpop.xlane.xlu1 %2853 }
 0x8c9   : > { %9324 = vrcp.f32 %v2854_v10 }
 0x8ca   : > { %v9321_v31 = vpop.eup %9320  ;;  %9326 = vrcp.f32 %v2848_v6 }
 0x8cb   : > { %v2896_v47 = vmul.f32 %v9321_v31, %v11123_v3 }
 0x8cc   : > { %v2851_v4 = vpop.xlane.xlu1 %2850  ;;  %v2860_v37 = vpop.xlane.xlu0 %2859 }
 0x8cd   : > { %9328 = vrcp.f32 %v2851_v4  ;;  %v2910_v7 = vpack.c.bf16 %v2897_v32, %v2896_v47 }
 0x8cf   : > { %8630 = vmatmul.mubr.msk.bf16.vlgmr.msra.gmra.mxu0 %vm1348_vm2, %v2910_v7 }
 0x8d0   : > { %v2866_v13 = vpop.xlane.xlu1 %2865  ;;  %v2869_v5 = vpop.xlane.xlu0 %2868  ;;  %8641 = vmatprep.mubr.msk.bf16.mxu0 %vm9849_vm1, %v13353_v22 }
 0x8d1   : > { %9330 = vrcp.f32 %v2866_v13 }
 0x8d2   : > { %9332 = vrcp.f32 %v2869_v5  ;;  %v9323_v45 = vpop.eup %9322 }
 0x8d3   : > { %9334 = vrcp.f32 %v2860_v37  ;;  %v2901_v53 = vmul.f32 %v9323_v45, %v11135_v2 }
 0x8d4   : > { %v2863_v14 = vpop.xlane.xlu1 %2862  ;;  %v2872_v35 = vpop.xlane.xlu0 %2871 }
 0x8d5   : > { %9336 = vrcp.f32 %v2863_v14  ;;  %v13354_v14 = vpack.c.bf16 %v10973_v43, %v10971_v19  ;;  %v13358_v19 = vpack.c.bf16 %v10997_v51, %v10993_v18  ;;  %v13359_v43 = vpack.c.bf16 %v11019_v52, %v11015_v29 }
 0x8d6   : > { %v9325_v3 = vpop.eup %9324  ;;  %9338 = vrcp.f32 %v2872_v35  ;;  %v13355_v35 = vpack.c.bf16 %v10979_v48, %v10977_v57  ;;  %v13360_v57 = vpack.c.bf16 %v11003_v56, %v11001_v59  ;;  %v13361_v48 = vpack.c.bf16 %v11031_v42, %v11027_v58 }
 0x8d7   : > { %v2900_v27 = vmul.f32 %v9325_v3, %v11140_v49  ;;  %v9327_v12 = vpop.eup %9326  ;;  %v13356_v3 = vpack.c.bf16 %v10985_v17, %v10983_v23 }
 0x8d8   : > { %v3152_v21 = vpop.permute.xlu1 %3151  ;;  %v3105_v41 = vpop.permute.xlu0 %3104  ;;  %v2898_v20 = vmul.f32 %v9327_v12, %v11130_v55 }
 0x8d9   : > { %8640 = vmatpush3.bf16.msra.mxu0 %v3105_v41  ;;  %v2912_v40 = vpack.c.bf16 %v2901_v53, %v2900_v27 }
 0x8da   : > { %v9329_v44 = vpop.eup %9328  ;;  %8651 = vmatprep.subr.bf16.mxu0 %v13353_v22 }
 0x8db   : > { %v2899_v30 = vmul.f32 %v9329_v44, %v11144_v9 }
 0x8dc   : > { %v3199_v6 = vpop.permute.xlu1 %3198  ;;  %8642 = vmatmul.mubr.msk.bf16.vlgmr.msra.gmra.mxu0 %vm1348_vm2, %v2912_v40 }
 0x8dd   : > { %8652 = vmatpush3.bf16.msra.mxu0 %v3199_v6  ;;  %v2911_v34 = vpack.c.bf16 %v2899_v30, %v2898_v20  ;;  %8653 = vmatprep.mubr.msk.bf16.mxu0 %vm9849_vm1, %v13353_v22 }
 0x8de   : > { %v9331_v2 = vpop.eup %9330 }
 0x8df   : > { %v9333_v49 = vpop.eup %9332  ;;  %8636 = vmatmul.mubr.msk.bf16.vlgmr.msra.gmra.mxu1 %vm1348_vm2, %v2911_v34  ;;  %v2904_v62 = vmul.f32 %v9331_v2, %v11154_v38 }
 0x8e0   : > { %v9335_v10 = vpop.eup %9334  ;;  %8646 = vmatpush3.bf16.msra.mxu1 %v3152_v21  ;;  %v2905_v55 = vmul.f32 %v9333_v49, %v11152_v8  ;;  %8647 = vmatprep.mubr.msk.bf16.mxu1 %vm9849_vm1, %v13353_v22  ;;  %v9117_v8 = vld [vmem:[%s13276_s5 + $0x8] sm:$0xff]  }
 0x8e1   : > { %8657 = vmatprep.subr.bf16.mxu1 %v13353_v22  ;;  %v2902_v47 = vmul.f32 %v9335_v10, %v11146_v24  ;;  %8663 = vmatprep.subr.bf16.mxu0 %v9117_v8  ;;  %v9116_v24 = vld [vmem:[%s13276_s5] sm:$0xff]  }
 0x8e2   : > { %v9337_v9 = vpop.eup %9336  ;;  %v2914_v31 = vpack.c.bf16 %v2905_v55, %v2904_v62 }
 0x8e3   : > { %v2903_v32 = vmul.f32 %v9337_v9, %v11160_v28  ;;  %v9339_v37 = vpop.eup %9338 }
 0x8e4   : > { %8654 = vmatmul.mubr.msk.bf16.vlgmr.msra.gmra.mxu0 %vm1348_vm2, %v2914_v31  ;;  %v2906_v13 = vmul.f32 %v9339_v37, %v11162_v39  ;;  %v13357_v39 = vpack.c.bf16 %v10991_v50, %v10987_v63 }
 0x8e5   : > { %v2913_v4 = vpack.c.bf16 %v2903_v32, %v2902_v47  ;;  %8664 = vmatpush3.bf16.msra.mxu0 %v9117_v8 }
 0x8e7   : > { %8648 = vmatmul.mubr.msk.bf16.vlgmr.msra.gmra.mxu1 %vm1348_vm2, %v2913_v4 }
 0x8e8   : > { %8659 = vmatprep.mubr.msk.bf16.mxu1 %vm9849_vm1, %v13353_v22 }
 0x90d   : > { %v2875_v38 = vpop.xlane.xlu1 %2874 }
 0x90e   : > { %9340 = vrcp.f32 %v2875_v38 }
 0x911   : > { %v3246_v28 = vpop.permute.xlu1 %3245 }
 0x912   : > { %8658 = vmatpush3.bf16.msra.mxu1 %v3246_v28 }
 0x913   : > { %8681 = vmatprep.subr.bf16.mxu1 %v9116_v24 }
 0x91b   : > { %v9341_v7 = vpop.eup %9340 }
 0x91c   : > { %v2907_v5 = vmul.f32 %v9341_v7, %v11175_v26 }
 0x91e   : > { %v2915_v45 = vpack.c.bf16 %v2907_v5, %v2906_v13 }
 0x920   : > { %8660 = vmatmul.mubr.msk.bf16.vlgmr.msra.gmra.mxu1 %vm1348_vm2, %v2915_v45 }
 0x921   : > { %8683 = vmatprep.mubr.msk.bf16.mxu1 %vm1348_vm2, %v13354_v14  ;;  %8682 = vmatpush3.bf16.msra.mxu1 %v9116_v24  ;;  %v11267_v14 = vld [vmem:[#allocation7] ss:$0 sm:$0xff] }
 0x928   : > { %8684 = vmatmul.mubr.msk.bf16.vlgmr.msra.gmra.mxu1 %vm1348_vm2, %v13355_v35 }
 0x929   : > { %8687 = vmatprep.mubr.msk.bf16.mxu1 %vm1348_vm2, %v13356_v3 }
 0x930   : > { %8688 = vmatmul.mubr.msk.bf16.gmra.mxu1 %vm1348_vm2, %v13357_v39 }
 0x931   : > { %8691 = vmatprep.mubr.msk.bf16.mxu1 %vm1348_vm2, %v13358_v19 }
 0x938   : > { %8692 = vmatmul.mubr.msk.bf16.gmra.mxu1 %vm1348_vm2, %v13359_v43 }
 0x939   : > { %8695 = vmatprep.mubr.msk.bf16.mxu1 %vm1348_vm2, %v13360_v57  ;;  %v11270_v57 = vstv %s648_s20  ;;  %s13389_s20 = sld [smem:[#allocation34_spill]] }
 0x940   : > { %8696 = vmatmul.mubr.msk.bf16.gmra.mxu1 %vm1348_vm2, %v13361_v48 }
 0x948   : > { %v2956_v23 = vpop.f32.mrf.mxu0 }
 0x94a   : > { %v8619_v17 = vpop.f32.mrf.mxu0 }
 0x94c   : > { %v2959_v63 = vpop.f32.mrf.mxu0 }
 0x94d   : > { %v3292_v50 = vpack.c.bf16 %v2959_v63, %v2956_v23 }
 0x94e   : > { %v8620_v18 = vpop.f32.mrf.mxu0 }
 0x94f   : > { %8665 = vmatprep.mubr.msk.bf16.mxu0 %vm1348_vm2, %v3292_v50 }
 0x97d   : > { %v3003_v51 = vpop.f32.mrf.mxu1 }
 0x97f   : > { %v8625_v29 = vpop.f32.mrf.mxu1 }
 0x981   : > { %v3006_v52 = vpop.f32.mrf.mxu1 }
 0x982   : > { %v3293_v26 = vpack.c.bf16 %v3006_v52, %v3003_v51 }
 0x983   : > { %v8626_v27 = vpop.f32.mrf.mxu1 }
 0x984   : > { %8666 = vmatmul.mubr.msk.bf16.vlgmr.msra.gmra.mxu0 %vm1348_vm2, %v3293_v26 }
 0x98f   : > { %v3050_v59 = vpop.f32.mrf.mxu0 }
 0x991   : > { %v8631_v56 = vpop.f32.mrf.mxu0 }
 0x993   : > { %v3053_v53 = vpop.f32.mrf.mxu0 }
 0x994   : > { %v3294_v58 = vpack.c.bf16 %v3053_v53, %v3050_v59 }
 0x995   : > { %v8632_v42 = vpop.f32.mrf.mxu0 }
 0x996   : > { %8669 = vmatprep.mubr.msk.bf16.mxu0 %vm1348_vm2, %v3294_v58 }
 0x99c   : > { %v3144_v12 = vpop.f32.mrf.mxu0 }
 0x99e   : > { %v8643_v21 = vpop.f32.mrf.mxu0 }
 0x99f   : > { %v3097_v41 = vpop.f32.mrf.mxu1 }
 0x9a0   : > { %v3147_v40 = vpop.f32.mrf.mxu0 }
 0x9a1   : > { %v8637_v44 = vpop.f32.mrf.mxu1  ;;  %v3296_v2 = vpack.c.bf16 %v3147_v40, %v3144_v12 }
 0x9a2   : > { %v8644_v20 = vpop.f32.mrf.mxu0 }
 0x9a3   : > { %v3100_v30 = vpop.f32.mrf.mxu1 }
 0x9a4   : > { %v3295_v6 = vpack.c.bf16 %v3100_v30, %v3097_v41  ;;  %v3238_v34 = vpop.f32.mrf.mxu0 }
 0x9a5   : > { %v8638_v49 = vpop.f32.mrf.mxu1 }
 0x9a6   : > { %v8655_v62 = vpop.f32.mrf.mxu0  ;;  %8670 = vmatmul.mubr.msk.bf16.gmra.mxu0 %vm1348_vm2, %v3295_v6 }
 0x9a7   : > { %v3191_v10 = vpop.f32.mrf.mxu1  ;;  %8673 = vmatprep.mubr.msk.bf16.mxu0 %vm1348_vm2, %v3296_v2 }
 0x9a8   : > { %v3241_v55 = vpop.f32.mrf.mxu0 }
 0x9a9   : > { %v8649_v9 = vpop.f32.mrf.mxu1  ;;  %v3298_v4 = vpack.c.bf16 %v3241_v55, %v3238_v34 }
 0x9aa   : > { %v8656_v31 = vpop.f32.mrf.mxu0 }
 0x9ab   : > { %v3194_v47 = vpop.f32.mrf.mxu1 }
 0x9ac   : > { %v3297_v32 = vpack.c.bf16 %v3194_v47, %v3191_v10 }
 0x9ad   : > { %v8650_v8 = vpop.f32.mrf.mxu1 }
 0x9ae   : > { %8674 = vmatmul.mubr.msk.bf16.gmra.mxu0 %vm1348_vm2, %v3297_v32 }
 0x9af   : > { %8677 = vmatprep.mubr.msk.bf16.mxu0 %vm1348_vm2, %v3298_v4 }
 0x9e0   : > { %v3285_v38 = vpop.f32.mrf.mxu1 }
 0x9e2   : > { %v8661_v24 = vpop.f32.mrf.mxu1 }
 0x9e4   : > { %v3288_v28 = vpop.f32.mrf.mxu1 }
 0x9e5   : > { %v3299_v37 = vpack.c.bf16 %v3288_v28, %v3285_v38 }
 0x9e6   : > { %v8662_v7 = vpop.f32.mrf.mxu1 }
 0x9e7   : > { %8678 = vmatmul.mubr.msk.bf16.gmra.mxu0 %vm1348_vm2, %v3299_v37 }
 0x9e8   : > { %v8685_v13 = vpop.f32.mrf.mxu1 }
 0x9ea   : > { %v3493_v5 = vpop.f32.mrf.mxu1 }
 0x9ec   : > { %v8686_v3 = vpop.f32.mrf.mxu1 }
 0x9ee   : > { %v3496_v63 = vpop.f32.mrf.mxu1 }
 0xa44   : > { %v8667_v45 = vpop.f32.mrf.mxu0 }
 0xa45   : > { %v3502_v35 = vadd.f32 %v8685_v13, %v8667_v45 }
 0xa46   : > { %v3366_v39 = vpop.f32.mrf.mxu0 }
 0xa47   : > { %v3565_v19 = vadd.f32 %v11267_v14, %v3502_v35  ;;  %v3494_v43 = vadd.f32 %v3493_v5, %v3366_v39 }
 0xa48   : > { %v8668_v48 = vpop.f32.mrf.mxu0 }
 0xa49   : > { %v3563_v23 = vadd.f32 %v11267_v14, %v3494_v43  ;;  %v3505_v17 = vadd.f32 %v8686_v3, %v8668_v48  ;;  %v3582_v18 = vmul.f32 %v11270_v57, %v3565_v19 }
 0xa4a   : > { %v3369_v50 = vpop.f32.mrf.mxu0 }
 0xa4b   : > { %v3580_v51 = vmul.f32 %v11270_v57, %v3563_v23  ;;  %v3566_v29 = vadd.f32 %v11267_v14, %v3505_v17  ;;  %v3497_v52 = vadd.f32 %v3496_v63, %v3369_v50  ;;  %v11285_v58 = vadd.f32 %v3582_v18, %v10312_v61  ;;  %v8689_v61 = vpop.f32.mrf.mxu1 }
 0xa4d   : > { %v3564_v26 = vadd.f32 %v11267_v14, %v3497_v52  ;;  %v11278_v27 = vadd.f32 %v3580_v51, %v10299_v46  ;;  %v3583_v59 = vmul.f32 %v11270_v57, %v3566_v29  ;;  %v3620_v46 = vsel %vm668_vm0, %v11285_v58, 0.0  ;;  %v3509_v40 = vpop.f32.mrf.mxu1 }
 0xa4f   : > { %v3581_v56 = vmul.f32 %v11270_v57, %v3564_v26  ;;  %v3614_v53 = vsel %vm668_vm0, %v11278_v27, 0.0  ;;  %v11295_v21 = vadd.f32 %v3583_v59, %v10322_v54  ;;  %v8690_v44 = vpop.f32.mrf.mxu1 }
 0xa50   : > { %3615 = vadd.xlane.f32.xlu0 %v3614_v53 }
 0xa51   : > { %v11288_v42 = vadd.f32 %v3581_v56, %v10309_v60  ;;  %v3623_v41 = vsel %vm668_vm0, %v11295_v21, 0.0  ;;  %v3512_v60 = vpop.f32.mrf.mxu1 }
 0xa53   : > { %v3617_v12 = vsel %vm668_vm0, %v11288_v42, 0.0  ;;  %v8693_v6 = vpop.f32.mrf.mxu1 }
 0xa54   : > { %3618 = vadd.xlane.f32.xlu1 %v3617_v12  ;;  %3621 = vadd.xlane.f32.xlu0 %v3620_v46 }
 0xa55   : > { %v3525_v55 = vpop.f32.mrf.mxu1 }
 0xa57   : > { %v8694_v37 = vpop.f32.mrf.mxu1 }
 0xa58   : > { %3624 = vadd.xlane.f32.xlu0 %v3623_v41 }
 0xa59   : > { %v3528_v23 = vpop.f32.mrf.mxu1 }
 0xa66   : > { %v8671_v20 = vpop.f32.mrf.mxu0 }
 0xa67   : > { %v3518_v30 = vadd.f32 %v8689_v61, %v8671_v20 }
 0xa68   : > { %v3382_v34 = vpop.f32.mrf.mxu0 }
 0xa69   : > { %v3569_v2 = vadd.f32 %v11267_v14, %v3518_v30  ;;  %v3510_v49 = vadd.f32 %v3509_v40, %v3382_v34  ;;  %v8697_v40 = vpop.f32.mrf.mxu1 }
 0xa6a   : > { %v8672_v62 = vpop.f32.mrf.mxu0 }
 0xa6b   : > { %v3567_v54 = vadd.f32 %v11267_v14, %v3510_v49  ;;  %v3521_v10 = vadd.f32 %v8690_v44, %v8672_v62  ;;  %v3586_v9 = vmul.f32 %v11270_v57, %v3569_v2  ;;  %v3541_v44 = vpop.f32.mrf.mxu1 }
 0xa6c   : > { %v3385_v31 = vpop.f32.mrf.mxu0 }
 0xa6d   : > { %v3584_v47 = vmul.f32 %v11270_v57, %v3567_v54  ;;  %v3570_v32 = vadd.f32 %v11267_v14, %v3521_v10  ;;  %v3513_v4 = vadd.f32 %v3512_v60, %v3385_v31  ;;  %v11310_v5 = vadd.f32 %v3586_v9, %v10340_v33  ;;  %v8698_v20 = vpop.f32.mrf.mxu1 }
 0xa6e   : > { %v8675_v8 = vpop.f32.mrf.mxu0 }
 0xa6f   : > { %v3568_v38 = vadd.f32 %v11267_v14, %v3513_v4  ;;  %v3534_v24 = vadd.f32 %v8693_v6, %v8675_v8  ;;  %v11306_v28 = vadd.f32 %v3584_v47, %v10326_v16  ;;  %v3587_v7 = vmul.f32 %v11270_v57, %v3570_v32  ;;  %v3544_v62 = vpop.f32.mrf.mxu1  ;;  %v13362_v32 = vld [vmem:[#allocation21_spill] sm:$0xff] }
 0xa70   : > { %v3398_v13 = vpop.f32.mrf.mxu0  ;;  %v3632_v63 = vsel %vm668_vm0, %v11310_v5, 0.0 }
 0xa71   : > { %v3585_v45 = vmul.f32 %v11270_v57, %v3568_v38  ;;  %v3573_v35 = vadd.f32 %v11267_v14, %v3534_v24  ;;  %v3526_v3 = vadd.f32 %v3525_v55, %v3398_v13  ;;  %v3626_v39 = vsel %vm668_vm0, %v11306_v28, 0.0  ;;  %v13364_v13 = vld [vmem:[#allocation22_spill] sm:$0xff] }
 0xa72   : > { %v8676_v19 = vpop.f32.mrf.mxu0  ;;  %3627 = vadd.xlane.f32.xlu0 %v3626_v39  ;;  %v11324_v50 = vadd.f32 %v3587_v7, %v10350_v1 }
 0xa73   : > { %v3571_v16 = vadd.f32 %v11267_v14, %v3526_v3  ;;  %v3537_v43 = vadd.f32 %v8694_v37, %v8676_v19  ;;  %v11318_v48 = vadd.f32 %v3585_v45, %v10336_v0  ;;  %v3590_v33 = vmul.f32 %v11270_v57, %v3573_v35  ;;  %v13363_v37 = vld [vmem:[#allocation23_spill] sm:$0xff]  ;;  %v13365_v3 = vld [vmem:[#allocation24_spill] sm:$0xff] }
 0xa74   : > { %v3401_v17 = vpop.f32.mrf.mxu0  ;;  %v3635_v59 = vsel %vm668_vm0, %v11324_v50, 0.0 }
 0xa75   : > { %v3588_v18 = vmul.f32 %v11270_v57, %v3571_v16  ;;  %v3574_v51 = vadd.f32 %v11267_v14, %v3537_v43  ;;  %v3529_v29 = vadd.f32 %v3528_v23, %v3401_v17  ;;  %v3629_v52 = vsel %vm668_vm0, %v11318_v48, 0.0 }
 0xa76   : > { %3630 = vadd.xlane.f32.xlu1 %v3629_v52  ;;  %3633 = vadd.xlane.f32.xlu0 %v3632_v63  ;;  %v11341_v12 = vadd.f32 %v3590_v33, %v10368_v25 }
 0xa77   : > { %v3572_v0 = vadd.f32 %v11267_v14, %v3529_v29  ;;  %v11332_v26 = vadd.f32 %v3588_v18, %v10354_v36  ;;  %v3591_v1 = vmul.f32 %v11270_v57, %v3574_v51 }
 0xa78   : > { %v3644_v41 = vsel %vm668_vm0, %v11341_v12, 0.0 }
 0xa79   : > { %v3589_v56 = vmul.f32 %v11270_v57, %v3572_v0  ;;  %v3638_v53 = vsel %vm668_vm0, %v11332_v26, 0.0  ;;  %v11351_v61 = vadd.f32 %v3591_v1, %v10378_v15 }
 0xa7a   : > { %3636 = vadd.xlane.f32.xlu1 %v3635_v59  ;;  %3639 = vadd.xlane.f32.xlu0 %v3638_v53 }
 0xa7b   : > { %v11344_v46 = vadd.f32 %v3589_v56, %v10364_v11  ;;  %v3647_v25 = vsel %vm668_vm0, %v11351_v61, 0.0 }
 0xa7d   : > { %v3641_v36 = vsel %vm668_vm0, %v11344_v46, 0.0 }
 0xa7e   : > { %3642 = vadd.xlane.f32.xlu1 %v3641_v36  ;;  %3645 = vadd.xlane.f32.xlu0 %v3644_v41 }
 0xa82   : > { %3648 = vadd.xlane.f32.xlu1 %v3647_v25 }
 0xaa7   : > { %v8679_v60 = vpop.f32.mrf.mxu0 }
 0xaa8   : > { %v3550_v11 = vadd.f32 %v8697_v40, %v8679_v60 }
 0xaa9   : > { %v3414_v30 = vpop.f32.mrf.mxu0 }
 0xaaa   : > { %v3577_v6 = vadd.f32 %v11267_v14, %v3550_v11  ;;  %v3542_v34 = vadd.f32 %v3541_v44, %v3414_v30 }
 0xaab   : > { %v8680_v2 = vpop.f32.mrf.mxu0 }
 0xaac   : > { %v3575_v49 = vadd.f32 %v11267_v14, %v3542_v34  ;;  %v3553_v15 = vadd.f32 %v8698_v20, %v8680_v2  ;;  %v3594_v10 = vmul.f32 %v11270_v57, %v3577_v6 }
 0xaad   : > { %v3417_v54 = vpop.f32.mrf.mxu0 }
 0xaae   : > { %v3592_v55 = vmul.f32 %v11270_v57, %v3575_v49  ;;  %v3578_v9 = vadd.f32 %v11267_v14, %v3553_v15  ;;  %v3545_v31 = vadd.f32 %v3544_v62, %v3417_v54  ;;  %v11369_v7 = vadd.f32 %v3594_v10, %v13363_v37  ;;  %v9120_v49 = vld [vmem:[%s13278_s7 + $0x14] ss:$8 sps:$4 sm:$0xff]   ;;  %v9118_v15 = vld [vmem:[%s13278_s7 + $0x10] ss:$8 sps:$4 sm:$0xff]  }
 0xaaf   : > { %3942 = vmatprep.subr.bf16.mxu0 %v9120_v49  ;;  %v13308_v37 = vmov 0  }
 0xab0   : > { %v3576_v47 = vadd.f32 %v11267_v14, %v3545_v31  ;;  %v11362_v4 = vadd.f32 %v3592_v55, %v13362_v32  ;;  %v3595_v8 = vmul.f32 %v11270_v57, %v3578_v9  ;;  %v3656_v35 = vsel %vm668_vm0, %v11369_v7, 0.0  ;;  %3943 = vmatpush1.bf16.msra.mxu0 %v9118_v15  ;;  %v9123_v31 = vld [vmem:[%s13278_s7 + $0x4] ss:$8 sps:$4 sm:$0xff]   ;;  %3962 = vmatprep.mubr.bf16.mxu0 %v13308_v37 }
 0xab1   : > { %3944 = vmatprep.subr.bf16.mxu0 %v9123_v31 }
 0xab2   : > { %v3593_v38 = vmul.f32 %v11270_v57, %v3576_v47  ;;  %v3650_v24 = vsel %vm668_vm0, %v11362_v4, 0.0  ;;  %v11379_v39 = vadd.f32 %v3595_v8, %v13365_v3 }
 0xab3   : > { %3651 = vadd.xlane.f32.xlu0 %v3650_v24  ;;  %v9121_v24 = vld [vmem:[%s13278_s7] ss:$8 sps:$4 sm:$0xff]  }
 0xab4   : > { %v11372_v45 = vadd.f32 %v3593_v38, %v13364_v13  ;;  %v3659_v57 = vsel %vm668_vm0, %v11379_v39, 0.0  ;;  %3945 = vmatpush1.bf16.msra.mxu0 %v9121_v24 }
 0xab5   : > { %8751 = vmatprep.subr.bf16.mxu0 %v13353_v22 }
 0xab6   : > { %v3653_v14 = vsel %vm668_vm0, %v11372_v45, 0.0 }
 0xab7   : > { %3654 = vadd.xlane.f32.xlu1 %v3653_v14  ;;  %3657 = vadd.xlane.f32.xlu0 %v3656_v35 }
 0xabb   : > { %3660 = vadd.xlane.f32.xlu1 %v3659_v57 }
 0xad9   : > { %v3616_v19 = vpop.xlane.xlu0 %3615 }
 0xada   : > { %v3662_v16 = vmul.f32 0.03125, %v3616_v19 }
 0xadc   : > { %v11384_v43 = vsub.f32 %v11278_v27, %v3662_v16 }
 0xadd   : > { %v3619_v23 = vpop.xlane.xlu1 %3618  ;;  %v3622_v33 = vpop.xlane.xlu0 %3621 }
 0xade   : > { %v3663_v17 = vmul.f32 0.03125, %v3619_v23  ;;  %v3664_v63 = vmul.f32 0.03125, %v3622_v33  ;;  %v3694_v18 = vmul.f32 %v11384_v43, %v11384_v43 }
 0xae0   : > { %v11389_v51 = vsub.f32 %v11288_v42, %v3663_v17  ;;  %v11392_v29 = vsub.f32 %v11285_v58, %v3664_v63  ;;  %v3710_v52 = vsel %vm668_vm0, %v3694_v18, 0.0 }
 0xae1   : > { %3711 = vadd.xlane.f32.xlu0 %v3710_v52  ;;  %v3625_v0 = vpop.xlane.xlu0 %3624 }
 0xae2   : > { %v3665_v59 = vmul.f32 0.03125, %v3625_v0  ;;  %v3695_v1 = vmul.f32 %v11389_v51, %v11389_v51  ;;  %v3696_v56 = vmul.f32 %v11392_v29, %v11392_v29 }
 0xae4   : > { %v11400_v53 = vsub.f32 %v11295_v21, %v3665_v59  ;;  %v3713_v36 = vsel %vm668_vm0, %v3695_v1, 0.0  ;;  %v3716_v41 = vsel %vm668_vm0, %v3696_v56, 0.0 }
 0xae5   : > { %3714 = vadd.xlane.f32.xlu1 %v3713_v36  ;;  %3717 = vadd.xlane.f32.xlu0 %v3716_v41 }
 0xae6   : > { %v3697_v25 = vmul.f32 %v11400_v53, %v11400_v53 }
 0xae8   : > { %v3719_v40 = vsel %vm668_vm0, %v3697_v25, 0.0 }
 0xae9   : > { %3720 = vadd.xlane.f32.xlu1 %v3719_v40 }
 0xafb   : > { %v3628_v44 = vpop.xlane.xlu0 %3627 }
 0xafc   : > { %v3666_v60 = vmul.f32 0.03125, %v3628_v44 }
 0xafe   : > { %v11408_v11 = vsub.f32 %v11306_v28, %v3666_v60 }
 0xaff   : > { %v3631_v20 = vpop.xlane.xlu1 %3630  ;;  %v3634_v30 = vpop.xlane.xlu0 %3633 }
 0xb00   : > { %v3667_v6 = vmul.f32 0.03125, %v3631_v20  ;;  %v3668_v34 = vmul.f32 0.03125, %v3634_v30  ;;  %v3698_v2 = vmul.f32 %v11408_v11, %v11408_v11 }
 0xb02   : > { %v11419_v62 = vsub.f32 %v11318_v48, %v3667_v6  ;;  %v11422_v54 = vsub.f32 %v11310_v5, %v3668_v34  ;;  %v3722_v10 = vsel %vm668_vm0, %v3698_v2, 0.0 }
 0xb03   : > { %v3637_v55 = vpop.xlane.xlu1 %3636  ;;  %3723 = vadd.xlane.f32.xlu0 %v3722_v10  ;;  %v3640_v9 = vpop.xlane.xlu0 %3639 }
 0xb04   : > { %v3669_v47 = vmul.f32 0.03125, %v3637_v55  ;;  %v3670_v32 = vmul.f32 0.03125, %v3640_v9  ;;  %v3699_v8 = vmul.f32 %v11419_v62, %v11419_v62  ;;  %v3700_v38 = vmul.f32 %v11422_v54, %v11422_v54 }
 0xb06   : > { %v11437_v13 = vsub.f32 %v11324_v50, %v3669_v47  ;;  %v11440_v14 = vsub.f32 %v11332_v26, %v3670_v32  ;;  %v3725_v35 = vsel %vm668_vm0, %v3699_v8, 0.0  ;;  %v3728_v3 = vsel %vm668_vm0, %v3700_v38, 0.0 }
 0xb07   : > { %v3643_v57 = vpop.xlane.xlu1 %3642  ;;  %3726 = vadd.xlane.f32.xlu1 %v3725_v35  ;;  %3729 = vadd.xlane.f32.xlu0 %v3728_v3  ;;  %v3646_v19 = vpop.xlane.xlu0 %3645 }
 0xb08   : > { %v3671_v16 = vmul.f32 0.03125, %v3643_v57  ;;  %v3672_v23 = vmul.f32 0.03125, %v3646_v19  ;;  %v3701_v33 = vmul.f32 %v11437_v13, %v11437_v13  ;;  %v3702_v17 = vmul.f32 %v11440_v14, %v11440_v14 }
 0xb0a   : > { %v11450_v63 = vsub.f32 %v11344_v46, %v3671_v16  ;;  %v11453_v18 = vsub.f32 %v11341_v12, %v3672_v23  ;;  %v3731_v52 = vsel %vm668_vm0, %v3701_v33, 0.0  ;;  %v3734_v0 = vsel %vm668_vm0, %v3702_v17, 0.0 }
 0xb0b   : > { %v3649_v59 = vpop.xlane.xlu1 %3648  ;;  %3732 = vadd.xlane.f32.xlu1 %v3731_v52  ;;  %3735 = vadd.xlane.f32.xlu0 %v3734_v0 }
 0xb0c   : > { %v3673_v1 = vmul.f32 0.03125, %v3649_v59  ;;  %v3703_v56 = vmul.f32 %v11450_v63, %v11450_v63  ;;  %v3704_v36 = vmul.f32 %v11453_v18, %v11453_v18 }
 0xb0e   : > { %v11462_v41 = vsub.f32 %v11351_v61, %v3673_v1  ;;  %v3737_v25 = vsel %vm668_vm0, %v3703_v56, 0.0  ;;  %v3740_v40 = vsel %vm668_vm0, %v3704_v36, 0.0 }
 0xb0f   : > { %3738 = vadd.xlane.f32.xlu1 %v3737_v25  ;;  %3741 = vadd.xlane.f32.xlu0 %v3740_v40 }
 0xb10   : > { %v3705_v44 = vmul.f32 %v11462_v41, %v11462_v41 }
 0xb12   : > { %v3743_v60 = vsel %vm668_vm0, %v3705_v44, 0.0 }
 0xb13   : > { %3744 = vadd.xlane.f32.xlu1 %v3743_v60 }
 0xb3c   : > { %v3652_v20 = vpop.xlane.xlu0 %3651 }
 0xb3d   : > { %v3674_v30 = vmul.f32 0.03125, %v3652_v20  ;;  %v11497_v20 = vld [vmem:[%s13348_s17 + $0x2] ss:$0 sm:$0xff] }
 0xb3f   : > { %v11470_v6 = vsub.f32 %v11362_v4, %v3674_v30 }
 0xb40   : > { %v3655_v34 = vpop.xlane.xlu1 %3654  ;;  %v3658_v2 = vpop.xlane.xlu0 %3657 }
 0xb41   : > { %v3675_v49 = vmul.f32 0.03125, %v3655_v34  ;;  %v3676_v15 = vmul.f32 0.03125, %v3658_v2  ;;  %v3706_v10 = vmul.f32 %v11470_v6, %v11470_v6 }
 0xb43   : > { %v11475_v55 = vsub.f32 %v11372_v45, %v3675_v49  ;;  %v11478_v9 = vsub.f32 %v11369_v7, %v3676_v15  ;;  %v3746_v31 = vsel %vm668_vm0, %v3706_v10, 0.0  ;;  %v11504_v15 = vld [vmem:[%s13274_s3 + $0x2] ss:$0 sm:$0xff] }
 0xb44   : > { %v3661_v47 = vpop.xlane.xlu1 %3660  ;;  %3747 = vadd.xlane.f32.xlu0 %v3746_v31 }
 0xb45   : > { %v3677_v32 = vmul.f32 0.03125, %v3661_v47  ;;  %v3707_v8 = vmul.f32 %v11475_v55, %v11475_v55  ;;  %v3708_v38 = vmul.f32 %v11478_v9, %v11478_v9 }
 0xb47   : > { %v11486_v24 = vsub.f32 %v11379_v39, %v3677_v32  ;;  %v3749_v35 = vsel %vm668_vm0, %v3707_v8, 0.0  ;;  %v3752_v3 = vsel %vm668_vm0, %v3708_v38, 0.0 }
 0xb48   : > { %3750 = vadd.xlane.f32.xlu1 %v3749_v35  ;;  %3753 = vadd.xlane.f32.xlu0 %v3752_v3 }
 0xb49   : > { %v3709_v57 = vmul.f32 %v11486_v24, %v11486_v24 }
 0xb4b   : > { %v3755_v19 = vsel %vm668_vm0, %v3709_v57, 0.0 }
 0xb4c   : > { %3756 = vadd.xlane.f32.xlu1 %v3755_v19 }
 0xb6a   : > { %v3712_v16 = vpop.xlane.xlu0 %3711 }
 0xb6b   : > { %v3758_v23 = vmul.f32 0.03125, %v3712_v16 }
 0xb6d   : > { %v3774_v33 = vadd.f32 1e-05, %v3758_v23 }
 0xb6e   : > { %v3715_v17 = vpop.xlane.xlu1 %3714  ;;  %v3718_v52 = vpop.xlane.xlu0 %3717 }
 0xb6f   : > { %9342 = vrsqrt.f32 %v3774_v33  ;;  %v3759_v0 = vmul.f32 0.03125, %v3715_v17  ;;  %v3760_v59 = vmul.f32 0.03125, %v3718_v52 }
 0xb71   : > { %v3775_v1 = vadd.f32 1e-05, %v3759_v0  ;;  %v3776_v56 = vadd.f32 1e-05, %v3760_v59 }
 0xb72   : > { %v3721_v36 = vpop.xlane.xlu1 %3720 }
 0xb73   : > { %9344 = vrsqrt.f32 %v3775_v1  ;;  %v3761_v25 = vmul.f32 0.03125, %v3721_v36 }
 0xb74   : > { %9346 = vrsqrt.f32 %v3776_v56 }
 0xb75   : > { %v3777_v40 = vadd.f32 1e-05, %v3761_v25 }
 0xb77   : > { %9348 = vrsqrt.f32 %v3777_v40 }
 0xb7c   : > { %v9343_v44 = vpop.eup %9342 }
 0xb7d   : > { %v3806_v60 = vmul.f32 %v9343_v44, %v11384_v43 }
 0xb7f   : > { %v3826_v34 = vmul.f32 %v11497_v20, %v3806_v60 }
 0xb80   : > { %v9345_v30 = vpop.eup %9344 }
 0xb81   : > { %v3807_v2 = vmul.f32 %v9345_v30, %v11389_v51  ;;  %v9347_v49 = vpop.eup %9346  ;;  %v3846_v43 = vadd.f32 %v11504_v15, %v3826_v34 }
 0xb82   : > { %v3808_v32 = vmul.f32 %v9347_v49, %v11392_v29 }
 0xb83   : > { %v3827_v10 = vmul.f32 %v11497_v20, %v3807_v2 }
 0xb84   : > { %v9349_v31 = vpop.eup %9348  ;;  %v3828_v35 = vmul.f32 %v11497_v20, %v3808_v32 }
 0xb85   : > { %v3847_v47 = vadd.f32 %v11504_v15, %v3827_v10  ;;  %v3809_v8 = vmul.f32 %v9349_v31, %v11400_v53 }
 0xb86   : > { %v3848_v16 = vadd.f32 %v11504_v15, %v3828_v35 }
 0xb87   : > { %v3862_v38 = vpack.c.bf16 %v3847_v47, %v3846_v43  ;;  %v3829_v51 = vmul.f32 %v11497_v20, %v3809_v8 }
 0xb89   : > { %8122 = vmatmul.mubr.msk.bf16.vlgmr.msra.gmra.mxu0 %vm668_vm0, %v3862_v38  ;;  %v3849_v3 = vadd.f32 %v11504_v15, %v3829_v51 }
 0xb8a   : > { %3972 = vmatprep.mubr.bf16.mxu0 %v13308_v37 }
 0xb8b   : > { %v3863_v33 = vpack.c.bf16 %v3849_v3, %v3848_v16 }
 0xb8c   : > { %v3724_v57 = vpop.xlane.xlu0 %3723 }
 0xb8d   : > { %v3762_v19 = vmul.f32 0.03125, %v3724_v57 }
 0xb8f   : > { %v3778_v23 = vadd.f32 1e-05, %v3762_v19 }
 0xb90   : > { %v3727_v29 = vpop.xlane.xlu1 %3726  ;;  %v3730_v17 = vpop.xlane.xlu0 %3729 }
 0xb91   : > { %9350 = vrsqrt.f32 %v3778_v23  ;;  %v3763_v53 = vmul.f32 0.03125, %v3727_v29  ;;  %v3764_v52 = vmul.f32 0.03125, %v3730_v17  ;;  %8123 = vmatmul.mubr.msk.bf16.gmra.mxu0 %vm668_vm0, %v3863_v33 }
 0xb92   : > { %3982 = vmatprep.mubr.bf16.mxu0 %v13308_v37 }
 0xb93   : > { %v3779_v0 = vadd.f32 1e-05, %v3763_v53  ;;  %v3780_v59 = vadd.f32 1e-05, %v3764_v52 }
 0xb94   : > { %v3733_v1 = vpop.xlane.xlu1 %3732  ;;  %v3736_v56 = vpop.xlane.xlu0 %3735 }
 0xb95   : > { %9352 = vrsqrt.f32 %v3779_v0  ;;  %v3765_v36 = vmul.f32 0.03125, %v3733_v1  ;;  %v3766_v40 = vmul.f32 0.03125, %v3736_v56 }
 0xb96   : > { %9354 = vrsqrt.f32 %v3780_v59 }
 0xb97   : > { %v3781_v25 = vadd.f32 1e-05, %v3765_v36  ;;  %v3782_v30 = vadd.f32 1e-05, %v3766_v40 }
 0xb98   : > { %v3739_v44 = vpop.xlane.xlu1 %3738  ;;  %v3742_v2 = vpop.xlane.xlu0 %3741 }
 0xb99   : > { %9356 = vrsqrt.f32 %v3781_v25  ;;  %v3767_v60 = vmul.f32 0.03125, %v3739_v44  ;;  %v3768_v43 = vmul.f32 0.03125, %v3742_v2 }
 0xb9b   : > { %v3783_v34 = vadd.f32 1e-05, %v3767_v60  ;;  %v3784_v38 = vadd.f32 1e-05, %v3768_v43 }
 0xb9c   : > { %v3745_v49 = vpop.xlane.xlu1 %3744 }
 0xb9d   : > { %9358 = vrsqrt.f32 %v3783_v34  ;;  %v3769_v10 = vmul.f32 0.03125, %v3745_v49 }
 0xb9e   : > { %v9351_v31 = vpop.eup %9350  ;;  %9360 = vrsqrt.f32 %v3782_v30 }
 0xb9f   : > { %v3810_v47 = vmul.f32 %v9351_v31, %v11408_v11  ;;  %v3785_v32 = vadd.f32 1e-05, %v3769_v10 }
 0xba1   : > { %v3830_v35 = vmul.f32 %v11497_v20, %v3810_v47  ;;  %9362 = vrsqrt.f32 %v3785_v32 }
 0xba2   : > { %v9353_v8 = vpop.eup %9352  ;;  %9364 = vrsqrt.f32 %v3784_v38 }
 0xba3   : > { %v3811_v51 = vmul.f32 %v9353_v8, %v11419_v62  ;;  %v9355_v3 = vpop.eup %9354  ;;  %v3850_v16 = vadd.f32 %v11504_v15, %v3830_v35 }
 0xba4   : > { %v3812_v33 = vmul.f32 %v9355_v3, %v11422_v54 }
 0xba5   : > { %v3831_v57 = vmul.f32 %v11497_v20, %v3811_v51 }
 0xba6   : > { %v9357_v19 = vpop.eup %9356  ;;  %v3832_v53 = vmul.f32 %v11497_v20, %v3812_v33 }
 0xba7   : > { %v3851_v23 = vadd.f32 %v11504_v15, %v3831_v57  ;;  %v3813_v11 = vmul.f32 %v9357_v19, %v11437_v13 }
 0xba8   : > { %v3852_v1 = vadd.f32 %v11504_v15, %v3832_v53 }
 0xba9   : > { %v3864_v29 = vpack.c.bf16 %v3851_v23, %v3850_v16  ;;  %v3833_v17 = vmul.f32 %v11497_v20, %v3813_v11  ;;  %v9124_v16 = vld [vmem:[%s13280_s9 + $0x38] sm:$0xff]   ;;  %v9125_v23 = vld [vmem:[%s13280_s9 + $0x30] sm:$0xff]  }
 0xbaa   : > { %v9359_v62 = vpop.eup %9358  ;;  %8699 = vmatprep.subr.bf16.mxu1 %v9124_v16 }
 0xbab   : > { %8124 = vmatmul.mubr.msk.bf16.gmra.mxu0 %vm668_vm0, %v3864_v29  ;;  %v9361_v52 = vpop.eup %9360  ;;  %v3853_v0 = vadd.f32 %v11504_v15, %v3833_v17  ;;  %v3815_v59 = vmul.f32 %v9359_v62, %v11450_v63  ;;  %8700 = vmatpush3.bf16.msra.mxu1 %v9124_v16  ;;  %v9126_v29 = vld [vmem:[%s13280_s9 + $0x28] sm:$0xff]  }
 0xbac   : > { %3992 = vmatprep.mubr.bf16.mxu0 %v13308_v37  ;;  %v3814_v54 = vmul.f32 %v9361_v52, %v11440_v14  ;;  %8701 = vmatprep.subr.bf16.mxu1 %v9125_v23 }
 0xbad   : > { %v3865_v13 = vpack.c.bf16 %v3853_v0, %v3852_v1  ;;  %v3835_v56 = vmul.f32 %v11497_v20, %v3815_v59  ;;  %v9127_v0 = vld [vmem:[%s13280_s9 + $0x20] sm:$0xff]  }
 0xbae   : > { %v9363_v36 = vpop.eup %9362  ;;  %v3834_v40 = vmul.f32 %v11497_v20, %v3814_v54 }
 0xbaf   : > { %v9365_v25 = vpop.eup %9364  ;;  %v3855_v44 = vadd.f32 %v11504_v15, %v3835_v56  ;;  %v3817_v60 = vmul.f32 %v9363_v36, %v11462_v41  ;;  %8702 = vmatpush3.bf16.msra.mxu1 %v9125_v23  ;;  %v9128_v56 = vld [vmem:[%s13280_s9 + $0x18] sm:$0xff]  }
 0xbb0   : > { %v3854_v63 = vadd.f32 %v11504_v15, %v3834_v40  ;;  %v3816_v30 = vmul.f32 %v9365_v25, %v11453_v18  ;;  %8703 = vmatprep.subr.bf16.mxu1 %v9126_v29 }
 0xbb1   : > { %v3837_v34 = vmul.f32 %v11497_v20, %v3817_v60  ;;  %v9130_v60 = vld [vmem:[%s13280_s9 + $0x8] sm:$0xff]  }
 0xbb2   : > { %v3866_v14 = vpack.c.bf16 %v3855_v44, %v3854_v63  ;;  %v3836_v2 = vmul.f32 %v11497_v20, %v3816_v30 }
 0xbb3   : > { %8125 = vmatmul.mubr.msk.bf16.gmra.mxu0 %vm668_vm0, %v3865_v13  ;;  %v3857_v49 = vadd.f32 %v11504_v15, %v3837_v34  ;;  %8704 = vmatpush3.bf16.msra.mxu1 %v9126_v29  ;;  %v3874_v34 = vld [vmem:[#allocation9] sm:$0x3] }
 0xbb4   : > { %4002 = vmatprep.mubr.bf16.mxu0 %v13308_v37  ;;  %v3856_v10 = vadd.f32 %v11504_v15, %v3836_v2  ;;  %8705 = vmatprep.subr.bf16.mxu1 %v9127_v0 }
 0xbb6   : > { %v3867_v31 = vpack.c.bf16 %v3857_v49, %v3856_v10 }
 0xbb7   : > { %8706 = vmatpush3.bf16.msra.mxu1 %v9127_v0 }
 0xbb8   : > { %8707 = vmatprep.subr.bf16.mxu1 %v9128_v56 }
 0xbbb   : > { %8126 = vmatmul.mubr.msk.bf16.gmra.mxu0 %vm668_vm0, %v3866_v14  ;;  %8708 = vmatpush3.bf16.msra.mxu1 %v9128_v56 }
 0xbbc   : > { %4012 = vmatprep.mubr.bf16.mxu0 %v13308_v37 }
 0xbc3   : > { %8127 = vmatmul.mubr.msk.bf16.gmra.mxu0 %vm668_vm0, %v3867_v31 }
 0xbc4   : > { %4022 = vmatprep.mubr.bf16.mxu0 %v13308_v37 }
 0xbcd   : > { %v3748_v41 = vpop.xlane.xlu0 %3747 }
 0xbce   : > { %v3770_v18 = vmul.f32 0.03125, %v3748_v41 }
 0xbd0   : > { %v3786_v43 = vadd.f32 1e-05, %v3770_v18 }
 0xbd1   : > { %v3751_v47 = vpop.xlane.xlu1 %3750  ;;  %v3754_v32 = vpop.xlane.xlu0 %3753 }
 0xbd2   : > { %9366 = vrsqrt.f32 %v3786_v43  ;;  %v3771_v8 = vmul.f32 0.03125, %v3751_v47  ;;  %v3772_v38 = vmul.f32 0.03125, %v3754_v32 }
 0xbd4   : > { %v3787_v51 = vadd.f32 1e-05, %v3771_v8  ;;  %v3788_v35 = vadd.f32 1e-05, %v3772_v38 }
 0xbd5   : > { %v3757_v3 = vpop.xlane.xlu1 %3756 }
 0xbd6   : > { %9368 = vrsqrt.f32 %v3787_v51  ;;  %v3773_v57 = vmul.f32 0.03125, %v3757_v3 }
 0xbd7   : > { %9370 = vrsqrt.f32 %v3788_v35 }
 0xbd8   : > { %v3789_v19 = vadd.f32 1e-05, %v3773_v57 }
 0xbda   : > { %9372 = vrsqrt.f32 %v3789_v19 }
 0xbdf   : > { %v9367_v33 = vpop.eup %9366 }
 0xbe0   : > { %v3818_v11 = vmul.f32 %v9367_v33, %v11470_v6 }
 0xbe2   : > { %v3838_v53 = vmul.f32 %v11497_v20, %v3818_v11 }
 0xbe3   : > { %v9369_v17 = vpop.eup %9368 }
 0xbe4   : > { %v3819_v62 = vmul.f32 %v9369_v17, %v11475_v55  ;;  %v9371_v52 = vpop.eup %9370  ;;  %v3858_v1 = vadd.f32 %v11504_v15, %v3838_v53 }
 0xbe5   : > { %v3820_v13 = vmul.f32 %v9371_v52, %v11478_v9  ;;  %v9129_v9 = vld [vmem:[%s13280_s9 + $0x10] sm:$0xff]  }
 0xbe6   : > { %v3839_v59 = vmul.f32 %v11497_v20, %v3819_v62  ;;  %8709 = vmatprep.subr.bf16.mxu1 %v9129_v9 }
 0xbe7   : > { %v9373_v6 = vpop.eup %9372  ;;  %v3840_v40 = vmul.f32 %v11497_v20, %v3820_v13  ;;  %8710 = vmatpush3.bf16.msra.mxu1 %v9129_v9 }
 0xbe8   : > { %v3859_v54 = vadd.f32 %v11504_v15, %v3839_v59  ;;  %v3821_v55 = vmul.f32 %v9373_v6, %v11486_v24  ;;  %8711 = vmatprep.subr.bf16.mxu1 %v9130_v60 }
 0xbe9   : > { %v3860_v44 = vadd.f32 %v11504_v15, %v3840_v40 }
 0xbea   : > { %v3868_v36 = vpack.c.bf16 %v3859_v54, %v3858_v1  ;;  %v3841_v25 = vmul.f32 %v11497_v20, %v3821_v55  ;;  %v9131_v20 = vld [vmem:[%s13280_s9] sm:$0xff]  }
 0xbeb   : > { %8712 = vmatpush3.bf16.msra.mxu1 %v9130_v60 }
 0xbec   : > { %8128 = vmatmul.mubr.msk.bf16.gmra.mxu0 %vm668_vm0, %v3868_v36  ;;  %v3861_v24 = vadd.f32 %v11504_v15, %v3841_v25  ;;  %8713 = vmatprep.subr.bf16.mxu1 %v9131_v20  ;;  %v3876_v15 = vlaneseq }
 0xbed   : > { %4032 = vmatprep.mubr.bf16.mxu0 %v13308_v37 }
 0xbee   : > { %v3869_v63 = vpack.c.bf16 %v3861_v24, %v3860_v44  ;;  %v11592_v30 = vshrl.u32 %v3876_v15, 7 }
 0xbef   : > { %8714 = vmatpush3.bf16.msra.mxu1 %v9131_v20 }
 0xbf0   : > { %13366 = vst [vmem:[#allocation21_spill] sm:$0xff] %v11592_v30  ;;  %v13307_v14 = vsub.s32 1, %v11592_v30  ;;  %v13306_v36 = vsub.s32 0, %v11592_v30 }
 0xbf2   : > { %v11597_v2 = vrot.slane %v3874_v34, %v13307_v14  ;;  %v11608_v9 = vrot.slane %v3874_v34, %v13306_v36 }
 0xbf4   : > { %8129 = vmatmul.mubr.msk.bf16.gmra.mxu0 %vm668_vm0, %v3869_v63 }
 0xbf5   : > { %8753 = vmatprep.mubr.msk.bf16.mxu0 %vm9849_vm1, %v13353_v22 }
 0xc49   : > { %v3964_v49 = vpop.f32.mrf.mxu0 }
 0xc4b   : > { %v3966_v10 = vpop.f32.mrf.mxu0 }
 0xc4c   : > { %v3967_v31 = vadd.f32 %v3966_v10, %v11597_v2  ;;  %v3965_v10 = vadd.f32 %v3964_v49, %v11608_v9 }
 0xc4d   : > { %v3968_v41 = vpop.f32.mrf.mxu0 }
 0xc4e   : > { %v4059_v18 = vmul.f32 0.044715, %v3967_v31  ;;  %v4043_v24 = vmul.f32 0.5, %v3967_v31 }
 0xc4f   : > { %v3970_v43 = vpop.f32.mrf.mxu0 }
 0xc50   : > { %v4075_v47 = vmul.f32 %v4059_v18, %v3967_v31  ;;  %v3971_v32 = vadd.f32 %v3970_v43, %v11597_v2  ;;  %v3969_v18 = vadd.f32 %v3968_v41, %v11608_v9 }
 0xc51   : > { %v11601_v8 = vpop.f32.mrf.mxu0 }
 0xc52   : > { %v4091_v38 = vmul.f32 %v4075_v47, %v3967_v31  ;;  %v4060_v51 = vmul.f32 0.044715, %v3971_v32  ;;  %v4044_v60 = vmul.f32 0.5, %v3971_v32 }
 0xc53   : > { %v3976_v35 = vpop.f32.mrf.mxu0 }
 0xc54   : > { %v4107_v3 = vadd.f32 %v4091_v38, %v3967_v31  ;;  %v4076_v57 = vmul.f32 %v4060_v51, %v3971_v32  ;;  %v3977_v19 = vadd.f32 %v3976_v35, %v11597_v2 }
 0xc55   : > { %v3978_v16 = vpop.f32.mrf.mxu0 }
 0xc56   : > { %v4123_v23 = vmul.f32 0.7978846, %v4107_v3  ;;  %v4092_v33 = vmul.f32 %v4076_v57, %v3971_v32  ;;  %v4061_v11 = vmul.f32 0.044715, %v3977_v19 }
 0xc57   : > { %v3980_v29 = vpop.f32.mrf.mxu0 }
 0xc58   : > { %v4108_v17 = vadd.f32 %v4092_v33, %v3971_v32  ;;  %v4077_v62 = vmul.f32 %v4061_v11, %v3977_v19  ;;  %v3981_v53 = vadd.f32 %v3980_v29, %v11597_v2  ;;  %9374 = vtanh.f32 %v4123_v23 }
 0xc59   : > { %v4045_v33 = vmul.f32 0.5, %v3977_v19 }
 0xc5a   : > { %v4093_v52 = vmul.f32 %v4077_v62, %v3977_v19  ;;  %v4062_v0 = vmul.f32 0.044715, %v3981_v53  ;;  %v4124_v59 = vmul.f32 0.7978846, %v4108_v17  ;;  %v4046_v49 = vmul.f32 0.5, %v3981_v53 }
 0xc5c   : > { %v4109_v6 = vadd.f32 %v4093_v52, %v3977_v19  ;;  %v4078_v1 = vmul.f32 %v4062_v0, %v3981_v53  ;;  %9376 = vtanh.f32 %v4124_v59  ;;  %v3979_v0 = vadd.f32 %v3978_v16, %v11608_v9 }
 0xc5d   : > { %v3975_v19 = vadd.f32 %v11601_v8, %v11608_v9 }
 0xc5e   : > { %v4125_v54 = vmul.f32 0.7978846, %v4109_v6  ;;  %v4094_v13 = vmul.f32 %v4078_v1, %v3981_v53 }
 0xc60   : > { %9378 = vtanh.f32 %v4125_v54  ;;  %v4110_v55 = vadd.f32 %v4094_v13, %v3981_v53 }
 0xc62   : > { %v4126_v56 = vmul.f32 0.7978846, %v4110_v55 }
 0xc64   : > { %9380 = vtanh.f32 %v4126_v56 }
 0xc65   : > { %v9375_v25 = vpop.eup %9374 }
 0xc66   : > { %v4155_v40 = vadd.f32 1.0, %v9375_v25 }
 0xc68   : > { %v4171_v20 = vmul.f32 %v4155_v40, %v4043_v24 }
 0xc69   : > { %v9377_v44 = vpop.eup %9376 }
 0xc6a   : > { %v4156_v63 = vadd.f32 1.0, %v9377_v44  ;;  %v4187_v35 = vmul.f32 %v4171_v20, %v3965_v10 }
 0xc6b   : > { %v11610_v15 = vpop.f32.mrf.mxu0 }
 0xc6c   : > { %v4172_v43 = vmul.f32 %v4156_v63, %v4044_v60 }
 0xc6d   : > { %v9379_v47 = vpop.eup %9378  ;;  %v3986_v38 = vpop.f32.mrf.mxu0 }
 0xc6e   : > { %v11615_v51 = vadd.f32 %v3986_v38, %v11597_v2  ;;  %v4188_v34 = vmul.f32 %v4172_v43, %v3969_v18  ;;  %v4157_v3 = vadd.f32 1.0, %v9379_v47 }
 0xc6f   : > { %v11617_v31 = vpop.f32.mrf.mxu0 }
 0xc70   : > { %v4063_v32 = vmul.f32 0.044715, %v11615_v51  ;;  %v4203_v57 = vpack.c.bf16 %v4188_v34, %v4187_v35  ;;  %v4173_v62 = vmul.f32 %v4157_v3, %v4045_v33 }
 0xc71   : > { %v9381_v23 = vpop.eup %9380  ;;  %v3990_v11 = vpop.f32.mrf.mxu0 }
 0xc72   : > { %v4079_v41 = vmul.f32 %v4063_v32, %v11615_v51  ;;  %v11622_v29 = vadd.f32 %v3990_v11, %v11597_v2  ;;  %8715 = vmatprep.mubr.bf16.mxu1 %v4203_v57  ;;  %v4158_v17 = vadd.f32 1.0, %v9381_v23  ;;  %v4189_v16 = vmul.f32 %v4173_v62, %v3975_v19 }
 0xc73   : > { %v11624_v52 = vpop.f32.mrf.mxu0 }
 0xc74   : > { %v4095_v59 = vmul.f32 %v4079_v41, %v11615_v51  ;;  %v4064_v6 = vmul.f32 0.044715, %v11622_v29  ;;  %v4174_v1 = vmul.f32 %v4158_v17, %v4046_v49 }
 0xc75   : > { %v3996_v53 = vpop.f32.mrf.mxu0 }
 0xc76   : > { %v4111_v54 = vadd.f32 %v4095_v59, %v11615_v51  ;;  %v4080_v13 = vmul.f32 %v4064_v6, %v11622_v29  ;;  %v11634_v55 = vadd.f32 %v3996_v53, %v11597_v2  ;;  %v4190_v56 = vmul.f32 %v4174_v1, %v3979_v0 }
 0xc77   : > { %v11636_v25 = vpop.f32.mrf.mxu0 }
 0xc78   : > { %v4127_v40 = vmul.f32 0.7978846, %v4111_v54  ;;  %v4096_v24 = vmul.f32 %v4080_v13, %v11622_v29  ;;  %v4065_v44 = vmul.f32 0.044715, %v11634_v55  ;;  %v4204_v63 = vpack.c.bf16 %v4190_v56, %v4189_v16 }
 0xc79   : > { %v4000_v60 = vpop.f32.mrf.mxu0 }
 0xc7a   : > { %v4112_v8 = vadd.f32 %v4096_v24, %v11622_v29  ;;  %v4081_v20 = vmul.f32 %v4065_v44, %v11634_v55  ;;  %v11643_v10 = vadd.f32 %v4000_v60, %v11597_v2  ;;  %9382 = vtanh.f32 %v4127_v40  ;;  %8716 = vmatmul.mubr.bf16.vlgmr.msra.gmra.mxu1 %v4204_v63 }
 0xc7b   : > { %v11645_v18 = vpop.f32.mrf.mxu0  ;;  %v4047_v63 = vmul.f32 0.5, %v11615_v51  ;;  %v3985_v51 = vadd.f32 %v11610_v15, %v11608_v9 }
 0xc7c   : > { %v4097_v43 = vmul.f32 %v4081_v20, %v11634_v55  ;;  %v4066_v47 = vmul.f32 0.044715, %v11643_v10  ;;  %v4128_v38 = vmul.f32 0.7978846, %v4112_v8 }
 0xc7d   : > { %v4006_v35 = vpop.f32.mrf.mxu0 }
 0xc7e   : > { %v4113_v34 = vadd.f32 %v4097_v43, %v11634_v55  ;;  %v4082_v3 = vmul.f32 %v4066_v47, %v11643_v10  ;;  %v11652_v32 = vadd.f32 %v4006_v35, %v11597_v2  ;;  %9384 = vtanh.f32 %v4128_v38 }
 0xc7f   : > { %v11654_v57 = vpop.f32.mrf.mxu0  ;;  %v4048_v35 = vmul.f32 0.5, %v11622_v29 }
 0xc80   : > { %v4129_v23 = vmul.f32 0.7978846, %v4113_v34  ;;  %v4098_v33 = vmul.f32 %v4082_v3, %v11643_v10  ;;  %v4067_v11 = vmul.f32 0.044715, %v11652_v32 }
 0xc81   : > { %v4010_v49 = vpop.f32.mrf.mxu0 }
 0xc82   : > { %v4114_v41 = vadd.f32 %v4098_v33, %v11643_v10  ;;  %v4083_v17 = vmul.f32 %v4067_v11, %v11652_v32  ;;  %v11661_v62 = vadd.f32 %v4010_v49, %v11597_v2  ;;  %9386 = vtanh.f32 %v4129_v23 }
 0xc83   : > { %v11663_v0 = vpop.f32.mrf.mxu0  ;;  %v3989_v49 = vadd.f32 %v11617_v31, %v11608_v9  ;;  %v4050_v31 = vmul.f32 0.5, %v11643_v10 }
 0xc84   : > { %v4099_v59 = vmul.f32 %v4083_v17, %v11652_v32  ;;  %v4068_v6 = vmul.f32 0.044715, %v11661_v62  ;;  %v4130_v1 = vmul.f32 0.7978846, %v4114_v41  ;;  %v4052_v10 = vmul.f32 0.5, %v11661_v62 }
 0xc85   : > { %v4016_v19 = vpop.f32.mrf.mxu0 }
 0xc86   : > { %v4115_v53 = vadd.f32 %v4099_v59, %v11652_v32  ;;  %v4084_v54 = vmul.f32 %v4068_v6, %v11661_v62  ;;  %v11670_v13 = vadd.f32 %v4016_v19, %v11597_v2  ;;  %9388 = vtanh.f32 %v4130_v1 }
 0xc87   : > { %v9383_v56 = vpop.eup %9382  ;;  %v11672_v16 = vpop.f32.mrf.mxu0 }
 0xc88   : > { %v4131_v40 = vmul.f32 0.7978846, %v4115_v53  ;;  %v4100_v24 = vmul.f32 %v4084_v54, %v11661_v62  ;;  %v4069_v44 = vmul.f32 0.044715, %v11670_v13  ;;  %v4159_v8 = vadd.f32 1.0, %v9383_v56 }
 0xc89   : > { %v4020_v60 = vpop.f32.mrf.mxu0 }
 0xc8a   : > { %v4116_v20 = vadd.f32 %v4100_v24, %v11661_v62  ;;  %v4085_v43 = vmul.f32 %v4069_v44, %v11670_v13  ;;  %v4021_v47 = vadd.f32 %v4020_v60, %v11597_v2  ;;  %9390 = vtanh.f32 %v4131_v40 }
 0xc8b   : > { %v9385_v38 = vpop.eup %9384  ;;  %v4175_v34 = vmul.f32 %v4159_v8, %v4047_v63  ;;  %v4049_v24 = vmul.f32 0.5, %v11634_v55  ;;  %v3995_v8 = vadd.f32 %v11624_v52, %v11608_v9  ;;  %v4005_v52 = vadd.f32 %v11645_v18, %v11608_v9 }
 0xc8c   : > { %v4101_v3 = vmul.f32 %v4085_v43, %v11670_v13  ;;  %v4070_v23 = vmul.f32 0.044715, %v4021_v47  ;;  %v4160_v33 = vadd.f32 1.0, %v9385_v38  ;;  %v4132_v11 = vmul.f32 0.7978846, %v4116_v20 }
 0xc8d   : > { %v4191_v1 = vmul.f32 %v4175_v34, %v3985_v51  ;;  %v3999_v20 = vadd.f32 %v11636_v25, %v11608_v9  ;;  %v4009_v25 = vadd.f32 %v11654_v57, %v11608_v9  ;;  %v4019_v18 = vadd.f32 %v11672_v16, %v11608_v9 }
 0xc8e   : > { %v4117_v41 = vadd.f32 %v4101_v3, %v11670_v13  ;;  %v4086_v17 = vmul.f32 %v4070_v23, %v4021_v47  ;;  %v4176_v59 = vmul.f32 %v4160_v33, %v4048_v35  ;;  %9392 = vtanh.f32 %v4132_v11 }
 0xc8f   : > { %v9387_v6 = vpop.eup %9386  ;;  %v4051_v23 = vmul.f32 0.5, %v11652_v32  ;;  %v4053_v32 = vmul.f32 0.5, %v11670_v13 }
 0xc90   : > { %v4133_v29 = vmul.f32 0.7978846, %v4117_v41  ;;  %v4102_v19 = vmul.f32 %v4086_v17, %v4021_v47  ;;  %v4192_v53 = vmul.f32 %v4176_v59, %v3989_v49  ;;  %v4161_v54 = vadd.f32 1.0, %v9387_v6 }
 0xc92   : > { %v4118_v56 = vadd.f32 %v4102_v19, %v4021_v47  ;;  %v4205_v40 = vpack.c.bf16 %v4192_v53, %v4191_v1  ;;  %9394 = vtanh.f32 %v4133_v29  ;;  %v4177_v60 = vmul.f32 %v4161_v54, %v4049_v24 }
 0xc93   : > { %v9389_v15 = vpop.eup %9388  ;;  %v4054_v19 = vmul.f32 0.5, %v4021_v47  ;;  %v4015_v54 = vadd.f32 %v11663_v0, %v11608_v9 }
 0xc94   : > { %8719 = vmatprep.mubr.bf16.mxu1 %v4205_v40  ;;  %v4162_v44 = vadd.f32 1.0, %v9389_v15  ;;  %v4134_v63 = vmul.f32 0.7978846, %v4118_v56  ;;  %v4193_v35 = vmul.f32 %v4177_v60, %v3995_v8 }
 0xc96   : > { %v4178_v43 = vmul.f32 %v4162_v44, %v4050_v31  ;;  %9396 = vtanh.f32 %v4134_v63 }
 0xc97   : > { %v9391_v38 = vpop.eup %9390 }
 0xc98   : > { %v4194_v34 = vmul.f32 %v4178_v43, %v3999_v20  ;;  %v4163_v55 = vadd.f32 1.0, %v9391_v38 }
 0xc9a   : > { %v4206_v3 = vpack.c.bf16 %v4194_v34, %v4193_v35  ;;  %v4179_v51 = vmul.f32 %v4163_v55, %v4051_v23 }
 0xc9b   : > { %v9393_v33 = vpop.eup %9392 }
 0xc9c   : > { %8720 = vmatmul.mubr.bf16.gmra.mxu1 %v4206_v3  ;;  %v4164_v11 = vadd.f32 1.0, %v9393_v33  ;;  %v4195_v17 = vmul.f32 %v4179_v51, %v4005_v52 }
 0xc9e   : > { %v4180_v49 = vmul.f32 %v4164_v11, %v4052_v10 }
 0xc9f   : > { %v9395_v41 = vpop.eup %9394 }
 0xca0   : > { %v4196_v59 = vmul.f32 %v4180_v49, %v4009_v25  ;;  %v4165_v6 = vadd.f32 1.0, %v9395_v41 }
 0xca2   : > { %v4207_v1 = vpack.c.bf16 %v4196_v59, %v4195_v17  ;;  %v4181_v53 = vmul.f32 %v4165_v6, %v4053_v32 }
 0xca3   : > { %v9397_v29 = vpop.eup %9396 }
 0xca4   : > { %8723 = vmatprep.mubr.bf16.mxu1 %v4207_v1  ;;  %v4166_v62 = vadd.f32 1.0, %v9397_v29  ;;  %v4197_v56 = vmul.f32 %v4181_v53, %v4015_v54 }
 0xca6   : > { %v4182_v57 = vmul.f32 %v4166_v62, %v4054_v19 }
 0xca8   : > { %v4198_v40 = vmul.f32 %v4182_v57, %v4019_v18 }
 0xcaa   : > { %v4208_v24 = vpack.c.bf16 %v4198_v40, %v4197_v56 }
 0xcac   : > { %v4024_v15 = vpop.f32.mrf.mxu0  ;;  %8724 = vmatmul.mubr.bf16.gmra.mxu1 %v4208_v24 }
 0xcad   : > { %v4025_v56 = vadd.f32 %v4024_v15, %v11608_v9 }
 0xcae   : > { %v4026_v31 = vpop.f32.mrf.mxu0 }
 0xcaf   : > { %v4027_v13 = vadd.f32 %v4026_v31, %v11597_v2 }
 0xcb0   : > { %v4028_v44 = vpop.f32.mrf.mxu0 }
 0xcb1   : > { %v4071_v60 = vmul.f32 0.044715, %v4027_v13  ;;  %v4055_v53 = vmul.f32 0.5, %v4027_v13  ;;  %v4029_v40 = vadd.f32 %v4028_v44, %v11608_v9 }
 0xcb2   : > { %v4030_v47 = vpop.f32.mrf.mxu0 }
 0xcb3   : > { %v4087_v63 = vmul.f32 %v4071_v60, %v4027_v13  ;;  %v4031_v8 = vadd.f32 %v4030_v47, %v11597_v2 }
 0xcb4   : > { %v4034_v20 = vpop.f32.mrf.mxu0 }
 0xcb5   : > { %v4103_v0 = vmul.f32 %v4087_v63, %v4027_v13  ;;  %v4072_v43 = vmul.f32 0.044715, %v4031_v8  ;;  %v4056_v18 = vmul.f32 0.5, %v4031_v8 }
 0xcb6   : > { %v4036_v38 = vpop.f32.mrf.mxu0 }
 0xcb7   : > { %v4119_v16 = vadd.f32 %v4103_v0, %v4027_v13  ;;  %v4088_v35 = vmul.f32 %v4072_v43, %v4031_v8  ;;  %v4037_v34 = vadd.f32 %v4036_v38, %v11597_v2 }
 0xcb8   : > { %v4038_v55 = vpop.f32.mrf.mxu0 }
 0xcb9   : > { %v4135_v3 = vmul.f32 0.7978846, %v4119_v16  ;;  %v4104_v23 = vmul.f32 %v4088_v35, %v4031_v8  ;;  %v4073_v33 = vmul.f32 0.044715, %v4037_v34  ;;  %v4057_v43 = vmul.f32 0.5, %v4037_v34 }
 0xcba   : > { %v4040_v10 = vpop.f32.mrf.mxu0 }
 0xcbb   : > { %v4120_v11 = vadd.f32 %v4104_v23, %v4031_v8  ;;  %v4089_v51 = vmul.f32 %v4073_v33, %v4037_v34  ;;  %v4041_v52 = vadd.f32 %v4040_v10, %v11597_v2  ;;  %9398 = vtanh.f32 %v4135_v3  ;;  %v11712_v10 = vld [vmem:[#allocation10] ss:$0 sm:$0xff] }
 0xcbc   : > { %v4035_v8 = vadd.f32 %v4034_v20, %v11608_v9  ;;  %v4039_v3 = vadd.f32 %v4038_v55, %v11608_v9 }
 0xcbd   : > { %v4105_v25 = vmul.f32 %v4089_v51, %v4037_v34  ;;  %v4074_v49 = vmul.f32 0.044715, %v4041_v52  ;;  %v4136_v41 = vmul.f32 0.7978846, %v4120_v11  ;;  %v4058_v16 = vmul.f32 0.5, %v4041_v52 }
 0xcbf   : > { %v4121_v17 = vadd.f32 %v4105_v25, %v4037_v34  ;;  %v4090_v59 = vmul.f32 %v4074_v49, %v4041_v52  ;;  %9400 = vtanh.f32 %v4136_v41  ;;  %v11714_v34 = vstv %s8050_s2 }
 0xcc1   : > { %v4137_v6 = vmul.f32 0.7978846, %v4121_v17  ;;  %v4106_v1 = vmul.f32 %v4090_v59, %v4041_v52 }
 0xcc3   : > { %v4122_v32 = vadd.f32 %v4106_v1, %v4041_v52  ;;  %9402 = vtanh.f32 %v4137_v6 }
 0xcc5   : > { %v4138_v29 = vmul.f32 0.7978846, %v4122_v32 }
 0xcc7   : > { %9404 = vtanh.f32 %v4138_v29  ;;  %v9630_v29 = vld [vmem:[%s10112_s6] sm:$0xff] }
 0xcc8   : > { %v9399_v19 = vpop.eup %9398 }
 0xcc9   : > { %v4167_v62 = vadd.f32 1.0, %v9399_v19 }
 0xccb   : > { %v4183_v2 = vmul.f32 %v4167_v62, %v4055_v53 }
 0xccc   : > { %v9401_v54 = vpop.eup %9400 }
 0xccd   : > { %v4168_v57 = vadd.f32 1.0, %v9401_v54  ;;  %v4199_v60 = vmul.f32 %v4183_v2, %v4025_v56 }
 0xccf   : > { %v4184_v24 = vmul.f32 %v4168_v57, %v4056_v18 }
 0xcd0   : > { %v9403_v31 = vpop.eup %9402 }
 0xcd1   : > { %v4200_v47 = vmul.f32 %v4184_v24, %v4029_v40  ;;  %v4169_v63 = vadd.f32 1.0, %v9403_v31  ;;  %v9633_v40 = vld [vmem:[%s10112_s6 + $0x18] sm:$0xff] }
 0xcd3   : > { %v4209_v0 = vpack.c.bf16 %v4200_v47, %v4199_v60  ;;  %v4185_v13 = vmul.f32 %v4169_v63, %v4057_v43 }
 0xcd4   : > { %v9405_v38 = vpop.eup %9404 }
 0xcd5   : > { %8727 = vmatprep.mubr.bf16.mxu1 %v4209_v0  ;;  %v4170_v35 = vadd.f32 1.0, %v9405_v38  ;;  %v4201_v15 = vmul.f32 %v4185_v13, %v4035_v8 }
 0xcd7   : > { %v4186_v23 = vmul.f32 %v4170_v35, %v4058_v16 }
 0xcd9   : > { %v4202_v33 = vmul.f32 %v4186_v23, %v4039_v3 }
 0xcdb   : > { %v4210_v44 = vpack.c.bf16 %v4202_v33, %v4201_v15  ;;  %v9634_v15 = vld [vmem:[%s10112_s6 + $0x20] sm:$0xff] }
 0xcdd   : > { %8728 = vmatmul.mubr.bf16.gmra.mxu1 %v4210_v44 }
 0xd3a   : > { %v8717_v11 = vpop.f32.mrf.mxu1 }
 0xd3b   : > { %v4325_v51 = vadd.f32 %v8717_v11, %v11712_v10 }
 0xd3c   : > { %v4316_v52 = vpop.f32.mrf.mxu1 }
 0xd3d   : > { %v4382_v25 = vmul.f32 %v11714_v34, %v4325_v51  ;;  %v4317_v9 = vadd.f32 %v11712_v10, %v4316_v52 }
 0xd3e   : > { %v8718_v20 = vpop.f32.mrf.mxu1 }
 0xd3f   : > { %v4380_v55 = vmul.f32 %v11714_v34, %v4317_v9  ;;  %v4328_v49 = vadd.f32 %v8718_v20, %v11712_v10  ;;  %v4398_v17 = vadd.f32 %v4382_v25, %v11285_v58  ;;  %v9631_v58 = vld [vmem:[%s10112_s6 + $0x10] sm:$0xff] }
 0xd40   : > { %v4319_v41 = vpop.f32.mrf.mxu1 }
 0xd41   : > { %v4396_v59 = vadd.f32 %v4380_v55, %v11278_v27  ;;  %v4383_v6 = vmul.f32 %v11714_v34, %v4328_v49  ;;  %v4320_v1 = vadd.f32 %v11712_v10, %v4319_v41  ;;  %v11734_v18 = vadd.f32 %v9631_v58, %v4398_v17  ;;  %v9632_v27 = vld [vmem:[%s10112_s6 + $0x8] sm:$0xff]  ;;  %v9637_v55 = vld [vmem:[%s10112_s6 + $0x38] sm:$0xff] }
 0xd43   : > { %v4381_v32 = vmul.f32 %v11714_v34, %v4320_v1  ;;  %v11727_v19 = vadd.f32 %v9630_v29, %v4396_v59  ;;  %v4399_v62 = vadd.f32 %v4383_v6, %v11295_v21  ;;  %v4436_v56 = vsel %vm668_vm0, %v11734_v18, 0.0 }
 0xd45   : > { %v4397_v53 = vadd.f32 %v4381_v32, %v11288_v42  ;;  %v4430_v54 = vsel %vm668_vm0, %v11727_v19, 0.0  ;;  %v11744_v21 = vadd.f32 %v9633_v40, %v4399_v62 }
 0xd46   : > { %4431 = vadd.xlane.f32.xlu0 %v4430_v54 }
 0xd47   : > { %v11737_v57 = vadd.f32 %v9632_v27, %v4397_v53  ;;  %v4439_v42 = vsel %vm668_vm0, %v11744_v21, 0.0 }
 0xd49   : > { %v4433_v2 = vsel %vm668_vm0, %v11737_v57, 0.0 }
 0xd4a   : > { %4434 = vadd.xlane.f32.xlu1 %v4433_v2  ;;  %4437 = vadd.xlane.f32.xlu0 %v4436_v56  ;;  %v9638_v56 = vld [vmem:[%s10112_s6 + $0x40] sm:$0xff] }
 0xd4e   : > { %4440 = vadd.xlane.f32.xlu1 %v4439_v42 }
 0xd5c   : > { %v8721_v24 = vpop.f32.mrf.mxu1 }
 0xd5d   : > { %v4341_v31 = vadd.f32 %v8721_v24, %v11712_v10 }
 0xd5e   : > { %v4332_v60 = vpop.f32.mrf.mxu1 }
 0xd5f   : > { %v4386_v47 = vmul.f32 %v11714_v34, %v4341_v31  ;;  %v4333_v63 = vadd.f32 %v11712_v10, %v4332_v60 }
 0xd60   : > { %v8722_v0 = vpop.f32.mrf.mxu1 }
 0xd61   : > { %v4384_v43 = vmul.f32 %v11714_v34, %v4333_v63  ;;  %v4344_v38 = vadd.f32 %v8722_v0, %v11712_v10  ;;  %v4402_v35 = vadd.f32 %v4386_v47, %v11310_v5  ;;  %v9635_v5 = vld [vmem:[%s10112_s6 + $0x30] sm:$0xff] }
 0xd62   : > { %v4335_v16 = vpop.f32.mrf.mxu1 }
 0xd63   : > { %v4400_v13 = vadd.f32 %v4384_v43, %v11306_v28  ;;  %v4387_v8 = vmul.f32 %v11714_v34, %v4344_v38  ;;  %v4336_v3 = vadd.f32 %v11712_v10, %v4335_v16  ;;  %v11766_v52 = vadd.f32 %v9635_v5, %v4402_v35  ;;  %v9636_v28 = vld [vmem:[%s10112_s6 + $0x28] sm:$0xff]  ;;  %v9641_v43 = vld [vmem:[%s10112_s6 + $0x58] sm:$0xff] }
 0xd65   : > { %v4385_v23 = vmul.f32 %v11714_v34, %v4336_v3  ;;  %v11759_v33 = vadd.f32 %v9634_v15, %v4400_v13  ;;  %v4403_v44 = vadd.f32 %v4387_v8, %v11324_v50  ;;  %v4448_v20 = vsel %vm668_vm0, %v11766_v52, 0.0 }
 0xd67   : > { %v4401_v11 = vadd.f32 %v4385_v23, %v11318_v48  ;;  %v4442_v51 = vsel %vm668_vm0, %v11759_v33, 0.0  ;;  %v11776_v50 = vadd.f32 %v9637_v55, %v4403_v44 }
 0xd68   : > { %4443 = vadd.xlane.f32.xlu0 %v4442_v51 }
 0xd69   : > { %v11769_v25 = vadd.f32 %v9636_v28, %v4401_v11  ;;  %v4451_v6 = vsel %vm668_vm0, %v11776_v50, 0.0 }
 0xd6b   : > { %v4445_v9 = vsel %vm668_vm0, %v11769_v25, 0.0 }
 0xd6c   : > { %4446 = vadd.xlane.f32.xlu1 %v4445_v9  ;;  %4449 = vadd.xlane.f32.xlu0 %v4448_v20  ;;  %v8725_v48 = vpop.f32.mrf.mxu1  ;;  %v9642_v20 = vld [vmem:[%s10112_s6 + $0x60] sm:$0xff] }
 0xd6d   : > { %v4357_v49 = vadd.f32 %v8725_v48, %v11712_v10 }
 0xd6e   : > { %v4348_v41 = vpop.f32.mrf.mxu1 }
 0xd6f   : > { %v4390_v17 = vmul.f32 %v11714_v34, %v4357_v49  ;;  %v4349_v59 = vadd.f32 %v11712_v10, %v4348_v41 }
 0xd70   : > { %4452 = vadd.xlane.f32.xlu1 %v4451_v6  ;;  %v8726_v1 = vpop.f32.mrf.mxu1  ;;  %v9645_v6 = vld [vmem:[%s10112_s6 + $0x78] sm:$0xff] }
 0xd71   : > { %v4388_v32 = vmul.f32 %v11714_v34, %v4349_v59  ;;  %v4360_v29 = vadd.f32 %v8726_v1, %v11712_v10  ;;  %v4406_v53 = vadd.f32 %v4390_v17, %v11341_v12  ;;  %v9639_v12 = vld [vmem:[%s10112_s6 + $0x50] sm:$0xff] }
 0xd72   : > { %v4351_v62 = vpop.f32.mrf.mxu1 }
 0xd73   : > { %v4404_v54 = vadd.f32 %v4388_v32, %v11332_v26  ;;  %v4391_v58 = vmul.f32 %v11714_v34, %v4360_v29  ;;  %v4352_v27 = vadd.f32 %v11712_v10, %v4351_v62  ;;  %v11798_v60 = vadd.f32 %v9639_v12, %v4406_v53  ;;  %v9640_v26 = vld [vmem:[%s10112_s6 + $0x48] sm:$0xff] }
 0xd75   : > { %v4389_v2 = vmul.f32 %v11714_v34, %v4352_v27  ;;  %v11791_v40 = vadd.f32 %v9638_v56, %v4404_v54  ;;  %v4407_v42 = vadd.f32 %v4391_v58, %v11351_v61  ;;  %v4460_v0 = vsel %vm668_vm0, %v11798_v60, 0.0 }
 0xd77   : > { %v4405_v24 = vadd.f32 %v4389_v2, %v11344_v46  ;;  %v4454_v31 = vsel %vm668_vm0, %v11791_v40, 0.0  ;;  %v11808_v61 = vadd.f32 %v9641_v43, %v4407_v42 }
 0xd78   : > { %4455 = vadd.xlane.f32.xlu0 %v4454_v31 }
 0xd79   : > { %v11801_v47 = vadd.f32 %v9640_v26, %v4405_v24  ;;  %v4463_v46 = vsel %vm668_vm0, %v11808_v61, 0.0 }
 0xd7b   : > { %v4457_v63 = vsel %vm668_vm0, %v11801_v47, 0.0 }
 0xd7c   : > { %4458 = vadd.xlane.f32.xlu1 %v4457_v63  ;;  %4461 = vadd.xlane.f32.xlu0 %v4460_v0 }
 0xd80   : > { %4464 = vadd.xlane.f32.xlu1 %v4463_v46 }
 0xd9d   : > { %v8729_v38 = vpop.f32.mrf.mxu1 }
 0xd9e   : > { %v4373_v16 = vadd.f32 %v8729_v38, %v11712_v10 }
 0xd9f   : > { %v4364_v35 = vpop.f32.mrf.mxu1 }
 0xda0   : > { %v4394_v13 = vmul.f32 %v11714_v34, %v4373_v16  ;;  %v4365_v8 = vadd.f32 %v11712_v10, %v4364_v35 }
 0xda1   : > { %v8730_v3 = vpop.f32.mrf.mxu1 }
 0xda2   : > { %v4392_v23 = vmul.f32 %v11714_v34, %v4365_v8  ;;  %v4376_v15 = vadd.f32 %v8730_v3, %v11712_v10  ;;  %v4410_v11 = vadd.f32 %v4394_v13, %v11369_v7  ;;  %v9643_v7 = vld [vmem:[%s10112_s6 + $0x70] sm:$0xff] }
 0xda3   : > { %v4367_v44 = vpop.f32.mrf.mxu1 }
 0xda4   : > { %v4408_v51 = vadd.f32 %v4392_v23, %v11362_v4  ;;  %v4395_v5 = vmul.f32 %v11714_v34, %v4376_v15  ;;  %v4368_v28 = vadd.f32 %v11712_v10, %v4367_v44  ;;  %v11830_v17 = vadd.f32 %v9643_v7, %v4410_v11  ;;  %v9644_v4 = vld [vmem:[%s10112_s6 + $0x68] sm:$0xff]  ;;  %s13390_s6 = sld [smem:[#allocation35_spill]] }
 0xda6   : > { %v4393_v9 = vmul.f32 %v11714_v34, %v4368_v28  ;;  %v11823_v55 = vadd.f32 %v9642_v20, %v4408_v51  ;;  %v4411_v48 = vadd.f32 %v4395_v5, %v11379_v39  ;;  %13368 = vst [vmem:[#allocation22_spill] sm:$0xff] %v11830_v17  ;;  %v4472_v34 = vsel %vm668_vm0, %v11830_v17, 0.0 }
 0xda8   : > { %13367 = vst [vmem:[#allocation23_spill] sm:$0xff] %v11823_v55  ;;  %v4409_v49 = vadd.f32 %v4393_v9, %v11372_v45  ;;  %v4466_v41 = vsel %vm668_vm0, %v11823_v55, 0.0  ;;  %v11840_v39 = vadd.f32 %v9645_v6, %v4411_v48 }
 0xda9   : > { %4467 = vadd.xlane.f32.xlu0 %v4466_v41 }
 0xdaa   : > { %v11833_v59 = vadd.f32 %v9644_v4, %v4409_v49  ;;  %13370 = vst [vmem:[#allocation25_spill] sm:$0xff] %v11840_v39  ;;  %v4475_v45 = vsel %vm668_vm0, %v11840_v39, 0.0  ;;  %v9132_v49 = vld [vmem:[%s13282_s11 + $0x8] sm:$0xff]  }
 0xdab   : > { %8731 = vmatprep.subr.bf16.mxu1 %v9132_v49 }
 0xdac   : > { %13369 = vst [vmem:[#allocation24_spill] sm:$0xff] %v11833_v59  ;;  %v4469_v10 = vsel %vm668_vm0, %v11833_v59, 0.0  ;;  %8732 = vmatpush3.bf16.msra.mxu1 %v9132_v49 }
 0xdad   : > { %4470 = vadd.xlane.f32.xlu1 %v4469_v10  ;;  %4473 = vadd.xlane.f32.xlu0 %v4472_v34  ;;  %v9133_v34 = vld [vmem:[%s13282_s11] sm:$0xff]  }
 0xdae   : > { %8733 = vmatprep.subr.bf16.mxu1 %v9133_v34 }
 0xdb0   : > { %8734 = vmatpush3.bf16.msra.mxu1 %v9133_v34 }
 0xdb1   : > { %4476 = vadd.xlane.f32.xlu1 %v4475_v45  ;;  %8757 = vmatprep.subr.bf16.mxu1 %v13353_v22 }
 0xdcf   : > { %v4432_v1 = vpop.xlane.xlu0 %4431 }
 0xdd0   : > { %v4478_v32 = vmul.f32 0.03125, %v4432_v1 }
 0xdd2   : > { %v11845_v29 = vsub.f32 %v11727_v19, %v4478_v32 }
 0xdd3   : > { %v4435_v62 = vpop.xlane.xlu1 %4434  ;;  %v4438_v53 = vpop.xlane.xlu0 %4437 }
 0xdd4   : > { %v4479_v54 = vmul.f32 0.03125, %v4435_v62  ;;  %v4480_v58 = vmul.f32 0.03125, %v4438_v53  ;;  %v4510_v27 = vmul.f32 %v11845_v29, %v11845_v29 }
 0xdd6   : > { %v11850_v2 = vsub.f32 %v11737_v57, %v4479_v54  ;;  %v11853_v56 = vsub.f32 %v11734_v18, %v4480_v58  ;;  %v4526_v42 = vsel %vm668_vm0, %v4510_v27, 0.0 }
 0xdd7   : > { %v4441_v24 = vpop.xlane.xlu1 %4440  ;;  %4527 = vadd.xlane.f32.xlu0 %v4526_v42 }
 0xdd8   : > { %v4481_v31 = vmul.f32 0.03125, %v4441_v24  ;;  %v4511_v12 = vmul.f32 %v11850_v2, %v11850_v2  ;;  %v4512_v26 = vmul.f32 %v11853_v56, %v11853_v56 }
 0xdda   : > { %v11861_v63 = vsub.f32 %v11744_v21, %v4481_v31  ;;  %v4529_v0 = vsel %vm668_vm0, %v4511_v12, 0.0  ;;  %v4532_v43 = vsel %vm668_vm0, %v4512_v26, 0.0 }
 0xddb   : > { %4530 = vadd.xlane.f32.xlu1 %v4529_v0  ;;  %4533 = vadd.xlane.f32.xlu0 %v4532_v43 }
 0xddc   : > { %v4513_v46 = vmul.f32 %v11861_v63, %v11861_v63 }
 0xdde   : > { %v4535_v38 = vsel %vm668_vm0, %v4513_v46, 0.0 }
 0xddf   : > { %4536 = vadd.xlane.f32.xlu1 %v4535_v38 }
 0xdf1   : > { %v4444_v16 = vpop.xlane.xlu0 %4443 }
 0xdf2   : > { %v4482_v35 = vmul.f32 0.03125, %v4444_v16 }
 0xdf4   : > { %v11869_v13 = vsub.f32 %v11759_v33, %v4482_v35 }
 0xdf5   : > { %v4447_v8 = vpop.xlane.xlu1 %4446  ;;  %v4450_v3 = vpop.xlane.xlu0 %4449 }
 0xdf6   : > { %v4483_v23 = vmul.f32 0.03125, %v4447_v8  ;;  %v4484_v15 = vmul.f32 0.03125, %v4450_v3  ;;  %v4514_v44 = vmul.f32 %v11869_v13, %v11869_v13 }
 0xdf8   : > { %v11874_v11 = vsub.f32 %v11769_v25, %v4483_v23  ;;  %v11877_v51 = vsub.f32 %v11766_v52, %v4484_v15  ;;  %v4538_v5 = vsel %vm668_vm0, %v4514_v44, 0.0 }
 0xdf9   : > { %v4453_v28 = vpop.xlane.xlu1 %4452  ;;  %4539 = vadd.xlane.f32.xlu0 %v4538_v5 }
 0xdfa   : > { %v4485_v9 = vmul.f32 0.03125, %v4453_v28  ;;  %v4515_v20 = vmul.f32 %v11874_v11, %v11874_v11  ;;  %v4516_v48 = vmul.f32 %v11877_v51, %v11877_v51 }
 0xdfc   : > { %v11888_v41 = vsub.f32 %v11776_v50, %v4485_v9  ;;  %v4541_v7 = vsel %vm668_vm0, %v4515_v20, 0.0  ;;  %v4544_v4 = vsel %vm668_vm0, %v4516_v48, 0.0 }
 0xdfd   : > { %4542 = vadd.xlane.f32.xlu1 %v4541_v7  ;;  %4545 = vadd.xlane.f32.xlu0 %v4544_v4 }
 0xdfe   : > { %v4517_v10 = vmul.f32 %v11888_v41, %v11888_v41 }
 0xe00   : > { %v4547_v6 = vsel %vm668_vm0, %v4517_v10, 0.0 }
 0xe01   : > { %4548 = vadd.xlane.f32.xlu1 %v4547_v6  ;;  %v4456_v45 = vpop.xlane.xlu0 %4455 }
 0xe02   : > { %v4486_v1 = vmul.f32 0.03125, %v4456_v45 }
 0xe04   : > { %v11899_v32 = vsub.f32 %v11791_v40, %v4486_v1 }
 0xe05   : > { %v4459_v62 = vpop.xlane.xlu1 %4458  ;;  %v4462_v53 = vpop.xlane.xlu0 %4461 }
 0xe06   : > { %v4487_v54 = vmul.f32 0.03125, %v4459_v62  ;;  %v4488_v58 = vmul.f32 0.03125, %v4462_v53  ;;  %v4518_v27 = vmul.f32 %v11899_v32, %v11899_v32 }
 0xe08   : > { %v11905_v42 = vsub.f32 %v11801_v47, %v4487_v54  ;;  %v11908_v24 = vsub.f32 %v11798_v60, %v4488_v58  ;;  %v4550_v31 = vsel %vm668_vm0, %v4518_v27, 0.0 }
 0xe09   : > { %v4465_v12 = vpop.xlane.xlu1 %4464  ;;  %4551 = vadd.xlane.f32.xlu0 %v4550_v31 }
 0xe0a   : > { %v4489_v26 = vmul.f32 0.03125, %v4465_v12  ;;  %v4519_v0 = vmul.f32 %v11905_v42, %v11905_v42  ;;  %v4520_v43 = vmul.f32 %v11908_v24, %v11908_v24 }
 0xe0c   : > { %v11916_v46 = vsub.f32 %v11808_v61, %v4489_v26  ;;  %v4553_v38 = vsel %vm668_vm0, %v4519_v0, 0.0  ;;  %v4556_v16 = vsel %vm668_vm0, %v4520_v43, 0.0 }
 0xe0d   : > { %4554 = vadd.xlane.f32.xlu1 %v4553_v38  ;;  %4557 = vadd.xlane.f32.xlu0 %v4556_v16 }
 0xe0e   : > { %v4521_v35 = vmul.f32 %v11916_v46, %v11916_v46 }
 0xe10   : > { %v4559_v8 = vsel %vm668_vm0, %v4521_v35, 0.0 }
 0xe11   : > { %4560 = vadd.xlane.f32.xlu1 %v4559_v8 }
 0xe32   : > { %v4468_v3 = vpop.xlane.xlu0 %4467 }
 0xe33   : > { %v4490_v23 = vmul.f32 0.03125, %v4468_v3 }
 0xe35   : > { %v11924_v15 = vsub.f32 %v11823_v55, %v4490_v23 }
 0xe36   : > { %v4471_v44 = vpop.xlane.xlu1 %4470  ;;  %v4474_v5 = vpop.xlane.xlu0 %4473 }
 0xe37   : > { %v4491_v28 = vmul.f32 0.03125, %v4471_v44  ;;  %v4492_v9 = vmul.f32 0.03125, %v4474_v5  ;;  %v4522_v20 = vmul.f32 %v11924_v15, %v11924_v15  ;;  %v11951_v5 = vld [vmem:[%s13348_s17 + $0x3] ss:$0 sm:$0xff] }
 0xe39   : > { %v11929_v48 = vsub.f32 %v11833_v59, %v4491_v28  ;;  %v11932_v49 = vsub.f32 %v11830_v17, %v4492_v9  ;;  %v4562_v7 = vsel %vm668_vm0, %v4522_v20, 0.0 }
 0xe3a   : > { %v4477_v4 = vpop.xlane.xlu1 %4476  ;;  %4563 = vadd.xlane.f32.xlu0 %v4562_v7 }
 0xe3b   : > { %v4493_v10 = vmul.f32 0.03125, %v4477_v4  ;;  %v4523_v34 = vmul.f32 %v11929_v48, %v11929_v48  ;;  %v4524_v6 = vmul.f32 %v11932_v49, %v11932_v49  ;;  %v11958_v4 = vld [vmem:[%s13274_s3 + $0x3] ss:$0 sm:$0xff] }
 0xe3d   : > { %v11940_v45 = vsub.f32 %v11840_v39, %v4493_v10  ;;  %v4565_v1 = vsel %vm668_vm0, %v4523_v34, 0.0  ;;  %v4568_v62 = vsel %vm668_vm0, %v4524_v6, 0.0 }
 0xe3e   : > { %4566 = vadd.xlane.f32.xlu1 %v4565_v1  ;;  %4569 = vadd.xlane.f32.xlu0 %v4568_v62 }
 0xe3f   : > { %v4525_v53 = vmul.f32 %v11940_v45, %v11940_v45 }
 0xe41   : > { %v4571_v54 = vsel %vm668_vm0, %v4525_v53, 0.0 }
 0xe42   : > { %4572 = vadd.xlane.f32.xlu1 %v4571_v54 }
 0xe60   : > { %v4528_v58 = vpop.xlane.xlu0 %4527 }
 0xe61   : > { %v4574_v27 = vmul.f32 0.03125, %v4528_v58 }
 0xe63   : > { %v4590_v31 = vadd.f32 1e-05, %v4574_v27 }
 0xe64   : > { %v4531_v12 = vpop.xlane.xlu1 %4530  ;;  %v4534_v26 = vpop.xlane.xlu0 %4533 }
 0xe65   : > { %9406 = vrsqrt.f32 %v4590_v31  ;;  %v4575_v0 = vmul.f32 0.03125, %v4531_v12  ;;  %v4576_v43 = vmul.f32 0.03125, %v4534_v26 }
 0xe67   : > { %v4591_v38 = vadd.f32 1e-05, %v4575_v0  ;;  %v4592_v16 = vadd.f32 1e-05, %v4576_v43 }
 0xe68   : > { %v4537_v35 = vpop.xlane.xlu1 %4536 }
 0xe69   : > { %9408 = vrsqrt.f32 %v4591_v38  ;;  %v4577_v8 = vmul.f32 0.03125, %v4537_v35 }
 0xe6a   : > { %9410 = vrsqrt.f32 %v4592_v16 }
 0xe6b   : > { %v4593_v3 = vadd.f32 1e-05, %v4577_v8 }
 0xe6d   : > { %9412 = vrsqrt.f32 %v4593_v3 }
 0xe72   : > { %v9407_v23 = vpop.eup %9406 }
 0xe73   : > { %v4622_v44 = vmul.f32 %v9407_v23, %v11845_v29 }
 0xe75   : > { %v4642_v7 = vmul.f32 %v11951_v5, %v4622_v44 }
 0xe76   : > { %v9409_v28 = vpop.eup %9408 }
 0xe77   : > { %v9411_v9 = vpop.eup %9410  ;;  %v4623_v20 = vmul.f32 %v9409_v28, %v11850_v2  ;;  %v4662_v62 = vadd.f32 %v11958_v4, %v4642_v7 }
 0xe78   : > { %v4624_v10 = vmul.f32 %v9411_v9, %v11853_v56 }
 0xe79   : > { %v4643_v29 = vmul.f32 %v11951_v5, %v4623_v20 }
 0xe7a   : > { %v9413_v34 = vpop.eup %9412  ;;  %v4644_v6 = vmul.f32 %v11951_v5, %v4624_v10 }
 0xe7b   : > { %v4625_v1 = vmul.f32 %v9413_v34, %v11861_v63  ;;  %v4663_v2 = vadd.f32 %v11958_v4, %v4643_v29 }
 0xe7c   : > { %v4664_v58 = vadd.f32 %v11958_v4, %v4644_v6 }
 0xe7d   : > { %v4645_v53 = vmul.f32 %v11951_v5, %v4625_v1  ;;  %v4678_v54 = vpack.c.bf16 %v4663_v2, %v4662_v62 }
 0xe7f   : > { %v4665_v27 = vadd.f32 %v11958_v4, %v4645_v53  ;;  %8735 = vmatprep.mubr.msk.bf16.mxu1 %vm668_vm0, %v4678_v54 }
 0xe81   : > { %v4679_v56 = vpack.c.bf16 %v4665_v27, %v4664_v58 }
 0xe82   : > { %v4540_v31 = vpop.xlane.xlu0 %4539 }
 0xe83   : > { %v4578_v12 = vmul.f32 0.03125, %v4540_v31  ;;  %8736 = vmatmul.mubr.msk.bf16.vlgmr.msra.gmra.mxu1 %vm668_vm0, %v4679_v56 }
 0xe85   : > { %v4594_v26 = vadd.f32 1e-05, %v4578_v12 }
 0xe86   : > { %v4543_v63 = vpop.xlane.xlu1 %4542  ;;  %v4546_v0 = vpop.xlane.xlu0 %4545 }
 0xe87   : > { %9414 = vrsqrt.f32 %v4594_v26  ;;  %v4579_v43 = vmul.f32 0.03125, %v4543_v63  ;;  %v4580_v38 = vmul.f32 0.03125, %v4546_v0 }
 0xe89   : > { %v4595_v16 = vadd.f32 1e-05, %v4579_v43  ;;  %v4596_v35 = vadd.f32 1e-05, %v4580_v38 }
 0xe8a   : > { %v4549_v8 = vpop.xlane.xlu1 %4548 }
 0xe8b   : > { %9416 = vrsqrt.f32 %v4595_v16  ;;  %v4581_v3 = vmul.f32 0.03125, %v4549_v8 }
 0xe8c   : > { %9418 = vrsqrt.f32 %v4596_v35 }
 0xe8d   : > { %v4597_v23 = vadd.f32 1e-05, %v4581_v3 }
 0xe8f   : > { %9420 = vrsqrt.f32 %v4597_v23 }
 0xe92   : > { %v4552_v44 = vpop.xlane.xlu0 %4551 }
 0xe93   : > { %v4582_v28 = vmul.f32 0.03125, %v4552_v44 }
 0xe94   : > { %v9415_v9 = vpop.eup %9414 }
 0xe95   : > { %v4598_v20 = vadd.f32 1e-05, %v4582_v28  ;;  %v4626_v7 = vmul.f32 %v9415_v9, %v11869_v13 }
 0xe96   : > { %v4555_v10 = vpop.xlane.xlu1 %4554  ;;  %v4558_v29 = vpop.xlane.xlu0 %4557 }
 0xe97   : > { %9422 = vrsqrt.f32 %v4598_v20  ;;  %v4583_v34 = vmul.f32 0.03125, %v4555_v10  ;;  %v4584_v6 = vmul.f32 0.03125, %v4558_v29  ;;  %v4646_v62 = vmul.f32 %v11951_v5, %v4626_v7 }
 0xe98   : > { %v9417_v1 = vpop.eup %9416 }
 0xe99   : > { %v9419_v2 = vpop.eup %9418  ;;  %v4599_v53 = vadd.f32 1e-05, %v4583_v34  ;;  %v4600_v54 = vadd.f32 1e-05, %v4584_v6  ;;  %v4627_v58 = vmul.f32 %v9417_v1, %v11874_v11  ;;  %v4666_v26 = vadd.f32 %v11958_v4, %v4646_v62 }
 0xe9a   : > { %v4628_v27 = vmul.f32 %v9419_v2, %v11877_v51  ;;  %v4561_v56 = vpop.xlane.xlu1 %4560 }
 0xe9b   : > { %9424 = vrsqrt.f32 %v4599_v53  ;;  %v4585_v31 = vmul.f32 0.03125, %v4561_v56  ;;  %v4647_v13 = vmul.f32 %v11951_v5, %v4627_v58 }
 0xe9c   : > { %v9421_v12 = vpop.eup %9420  ;;  %9426 = vrsqrt.f32 %v4600_v54  ;;  %v4648_v38 = vmul.f32 %v11951_v5, %v4628_v27 }
 0xe9d   : > { %v4629_v63 = vmul.f32 %v9421_v12, %v11888_v41  ;;  %v4601_v0 = vadd.f32 1e-05, %v4585_v31  ;;  %v4667_v43 = vadd.f32 %v11958_v4, %v4647_v13 }
 0xe9e   : > { %v4668_v16 = vadd.f32 %v11958_v4, %v4648_v38 }
 0xe9f   : > { %9428 = vrsqrt.f32 %v4601_v0  ;;  %v4680_v11 = vpack.c.bf16 %v4667_v43, %v4666_v26  ;;  %v4649_v51 = vmul.f32 %v11951_v5, %v4629_v63 }
 0xea1   : > { %8739 = vmatprep.mubr.msk.bf16.mxu1 %vm668_vm0, %v4680_v11  ;;  %v4669_v35 = vadd.f32 %v11958_v4, %v4649_v51 }
 0xea3   : > { %v4681_v8 = vpack.c.bf16 %v4669_v35, %v4668_v16 }
 0xea4   : > { %v9423_v3 = vpop.eup %9422 }
 0xea5   : > { %8740 = vmatmul.mubr.msk.bf16.gmra.mxu1 %vm668_vm0, %v4681_v8  ;;  %v4630_v41 = vmul.f32 %v9423_v3, %v11899_v32 }
 0xea7   : > { %v4650_v9 = vmul.f32 %v11951_v5, %v4630_v41 }
 0xea8   : > { %v9425_v23 = vpop.eup %9424 }
 0xea9   : > { %v9427_v44 = vpop.eup %9426  ;;  %v4631_v28 = vmul.f32 %v9425_v23, %v11905_v42  ;;  %v4670_v34 = vadd.f32 %v11958_v4, %v4650_v9 }
 0xeaa   : > { %v4632_v20 = vmul.f32 %v9427_v44, %v11908_v24 }
 0xeab   : > { %v4651_v7 = vmul.f32 %v11951_v5, %v4631_v28 }
 0xeac   : > { %v9429_v10 = vpop.eup %9428  ;;  %v4652_v1 = vmul.f32 %v11951_v5, %v4632_v20 }
 0xead   : > { %v4633_v29 = vmul.f32 %v9429_v10, %v11916_v46  ;;  %v4671_v6 = vadd.f32 %v11958_v4, %v4651_v7 }
 0xeae   : > { %v4672_v42 = vadd.f32 %v11958_v4, %v4652_v1 }
 0xeaf   : > { %v4682_v32 = vpack.c.bf16 %v4671_v6, %v4670_v34  ;;  %v4653_v62 = vmul.f32 %v11951_v5, %v4633_v29 }
 0xeb1   : > { %8743 = vmatprep.mubr.msk.bf16.mxu1 %vm668_vm0, %v4682_v32  ;;  %v4673_v24 = vadd.f32 %v11958_v4, %v4653_v62 }
 0xeb3   : > { %v4683_v2 = vpack.c.bf16 %v4673_v24, %v4672_v42 }
 0xeb5   : > { %8744 = vmatmul.mubr.msk.bf16.gmra.mxu1 %vm668_vm0, %v4683_v2 }
 0xec3   : > { %v4564_v53 = vpop.xlane.xlu0 %4563 }
 0xec4   : > { %v4586_v46 = vmul.f32 0.03125, %v4564_v53 }
 0xec6   : > { %v4602_v54 = vadd.f32 1e-05, %v4586_v46 }
 0xec7   : > { %v4567_v58 = vpop.xlane.xlu1 %4566  ;;  %v4570_v27 = vpop.xlane.xlu0 %4569 }
 0xec8   : > { %9430 = vrsqrt.f32 %v4602_v54  ;;  %v4587_v56 = vmul.f32 0.03125, %v4567_v58  ;;  %v4588_v31 = vmul.f32 0.03125, %v4570_v27 }
 0xeca   : > { %v4603_v13 = vadd.f32 1e-05, %v4587_v56  ;;  %v4604_v12 = vadd.f32 1e-05, %v4588_v31 }
 0xecb   : > { %v4573_v26 = vpop.xlane.xlu1 %4572 }
 0xecc   : > { %9432 = vrsqrt.f32 %v4603_v13  ;;  %v4589_v63 = vmul.f32 0.03125, %v4573_v26 }
 0xecd   : > { %9434 = vrsqrt.f32 %v4604_v12 }
 0xece   : > { %v4605_v0 = vadd.f32 1e-05, %v4589_v63 }
 0xed0   : > { %9436 = vrsqrt.f32 %v4605_v0 }
 0xed5   : > { %v9431_v43 = vpop.eup %9430 }
 0xed6   : > { %v4634_v38 = vmul.f32 %v9431_v43, %v11924_v15 }
 0xed8   : > { %v4654_v35 = vmul.f32 %v11951_v5, %v4634_v38 }
 0xed9   : > { %v9433_v11 = vpop.eup %9432 }
 0xeda   : > { %v9435_v51 = vpop.eup %9434  ;;  %v4635_v16 = vmul.f32 %v9433_v11, %v11929_v48  ;;  %v4674_v44 = vadd.f32 %v11958_v4, %v4654_v35 }
 0xedb   : > { %v4636_v8 = vmul.f32 %v9435_v51, %v11932_v49 }
 0xedc   : > { %v4655_v3 = vmul.f32 %v11951_v5, %v4635_v16 }
 0xedd   : > { %v9437_v41 = vpop.eup %9436  ;;  %v4656_v9 = vmul.f32 %v11951_v5, %v4636_v8 }
 0xede   : > { %v4637_v23 = vmul.f32 %v9437_v41, %v11940_v45  ;;  %v4675_v28 = vadd.f32 %v11958_v4, %v4655_v3 }
 0xedf   : > { %v4676_v48 = vadd.f32 %v11958_v4, %v4656_v9 }
 0xee0   : > { %v4684_v15 = vpack.c.bf16 %v4675_v28, %v4674_v44  ;;  %v4657_v20 = vmul.f32 %v11951_v5, %v4637_v23 }
 0xee2   : > { %8747 = vmatprep.mubr.msk.bf16.mxu1 %vm668_vm0, %v4684_v15  ;;  %v4677_v49 = vadd.f32 %v11958_v4, %v4657_v20 }
 0xee4   : > { %v4685_v7 = vpack.c.bf16 %v4677_v49, %v4676_v48 }
 0xee6   : > { %8748 = vmatmul.mubr.msk.bf16.gmra.mxu1 %vm668_vm0, %v4685_v7 }
 0xee7   : > { %8759 = vmatprep.mubr.msk.bf16.mxu1 %vm9849_vm1, %v13353_v22 }
 0xf43   : > { %v8737_v45 = vpop.f32.mrf.mxu1 }
 0xf44   : > { %v4825_v34 = vmul.f32 0.25, %v8737_v45 }
 0xf45   : > { %v4760_v10 = vpop.f32.mrf.mxu1 }
 0xf46   : > { %v4823_v32 = vmul.f32 0.25, %v4760_v10 }
 0xf47   : > { %v8738_v29 = vpop.f32.mrf.mxu1 }
 0xf48   : > { %v4826_v6 = vmul.f32 0.25, %v8738_v29  ;;  %v12015_v1 = vpack.c.bf16 %v8738_v29, %v8737_v45 }
 0xf49   : > { %v4763_v5 = vpop.f32.mrf.mxu1 }
 0xf4a   : > { %v12017_v62 = vpack.c.bf16 %v4826_v6, %v4825_v34  ;;  %v4824_v42 = vmul.f32 0.25, %v4763_v5  ;;  %v12019_v24 = vpack.c.bf16 %v4763_v5, %v4760_v10  ;;  %4906 = vrot.lane.b32.xlu1 %v12015_v1, %s9850_s21 }
 0xf4c   : > { %v12023_v4 = vpack.c.bf16 %v4824_v42, %v4823_v32  ;;  %4856 = vrot.lane.b32.xlu0 %v12019_v24, %s9850_s21 }
 0xf65   : > { %v8741_v2 = vpop.f32.mrf.mxu1 }
 0xf66   : > { %v4829_v54 = vmul.f32 0.25, %v8741_v2 }
 0xf67   : > { %v4776_v53 = vpop.f32.mrf.mxu1 }
 0xf68   : > { %v4827_v56 = vmul.f32 0.25, %v4776_v53 }
 0xf69   : > { %v8742_v46 = vpop.f32.mrf.mxu1 }
 0xf6a   : > { %v4830_v58 = vmul.f32 0.25, %v8742_v46  ;;  %v12035_v63 = vpack.c.bf16 %v8742_v46, %v8741_v2 }
 0xf6b   : > { %v4779_v27 = vpop.f32.mrf.mxu1 }
 0xf6c   : > { %v12027_v31 = vpack.c.bf16 %v4830_v58, %v4829_v54  ;;  %v4828_v13 = vmul.f32 0.25, %v4779_v27  ;;  %v12029_v12 = vpack.c.bf16 %v4779_v27, %v4776_v53 }
 0xf6e   : > { %v12031_v26 = vpack.c.bf16 %v4828_v13, %v4827_v56  ;;  %4956 = vrot.lane.b32.xlu1 %v12029_v12, %s9850_s21 }
 0xf72   : > { %5006 = vrot.lane.b32.xlu1 %v12035_v63, %s9850_s21 }
 0xf75   : > { %v8745_v0 = vpop.f32.mrf.mxu1 }
 0xf76   : > { %v4833_v11 = vmul.f32 0.25, %v8745_v0 }
 0xf77   : > { %v4792_v43 = vpop.f32.mrf.mxu1 }
 0xf78   : > { %v4831_v8 = vmul.f32 0.25, %v4792_v43 }
 0xf79   : > { %v8746_v38 = vpop.f32.mrf.mxu1 }
 0xf7a   : > { %v4834_v51 = vmul.f32 0.25, %v8746_v38  ;;  %v12039_v16 = vpack.c.bf16 %v8746_v38, %v8745_v0 }
 0xf7b   : > { %v4795_v35 = vpop.f32.mrf.mxu1 }
 0xf7c   : > { %v12041_v3 = vpack.c.bf16 %v4834_v51, %v4833_v11  ;;  %v4832_v41 = vmul.f32 0.25, %v4795_v35  ;;  %v12043_v23 = vpack.c.bf16 %v4795_v35, %v4792_v43  ;;  %5106 = vrot.lane.b32.xlu1 %v12039_v16, %s9850_s21 }
 0xf7e   : > { %v12047_v44 = vpack.c.bf16 %v4832_v41, %v4831_v8  ;;  %5056 = vrot.lane.b32.xlu0 %v12043_v23, %s9850_s21 }
 0xfa6   : > { %v8749_v28 = vpop.f32.mrf.mxu1 }
 0xfa7   : > { %v4837_v20 = vmul.f32 0.25, %v8749_v28 }
 0xfa8   : > { %v4808_v9 = vpop.f32.mrf.mxu1 }
 0xfa9   : > { %v4835_v11 = vmul.f32 0.25, %v4808_v9 }
 0xfaa   : > { %v8750_v15 = vpop.f32.mrf.mxu1 }
 0xfab   : > { %v4838_v48 = vmul.f32 0.25, %v8750_v15  ;;  %v12051_v49 = vpack.c.bf16 %v8750_v15, %v8749_v28 }
 0xfac   : > { %v4811_v7 = vpop.f32.mrf.mxu1 }
 0xfad   : > { %v12053_v45 = vpack.c.bf16 %v4838_v48, %v4837_v20  ;;  %v12055_v10 = vpack.c.bf16 %v4811_v7, %v4808_v9  ;;  %5206 = vrot.lane.b32.xlu1 %v12051_v49, %s9850_s21  ;;  %v4836_v38 = vmul.f32 0.25, %v4811_v7 }
 0xfaf   : > { %5156 = vrot.lane.b32.xlu0 %v12055_v10, %s9850_s21  ;;  %v12101_v51 = vpack.c.bf16 %v4836_v38, %v4835_v11  ;;  %s13221_s21 = scalar_lea.hbm %s13390_s6, %s8234_s22 }
 0xfbc   : > { %v4907_v29 = vpop.permute.xlu1 %4906 }
 0xfbd   : > { %v4912_v34 = vsel %vm1348_vm2, %v4907_v29, 0 }
 0xfbe   : > { %8758 = vmatpush3.bf16.xpose.msra.mxu1 %v4912_v34  ;;  %v4857_v6 = vpop.permute.xlu0 %4856 }
 0xfbf   : > { %v4862_v5 = vsel %vm1348_vm2, %v4857_v6, 0  ;;  %8769 = vmatprep.subr.bf16.mxu1 %v13353_v22 }
 0xfc0   : > { %8752 = vmatpush3.bf16.xpose.msra.mxu0 %v4862_v5 }
 0xfc1   : > { %8763 = vmatprep.subr.bf16.mxu0 %v13353_v22 }
 0xfc5   : > { %8760 = vmatmul.mubr.msk.bf16.vlgmr.msra.gmra.mxu1 %vm1348_vm2, %v12017_v62 }
 0xfc6   : > { %8771 = vmatprep.mubr.msk.bf16.mxu1 %vm9849_vm1, %v13353_v22 }
 0xfc7   : > { %8754 = vmatmul.mubr.msk.bf16.vlgmr.msra.gmra.mxu0 %vm1348_vm2, %v12023_v4 }
 0xfc8   : > { %8765 = vmatprep.mubr.msk.bf16.mxu0 %vm9849_vm1, %v13353_v22 }
 0xfe0   : > { %v4957_v32 = vpop.permute.xlu1 %4956 }
 0xfe1   : > { %v4962_v42 = vsel %vm1348_vm2, %v4957_v32, 0 }
 0xfe2   : > { %8764 = vmatpush3.bf16.xpose.msra.mxu0 %v4962_v42 }
 0xfe3   : > { %8775 = vmatprep.subr.bf16.mxu0 %v13353_v22 }
 0xfe4   : > { %v5007_v2 = vpop.permute.xlu1 %5006 }
 0xfe5   : > { %v5012_v53 = vsel %vm1348_vm2, %v5007_v2, 0 }
 0xfe6   : > { %8770 = vmatpush3.bf16.xpose.msra.mxu1 %v5012_v53 }
 0xfe7   : > { %8781 = vmatprep.subr.bf16.mxu1 %v13353_v22 }
 0xfe9   : > { %8766 = vmatmul.mubr.msk.bf16.vlgmr.msra.gmra.mxu0 %vm1348_vm2, %v12031_v26 }
 0xfea   : > { %8777 = vmatprep.mubr.msk.bf16.mxu0 %vm9849_vm1, %v13353_v22 }
 0xfed   : > { %8772 = vmatmul.mubr.msk.bf16.vlgmr.msra.gmra.mxu1 %vm1348_vm2, %v12027_v31 }
 0xfee   : > { %v5107_v46 = vpop.permute.xlu1 %5106  ;;  %8783 = vmatprep.mubr.msk.bf16.mxu1 %vm9849_vm1, %v13353_v22 }
 0xfef   : > { %v5112_v54 = vsel %vm1348_vm2, %v5107_v46, 0 }
 0xff0   : > { %8782 = vmatpush3.bf16.xpose.msra.mxu1 %v5112_v54  ;;  %v5057_v58 = vpop.permute.xlu0 %5056 }
 0xff1   : > { %v5062_v27 = vsel %vm1348_vm2, %v5057_v58, 0  ;;  %8793 = vmatprep.subr.bf16.mxu1 %v13353_v22 }
 0xff2   : > { %8776 = vmatpush3.bf16.xpose.msra.mxu0 %v5062_v27 }
 0xff3   : > { %8787 = vmatprep.subr.bf16.mxu0 %v13353_v22 }
 0xff7   : > { %8784 = vmatmul.mubr.msk.bf16.vlgmr.msra.gmra.mxu1 %vm1348_vm2, %v12041_v3 }
 0xff8   : > { %8795 = vmatprep.mubr.msk.bf16.mxu1 %vm9849_vm1, %v13353_v22 }
 0xff9   : > { %8778 = vmatmul.mubr.msk.bf16.vlgmr.msra.gmra.mxu0 %vm1348_vm2, %v12047_v44 }
 0xffa   : > { %8789 = vmatprep.mubr.msk.bf16.mxu0 %vm9849_vm1, %v13353_v22 }
0x101f   : > { %v5207_v56 = vpop.permute.xlu1 %5206 }
0x1020   : > { %v5212_v13 = vsel %vm1348_vm2, %v5207_v56, 0 }
0x1021   : > { %8794 = vmatpush3.bf16.xpose.msra.mxu1 %v5212_v13  ;;  %v5157_v0 = vpop.permute.xlu0 %5156 }
0x1022   : > { %v5162_v43 = vsel %vm1348_vm2, %v5157_v0, 0  ;;  %8805 = vmatprep.subr.bf16.mxu1 %v13353_v22 }
0x1023   : > { %8788 = vmatpush3.bf16.xpose.msra.mxu0 %v5162_v43 }
0x1024   : > { %8799 = vmatprep.subr.bf16.mxu0 %v13353_v22 }
0x1028   : > { %8796 = vmatmul.mubr.msk.bf16.vlgmr.msra.gmra.mxu1 %vm1348_vm2, %v12053_v45 }
0x1029   : > { %8807 = vmatprep.mubr.msk.bf16.mxu1 %vm9849_vm1, %v13353_v22 }
0x102a   : > { %8790 = vmatmul.mubr.msk.bf16.vlgmr.msra.gmra.mxu0 %vm1348_vm2, %v12101_v51 }
0x102b   : > { %8801 = vmatprep.mubr.msk.bf16.mxu0 %vm9849_vm1, %v13353_v22 }
0x1085   : > { %v12111_v35 = vpop.f32.mrf.mxu1 }
0x1086   : > { %v5261_v8 = vsel %vm1348_vm2, %v12111_v35, -inf }
0x1087   : > { %v8761_v41 = vpop.f32.mrf.mxu1  ;;  %5262 = vmax.xlane.f32.xlu0 %v5261_v8  ;;  %v12115_v28 = vpop.f32.mrf.mxu0 }
0x1088   : > { %v5255_v20 = vsel %vm1348_vm2, %v12115_v28, -inf }
0x1089   : > { %v8755_v9 = vpop.f32.mrf.mxu0  ;;  %v12117_v15 = vpop.f32.mrf.mxu1 }
0x108a   : > { %v5264_v6 = vsel %vm1348_vm2, %v12117_v15, -inf }
0x108b   : > { %v8762_v48 = vpop.f32.mrf.mxu1  ;;  %5256 = vmax.xlane.f32.xlu0 %v5255_v20  ;;  %v12121_v7 = vpop.f32.mrf.mxu0 }
0x108c   : > { %v5258_v29 = vsel %vm1348_vm2, %v12121_v7, -inf }
0x108d   : > { %5259 = vmax.xlane.f32.xlu1 %v5258_v29  ;;  %v8756_v34 = vpop.f32.mrf.mxu0 }
0x108f   : > { %5265 = vmax.xlane.f32.xlu0 %v5264_v6 }
0x10a9   : > { %v12127_v5 = vpop.f32.mrf.mxu0 }
0x10aa   : > { %v5267_v56 = vsel %vm1348_vm2, %v12127_v5, -inf }
0x10ab   : > { %v8767_v32 = vpop.f32.mrf.mxu0 }
0x10ad   : > { %v12129_v42 = vpop.f32.mrf.mxu0  ;;  %v12131_v2 = vpop.f32.mrf.mxu1 }
0x10ae   : > { %v5273_v53 = vsel %vm1348_vm2, %v12131_v2, -inf  ;;  %v5270_v0 = vsel %vm1348_vm2, %v12129_v42, -inf }
0x10af   : > { %v8773_v46 = vpop.f32.mrf.mxu1  ;;  %5274 = vmax.xlane.f32.xlu0 %v5273_v53  ;;  %v8768_v54 = vpop.f32.mrf.mxu0 }
0x10b1   : > { %v12135_v58 = vpop.f32.mrf.mxu1 }
0x10b2   : > { %v5276_v27 = vsel %vm1348_vm2, %v12135_v58, -inf }
0x10b3   : > { %v8774_v13 = vpop.f32.mrf.mxu1  ;;  %5277 = vmax.xlane.f32.xlu1 %v5276_v27  ;;  %5268 = vmax.xlane.f32.xlu0 %v5267_v56 }
0x10b7   : > { %v12143_v43 = vpop.f32.mrf.mxu1  ;;  %5271 = vmax.xlane.f32.xlu1 %v5270_v0 }
0x10b8   : > { %v5285_v38 = vsel %vm1348_vm2, %v12143_v43, -inf }
0x10b9   : > { %v8785_v11 = vpop.f32.mrf.mxu1  ;;  %5286 = vmax.xlane.f32.xlu0 %v5285_v38  ;;  %v12147_v8 = vpop.f32.mrf.mxu0 }
0x10ba   : > { %v5279_v48 = vsel %vm1348_vm2, %v12147_v8, -inf }
0x10bb   : > { %v8779_v41 = vpop.f32.mrf.mxu0  ;;  %v12149_v9 = vpop.f32.mrf.mxu1 }
0x10bc   : > { %v5288_v20 = vsel %vm1348_vm2, %v12149_v9, -inf }
0x10bd   : > { %v8786_v29 = vpop.f32.mrf.mxu1  ;;  %5289 = vmax.xlane.f32.xlu1 %v5288_v20  ;;  %5280 = vmax.xlane.f32.xlu0 %v5279_v48  ;;  %v12155_v34 = vpop.f32.mrf.mxu0 }
0x10be   : > { %v5282_v32 = vsel %vm1348_vm2, %v12155_v34, -inf }
0x10bf   : > { %v8780_v6 = vpop.f32.mrf.mxu0 }
0x10c1   : > { %5283 = vmax.xlane.f32.xlu1 %v5282_v32 }
0x10d2   : > { %5486 = vrot.lane.b32.xlu1 %v12015_v1, %s9851_s23 }
0x10d6   : > { %5533 = vrot.lane.b32.xlu1 %v12029_v12, %s9851_s23 }
0x10da   : > { %5580 = vrot.lane.b32.xlu1 %v12035_v63, %s9851_s23 }
0x10e8   : > { %v12165_v53 = vpop.f32.mrf.mxu1 }
0x10e9   : > { %v5297_v46 = vsel %vm1348_vm2, %v12165_v53, -inf }
0x10ea   : > { %v8797_v54 = vpop.f32.mrf.mxu1  ;;  %5298 = vmax.xlane.f32.xlu0 %v5297_v46  ;;  %v12169_v27 = vpop.f32.mrf.mxu0 }
0x10eb   : > { %v5291_v0 = vsel %vm1348_vm2, %v12169_v27, -inf }
0x10ec   : > { %v8791_v56 = vpop.f32.mrf.mxu0  ;;  %v12171_v13 = vpop.f32.mrf.mxu1 }
0x10ed   : > { %v5300_v20 = vsel %vm1348_vm2, %v12171_v13, -inf }
0x10ee   : > { %v8798_v38 = vpop.f32.mrf.mxu1  ;;  %5292 = vmax.xlane.f32.xlu0 %v5291_v0  ;;  %v12175_v11 = vpop.f32.mrf.mxu0 }
0x10ef   : > { %v5294_v48 = vsel %vm1348_vm2, %v12175_v11, -inf }
0x10f0   : > { %v8792_v41 = vpop.f32.mrf.mxu0 }
0x10fe   : > { %5301 = vmax.xlane.f32.xlu1 %v5300_v20 }
0x1102   : > { %5295 = vmax.xlane.f32.xlu1 %v5294_v48 }
0x1104   : > { %5439 = vrot.lane.b32.xlu0 %v12019_v24, %s9851_s23 }
0x1108   : > { %5627 = vrot.lane.b32.xlu0 %v12043_v23, %s9851_s23 }
0x110c   : > { %5721 = vrot.lane.b32.xlu0 %v12055_v10, %s9851_s23 }
0x1110   : > { %v5263_v29 = vpop.xlane.xlu0 %5262 }
0x1111   : > { %v5305_v6 = vsub.f32 %v12111_v35, %v5263_v29 }
0x1113   : > { %5674 = vrot.lane.b32.xlu1 %v12039_v16, %s9851_s23  ;;  %v5323_v46 = vmul.f32 1.442695, %v5305_v6 }
0x1114   : > { %v5257_v32 = vpop.xlane.xlu0 %5256 }
0x1115   : > { %v5303_v54 = vsub.f32 %v12115_v28, %v5257_v32  ;;  %9438 = vpow2.f32 %v5323_v46 }
0x1116   : > { %v5260_v41 = vpop.xlane.xlu1 %5259 }
0x1117   : > { %5768 = vrot.lane.b32.xlu1 %v12051_v49, %s9851_s23  ;;  %v5319_v56 = vmul.f32 1.442695, %v5303_v54  ;;  %v5304_v20 = vsub.f32 %v12121_v7, %v5260_v41  ;;  %s9763_s23 = scalar_lea.vmem %s13223_s26, 2048 }
0x1118   : > { %v5266_v0 = vpop.xlane.xlu0 %5265  ;;  %p9764_p12 = scmp.ne.s32.totalorder %s13223_s26, %s9763_s23 }
0x1119   : > { %9440 = vpow2.f32 %v5319_v56  ;;  %v5306_v38 = vsub.f32 %v12117_v15, %v5266_v0  ;;  %v5321_v29 = vmul.f32 1.442695, %v5304_v20 }
0x111a   : > { %p9765_p13 = pnand %p9764_p12, %p13391_p10 }
0x111b   : > { %v5325_v35 = vmul.f32 1.442695, %v5306_v38 }
0x111c   : > { %p9766_p9 = pneg %p9765_p13 }
0x111d   : > { %9442 = vpow2.f32 %v5325_v35 }
0x111e   : > { %9444 = vpow2.f32 %v5321_v29 }
0x1122   : > { %v12195_v48 = vpop.eup %9438 }
0x1123   : > { %v5357_v28 = vsel %vm1348_vm2, %v12195_v48, 0.0 }
0x1126   : > { %v12199_v6 = vpop.eup %9440 }
0x1127   : > { %v5351_v32 = vsel %vm1348_vm2, %v12199_v6, 0.0 }
0x112a   : > { %v12203_v15 = vpop.eup %9442 }
0x112b   : > { %5358 = vadd.xlane.f32.xlu0 %v5357_v28  ;;  %v5360_v54 = vsel %vm1348_vm2, %v12203_v15, 0.0  ;;  %v12208_v56 = vpop.eup %9444 }
0x112c   : > { %v5354_v29 = vsel %vm1348_vm2, %v12208_v56, 0.0 }
0x112f   : > { %5352 = vadd.xlane.f32.xlu0 %v5351_v32 }
0x1138   : > { %v5275_v46 = vpop.xlane.xlu0 %5274 }
0x1139   : > { %v5309_v7 = vsub.f32 %v12131_v2, %v5275_v46 }
0x113b   : > { %v5331_v0 = vmul.f32 1.442695, %v5309_v7  ;;  %5361 = vadd.xlane.f32.xlu1 %v5360_v54 }
0x113c   : > { %v5278_v38 = vpop.xlane.xlu1 %5277  ;;  %v5269_v41 = vpop.xlane.xlu0 %5268 }
0x113d   : > { %9446 = vpow2.f32 %v5331_v0  ;;  %v5310_v20 = vsub.f32 %v12135_v58, %v5278_v38  ;;  %v5307_v35 = vsub.f32 %v12127_v5, %v5269_v41 }
0x113f   : > { %v5333_v28 = vmul.f32 1.442695, %v5310_v20  ;;  %v5327_v32 = vmul.f32 1.442695, %v5307_v35  ;;  %5355 = vadd.xlane.f32.xlu1 %v5354_v29 }
0x1140   : > { %v5272_v2 = vpop.xlane.xlu1 %5271 }
0x1141   : > { %9448 = vpow2.f32 %v5333_v28  ;;  %v5308_v46 = vsub.f32 %v12129_v42, %v5272_v2 }
0x1142   : > { %9450 = vpow2.f32 %v5327_v32  ;;  %v5287_v7 = vpop.xlane.xlu0 %5286 }
0x1143   : > { %v5329_v54 = vmul.f32 1.442695, %v5308_v46  ;;  %v5313_v36 = vsub.f32 %v12143_v43, %v5287_v7 }
0x1145   : > { %9452 = vpow2.f32 %v5329_v54  ;;  %v5339_v0 = vmul.f32 1.442695, %v5313_v36 }
0x1146   : > { %v5290_v58 = vpop.xlane.xlu1 %5289  ;;  %v5281_v38 = vpop.xlane.xlu0 %5280 }
0x1147   : > { %9454 = vpow2.f32 %v5339_v0  ;;  %v5314_v5 = vsub.f32 %v12149_v9, %v5290_v58  ;;  %v5311_v41 = vsub.f32 %v12147_v8, %v5281_v38 }
0x1149   : > { %v5341_v20 = vmul.f32 1.442695, %v5314_v5  ;;  %v5335_v35 = vmul.f32 1.442695, %v5311_v41 }
0x114a   : > { %v12218_v29 = vpop.eup %9446  ;;  %v5284_v28 = vpop.xlane.xlu1 %5283 }
0x114b   : > { %9456 = vpow2.f32 %v5341_v20  ;;  %v5312_v42 = vsub.f32 %v12155_v34, %v5284_v28  ;;  %v5369_v43 = vsel %vm1348_vm2, %v12218_v29, 0.0 }
0x114c   : > { %9458 = vpow2.f32 %v5335_v35  ;;  %5370 = vadd.xlane.f32.xlu0 %v5369_v43 }
0x114d   : > { %v5337_v36 = vmul.f32 1.442695, %v5312_v42 }
0x114e   : > { %v12223_v32 = vpop.eup %9448  ;;  %v5487_v2 = vpop.permute.xlu1 %5486 }
0x114f   : > { %v12225_v9 = vpop.eup %9450  ;;  %9460 = vpow2.f32 %v5337_v36  ;;  %8806 = vmatpush3.bf16.msra.mxu1 %v5487_v2  ;;  %v5372_v8 = vsel %vm1348_vm2, %v12223_v32, 0.0 }
0x1150   : > { %5373 = vadd.xlane.f32.xlu1 %v5372_v8  ;;  %v5363_v34 = vsel %vm1348_vm2, %v12225_v9, 0.0  ;;  %8817 = vmatprep.subr.bf16.mxu1 %v13353_v22 }
0x1151   : > { %5364 = vadd.xlane.f32.xlu0 %v5363_v34 }
0x1152   : > { %v12232_v46 = vpop.eup %9452 }
0x1153   : > { %v5366_v7 = vsel %vm1348_vm2, %v12232_v46, 0.0 }
0x1154   : > { %v12236_v54 = vpop.eup %9454  ;;  %5367 = vadd.xlane.f32.xlu1 %v5366_v7  ;;  %v12254_v7 = vpop.permute.xlu1 %5533 }
0x1155   : > { %v5381_v0 = vsel %vm1348_vm2, %v12236_v54, 0.0 }
0x1156   : > { %5382 = vadd.xlane.f32.xlu0 %v5381_v0 }
0x1158   : > { %v12240_v58 = vpop.eup %9456  ;;  %v5581_v0 = vpop.permute.xlu1 %5580 }
0x1159   : > { %v12242_v38 = vpop.eup %9458  ;;  %v5384_v5 = vsel %vm1348_vm2, %v12240_v58, 0.0 }
0x115a   : > { %5385 = vadd.xlane.f32.xlu1 %v5384_v5  ;;  %v5375_v41 = vsel %vm1348_vm2, %v12242_v38, 0.0 }
0x115b   : > { %5376 = vadd.xlane.f32.xlu0 %v5375_v41 }
0x115c   : > { %v12248_v20 = vpop.eup %9460 }
0x115d   : > { %v5378_v35 = vsel %vm1348_vm2, %v12248_v20, 0.0 }
0x115e   : > { %5379 = vadd.xlane.f32.xlu1 %v5378_v35 }
0x1173   : > { %v5299_v28 = vpop.xlane.xlu0 %5298 }
0x1174   : > { %v5317_v42 = vsub.f32 %v12165_v53, %v5299_v28 }
0x1176   : > { %v5347_v43 = vmul.f32 1.442695, %v5317_v42 }
0x1177   : > { %v5293_v36 = vpop.xlane.xlu0 %5292 }
0x1178   : > { %9462 = vpow2.f32 %v5347_v43  ;;  %v5315_v2 = vsub.f32 %v12169_v27, %v5293_v36 }
0x117a   : > { %v5343_v8 = vmul.f32 1.442695, %v5315_v2 }
0x117b   : > { %v5440_v34 = vpop.permute.xlu0 %5439 }
0x117c   : > { %9464 = vpow2.f32 %v5343_v8  ;;  %8800 = vmatpush3.bf16.msra.mxu0 %v5440_v34 }
0x117d   : > { %8811 = vmatprep.subr.bf16.mxu0 %v13353_v22 }
0x1185   : > { %v12257_v5 = vpop.eup %9462 }
0x1186   : > { %v5393_v41 = vsel %vm1348_vm2, %v12257_v5, 0.0 }
0x1187   : > { %v5302_v53 = vpop.xlane.xlu1 %5301  ;;  %5394 = vadd.xlane.f32.xlu0 %v5393_v41 }
0x1188   : > { %v5318_v35 = vsub.f32 %v12171_v13, %v5302_v53 }
0x1189   : > { %v12262_v28 = vpop.eup %9464 }
0x118a   : > { %v5349_v27 = vmul.f32 1.442695, %v5318_v35  ;;  %v5387_v42 = vsel %vm1348_vm2, %v12262_v28, 0.0 }
0x118b   : > { %v5296_v43 = vpop.xlane.xlu1 %5295  ;;  %5388 = vadd.xlane.f32.xlu0 %v5387_v42 }
0x118c   : > { %9466 = vpow2.f32 %v5349_v27  ;;  %v5316_v36 = vsub.f32 %v12175_v11, %v5296_v43  ;;  %v12287_v11 = vpop.permute.xlu0 %5627 }
0x118e   : > { %v5345_v2 = vmul.f32 1.442695, %v5316_v36 }
0x1190   : > { %9468 = vpow2.f32 %v5345_v2 }
0x1199   : > { %v12267_v8 = vpop.eup %9466 }
0x119a   : > { %v5396_v34 = vsel %vm1348_vm2, %v12267_v8, 0.0 }
0x119b   : > { %5397 = vadd.xlane.f32.xlu1 %v5396_v34 }
0x119d   : > { %v12271_v13 = vpop.eup %9468 }
0x119e   : > { %v5390_v41 = vsel %vm1348_vm2, %v12271_v13, 0.0 }
0x119f   : > { %5391 = vadd.xlane.f32.xlu1 %v5390_v41 }
0x11a1   : > { %5828 = vrot.lane.b32.xlu0 %v12019_v24, %s9852_s25 }
0x11a5   : > { %5826 = vrot.lane.b32.xlu0 %v12023_v4, %s9853_s15  ;;  %v12297_v4 = vpop.permute.xlu0 %5721 }
0x11a9   : > { %5932 = vrot.lane.b32.xlu0 %v12029_v12, %s9852_s25 }
0x11ad   : > { %5930 = vrot.lane.b32.xlu0 %v12031_v26, %s9853_s15  ;;  %v5675_v26 = vpop.permute.xlu1 %5674 }
0x11b0   : > { %5880 = vrot.lane.b32.xlu1 %v12015_v1, %s9852_s25 }
0x11b1   : > { %6036 = vrot.lane.b32.xlu0 %v12043_v23, %s9852_s25 }
0x11b4   : > { %5878 = vrot.lane.b32.xlu1 %v12017_v62, %s9853_s15  ;;  %v5359_v53 = vpop.xlane.xlu0 %5358  ;;  %v12303_v62 = vpop.permute.xlu1 %5768 }
0x11b5   : > { %6034 = vrot.lane.b32.xlu0 %v12047_v44, %s9853_s15  ;;  %9470 = vrcp.f32 %v5359_v53 }
0x11b8   : > { %5984 = vrot.lane.b32.xlu1 %v12035_v63, %s9852_s25  ;;  %v5353_v44 = vpop.xlane.xlu0 %5352 }
0x11b9   : > { %6140 = vrot.lane.b32.xlu0 %v12055_v10, %s9852_s25 }
0x11bc   : > { %5982 = vrot.lane.b32.xlu1 %v12027_v31, %s9853_s15 }
0x11bd   : > { %6138 = vrot.lane.b32.xlu0 %v12101_v51, %s9853_s15 }
0x11c0   : > { %6088 = vrot.lane.b32.xlu1 %v12039_v16, %s9852_s25 }
0x11c2   : > { %v9471_v51 = vpop.eup %9470 }
0x11c3   : > { %v5417_v42 = vmul.f32 %v9471_v51, %v12195_v48 }
0x11c4   : > { %6086 = vrot.lane.b32.xlu1 %v12041_v3, %s9853_s15  ;;  %v5362_v35 = vpop.xlane.xlu1 %5361 }
0x11c5   : > { %9472 = vrcp.f32 %v5362_v35 }
0x11c6   : > { %9474 = vrcp.f32 %v5353_v44 }
0x11c8   : > { %6192 = vrot.lane.b32.xlu1 %v12051_v49, %s9852_s25  ;;  %v5356_v31 = vpop.xlane.xlu1 %5355  ;;  %s13385_s25 = sld [smem:[#allocation32_spill]] }
0x11c9   : > { %9476 = vrcp.f32 %v5356_v31 }
0x11cc   : > { %6190 = vrot.lane.b32.xlu1 %v12053_v45, %s9853_s15 }
0x11d2   : > { %v9473_v27 = vpop.eup %9472 }
0x11d3   : > { %v5418_v43 = vmul.f32 %v9473_v27, %v12203_v15  ;;  %v9475_v36 = vpop.eup %9474 }
0x11d4   : > { %v5415_v41 = vmul.f32 %v9475_v36, %v12199_v6 }
0x11d5   : > { %v5371_v2 = vpop.xlane.xlu0 %5370  ;;  %v5432_v3 = vpack.c.bf16 %v5418_v43, %v5417_v42 }
0x11d6   : > { %v9477_v34 = vpop.eup %9476  ;;  %9478 = vrcp.f32 %v5371_v2 }
0x11d7   : > { %v5416_v53 = vmul.f32 %v9477_v34, %v12208_v56  ;;  %8808 = vmatmul.mubr.msk.bf16.vlgmr.msra.gmra.mxu1 %vm1348_vm2, %v5432_v3 }
0x11d8   : > { %8818 = vmatpush3.bf16.msra.mxu1 %v5581_v0  ;;  %8819 = vmatprep.mubr.msk.bf16.mxu1 %vm9849_vm1, %v13353_v22 }
0x11d9   : > { %v5374_v45 = vpop.xlane.xlu1 %5373  ;;  %v5431_v44 = vpack.c.bf16 %v5416_v53, %v5415_v41  ;;  %8829 = vmatprep.subr.bf16.mxu1 %v13353_v22 }
0x11da   : > { %9480 = vrcp.f32 %v5374_v45  ;;  %v5365_v48 = vpop.xlane.xlu0 %5364 }
0x11db   : > { %8802 = vmatmul.mubr.msk.bf16.vlgmr.msra.gmra.mxu0 %vm1348_vm2, %v5431_v44  ;;  %9482 = vrcp.f32 %v5365_v48 }
0x11dc   : > { %8812 = vmatpush3.bf16.msra.mxu0 %v12254_v7  ;;  %8813 = vmatprep.mubr.msk.bf16.mxu0 %vm9849_vm1, %v13353_v22 }
0x11dd   : > { %v5368_v6 = vpop.xlane.xlu1 %5367  ;;  %8823 = vmatprep.subr.bf16.mxu0 %v13353_v22 }
0x11de   : > { %9484 = vrcp.f32 %v5368_v6 }
0x11df   : > { %v5383_v15 = vpop.xlane.xlu0 %5382 }
0x11e0   : > { %9486 = vrcp.f32 %v5383_v15 }
0x11e3   : > { %v5386_v56 = vpop.xlane.xlu1 %5385  ;;  %v9479_v35 = vpop.eup %9478 }
0x11e4   : > { %9488 = vrcp.f32 %v5386_v56  ;;  %v5377_v0 = vpop.xlane.xlu0 %5376  ;;  %v5421_v27 = vmul.f32 %v9479_v35, %v12218_v29 }
0x11e5   : > { %9490 = vrcp.f32 %v5377_v0 }
0x11e7   : > { %v9481_v31 = vpop.eup %9480  ;;  %v5380_v51 = vpop.xlane.xlu1 %5379 }
0x11e8   : > { %v5422_v7 = vmul.f32 %v9481_v31, %v12223_v32  ;;  %9492 = vrcp.f32 %v5380_v51  ;;  %v9483_v42 = vpop.eup %9482 }
0x11e9   : > { %v5419_v2 = vmul.f32 %v9483_v42, %v12225_v9 }
0x11ea   : > { %v5434_v43 = vpack.c.bf16 %v5422_v7, %v5421_v27 }
0x11eb   : > { %v9485_v36 = vpop.eup %9484 }
0x11ec   : > { %v5420_v3 = vmul.f32 %v9485_v36, %v12232_v46  ;;  %8820 = vmatmul.mubr.msk.bf16.vlgmr.msra.gmra.mxu1 %vm1348_vm2, %v5434_v43 }
0x11ed   : > { %8830 = vmatpush3.bf16.msra.mxu1 %v5675_v26  ;;  %8831 = vmatprep.mubr.msk.bf16.mxu1 %vm9849_vm1, %v13353_v22  ;;  %v9487_v29 = vpop.eup %9486 }
0x11ee   : > { %v5433_v34 = vpack.c.bf16 %v5420_v3, %v5419_v2  ;;  %8841 = vmatprep.subr.bf16.mxu1 %v13353_v22  ;;  %v5425_v9 = vmul.f32 %v9487_v29, %v12236_v54 }
0x11f0   : > { %8814 = vmatmul.mubr.msk.bf16.vlgmr.msra.gmra.mxu0 %vm1348_vm2, %v5433_v34 }
0x11f1   : > { %v9489_v32 = vpop.eup %9488  ;;  %8824 = vmatpush3.bf16.msra.mxu0 %v12287_v11  ;;  %8825 = vmatprep.mubr.msk.bf16.mxu0 %vm9849_vm1, %v13353_v22 }
0x11f2   : > { %v5426_v46 = vmul.f32 %v9489_v32, %v12240_v58  ;;  %8835 = vmatprep.subr.bf16.mxu0 %v13353_v22  ;;  %v9491_v26 = vpop.eup %9490 }
0x11f3   : > { %v5423_v45 = vmul.f32 %v9491_v26, %v12242_v38 }
0x11f4   : > { %v5436_v41 = vpack.c.bf16 %v5426_v46, %v5425_v9 }
0x11f5   : > { %v9493_v53 = vpop.eup %9492 }
0x11f6   : > { %v5424_v44 = vmul.f32 %v9493_v53, %v12248_v20  ;;  %8832 = vmatmul.mubr.msk.bf16.vlgmr.msra.gmra.mxu1 %vm1348_vm2, %v5436_v41 }
0x11f7   : > { %8842 = vmatpush3.bf16.msra.mxu1 %v12303_v62  ;;  %8843 = vmatprep.mubr.msk.bf16.mxu1 %vm9849_vm1, %v13353_v22 }
0x11f8   : > { %v5435_v11 = vpack.c.bf16 %v5424_v44, %v5423_v45  ;;  %8853 = vmatprep.subr.bf16.mxu1 %v13353_v22 }
0x11fa   : > { %8826 = vmatmul.mubr.msk.bf16.vlgmr.msra.gmra.mxu0 %vm1348_vm2, %v5435_v11 }
0x11fb   : > { %8836 = vmatpush3.bf16.msra.mxu0 %v12297_v4  ;;  %8837 = vmatprep.mubr.msk.bf16.mxu0 %vm9849_vm1, %v13353_v22 }
0x11fc   : > { %8847 = vmatprep.subr.bf16.mxu0 %v13353_v22 }
0x1210   : > { %v5395_v54 = vpop.xlane.xlu0 %5394 }
0x1211   : > { %9494 = vrcp.f32 %v5395_v54 }
0x1214   : > { %v5389_v58 = vpop.xlane.xlu0 %5388 }
0x1218   : > { %v5829_v62 = vpop.permute.xlu0 %5828 }
0x1219   : > { %v5834_v3 = vsel %vm1348_vm2, %v5829_v62, 0 }
0x121c   : > { %v5827_v0 = vpop.permute.xlu0 %5826 }
0x121e   : > { %v9495_v6 = vpop.eup %9494 }
0x121f   : > { %v5429_v4 = vmul.f32 %v9495_v6, %v12257_v5 }
0x1220   : > { %v5933_v2 = vpop.permute.xlu0 %5932 }
0x1221   : > { %v5938_v29 = vsel %vm1348_vm2, %v5933_v2, 0 }
0x1224   : > { %v5398_v38 = vpop.xlane.xlu1 %5397 }
0x1225   : > { %9496 = vrcp.f32 %v5398_v38 }
0x1226   : > { %9498 = vrcp.f32 %v5389_v58 }
0x1228   : > { %v5392_v20 = vpop.xlane.xlu1 %5391 }
0x1229   : > { %9500 = vrcp.f32 %v5392_v20 }
0x122c   : > { %v5881_v48 = vpop.permute.xlu1 %5880 }
0x122d   : > { %v5886_v36 = vsel %vm1348_vm2, %v5881_v48, 0 }
0x1230   : > { %v5879_v15 = vpop.permute.xlu1 %5878 }
0x1232   : > { %v9497_v56 = vpop.eup %9496 }
0x1233   : > { %v5430_v35 = vmul.f32 %v9497_v56, %v12267_v8  ;;  %v9499_v31 = vpop.eup %9498 }
0x1234   : > { %v5985_v51 = vpop.permute.xlu1 %5984  ;;  %v5427_v42 = vmul.f32 %v9499_v31, %v12262_v28  ;;  %v5931_v28 = vpop.permute.xlu0 %5930 }
0x1235   : > { %v5438_v27 = vpack.c.bf16 %v5430_v35, %v5429_v4 }
0x1236   : > { %v9501_v7 = vpop.eup %9500 }
0x1237   : > { %v5428_v43 = vmul.f32 %v9501_v7, %v12271_v13  ;;  %8844 = vmatmul.mubr.msk.bf16.vlgmr.msra.gmra.mxu1 %vm1348_vm2, %v5438_v27  ;;  %v5990_v13 = vsel %vm1348_vm2, %v5985_v51, 0 }
0x1238   : > { %8854 = vmatpush3.bf16.xpose.msra.mxu1 %v5886_v36  ;;  %8855 = vmatprep.mubr.msk.bf16.mxu1 %vm9849_vm1, %v13353_v22  ;;  %v5983_v8 = vpop.permute.xlu1 %5982  ;;  %v6037_v32 = vpop.permute.xlu0 %6036 }
0x1239   : > { %v5437_v5 = vpack.c.bf16 %v5428_v43, %v5427_v42  ;;  %8865 = vmatprep.subr.bf16.mxu1 %v13353_v22  ;;  %v6042_v41 = vsel %vm1348_vm2, %v6037_v32, 0 }
0x123b   : > { %8838 = vmatmul.mubr.msk.bf16.vlgmr.msra.gmra.mxu0 %vm1348_vm2, %v5437_v5 }
0x123c   : > { %8848 = vmatpush3.bf16.xpose.msra.mxu0 %v5834_v3  ;;  %8849 = vmatprep.mubr.msk.bf16.mxu0 %vm9849_vm1, %v13353_v22  ;;  %v6089_v34 = vpop.permute.xlu1 %6088  ;;  %v6035_v26 = vpop.permute.xlu0 %6034 }
0x123d   : > { %8859 = vmatprep.subr.bf16.mxu0 %v13353_v22  ;;  %v6094_v46 = vsel %vm1348_vm2, %v6089_v34, 0 }
0x123f   : > { %8856 = vmatmul.mubr.msk.bf16.vlgmr.msra.gmra.mxu1 %vm1348_vm2, %v5879_v15 }
0x1240   : > { %8866 = vmatpush3.bf16.xpose.msra.mxu1 %v5990_v13  ;;  %8867 = vmatprep.mubr.msk.bf16.mxu1 %vm9849_vm1, %v13353_v22  ;;  %v6087_v9 = vpop.permute.xlu1 %6086  ;;  %v6141_v44 = vpop.permute.xlu0 %6140 }
0x1241   : > { %8877 = vmatprep.subr.bf16.mxu1 %v13353_v22  ;;  %v6146_v11 = vsel %vm1348_vm2, %v6141_v44, 0 }
0x1243   : > { %8850 = vmatmul.mubr.msk.bf16.vlgmr.msra.gmra.mxu0 %vm1348_vm2, %v5827_v0 }
0x1244   : > { %8860 = vmatpush3.bf16.xpose.msra.mxu0 %v5938_v29  ;;  %8861 = vmatprep.mubr.msk.bf16.mxu0 %vm9849_vm1, %v13353_v22  ;;  %v6193_v53 = vpop.permute.xlu1 %6192  ;;  %v6139_v58 = vpop.permute.xlu0 %6138 }
0x1245   : > { %8871 = vmatprep.subr.bf16.mxu0 %v13353_v22  ;;  %v6198_v45 = vsel %vm1348_vm2, %v6193_v53, 0 }
0x1247   : > { %8868 = vmatmul.mubr.msk.bf16.vlgmr.msra.gmra.mxu1 %vm1348_vm2, %v5983_v8 }
0x1248   : > { %8878 = vmatpush3.bf16.xpose.msra.mxu1 %v6094_v46  ;;  %8879 = vmatprep.mubr.msk.bf16.mxu1 %vm9849_vm1, %v13353_v22  ;;  %v6191_v54 = vpop.permute.xlu1 %6190 }
0x1249   : > { %8889 = vmatprep.subr.bf16.mxu1 %v13353_v22 }
0x124b   : > { %8862 = vmatmul.mubr.msk.bf16.vlgmr.msra.gmra.mxu0 %vm1348_vm2, %v5931_v28 }
0x124c   : > { %8872 = vmatpush3.bf16.xpose.msra.mxu0 %v6042_v41  ;;  %8873 = vmatprep.mubr.msk.bf16.mxu0 %vm9849_vm1, %v13353_v22 }
0x124d   : > { %8883 = vmatprep.subr.bf16.mxu0 %v13353_v22 }
0x124f   : > { %8880 = vmatmul.mubr.msk.bf16.vlgmr.msra.gmra.mxu1 %vm1348_vm2, %v6087_v9 }
0x1250   : > { %8890 = vmatpush3.bf16.xpose.msra.mxu1 %v6198_v45  ;;  %8891 = vmatprep.mubr.msk.bf16.mxu1 %vm9849_vm1, %v13353_v22 }
0x1251   : > { %8901 = vmatprep.subr.bf16.mxu1 %v13353_v22 }
0x1253   : > { %8874 = vmatmul.mubr.msk.bf16.vlgmr.msra.gmra.mxu0 %vm1348_vm2, %v6035_v26 }
0x1254   : > { %8884 = vmatpush3.bf16.xpose.msra.mxu0 %v6146_v11  ;;  %8885 = vmatprep.mubr.msk.bf16.mxu0 %vm9849_vm1, %v13353_v22 }
0x1255   : > { %8895 = vmatprep.subr.bf16.mxu0 %v13353_v22 }
0x1257   : > { %8892 = vmatmul.mubr.msk.bf16.vlgmr.msra.gmra.mxu1 %vm1348_vm2, %v6191_v54 }
0x1258   : > { %8903 = vmatprep.mubr.msk.bf16.mxu1 %vm9849_vm1, %v13353_v22 }
0x125b   : > { %8886 = vmatmul.mubr.msk.bf16.vlgmr.msra.gmra.mxu0 %vm1348_vm2, %v6139_v58 }
0x125c   : > { %8897 = vmatprep.mubr.msk.bf16.mxu0 %vm9849_vm1, %v13353_v22 }
0x1297   : > { %v12403_v38 = vpop.f32.mrf.mxu1 }
0x1299   : > { %v8809_v20 = vpop.f32.mrf.mxu1 }
0x129b   : > { %v12405_v62 = vpop.f32.mrf.mxu0  ;;  %v12407_v48 = vpop.f32.mrf.mxu1 }
0x129d   : > { %v8803_v15 = vpop.f32.mrf.mxu0  ;;  %v8810_v56 = vpop.f32.mrf.mxu1 }
0x129f   : > { %v12411_v0 = vpop.f32.mrf.mxu0 }
0x12a1   : > { %v8804_v35 = vpop.f32.mrf.mxu0 }
0x12ac   : > { %v12415_v31 = vpop.f32.mrf.mxu1 }
0x12ae   : > { %v8821_v51 = vpop.f32.mrf.mxu1 }
0x12b0   : > { %v12417_v27 = vpop.f32.mrf.mxu0  ;;  %v12419_v7 = vpop.f32.mrf.mxu1 }
0x12b2   : > { %v8815_v43 = vpop.f32.mrf.mxu0  ;;  %v8822_v36 = vpop.f32.mrf.mxu1 }
0x12b4   : > { %v12423_v2 = vpop.f32.mrf.mxu0 }
0x12b6   : > { %v8816_v8 = vpop.f32.mrf.mxu0  ;;  %v12427_v3 = vpop.f32.mrf.mxu1 }
0x12b8   : > { %v8833_v28 = vpop.f32.mrf.mxu1 }
0x12ba   : > { %v12429_v13 = vpop.f32.mrf.mxu0  ;;  %v12431_v34 = vpop.f32.mrf.mxu1 }
0x12bc   : > { %v8827_v32 = vpop.f32.mrf.mxu0  ;;  %v8834_v9 = vpop.f32.mrf.mxu1 }
0x12be   : > { %v12435_v46 = vpop.f32.mrf.mxu0 }
0x12c0   : > { %v8828_v41 = vpop.f32.mrf.mxu0 }
0x12f7   : > { %v12439_v53 = vpop.f32.mrf.mxu1 }
0x12f9   : > { %v8845_v45 = vpop.f32.mrf.mxu1 }
0x12fb   : > { %v12441_v44 = vpop.f32.mrf.mxu0  ;;  %v12443_v11 = vpop.f32.mrf.mxu1 }
0x12fd   : > { %v8839_v58 = vpop.f32.mrf.mxu0  ;;  %v8846_v20 = vpop.f32.mrf.mxu1 }
0x12ff   : > { %v12447_v15 = vpop.f32.mrf.mxu0  ;;  %v12449_v56 = vpop.f32.mrf.mxu1 }
0x1300   : > { %v6247_v51 = vsel %vm1348_vm2, %v12449_v56, -inf }
0x1301   : > { %6248 = vmax.xlane.f32.xlu0 %v6247_v51  ;;  %v8840_v43 = vpop.f32.mrf.mxu0  ;;  %v8857_v36 = vpop.f32.mrf.mxu1 }
0x1303   : > { %v12455_v8 = vpop.f32.mrf.mxu0  ;;  %v12457_v28 = vpop.f32.mrf.mxu1 }
0x1304   : > { %v6241_v32 = vsel %vm1348_vm2, %v12455_v8, -inf  ;;  %v6250_v20 = vsel %vm1348_vm2, %v12457_v28, -inf }
0x1305   : > { %v8858_v9 = vpop.f32.mrf.mxu1  ;;  %6242 = vmax.xlane.f32.xlu0 %v6241_v32  ;;  %v8851_v41 = vpop.f32.mrf.mxu0 }
0x1307   : > { %v12461_v45 = vpop.f32.mrf.mxu0  ;;  %v12463_v58 = vpop.f32.mrf.mxu1 }
0x1308   : > { %v6244_v51 = vsel %vm1348_vm2, %v12461_v45, -inf  ;;  %v6259_v32 = vsel %vm1348_vm2, %v12463_v58, -inf }
0x1309   : > { %v8869_v43 = vpop.f32.mrf.mxu1  ;;  %6251 = vmax.xlane.f32.xlu0 %v6250_v20  ;;  %6245 = vmax.xlane.f32.xlu1 %v6244_v51  ;;  %v8852_v36 = vpop.f32.mrf.mxu0 }
0x130b   : > { %v12469_v14 = vpop.f32.mrf.mxu0  ;;  %v12471_v37 = vpop.f32.mrf.mxu1 }
0x130c   : > { %v6253_v43 = vsel %vm1348_vm2, %v12469_v14, -inf }
0x130d   : > { %v8870_v9 = vpop.f32.mrf.mxu1  ;;  %6260 = vmax.xlane.f32.xlu0 %v6259_v32  ;;  %v8863_v41 = vpop.f32.mrf.mxu0 }
0x130f   : > { %v12475_v54 = vpop.f32.mrf.mxu0  ;;  %v12477_v35 = vpop.f32.mrf.mxu1 }
0x1311   : > { %v8881_v20 = vpop.f32.mrf.mxu1  ;;  %6254 = vmax.xlane.f32.xlu0 %v6253_v43  ;;  %v8864_v51 = vpop.f32.mrf.mxu0 }
0x1313   : > { %v12481_v36 = vpop.f32.mrf.mxu0  ;;  %v12483_v29 = vpop.f32.mrf.mxu1 }
0x1315   : > { %v8875_v26 = vpop.f32.mrf.mxu0  ;;  %v8882_v42 = vpop.f32.mrf.mxu1 }
0x1316   : > { %v6262_v42 = vsel %vm1348_vm2, %v12471_v37, -inf  ;;  %v6256_v26 = vsel %vm1348_vm2, %v12475_v54, -inf }
0x1317   : > { %v12485_v5 = vpop.f32.mrf.mxu0  ;;  %v12487_v32 = vpop.f32.mrf.mxu1 }
0x1319   : > { %v8876_v9 = vpop.f32.mrf.mxu0  ;;  %v8893_v41 = vpop.f32.mrf.mxu1 }
0x131a   : > { %6472 = vrot.lane.b32.xlu1 %v12015_v1, %s9854_s18  ;;  %v6271_v1 = vsel %vm1348_vm2, %v12477_v35, -inf  ;;  %v6274_v9 = vsel %vm1348_vm2, %v12483_v29, -inf  ;;  %v6283_v41 = vsel %vm1348_vm2, %v12487_v32, -inf }
0x131b   : > { %v12491_v6 = vpop.f32.mrf.mxu0  ;;  %v12493_v20 = vpop.f32.mrf.mxu1 }
0x131d   : > { %v8887_v43 = vpop.f32.mrf.mxu0  ;;  %v8894_v51 = vpop.f32.mrf.mxu1 }
0x131e   : > { %v6286_v43 = vsel %vm1348_vm2, %v12493_v20, -inf  ;;  %v6277_v51 = vsel %vm1348_vm2, %v12491_v6, -inf }
0x131f   : > { %v12495_v4 = vpop.f32.mrf.mxu0 }
0x1321   : > { %v8888_v30 = vpop.f32.mrf.mxu0 }
0x1322   : > { %v6265_v30 = vsel %vm1348_vm2, %v12481_v36, -inf }
0x1327   : > { %6425 = vrot.lane.b32.xlu0 %v12019_v24, %s9854_s18  ;;  %v6268_v24 = vsel %vm1348_vm2, %v12485_v5, -inf }
0x133e   : > { %6263 = vmax.xlane.f32.xlu1 %v6262_v42  ;;  %v6280_v42 = vsel %vm1348_vm2, %v12495_v4, -inf }
0x1342   : > { %6257 = vmax.xlane.f32.xlu1 %v6256_v26 }
0x1346   : > { %6272 = vmax.xlane.f32.xlu0 %v6271_v1  ;;  %6275 = vmax.xlane.f32.xlu1 %v6274_v9 }
0x134a   : > { %6266 = vmax.xlane.f32.xlu0 %v6265_v30  ;;  %6269 = vmax.xlane.f32.xlu1 %v6268_v24 }
0x134e   : > { %6284 = vmax.xlane.f32.xlu0 %v6283_v41  ;;  %6287 = vmax.xlane.f32.xlu1 %v6286_v43 }
0x1352   : > { %6278 = vmax.xlane.f32.xlu0 %v6277_v51  ;;  %6281 = vmax.xlane.f32.xlu1 %v6280_v42 }
0x1363   : > { %6566 = vrot.lane.b32.xlu1 %v12035_v63, %s9854_s18 }
0x138a   : > { %v6249_v26 = vpop.xlane.xlu0 %6248 }
0x138b   : > { %v6291_v1 = vsub.f32 %v12449_v56, %v6249_v26 }
0x138d   : > { %v6309_v9 = vmul.f32 1.442695, %v6291_v1 }
0x138e   : > { %v6243_v30 = vpop.xlane.xlu0 %6242 }
0x138f   : > { %9502 = vpow2.f32 %v6309_v9  ;;  %v6289_v24 = vsub.f32 %v12455_v8, %v6243_v30 }
0x1391   : > { %v6305_v41 = vmul.f32 1.442695, %v6289_v24 }
0x1392   : > { %v6246_v43 = vpop.xlane.xlu1 %6245  ;;  %v6252_v39 = vpop.xlane.xlu0 %6251 }
0x1393   : > { %9504 = vpow2.f32 %v6305_v41  ;;  %v6290_v59 = vsub.f32 %v12461_v45, %v6246_v43  ;;  %v6292_v51 = vsub.f32 %v12457_v28, %v6252_v39 }
0x1395   : > { %v6311_v42 = vmul.f32 1.442695, %v6292_v51  ;;  %v6307_v17 = vmul.f32 1.442695, %v6290_v59 }
0x1396   : > { %v6473_v55 = vpop.permute.xlu1 %6472  ;;  %v6261_v63 = vpop.xlane.xlu0 %6260 }
0x1397   : > { %8902 = vmatpush3.bf16.msra.mxu1 %v6473_v55  ;;  %9506 = vpow2.f32 %v6311_v42  ;;  %v6295_v9 = vsub.f32 %v12463_v58, %v6261_v63 }
0x1398   : > { %8913 = vmatprep.subr.bf16.mxu1 %v13353_v22  ;;  %9508 = vpow2.f32 %v6307_v17 }
0x1399   : > { %v6317_v30 = vmul.f32 1.442695, %v6295_v9 }
0x139a   : > { %v6255_v56 = vpop.xlane.xlu0 %6254 }
0x139b   : > { %v6293_v24 = vsub.f32 %v12469_v14, %v6255_v56  ;;  %9510 = vpow2.f32 %v6317_v30 }
0x139c   : > { %v12526_v26 = vpop.eup %9502 }
0x139d   : > { %v6343_v8 = vsel %vm1348_vm2, %v12526_v26, 0.0  ;;  %v6313_v41 = vmul.f32 1.442695, %v6293_v24 }
0x139e   : > { %6344 = vadd.xlane.f32.xlu0 %v6343_v8  ;;  %v6426_v1 = vpop.permute.xlu0 %6425 }
0x139f   : > { %8896 = vmatpush3.bf16.msra.mxu0 %v6426_v1  ;;  %9512 = vpow2.f32 %v6313_v41 }
0x13a0   : > { %v12530_v45 = vpop.eup %9504  ;;  %8907 = vmatprep.subr.bf16.mxu0 %v13353_v22 }
0x13a1   : > { %v6337_v55 = vsel %vm1348_vm2, %v12530_v45, 0.0 }
0x13a2   : > { %6338 = vadd.xlane.f32.xlu0 %v6337_v55 }
0x13a4   : > { %v12535_v59 = vpop.eup %9506 }
0x13a5   : > { %v6346_v17 = vsel %vm1348_vm2, %v12535_v59, 0.0  ;;  %v12539_v39 = vpop.eup %9508 }
0x13a6   : > { %6347 = vadd.xlane.f32.xlu1 %v6346_v17  ;;  %v6340_v28 = vsel %vm1348_vm2, %v12539_v39, 0.0 }
0x13a8   : > { %v12550_v63 = vpop.eup %9510 }
0x13a9   : > { %v6355_v41 = vsel %vm1348_vm2, %v12550_v63, 0.0 }
0x13aa   : > { %6341 = vadd.xlane.f32.xlu1 %v6340_v28 }
0x13b8   : > { %6519 = vrot.lane.b32.xlu0 %v12029_v12, %s9854_s18 }
0x13c7   : > { %v6264_v43 = vpop.xlane.xlu1 %6263 }
0x13c8   : > { %v6296_v51 = vsub.f32 %v12471_v37, %v6264_v43  ;;  %v12557_v43 = vpop.eup %9512 }
0x13ca   : > { %v6319_v42 = vmul.f32 1.442695, %v6296_v51 }
0x13cb   : > { %v6258_v8 = vpop.xlane.xlu1 %6257 }
0x13cc   : > { %9514 = vpow2.f32 %v6319_v42  ;;  %v6294_v1 = vsub.f32 %v12475_v54, %v6258_v8 }
0x13ce   : > { %v6315_v55 = vmul.f32 1.442695, %v6294_v1  ;;  %v6349_v1 = vsel %vm1348_vm2, %v12557_v43, 0.0 }
0x13cf   : > { %v6276_v17 = vpop.xlane.xlu1 %6275  ;;  %v6273_v28 = vpop.xlane.xlu0 %6272 }
0x13d0   : > { %9516 = vpow2.f32 %v6315_v55  ;;  %v6299_v12 = vsub.f32 %v12477_v35, %v6273_v28  ;;  %v6300_v14 = vsub.f32 %v12483_v29, %v6276_v17 }
0x13d2   : > { %v6325_v58 = vmul.f32 1.442695, %v6299_v12  ;;  %v6327_v35 = vmul.f32 1.442695, %v6300_v14 }
0x13d3   : > { %v6270_v56 = vpop.xlane.xlu1 %6269  ;;  %v6267_v9 = vpop.xlane.xlu0 %6266 }
0x13d4   : > { %v6298_v37 = vsub.f32 %v12485_v5, %v6270_v56  ;;  %v6297_v30 = vsub.f32 %v12481_v36, %v6267_v9  ;;  %9518 = vpow2.f32 %v6325_v58 }
0x13d6   : > { %v6323_v24 = vmul.f32 1.442695, %v6298_v37  ;;  %v6321_v54 = vmul.f32 1.442695, %v6297_v30 }
0x13d7   : > { %v6288_v51 = vpop.xlane.xlu1 %6287  ;;  %6356 = vadd.xlane.f32.xlu0 %v6355_v41  ;;  %v6285_v42 = vpop.xlane.xlu0 %6284 }
0x13d8   : > { %9520 = vpow2.f32 %v6323_v24  ;;  %v6303_v29 = vsub.f32 %v12487_v32, %v6285_v42  ;;  %v6304_v55 = vsub.f32 %v12493_v20, %v6288_v51 }
0x13d9   : > { %v12560_v8 = vpop.eup %9514  ;;  %9522 = vpow2.f32 %v6321_v54 }
0x13da   : > { %v6333_v5 = vmul.f32 1.442695, %v6303_v29  ;;  %v6358_v36 = vsel %vm1348_vm2, %v12560_v8, 0.0  ;;  %9524 = vpow2.f32 %v6327_v35  ;;  %v6335_v37 = vmul.f32 1.442695, %v6304_v55 }
0x13db   : > { %v6282_v17 = vpop.xlane.xlu1 %6281  ;;  %6359 = vadd.xlane.f32.xlu1 %v6358_v36  ;;  %6350 = vadd.xlane.f32.xlu0 %v6349_v1  ;;  %v6279_v28 = vpop.xlane.xlu0 %6278 }
0x13dc   : > { %v6302_v12 = vsub.f32 %v12495_v4, %v6282_v17  ;;  %v6301_v32 = vsub.f32 %v12491_v6, %v6279_v28  ;;  %9526 = vpow2.f32 %v6333_v5 }
0x13dd   : > { %v12569_v58 = vpop.eup %9516 }
0x13de   : > { %v6331_v14 = vmul.f32 1.442695, %v6302_v12  ;;  %v6329_v56 = vmul.f32 1.442695, %v6301_v32  ;;  %v6352_v9 = vsel %vm1348_vm2, %v12569_v58, 0.0 }
0x13df   : > { %6353 = vadd.xlane.f32.xlu1 %v6352_v9  ;;  %v6567_v12 = vpop.permute.xlu1 %6566 }
0x13e0   : > { %9528 = vpow2.f32 %v6331_v14 }
0x13e1   : > { %9530 = vpow2.f32 %v6329_v56  ;;  %v12573_v20 = vpop.eup %9518 }
0x13e2   : > { %9532 = vpow2.f32 %v6335_v37  ;;  %v6367_v4 = vsel %vm1348_vm2, %v12573_v20, 0.0 }
0x13e3   : > { %6368 = vadd.xlane.f32.xlu0 %v6367_v4 }
0x13e5   : > { %v12577_v6 = vpop.eup %9520 }
0x13e6   : > { %v12579_v30 = vpop.eup %9522  ;;  %v6364_v24 = vsel %vm1348_vm2, %v12577_v6, 0.0 }
0x13e7   : > { %v6361_v54 = vsel %vm1348_vm2, %v12579_v30, 0.0  ;;  %v12585_v41 = vpop.eup %9524  ;;  %6365 = vadd.xlane.f32.xlu0 %v6364_v24 }
0x13e8   : > { %6362 = vadd.xlane.f32.xlu1 %v6361_v54  ;;  %v6370_v51 = vsel %vm1348_vm2, %v12585_v41, 0.0 }
0x13e9   : > { %v12587_v35 = vpop.eup %9526 }
0x13ea   : > { %v6379_v42 = vsel %vm1348_vm2, %v12587_v35, 0.0 }
0x13eb   : > { %6380 = vadd.xlane.f32.xlu0 %v6379_v42 }
0x13ec   : > { %6371 = vadd.xlane.f32.xlu1 %v6370_v51 }
0x13ed   : > { %v12593_v29 = vpop.eup %9528 }
0x13ee   : > { %v12595_v5 = vpop.eup %9530  ;;  %v6376_v36 = vsel %vm1348_vm2, %v12593_v29, 0.0 }
0x13ef   : > { %v6373_v1 = vsel %vm1348_vm2, %v12595_v5, 0.0  ;;  %v12601_v55 = vpop.eup %9532  ;;  %6377 = vadd.xlane.f32.xlu0 %v6376_v36 }
0x13f0   : > { %6374 = vadd.xlane.f32.xlu1 %v6373_v1  ;;  %v6382_v17 = vsel %vm1348_vm2, %v12601_v55, 0.0 }
0x13f4   : > { %6383 = vadd.xlane.f32.xlu1 %v6382_v17 }
0x1405   : > { %6660 = vrot.lane.b32.xlu1 %v12039_v16, %s9854_s18  ;;  %6613 = vrot.lane.b32.xlu0 %v12043_v23, %s9854_s18 }
0x1409   : > { %6707 = vrot.lane.b32.xlu1 %v12055_v10, %s9854_s18 }
0x140d   : > { %6754 = vrot.lane.b32.xlu1 %v12051_v49, %s9854_s18 }
0x1427   : > { %v6345_v28 = vpop.xlane.xlu0 %6344 }
0x1428   : > { %9534 = vrcp.f32 %v6345_v28 }
0x142b   : > { %v6339_v32 = vpop.xlane.xlu0 %6338 }
0x142f   : > { %v6348_v14 = vpop.xlane.xlu1 %6347  ;;  %v6520_v42 = vpop.permute.xlu0 %6519 }
0x1430   : > { %9536 = vrcp.f32 %v6348_v14 }
0x1431   : > { %9538 = vrcp.f32 %v6339_v32 }
0x1433   : > { %v6342_v56 = vpop.xlane.xlu1 %6341 }
0x1434   : > { %9540 = vrcp.f32 %v6342_v56 }
0x1435   : > { %v9535_v9 = vpop.eup %9534 }
0x1436   : > { %v6403_v37 = vmul.f32 %v9535_v9, %v12526_v26 }
0x143d   : > { %v9537_v16 = vpop.eup %9536 }
0x143e   : > { %v6404_v23 = vmul.f32 %v9537_v16, %v12535_v59  ;;  %v9539_v4 = vpop.eup %9538 }
0x143f   : > { %v6401_v49 = vmul.f32 %v9539_v4, %v12530_v45 }
0x1440   : > { %v6418_v10 = vpack.c.bf16 %v6404_v23, %v6403_v37 }
0x1441   : > { %v9541_v24 = vpop.eup %9540 }
0x1442   : > { %v6402_v54 = vmul.f32 %v9541_v24, %v12539_v39  ;;  %8904 = vmatmul.mubr.msk.bf16.vlgmr.msra.gmra.mxu1 %vm1348_vm2, %v6418_v10 }
0x1443   : > { %8914 = vmatpush3.bf16.msra.mxu1 %v6567_v12  ;;  %8915 = vmatprep.mubr.msk.bf16.mxu1 %vm9849_vm1, %v13353_v22 }
0x1444   : > { %v6417_v51 = vpack.c.bf16 %v6402_v54, %v6401_v49  ;;  %8925 = vmatprep.subr.bf16.mxu1 %v13353_v22 }
0x1446   : > { %8898 = vmatmul.mubr.msk.bf16.vlgmr.msra.gmra.mxu0 %vm1348_vm2, %v6417_v51 }
0x1447   : > { %8908 = vmatpush3.bf16.msra.mxu0 %v6520_v42  ;;  %8909 = vmatprep.mubr.msk.bf16.mxu0 %vm9849_vm1, %v13353_v22 }
0x1448   : > { %8919 = vmatprep.subr.bf16.mxu0 %v13353_v22 }
0x1460   : > { %v6357_v26 = vpop.xlane.xlu0 %6356 }
0x1461   : > { %9542 = vrcp.f32 %v6357_v26 }
0x1464   : > { %v6360_v45 = vpop.xlane.xlu1 %6359  ;;  %v6351_v59 = vpop.xlane.xlu0 %6350 }
0x1465   : > { %9544 = vrcp.f32 %v6360_v45 }
0x1466   : > { %9546 = vrcp.f32 %v6351_v59 }
0x1468   : > { %v6354_v39 = vpop.xlane.xlu1 %6353 }
0x1469   : > { %9548 = vrcp.f32 %v6354_v39 }
0x146c   : > { %v6369_v36 = vpop.xlane.xlu0 %6368 }
0x146e   : > { %v9543_v1 = vpop.eup %9542 }
0x146f   : > { %v6407_v32 = vmul.f32 %v9543_v1, %v12550_v63 }
0x1470   : > { %v6366_v28 = vpop.xlane.xlu0 %6365 }
0x1471   : > { %v6363_v17 = vpop.xlane.xlu1 %6362 }
0x1472   : > { %v9545_v12 = vpop.eup %9544  ;;  %9550 = vrcp.f32 %v6363_v17 }
0x1473   : > { %v6408_v14 = vmul.f32 %v9545_v12, %v12560_v8  ;;  %9552 = vrcp.f32 %v6366_v28  ;;  %v9547_v56 = vpop.eup %9546 }
0x1474   : > { %9554 = vrcp.f32 %v6369_v36  ;;  %v6381_v37 = vpop.xlane.xlu0 %6380  ;;  %v6405_v4 = vmul.f32 %v9547_v56, %v12557_v43  ;;  %v9135_v56 = vld [vmem:[%s13283_s12 + $0x8] sm:$0xff]  }
0x1475   : > { %v6420_v9 = vpack.c.bf16 %v6408_v14, %v6407_v32  ;;  %v6372_v16 = vpop.xlane.xlu1 %6371 }
0x1476   : > { %v9549_v23 = vpop.eup %9548  ;;  %9556 = vrcp.f32 %v6372_v16 }
0x1477   : > { %v6406_v10 = vmul.f32 %v9549_v23, %v12569_v58  ;;  %8916 = vmatmul.mubr.msk.bf16.vlgmr.msra.gmra.mxu1 %vm1348_vm2, %v6420_v9  ;;  %v13372_v23 = vpack.c.bf16 %v12407_v48, %v12403_v38  ;;  %v13376_v38 = vpack.c.bf16 %v12431_v34, %v12427_v3  ;;  %v13377_v48 = vpack.c.bf16 %v12447_v15, %v12441_v44 }
0x1478   : > { %8927 = vmatprep.mubr.msk.bf16.mxu1 %vm9849_vm1, %v13353_v22  ;;  %v6378_v8 = vpop.xlane.xlu0 %6377 }
0x1479   : > { %v6419_v63 = vpack.c.bf16 %v6406_v10, %v6405_v4  ;;  %v6375_v24 = vpop.xlane.xlu1 %6374 }
0x147a   : > { %9558 = vrcp.f32 %v6375_v24 }
0x147b   : > { %9560 = vrcp.f32 %v6378_v8  ;;  %8910 = vmatmul.mubr.msk.bf16.vlgmr.msra.gmra.mxu0 %vm1348_vm2, %v6419_v63 }
0x147c   : > { %9562 = vrcp.f32 %v6381_v37  ;;  %8921 = vmatprep.mubr.msk.bf16.mxu0 %vm9849_vm1, %v13353_v22  ;;  %v6614_v43 = vpop.permute.xlu0 %6613 }
0x147d   : > { %v6384_v49 = vpop.xlane.xlu1 %6383  ;;  %8920 = vmatpush3.bf16.msra.mxu0 %v6614_v43 }
0x147e   : > { %9564 = vrcp.f32 %v6384_v49  ;;  %8931 = vmatprep.subr.bf16.mxu0 %v13353_v22 }
0x147f   : > { %v9551_v58 = vpop.eup %9550 }
0x1480   : > { %v9553_v54 = vpop.eup %9552  ;;  %v6409_v51 = vmul.f32 %v9551_v58, %v12579_v30 }
0x1481   : > { %v9555_v42 = vpop.eup %9554  ;;  %v6410_v26 = vmul.f32 %v9553_v54, %v12577_v6  ;;  %v6661_v45 = vpop.permute.xlu1 %6660  ;;  %v9134_v6 = vld [vmem:[%s13283_s12] sm:$0xff]  }
0x1482   : > { %8926 = vmatpush3.bf16.msra.mxu1 %v6661_v45  ;;  %v6411_v36 = vmul.f32 %v9555_v42, %v12573_v20 }
0x1483   : > { %v9557_v59 = vpop.eup %9556  ;;  %v6421_v39 = vpack.c.bf16 %v6410_v26, %v6409_v51  ;;  %8937 = vmatprep.subr.bf16.mxu1 %v13353_v22 }
0x1484   : > { %v6412_v1 = vmul.f32 %v9557_v59, %v12585_v41 }
0x1485   : > { %8922 = vmatmul.mubr.msk.bf16.vlgmr.msra.gmra.mxu0 %vm1348_vm2, %v6421_v39  ;;  %v6708_v17 = vpop.permute.xlu1 %6707 }
0x1486   : > { %v6422_v28 = vpack.c.bf16 %v6412_v1, %v6411_v36  ;;  %8932 = vmatpush3.bf16.msra.mxu0 %v6708_v17  ;;  %8933 = vmatprep.mubr.msk.bf16.mxu0 %vm9849_vm1, %v13353_v22 }
0x1487   : > { %v9559_v30 = vpop.eup %9558  ;;  %8943 = vmatprep.subr.bf16.mxu0 %v9135_v56 }
0x1488   : > { %v9561_v12 = vpop.eup %9560  ;;  %v6413_v32 = vmul.f32 %v9559_v30, %v12595_v5  ;;  %8928 = vmatmul.mubr.msk.bf16.vlgmr.msra.gmra.mxu1 %vm1348_vm2, %v6422_v28 }
0x1489   : > { %v9563_v20 = vpop.eup %9562  ;;  %v6414_v41 = vmul.f32 %v9561_v12, %v12593_v29  ;;  %v6755_v14 = vpop.permute.xlu1 %6754  ;;  %8939 = vmatprep.mubr.msk.bf16.mxu1 %vm9849_vm1, %v13353_v22  ;;  %v13371_v22 = vpack.c.bf16 %v12411_v0, %v12405_v62  ;;  %v13375_v62 = vpack.c.bf16 %v12435_v46, %v12429_v13  ;;  %v13378_v0 = vpack.c.bf16 %v12443_v11, %v12439_v53 }
0x148a   : > { %8938 = vmatpush3.bf16.msra.mxu1 %v6755_v14  ;;  %v6415_v37 = vmul.f32 %v9563_v20, %v12587_v35  ;;  %v13373_v35 = vpack.c.bf16 %v12423_v2, %v12417_v27 }
0x148b   : > { %v9565_v9 = vpop.eup %9564  ;;  %v6423_v16 = vpack.c.bf16 %v6414_v41, %v6413_v32  ;;  %8961 = vmatprep.subr.bf16.mxu1 %v9134_v6 }
0x148c   : > { %v6416_v5 = vmul.f32 %v9565_v9, %v12601_v55  ;;  %v13374_v55 = vpack.c.bf16 %v12419_v7, %v12415_v31 }
0x148d   : > { %8934 = vmatmul.mubr.msk.bf16.vlgmr.msra.gmra.mxu0 %vm1348_vm2, %v6423_v16  ;;  %v13379_v16 = vmov 0  }
0x148e   : > { %v6424_v29 = vpack.c.bf16 %v6416_v5, %v6415_v37  ;;  %8944 = vmatpush3.bf16.msra.mxu0 %v9135_v56 }
0x1490   : > { %8940 = vmatmul.mubr.msk.bf16.vlgmr.msra.gmra.mxu1 %vm1348_vm2, %v6424_v29 }
0x1491   : > { %8963 = vmatprep.mubr.msk.bf16.mxu1 %vm1348_vm2, %v13371_v22  ;;  %8962 = vmatpush3.bf16.msra.mxu1 %v9134_v6 }
0x1498   : > { %8964 = vmatmul.mubr.msk.bf16.vlgmr.msra.gmra.mxu1 %vm1348_vm2, %v13372_v23 }
0x1499   : > { %8967 = vmatprep.mubr.msk.bf16.mxu1 %vm1348_vm2, %v13373_v35  ;;  %v12703_v35 = vld [vmem:[%s13284_s13] ss:$0 sm:$0xff] }
0x14a0   : > { %8968 = vmatmul.mubr.msk.bf16.gmra.mxu1 %vm1348_vm2, %v13374_v55 }
0x14a1   : > { %8971 = vmatprep.mubr.msk.bf16.mxu1 %vm1348_vm2, %v13375_v62 }
0x14a8   : > { %8972 = vmatmul.mubr.msk.bf16.gmra.mxu1 %vm1348_vm2, %v13376_v38 }
0x14a9   : > { %8975 = vmatprep.mubr.msk.bf16.mxu1 %vm1348_vm2, %v13377_v48 }
0x14b0   : > { %8976 = vmatmul.mubr.msk.bf16.gmra.mxu1 %vm1348_vm2, %v13378_v0 }
0x1502   : > { %v6512_v31 = vpop.f32.mrf.mxu1 }
0x1504   : > { %v8905_v27 = vpop.f32.mrf.mxu1 }
0x1506   : > { %v6465_v7 = vpop.f32.mrf.mxu0  ;;  %v6515_v2 = vpop.f32.mrf.mxu1 }
0x1507   : > { %v6802_v34 = vpack.c.bf16 %v6515_v2, %v6512_v31 }
0x1508   : > { %v8899_v13 = vpop.f32.mrf.mxu0  ;;  %v8906_v46 = vpop.f32.mrf.mxu1 }
0x150a   : > { %v6468_v4 = vpop.f32.mrf.mxu0 }
0x150b   : > { %v6801_v3 = vpack.c.bf16 %v6468_v4, %v6465_v7 }
0x150c   : > { %v8900_v10 = vpop.f32.mrf.mxu0 }
0x150d   : > { %8945 = vmatprep.mubr.msk.bf16.mxu0 %vm1348_vm2, %v6801_v3 }
0x150e   : > { %8946 = vmatmul.mubr.msk.bf16.vlgmr.msra.gmra.mxu0 %vm1348_vm2, %v6802_v34 }
0x1537   : > { %v6606_v44 = vpop.f32.mrf.mxu1 }
0x1539   : > { %v8917_v15 = vpop.f32.mrf.mxu1 }
0x153b   : > { %v6559_v63 = vpop.f32.mrf.mxu0  ;;  %v6609_v53 = vpop.f32.mrf.mxu1 }
0x153c   : > { %v6804_v43 = vpack.c.bf16 %v6609_v53, %v6606_v44 }
0x153d   : > { %v8911_v11 = vpop.f32.mrf.mxu0  ;;  %v8918_v24 = vpop.f32.mrf.mxu1 }
0x153f   : > { %v6562_v8 = vpop.f32.mrf.mxu0 }
0x1540   : > { %v6803_v49 = vpack.c.bf16 %v6562_v8, %v6559_v63 }
0x1541   : > { %v8912_v58 = vpop.f32.mrf.mxu0 }
0x1542   : > { %8949 = vmatprep.mubr.msk.bf16.mxu0 %vm1348_vm2, %v6803_v49 }
0x1543   : > { %8950 = vmatmul.mubr.msk.bf16.gmra.mxu0 %vm1348_vm2, %v6804_v43 }
0x1545   : > { %v6653_v54 = vpop.f32.mrf.mxu0 }
0x1547   : > { %v8923_v51 = vpop.f32.mrf.mxu0 }
0x1548   : > { %v6700_v42 = vpop.f32.mrf.mxu1 }
0x1549   : > { %v6656_v26 = vpop.f32.mrf.mxu0 }
0x154a   : > { %v6805_v45 = vpack.c.bf16 %v6656_v26, %v6653_v54  ;;  %v8929_v59 = vpop.f32.mrf.mxu1 }
0x154b   : > { %v8924_v39 = vpop.f32.mrf.mxu0 }
0x154c   : > { %8953 = vmatprep.mubr.msk.bf16.mxu0 %vm1348_vm2, %v6805_v45  ;;  %v6703_v36 = vpop.f32.mrf.mxu1 }
0x154d   : > { %v6806_v1 = vpack.c.bf16 %v6703_v36, %v6700_v42  ;;  %v6747_v17 = vpop.f32.mrf.mxu0 }
0x154e   : > { %v8930_v28 = vpop.f32.mrf.mxu1 }
0x154f   : > { %v8935_v30 = vpop.f32.mrf.mxu0  ;;  %8954 = vmatmul.mubr.msk.bf16.gmra.mxu0 %vm1348_vm2, %v6806_v1 }
0x1550   : > { %v6794_v6 = vpop.f32.mrf.mxu1 }
0x1551   : > { %v6750_v12 = vpop.f32.mrf.mxu0 }
0x1552   : > { %v6807_v32 = vpack.c.bf16 %v6750_v12, %v6747_v17  ;;  %v8941_v20 = vpop.f32.mrf.mxu1 }
0x1553   : > { %v8936_v41 = vpop.f32.mrf.mxu0 }
0x1554   : > { %8957 = vmatprep.mubr.msk.bf16.mxu0 %vm1348_vm2, %v6807_v32  ;;  %v6797_v14 = vpop.f32.mrf.mxu1 }
0x1555   : > { %v6808_v56 = vpack.c.bf16 %v6797_v14, %v6794_v6 }
0x1556   : > { %v8942_v9 = vpop.f32.mrf.mxu1 }
0x1557   : > { %8958 = vmatmul.mubr.msk.bf16.gmra.mxu0 %vm1348_vm2, %v6808_v56 }
0x1558   : > { %7454 = vmatprep.mubr.bf16.mxu0 %v13379_v16  ;;  %v8965_v37 = vpop.f32.mrf.mxu1 }
0x155a   : > { %v7002_v5 = vpop.f32.mrf.mxu1 }
0x155c   : > { %v8966_v23 = vpop.f32.mrf.mxu1 }
0x155e   : > { %v7005_v27 = vpop.f32.mrf.mxu1 }
0x1560   : > { %v8969_v63 = vpop.f32.mrf.mxu1 }
0x1562   : > { %v7018_v53 = vpop.f32.mrf.mxu1 }
0x1564   : > { %v8970_v11 = vpop.f32.mrf.mxu1 }
0x15ce   : > { %v8947_v29 = vpop.f32.mrf.mxu0 }
0x15cf   : > { %v7011_v22 = vadd.f32 %v8965_v37, %v8947_v29 }
0x15d0   : > { %v6875_v55 = vpop.f32.mrf.mxu0 }
0x15d1   : > { %v7003_v62 = vadd.f32 %v7002_v5, %v6875_v55  ;;  %v7074_v48 = vadd.f32 %v12703_v35, %v7011_v22 }
0x15d2   : > { %v8948_v38 = vpop.f32.mrf.mxu0 }
0x15d3   : > { %v7072_v0 = vadd.f32 %v12703_v35, %v7003_v62  ;;  %v7014_v31 = vadd.f32 %v8966_v23, %v8948_v38  ;;  %v12711_v46 = vadd.f32 %v7074_v48, %v11734_v18 }
0x15d4   : > { %v6878_v7 = vpop.f32.mrf.mxu0 }
0x15d5   : > { %v12708_v2 = vadd.f32 %v7072_v0, %v11727_v19  ;;  %v7006_v13 = vadd.f32 %v7005_v27, %v6878_v7  ;;  %v7075_v4 = vadd.f32 %v12703_v35, %v7014_v31  ;;  %v7112_v19 = vsel %vm668_vm0, %v12711_v46, 0.0 }
0x15d7   : > { %v7073_v3 = vadd.f32 %v12703_v35, %v7006_v13  ;;  %v7106_v34 = vsel %vm668_vm0, %v12708_v2, 0.0  ;;  %v12721_v44 = vadd.f32 %v7075_v4, %v11744_v21 }
0x15d8   : > { %7107 = vadd.xlane.f32.xlu0 %v7106_v34 }
0x15d9   : > { %v12718_v10 = vadd.f32 %v7073_v3, %v11737_v57  ;;  %v7115_v15 = vsel %vm668_vm0, %v12721_v44, 0.0  ;;  %v7021_v57 = vpop.f32.mrf.mxu1 }
0x15db   : > { %v7109_v18 = vsel %vm668_vm0, %v12718_v10, 0.0  ;;  %v8973_v24 = vpop.f32.mrf.mxu1 }
0x15dc   : > { %7113 = vadd.xlane.f32.xlu0 %v7112_v19  ;;  %7110 = vadd.xlane.f32.xlu1 %v7109_v18 }
0x15dd   : > { %v7034_v49 = vpop.f32.mrf.mxu1 }
0x15df   : > { %v8974_v45 = vpop.f32.mrf.mxu1 }
0x15e0   : > { %7116 = vadd.xlane.f32.xlu0 %v7115_v15 }
0x15e1   : > { %v7037_v6 = vpop.f32.mrf.mxu1 }
0x15e3   : > { %v8977_v14 = vpop.f32.mrf.mxu1 }
0x15e5   : > { %v7050_v22 = vpop.f32.mrf.mxu1 }
0x15e7   : > { %v8978_v13 = vpop.f32.mrf.mxu1 }
0x1603   : > { %v8951_v8 = vpop.f32.mrf.mxu0 }
0x1604   : > { %v7027_v21 = vadd.f32 %v8969_v63, %v8951_v8 }
0x1605   : > { %v6891_v43 = vpop.f32.mrf.mxu0 }
0x1606   : > { %v7019_v58 = vadd.f32 %v7018_v53, %v6891_v43  ;;  %v7078_v51 = vadd.f32 %v12703_v35, %v7027_v21  ;;  %v13381_v21 = vld [vmem:[#allocation22_spill] sm:$0xff] }
0x1607   : > { %v8952_v54 = vpop.f32.mrf.mxu0 }
0x1608   : > { %v7076_v42 = vadd.f32 %v12703_v35, %v7019_v58  ;;  %v7030_v26 = vadd.f32 %v8970_v11, %v8952_v54  ;;  %v12735_v1 = vadd.f32 %v7078_v51, %v11766_v52  ;;  %v7053_v11 = vpop.f32.mrf.mxu1  ;;  %v13382_v51 = vld [vmem:[#allocation24_spill] sm:$0xff] }
0x1609   : > { %v6894_v59 = vpop.f32.mrf.mxu0 }
0x160a   : > { %v12732_v39 = vadd.f32 %v7076_v42, %v11759_v33  ;;  %v7022_v36 = vadd.f32 %v7021_v57, %v6894_v59  ;;  %v7079_v17 = vadd.f32 %v12703_v35, %v7030_v26  ;;  %v7124_v52 = vsel %vm668_vm0, %v12735_v1, 0.0  ;;  %v13380_v57 = vld [vmem:[#allocation23_spill] sm:$0xff]  ;;  %v13383_v26 = vld [vmem:[#allocation25_spill] sm:$0xff] }
0x160c   : > { %v7077_v28 = vadd.f32 %v12703_v35, %v7022_v36  ;;  %v7118_v30 = vsel %vm668_vm0, %v12732_v39, 0.0  ;;  %v12745_v33 = vadd.f32 %v7079_v17, %v11776_v50 }
0x160d   : > { %7119 = vadd.xlane.f32.xlu0 %v7118_v30 }
0x160e   : > { %v12742_v12 = vadd.f32 %v7077_v28, %v11769_v25  ;;  %v7127_v50 = vsel %vm668_vm0, %v12745_v33, 0.0 }
0x160f   : > { %v8955_v32 = vpop.f32.mrf.mxu0 }
0x1610   : > { %v7043_v20 = vadd.f32 %v8973_v24, %v8955_v32  ;;  %v7121_v41 = vsel %vm668_vm0, %v12742_v12, 0.0 }
0x1611   : > { %v6907_v56 = vpop.f32.mrf.mxu0  ;;  %7125 = vadd.xlane.f32.xlu0 %v7124_v52  ;;  %7122 = vadd.xlane.f32.xlu1 %v7121_v41 }
0x1612   : > { %v7035_v9 = vadd.f32 %v7034_v49, %v6907_v56  ;;  %v7082_v37 = vadd.f32 %v12703_v35, %v7043_v20 }
0x1613   : > { %v8956_v25 = vpop.f32.mrf.mxu0 }
0x1614   : > { %v7080_v5 = vadd.f32 %v12703_v35, %v7035_v9  ;;  %v7046_v29 = vadd.f32 %v8974_v45, %v8956_v25  ;;  %v12759_v38 = vadd.f32 %v7082_v37, %v11798_v60 }
0x1615   : > { %v6910_v23 = vpop.f32.mrf.mxu0  ;;  %7128 = vadd.xlane.f32.xlu1 %v7127_v50 }
0x1616   : > { %v12756_v55 = vadd.f32 %v7080_v5, %v11791_v40  ;;  %v7038_v62 = vadd.f32 %v7037_v6, %v6910_v23  ;;  %v7083_v48 = vadd.f32 %v12703_v35, %v7046_v29  ;;  %v7136_v19 = vsel %vm668_vm0, %v12759_v38, 0.0 }
0x1617   : > { %v8959_v0 = vpop.f32.mrf.mxu0 }
0x1618   : > { %v7081_v31 = vadd.f32 %v12703_v35, %v7038_v62  ;;  %v7059_v27 = vadd.f32 %v8977_v14, %v8959_v0  ;;  %v7130_v7 = vsel %vm668_vm0, %v12756_v55, 0.0  ;;  %v12769_v34 = vadd.f32 %v7083_v48, %v11808_v61  ;;  %v9138_v0 = vld [vmem:[%s13285_s14 + $0x14] ss:$8 sps:$4 sm:$0xff]  }
0x1619   : > { %7131 = vadd.xlane.f32.xlu0 %v7130_v7  ;;  %v6923_v4 = vpop.f32.mrf.mxu0  ;;  %7434 = vmatprep.subr.bf16.mxu0 %v9138_v0  ;;  %v9139_v7 = vld [vmem:[%s13285_s14] ss:$8 sps:$4 sm:$0xff]  }
0x161a   : > { %v12766_v3 = vadd.f32 %v7081_v31, %v11801_v47  ;;  %v7051_v40 = vadd.f32 %v7050_v22, %v6923_v4  ;;  %v7086_v18 = vadd.f32 %v12703_v35, %v7059_v27  ;;  %v7139_v8 = vsel %vm668_vm0, %v12769_v34, 0.0  ;;  %v9136_v31 = vld [vmem:[%s13285_s14 + $0x10] ss:$8 sps:$4 sm:$0xff]   ;;  %v9141_v27 = vld [vmem:[%s13285_s14 + $0x4] ss:$8 sps:$4 sm:$0xff]  }
0x161b   : > { %v8960_v60 = vpop.f32.mrf.mxu0  ;;  %7435 = vmatpush1.bf16.msra.mxu0 %v9136_v31 }
0x161c   : > { %v7084_v15 = vadd.f32 %v12703_v35, %v7051_v40  ;;  %v7062_v63 = vadd.f32 %v8978_v13, %v8960_v60  ;;  %v7133_v53 = vsel %vm668_vm0, %v12766_v3, 0.0  ;;  %v12783_v49 = vadd.f32 %v7086_v18, %v13381_v21  ;;  %7436 = vmatprep.subr.bf16.mxu0 %v9141_v27 }
0x161d   : > { %7137 = vadd.xlane.f32.xlu0 %v7136_v19  ;;  %7134 = vadd.xlane.f32.xlu1 %v7133_v53  ;;  %v6926_v47 = vpop.f32.mrf.mxu0 }
0x161e   : > { %v12778_v24 = vadd.f32 %v7084_v15, %v13380_v57  ;;  %v7054_v61 = vadd.f32 %v7053_v11, %v6926_v47  ;;  %v7087_v43 = vadd.f32 %v12703_v35, %v7062_v63  ;;  %v7148_v59 = vsel %vm668_vm0, %v12783_v49, 0.0 }
0x161f   : > { %7437 = vmatpush1.bf16.msra.mxu0 %v9139_v7 }
0x1620   : > { %v7085_v58 = vadd.f32 %v12703_v35, %v7054_v61  ;;  %v7142_v54 = vsel %vm668_vm0, %v12778_v24, 0.0  ;;  %v12793_v45 = vadd.f32 %v7087_v43, %v13383_v26 }
0x1621   : > { %7140 = vadd.xlane.f32.xlu1 %v7139_v8  ;;  %7143 = vadd.xlane.f32.xlu0 %v7142_v54 }
0x1622   : > { %v12790_v42 = vadd.f32 %v7085_v58, %v13382_v51  ;;  %v7151_v35 = vsel %vm668_vm0, %v12793_v45, 0.0 }
0x1624   : > { %v7145_v36 = vsel %vm668_vm0, %v12790_v42, 0.0 }
0x1625   : > { %7149 = vadd.xlane.f32.xlu0 %v7148_v59  ;;  %7146 = vadd.xlane.f32.xlu1 %v7145_v36 }
0x1629   : > { %7152 = vadd.xlane.f32.xlu1 %v7151_v35 }
0x1661   : > { %v7108_v17 = vpop.xlane.xlu0 %7107 }
0x1662   : > { %v7154_v28 = vmul.f32 0.03125, %v7108_v17 }
0x1664   : > { %v12802_v30 = vsub.f32 %v12708_v2, %v7154_v28 }
0x1665   : > { %v7114_v6 = vpop.xlane.xlu0 %7113  ;;  %v7111_v32 = vpop.xlane.xlu1 %7110 }
0x1666   : > { %v7156_v20 = vmul.f32 0.03125, %v7114_v6  ;;  %v7155_v52 = vmul.f32 0.03125, %v7111_v32  ;;  %v7186_v41 = vmul.f32 %v12802_v30, %v12802_v30 }
0x1668   : > { %v12807_v14 = vsub.f32 %v12711_v46, %v7156_v20  ;;  %v12810_v56 = vsub.f32 %v12718_v10, %v7155_v52  ;;  %v7202_v9 = vsel %vm668_vm0, %v7186_v41, 0.0 }
0x1669   : > { %v7117_v37 = vpop.xlane.xlu0 %7116  ;;  %7203 = vadd.xlane.f32.xlu0 %v7202_v9 }
0x166a   : > { %v7157_v25 = vmul.f32 0.03125, %v7117_v37  ;;  %v7188_v5 = vmul.f32 %v12807_v14, %v12807_v14  ;;  %v7187_v29 = vmul.f32 %v12810_v56, %v12810_v56 }
0x166c   : > { %v12818_v50 = vsub.f32 %v12721_v44, %v7157_v25  ;;  %v7208_v22 = vsel %vm668_vm0, %v7188_v5, 0.0  ;;  %v7205_v23 = vsel %vm668_vm0, %v7187_v29, 0.0 }
0x166d   : > { %7209 = vadd.xlane.f32.xlu0 %v7208_v22  ;;  %7206 = vadd.xlane.f32.xlu1 %v7205_v23 }
0x166e   : > { %v7189_v62 = vmul.f32 %v12818_v50, %v12818_v50 }
0x1670   : > { %v7211_v48 = vsel %vm668_vm0, %v7189_v62, 0.0 }
0x1671   : > { %7212 = vadd.xlane.f32.xlu1 %v7211_v48 }
0x1696   : > { %v7120_v13 = vpop.xlane.xlu0 %7119 }
0x1697   : > { %v7158_v4 = vmul.f32 0.03125, %v7120_v13 }
0x1699   : > { %v12838_v40 = vsub.f32 %v12732_v39, %v7158_v4 }
0x169a   : > { %v7126_v60 = vpop.xlane.xlu0 %7125  ;;  %v7123_v19 = vpop.xlane.xlu1 %7122 }
0x169b   : > { %v7160_v18 = vmul.f32 0.03125, %v7126_v60  ;;  %v7159_v15 = vmul.f32 0.03125, %v7123_v19  ;;  %v7190_v63 = vmul.f32 %v12838_v40, %v12838_v40 }
0x169d   : > { %v12843_v53 = vsub.f32 %v12735_v1, %v7160_v18  ;;  %v12846_v11 = vsub.f32 %v12742_v12, %v7159_v15  ;;  %v7214_v47 = vsel %vm668_vm0, %v7190_v63, 0.0 }
0x169e   : > { %v7129_v57 = vpop.xlane.xlu1 %7128  ;;  %7215 = vadd.xlane.f32.xlu0 %v7214_v47 }
0x169f   : > { %v7161_v61 = vmul.f32 0.03125, %v7129_v57  ;;  %v7192_v8 = vmul.f32 %v12843_v53, %v12843_v53  ;;  %v7191_v21 = vmul.f32 %v12846_v11, %v12846_v11 }
0x16a1   : > { %v12854_v43 = vsub.f32 %v12745_v33, %v7161_v61  ;;  %v7220_v58 = vsel %vm668_vm0, %v7192_v8, 0.0  ;;  %v7217_v54 = vsel %vm668_vm0, %v7191_v21, 0.0 }
0x16a2   : > { %v7132_v51 = vpop.xlane.xlu0 %7131  ;;  %7221 = vadd.xlane.f32.xlu0 %v7220_v58  ;;  %7218 = vadd.xlane.f32.xlu1 %v7217_v54 }
0x16a3   : > { %v7162_v26 = vmul.f32 0.03125, %v7132_v51  ;;  %v7193_v59 = vmul.f32 %v12854_v43, %v12854_v43 }
0x16a5   : > { %v12861_v36 = vsub.f32 %v12756_v55, %v7162_v26  ;;  %v7223_v35 = vsel %vm668_vm0, %v7193_v59, 0.0 }
0x16a6   : > { %v7138_v17 = vpop.xlane.xlu0 %7137  ;;  %v7135_v28 = vpop.xlane.xlu1 %7134  ;;  %7224 = vadd.xlane.f32.xlu1 %v7223_v35 }
0x16a7   : > { %v7164_v6 = vmul.f32 0.03125, %v7138_v17  ;;  %v7163_v32 = vmul.f32 0.03125, %v7135_v28  ;;  %v7194_v20 = vmul.f32 %v12861_v36, %v12861_v36 }
0x16a9   : > { %v12867_v52 = vsub.f32 %v12759_v38, %v7164_v6  ;;  %v12870_v41 = vsub.f32 %v12766_v3, %v7163_v32  ;;  %v7226_v9 = vsel %vm668_vm0, %v7194_v20, 0.0 }
0x16aa   : > { %v7141_v37 = vpop.xlane.xlu1 %7140  ;;  %7227 = vadd.xlane.f32.xlu0 %v7226_v9  ;;  %v7144_v25 = vpop.xlane.xlu0 %7143 }
0x16ab   : > { %v7165_v5 = vmul.f32 0.03125, %v7141_v37  ;;  %v7166_v29 = vmul.f32 0.03125, %v7144_v25  ;;  %v7196_v22 = vmul.f32 %v12867_v52, %v12867_v52  ;;  %v7195_v23 = vmul.f32 %v12870_v41, %v12870_v41 }
0x16ad   : > { %v12878_v62 = vsub.f32 %v12769_v34, %v7165_v5  ;;  %v12881_v48 = vsub.f32 %v12778_v24, %v7166_v29  ;;  %v7232_v0 = vsel %vm668_vm0, %v7196_v22, 0.0  ;;  %v7229_v31 = vsel %vm668_vm0, %v7195_v23, 0.0 }
0x16ae   : > { %7233 = vadd.xlane.f32.xlu0 %v7232_v0  ;;  %v7150_v27 = vpop.xlane.xlu0 %7149  ;;  %7230 = vadd.xlane.f32.xlu1 %v7229_v31  ;;  %v7147_v7 = vpop.xlane.xlu1 %7146  ;;  %v12913_v31 = vld [vmem:[%s13348_s17 + $0x4] ss:$0 sm:$0xff] }
0x16af   : > { %v7168_v13 = vmul.f32 0.03125, %v7150_v27  ;;  %v7167_v4 = vmul.f32 0.03125, %v7147_v7  ;;  %v7198_v60 = vmul.f32 %v12881_v48, %v12881_v48  ;;  %v7197_v19 = vmul.f32 %v12878_v62, %v12878_v62 }
0x16b1   : > { %v12890_v18 = vsub.f32 %v12783_v49, %v7168_v13  ;;  %v12893_v15 = vsub.f32 %v12790_v42, %v7167_v4  ;;  %v7238_v63 = vsel %vm668_vm0, %v7198_v60, 0.0  ;;  %v7235_v47 = vsel %vm668_vm0, %v7197_v19, 0.0  ;;  %v12920_v60 = vld [vmem:[%s13274_s3 + $0x4] ss:$0 sm:$0xff] }
0x16b2   : > { %7239 = vadd.xlane.f32.xlu0 %v7238_v63  ;;  %7236 = vadd.xlane.f32.xlu1 %v7235_v47  ;;  %v7153_v57 = vpop.xlane.xlu1 %7152 }
0x16b3   : > { %v7169_v61 = vmul.f32 0.03125, %v7153_v57  ;;  %v7200_v8 = vmul.f32 %v12890_v18, %v12890_v18  ;;  %v7199_v21 = vmul.f32 %v12893_v15, %v12893_v15 }
0x16b5   : > { %v12902_v58 = vsub.f32 %v12793_v45, %v7169_v61  ;;  %v7244_v54 = vsel %vm668_vm0, %v7200_v8, 0.0  ;;  %v7241_v51 = vsel %vm668_vm0, %v7199_v21, 0.0 }
0x16b6   : > { %7245 = vadd.xlane.f32.xlu0 %v7244_v54  ;;  %7242 = vadd.xlane.f32.xlu1 %v7241_v51 }
0x16b7   : > { %v7201_v26 = vmul.f32 %v12902_v58, %v12902_v58 }
0x16b9   : > { %v7247_v59 = vsel %vm668_vm0, %v7201_v26, 0.0 }
0x16ba   : > { %7248 = vadd.xlane.f32.xlu1 %v7247_v59 }
0x16f2   : > { %v7204_v35 = vpop.xlane.xlu0 %7203 }
0x16f3   : > { %v7250_v17 = vmul.f32 0.03125, %v7204_v35 }
0x16f5   : > { %v7266_v28 = vadd.f32 1e-05, %v7250_v17 }
0x16f6   : > { %v7210_v6 = vpop.xlane.xlu0 %7209  ;;  %v7207_v32 = vpop.xlane.xlu1 %7206 }
0x16f7   : > { %9566 = vrsqrt.f32 %v7266_v28  ;;  %v7252_v20 = vmul.f32 0.03125, %v7210_v6  ;;  %v7251_v9 = vmul.f32 0.03125, %v7207_v32 }
0x16f9   : > { %v7267_v37 = vadd.f32 1e-05, %v7251_v9  ;;  %v7268_v25 = vadd.f32 1e-05, %v7252_v20 }
0x16fa   : > { %v7213_v5 = vpop.xlane.xlu1 %7212 }
0x16fb   : > { %v7253_v29 = vmul.f32 0.03125, %v7213_v5  ;;  %9568 = vrsqrt.f32 %v7267_v37 }
0x16fc   : > { %9570 = vrsqrt.f32 %v7268_v25 }
0x16fd   : > { %v7269_v22 = vadd.f32 1e-05, %v7253_v29 }
0x16ff   : > { %9572 = vrsqrt.f32 %v7269_v22 }
0x1704   : > { %v9567_v23 = vpop.eup %9566 }
0x1705   : > { %v7298_v0 = vmul.f32 %v9567_v23, %v12802_v30 }
0x1707   : > { %v7318_v7 = vmul.f32 %v12913_v31, %v7298_v0 }
0x1708   : > { %v9569_v27 = vpop.eup %9568 }
0x1709   : > { %v7299_v13 = vmul.f32 %v9569_v27, %v12810_v56  ;;  %v9571_v4 = vpop.eup %9570  ;;  %v7338_v47 = vadd.f32 %v12920_v60, %v7318_v7 }
0x170a   : > { %v7300_v57 = vmul.f32 %v9571_v4, %v12807_v14 }
0x170b   : > { %v7319_v63 = vmul.f32 %v12913_v31, %v7299_v13 }
0x170c   : > { %v9573_v19 = vpop.eup %9572  ;;  %v7320_v21 = vmul.f32 %v12913_v31, %v7300_v57 }
0x170d   : > { %v7301_v30 = vmul.f32 %v9573_v19, %v12818_v50  ;;  %v7339_v61 = vadd.f32 %v12920_v60, %v7319_v63 }
0x170e   : > { %v7340_v51 = vadd.f32 %v12920_v60, %v7320_v21 }
0x170f   : > { %v7354_v8 = vpack.c.bf16 %v7339_v61, %v7338_v47  ;;  %v7321_v56 = vmul.f32 %v12913_v31, %v7301_v30 }
0x1711   : > { %8208 = vmatmul.mubr.msk.bf16.vlgmr.msra.gmra.mxu0 %vm668_vm0, %v7354_v8  ;;  %v7341_v54 = vadd.f32 %v12920_v60, %v7321_v56 }
0x1712   : > { %7464 = vmatprep.mubr.bf16.mxu0 %v13379_v16 }
0x1713   : > { %v7355_v50 = vpack.c.bf16 %v7341_v54, %v7340_v51 }
0x1719   : > { %8209 = vmatmul.mubr.msk.bf16.gmra.mxu0 %vm668_vm0, %v7355_v50 }
0x171a   : > { %7474 = vmatprep.mubr.bf16.mxu0 %v13379_v16 }
0x1727   : > { %v7216_v14 = vpop.xlane.xlu0 %7215 }
0x1728   : > { %v7254_v26 = vmul.f32 0.03125, %v7216_v14 }
0x172a   : > { %v7270_v59 = vadd.f32 1e-05, %v7254_v26 }
0x172b   : > { %v7222_v35 = vpop.xlane.xlu0 %7221  ;;  %v7219_v17 = vpop.xlane.xlu1 %7218 }
0x172c   : > { %9574 = vrsqrt.f32 %v7270_v59  ;;  %v7256_v28 = vmul.f32 0.03125, %v7222_v35  ;;  %v7255_v6 = vmul.f32 0.03125, %v7219_v17 }
0x172e   : > { %v7271_v32 = vadd.f32 1e-05, %v7255_v6  ;;  %v7272_v20 = vadd.f32 1e-05, %v7256_v28 }
0x172f   : > { %v7225_v9 = vpop.xlane.xlu1 %7224 }
0x1730   : > { %v7257_v37 = vmul.f32 0.03125, %v7225_v9  ;;  %9576 = vrsqrt.f32 %v7271_v32 }
0x1731   : > { %9578 = vrsqrt.f32 %v7272_v20 }
0x1732   : > { %v7273_v25 = vadd.f32 1e-05, %v7257_v37 }
0x1733   : > { %v7228_v5 = vpop.xlane.xlu0 %7227 }
0x1734   : > { %9580 = vrsqrt.f32 %v7273_v25  ;;  %v7258_v29 = vmul.f32 0.03125, %v7228_v5 }
0x1736   : > { %v7274_v22 = vadd.f32 1e-05, %v7258_v29 }
0x1737   : > { %v7231_v23 = vpop.xlane.xlu1 %7230  ;;  %v7234_v0 = vpop.xlane.xlu0 %7233 }
0x1738   : > { %v7259_v27 = vmul.f32 0.03125, %v7231_v23  ;;  %9582 = vrsqrt.f32 %v7274_v22  ;;  %v7260_v19 = vmul.f32 0.03125, %v7234_v0 }
0x1739   : > { %v9575_v7 = vpop.eup %9574 }
0x173a   : > { %v7275_v13 = vadd.f32 1e-05, %v7259_v27  ;;  %v7302_v4 = vmul.f32 %v9575_v7, %v12838_v40  ;;  %v7276_v8 = vadd.f32 1e-05, %v7260_v19 }
0x173b   : > { %v7237_v63 = vpop.xlane.xlu1 %7236  ;;  %v7240_v56 = vpop.xlane.xlu0 %7239 }
0x173c   : > { %v7261_v30 = vmul.f32 0.03125, %v7237_v63  ;;  %9584 = vrsqrt.f32 %v7275_v13  ;;  %v7322_v54 = vmul.f32 %v12913_v31, %v7302_v4  ;;  %v7262_v59 = vmul.f32 0.03125, %v7240_v56 }
0x173d   : > { %v9577_v47 = vpop.eup %9576 }
0x173e   : > { %v7277_v57 = vadd.f32 1e-05, %v7261_v30  ;;  %v7303_v61 = vmul.f32 %v9577_v47, %v12846_v11  ;;  %v9579_v51 = vpop.eup %9578  ;;  %v7342_v17 = vadd.f32 %v12920_v60, %v7322_v54  ;;  %v7278_v20 = vadd.f32 1e-05, %v7262_v59 }
0x173f   : > { %v7243_v21 = vpop.xlane.xlu1 %7242  ;;  %v7304_v35 = vmul.f32 %v9579_v51, %v12843_v53 }
0x1740   : > { %9586 = vrsqrt.f32 %v7277_v57  ;;  %v7263_v14 = vmul.f32 0.03125, %v7243_v21  ;;  %v7323_v40 = vmul.f32 %v12913_v31, %v7303_v61 }
0x1741   : > { %v9581_v50 = vpop.eup %9580  ;;  %9588 = vrsqrt.f32 %v7276_v8  ;;  %v7324_v37 = vmul.f32 %v12913_v31, %v7304_v35 }
0x1742   : > { %v7305_v26 = vmul.f32 %v9581_v50, %v12854_v43  ;;  %v7343_v11 = vadd.f32 %v12920_v60, %v7323_v40  ;;  %v7279_v28 = vadd.f32 1e-05, %v7263_v14  ;;  %v7246_v43 = vpop.xlane.xlu0 %7245 }
0x1743   : > { %v7249_v9 = vpop.xlane.xlu1 %7248  ;;  %v7264_v0 = vmul.f32 0.03125, %v7246_v43  ;;  %v7344_v27 = vadd.f32 %v12920_v60, %v7324_v37 }
0x1744   : > { %v7356_v6 = vpack.c.bf16 %v7343_v11, %v7342_v17  ;;  %v7325_v32 = vmul.f32 %v12913_v31, %v7305_v26  ;;  %9590 = vrsqrt.f32 %v7279_v28  ;;  %v7265_v53 = vmul.f32 0.03125, %v7249_v9 }
0x1745   : > { %v9583_v25 = vpop.eup %9582  ;;  %9592 = vrsqrt.f32 %v7278_v20  ;;  %v7280_v63 = vadd.f32 1e-05, %v7264_v0 }
0x1746   : > { %8210 = vmatmul.mubr.msk.bf16.gmra.mxu0 %vm668_vm0, %v7356_v6  ;;  %v7345_v5 = vadd.f32 %v12920_v60, %v7325_v32  ;;  %v7306_v22 = vmul.f32 %v9583_v25, %v12861_v36  ;;  %v7281_v7 = vadd.f32 1e-05, %v7265_v53  ;;  %v9142_v6 = vld [vmem:[%s13384_s19 + $0x38] sm:$0xff]   ;;  %v9144_v25 = vld [vmem:[%s13384_s19 + $0x28] sm:$0xff]  }
0x1747   : > { %7484 = vmatprep.mubr.bf16.mxu0 %v13379_v16  ;;  %8979 = vmatprep.subr.bf16.mxu1 %v9142_v6  ;;  %v9148_v53 = vld [vmem:[%s13384_s19 + $0x8] sm:$0xff]  }
0x1748   : > { %v7357_v13 = vpack.c.bf16 %v7345_v5, %v7344_v27  ;;  %v7326_v30 = vmul.f32 %v12913_v31, %v7306_v22  ;;  %9594 = vrsqrt.f32 %v7281_v7  ;;  %8980 = vmatpush3.bf16.msra.mxu1 %v9142_v6  ;;  %v9149_v5 = vld [vmem:[%s13384_s19] sm:$0xff]  }
0x1749   : > { %v9585_v29 = vpop.eup %9584  ;;  %9596 = vrsqrt.f32 %v7280_v63  ;;  %v13386_v22 = vld [vmem:[#allocation21_spill] sm:$0xff] }
0x174a   : > { %v7307_v23 = vmul.f32 %v9585_v29, %v12870_v41  ;;  %v7346_v61 = vadd.f32 %v12920_v60, %v7326_v30  ;;  %v7366_v29 = vld [vmem:[%s13385_s25] sm:$0x3]  ;;  %s9856_s25 = smov [#allocation12]  }
0x174b   : > { %s9767_s15 = sshll.u32 %s9856_s25, 4  ;;  %s9768_s15 = int_to_ptr.vmem [resolvable:$false] %s9767_s15 }
0x174c   : > { %v7327_v4 = vmul.f32 %v12913_v31, %v7307_v23  ;;  %v13387_v23 = vsub.s32 1, %v13386_v22  ;;  %s9769_s18 = scalar_lea.vmem %s9768_s15, 4096  ;;  %p9770_p11 = scmp.lt.s32.totalorder %s13223_s26, %s9768_s15 }
0x174d   : > { %v9587_v19 = vpop.eup %9586  ;;  %p9771_p5 = scmp.lt.s32.totalorder %s9769_s18, %s9763_s23 }
0x174e   : > { %8211 = vmatmul.mubr.msk.bf16.gmra.mxu0 %vm668_vm0, %v7357_v13  ;;  %v9589_v47 = vpop.eup %9588  ;;  %v7309_v36 = vmul.f32 %v9587_v19, %v12878_v62  ;;  %v7347_v41 = vadd.f32 %v12920_v60, %v7327_v4  ;;  %v13011_v0 = vrot.slane %v7366_v29, %v13387_v23 }
0x174f   : > { %7494 = vmatprep.mubr.bf16.mxu0 %v13379_v16  ;;  %v7308_v57 = vmul.f32 %v9589_v47, %v12867_v52  ;;  %p9772_p3 = por %p9771_p5, %p9770_p11 }
0x1750   : > { %v7358_v8 = vpack.c.bf16 %v7347_v41, %v7346_v61  ;;  %v7329_v56 = vmul.f32 %v12913_v31, %v7309_v36 }
0x1751   : > { %v9591_v21 = vpop.eup %9590  ;;  %v7328_v51 = vmul.f32 %v12913_v31, %v7308_v57  ;;  %p9773_p6 = pnand %p9772_p3, %p9766_p9 }
0x1752   : > { %v9593_v54 = vpop.eup %9592  ;;  %v7311_v62 = vmul.f32 %v9591_v21, %v12893_v15  ;;  %v7349_v50 = vadd.f32 %v12920_v60, %v7329_v56 }
0x1753   : > { %v7310_v52 = vmul.f32 %v9593_v54, %v12881_v48  ;;  %v7348_v14 = vadd.f32 %v12920_v60, %v7328_v51 }
0x1754   : > { %v7331_v26 = vmul.f32 %v12913_v31, %v7311_v62 }
0x1755   : > { %v7359_v40 = vpack.c.bf16 %v7349_v50, %v7348_v14  ;;  %v9595_v59 = vpop.eup %9594  ;;  %v7330_v35 = vmul.f32 %v12913_v31, %v7310_v52 }
0x1756   : > { %8212 = vmatmul.mubr.msk.bf16.gmra.mxu0 %vm668_vm0, %v7358_v8  ;;  %v9597_v17 = vpop.eup %9596  ;;  %v7313_v11 = vmul.f32 %v9595_v59, %v12902_v58  ;;  %v7351_v15 = vadd.f32 %v12920_v60, %v7331_v26  ;;  %v9143_v58 = vld [vmem:[%s13384_s19 + $0x30] sm:$0xff]  }
0x1757   : > { %7504 = vmatprep.mubr.bf16.mxu0 %v13379_v16  ;;  %v7312_v28 = vmul.f32 %v9597_v17, %v12890_v18  ;;  %v7350_v48 = vadd.f32 %v12920_v60, %v7330_v35  ;;  %8981 = vmatprep.subr.bf16.mxu1 %v9143_v58 }
0x1758   : > { %v7333_v20 = vmul.f32 %v12913_v31, %v7313_v11  ;;  %8982 = vmatpush3.bf16.msra.mxu1 %v9143_v58  ;;  %v13388_v58 = vsub.s32 0, %v13386_v22 }
0x1759   : > { %v7360_v32 = vpack.c.bf16 %v7351_v15, %v7350_v48  ;;  %v7332_v9 = vmul.f32 %v12913_v31, %v7312_v28  ;;  %8983 = vmatprep.subr.bf16.mxu1 %v9144_v25  ;;  %v9145_v31 = vld [vmem:[%s13384_s19 + $0x20] sm:$0xff]  }
0x175a   : > { %v7353_v18 = vadd.f32 %v12920_v60, %v7333_v20 }
0x175b   : > { %v7352_v37 = vadd.f32 %v12920_v60, %v7332_v9  ;;  %v9147_v60 = vld [vmem:[%s13384_s19 + $0x10] sm:$0xff]  }
0x175c   : > { %8984 = vmatpush3.bf16.msra.mxu1 %v9144_v25 }
0x175d   : > { %v7361_v43 = vpack.c.bf16 %v7353_v18, %v7352_v37  ;;  %8985 = vmatprep.subr.bf16.mxu1 %v9145_v31  ;;  %v13019_v18 = vrot.slane %v7366_v29, %v13388_v58 }
0x175e   : > { %8213 = vmatmul.mubr.msk.bf16.gmra.mxu0 %vm668_vm0, %v7359_v40 }
0x175f   : > { %7514 = vmatprep.mubr.bf16.mxu0 %v13379_v16 }
0x1760   : > { %8986 = vmatpush3.bf16.msra.mxu1 %v9145_v31 }
0x1766   : > { %8214 = vmatmul.mubr.msk.bf16.gmra.mxu0 %vm668_vm0, %v7360_v32 }
0x1767   : > { %7524 = vmatprep.mubr.bf16.mxu0 %v13379_v16  ;;  %v9146_v16 = vld [vmem:[%s13384_s19 + $0x18] sm:$0xff]  }
0x1768   : > { %8987 = vmatprep.subr.bf16.mxu1 %v9146_v16 }
0x1769   : > { %8988 = vmatpush3.bf16.msra.mxu1 %v9146_v16 }
0x176a   : > { %8989 = vmatprep.subr.bf16.mxu1 %v9147_v60 }
0x176d   : > { %8990 = vmatpush3.bf16.msra.mxu1 %v9147_v60 }
0x176e   : > { %8215 = vmatmul.mubr.msk.bf16.gmra.mxu0 %vm668_vm0, %v7361_v43  ;;  %8991 = vmatprep.subr.bf16.mxu1 %v9148_v53 }
0x1771   : > { %8992 = vmatpush3.bf16.msra.mxu1 %v9148_v53 }
0x1772   : > { %8993 = vmatprep.subr.bf16.mxu1 %v9149_v5 }
0x1775   : > { %8994 = vmatpush3.bf16.msra.mxu1 %v9149_v5 }
0x17d1   : > { %v7456_v27 = vpop.f32.mrf.mxu0 }
0x17d2   : > { %v7457_v60 = vadd.f32 %v7456_v27, %v13019_v18 }
0x17d3   : > { %v7458_v7 = vpop.f32.mrf.mxu0 }
0x17d4   : > { %v7459_v13 = vadd.f32 %v7458_v7, %v13011_v0 }
0x17d5   : > { %v7460_v4 = vpop.f32.mrf.mxu0 }
0x17d6   : > { %v7551_v19 = vmul.f32 0.044715, %v7459_v13  ;;  %v7535_v37 = vmul.f32 0.5, %v7459_v13  ;;  %v7461_v53 = vadd.f32 %v7460_v4, %v13019_v18 }
0x17d7   : > { %v7462_v63 = vpop.f32.mrf.mxu0 }
0x17d8   : > { %v7567_v30 = vmul.f32 %v7551_v19, %v7459_v13  ;;  %v7463_v47 = vadd.f32 %v7462_v63, %v13011_v0 }
0x17d9   : > { %v7466_v36 = vpop.f32.mrf.mxu0 }
0x17da   : > { %v7583_v41 = vmul.f32 %v7567_v30, %v7459_v13  ;;  %v7552_v57 = vmul.f32 0.044715, %v7463_v47  ;;  %v7536_v43 = vmul.f32 0.5, %v7463_v47 }
0x17db   : > { %v7468_v61 = vpop.f32.mrf.mxu0 }
0x17dc   : > { %v7599_v8 = vadd.f32 %v7583_v41, %v7459_v13  ;;  %v7568_v56 = vmul.f32 %v7552_v57, %v7463_v47  ;;  %v7469_v21 = vadd.f32 %v7468_v61, %v13011_v0  ;;  %v7467_v13 = vadd.f32 %v7466_v36, %v13019_v18 }
0x17dd   : > { %v7470_v54 = vpop.f32.mrf.mxu0 }
0x17de   : > { %v7615_v51 = vmul.f32 0.7978846, %v7599_v8  ;;  %v7584_v62 = vmul.f32 %v7568_v56, %v7463_v47  ;;  %v7553_v50 = vmul.f32 0.044715, %v7469_v21  ;;  %v7537_v30 = vmul.f32 0.5, %v7469_v21 }
0x17df   : > { %v7472_v52 = vpop.f32.mrf.mxu0 }
0x17e0   : > { %v7600_v14 = vadd.f32 %v7584_v62, %v7463_v47  ;;  %v7569_v40 = vmul.f32 %v7553_v50, %v7469_v21  ;;  %v7473_v26 = vadd.f32 %v7472_v52, %v13011_v0  ;;  %9598 = vtanh.f32 %v7615_v51 }
0x17e1   : > { %v7471_v47 = vadd.f32 %v7470_v54, %v13019_v18 }
0x17e2   : > { %v7616_v59 = vmul.f32 0.7978846, %v7600_v14  ;;  %v7585_v35 = vmul.f32 %v7569_v40, %v7469_v21  ;;  %v7554_v17 = vmul.f32 0.044715, %v7473_v26  ;;  %v7538_v29 = vmul.f32 0.5, %v7473_v26 }
0x17e4   : > { %v7601_v11 = vadd.f32 %v7585_v35, %v7469_v21  ;;  %v7570_v15 = vmul.f32 %v7554_v17, %v7473_v26  ;;  %9600 = vtanh.f32 %v7616_v59 }
0x17e6   : > { %v7617_v28 = vmul.f32 0.7978846, %v7601_v11  ;;  %v7586_v48 = vmul.f32 %v7570_v15, %v7473_v26 }
0x17e8   : > { %9602 = vtanh.f32 %v7617_v28  ;;  %v7602_v6 = vadd.f32 %v7586_v48, %v7473_v26 }
0x17ea   : > { %v7618_v32 = vmul.f32 0.7978846, %v7602_v6 }
0x17ec   : > { %9604 = vtanh.f32 %v7618_v32 }
0x17ed   : > { %v9599_v20 = vpop.eup %9598 }
0x17ee   : > { %v7647_v9 = vadd.f32 1.0, %v9599_v20 }
0x17f0   : > { %v7663_v16 = vmul.f32 %v7647_v9, %v7535_v37 }
0x17f1   : > { %v9601_v25 = vpop.eup %9600 }
0x17f2   : > { %v7648_v31 = vadd.f32 1.0, %v9601_v25  ;;  %v7679_v19 = vmul.f32 %v7663_v16, %v7457_v60 }
0x17f4   : > { %v7664_v5 = vmul.f32 %v7648_v31, %v7536_v43 }
0x17f5   : > { %v9603_v23 = vpop.eup %9602 }
0x17f6   : > { %v7649_v7 = vadd.f32 1.0, %v9603_v23  ;;  %v7680_v63 = vmul.f32 %v7664_v5, %v7461_v53 }
0x17f8   : > { %v7695_v41 = vpack.c.bf16 %v7680_v63, %v7679_v19  ;;  %v7665_v22 = vmul.f32 %v7649_v7, %v7537_v30 }
0x17f9   : > { %v9605_v57 = vpop.eup %9604 }
0x17fa   : > { %v7650_v61 = vadd.f32 1.0, %v9605_v57  ;;  %8995 = vmatprep.mubr.bf16.mxu1 %v7695_v41  ;;  %v7681_v27 = vmul.f32 %v7665_v22, %v7467_v13 }
0x17fc   : > { %v7666_v8 = vmul.f32 %v7650_v61, %v7538_v29 }
0x17fe   : > { %v7682_v56 = vmul.f32 %v7666_v8, %v7471_v47 }
0x1800   : > { %v7696_v4 = vpack.c.bf16 %v7682_v56, %v7681_v27 }
0x1802   : > { %8996 = vmatmul.mubr.bf16.vlgmr.msra.gmra.mxu1 %v7696_v4 }
0x1806   : > { %v13025_v51 = vpop.f32.mrf.mxu0 }
0x1808   : > { %v7478_v62 = vpop.f32.mrf.mxu0 }
0x1809   : > { %v7479_v21 = vadd.f32 %v7478_v62, %v13011_v0 }
0x180a   : > { %v13028_v50 = vpop.f32.mrf.mxu0 }
0x180b   : > { %v7555_v52 = vmul.f32 0.044715, %v7479_v21 }
0x180c   : > { %v7482_v14 = vpop.f32.mrf.mxu0 }
0x180d   : > { %v7571_v40 = vmul.f32 %v7555_v52, %v7479_v21  ;;  %v7483_v26 = vadd.f32 %v7482_v14, %v13011_v0 }
0x180e   : > { %v13031_v36 = vpop.f32.mrf.mxu0 }
0x180f   : > { %v7587_v54 = vmul.f32 %v7571_v40, %v7479_v21  ;;  %v7556_v59 = vmul.f32 0.044715, %v7483_v26 }
0x1810   : > { %v7488_v35 = vpop.f32.mrf.mxu0 }
0x1811   : > { %v7603_v17 = vadd.f32 %v7587_v54, %v7479_v21  ;;  %v7572_v11 = vmul.f32 %v7556_v59, %v7483_v26  ;;  %v13034_v15 = vadd.f32 %v7488_v35, %v13011_v0 }
0x1812   : > { %v13036_v28 = vpop.f32.mrf.mxu0 }
0x1813   : > { %v7619_v48 = vmul.f32 0.7978846, %v7603_v17  ;;  %v7588_v6 = vmul.f32 %v7572_v11, %v7483_v26  ;;  %v7557_v32 = vmul.f32 0.044715, %v13034_v15 }
0x1814   : > { %v7492_v20 = vpop.f32.mrf.mxu0 }
0x1815   : > { %v7604_v9 = vadd.f32 %v7588_v6, %v7483_v26  ;;  %v7573_v58 = vmul.f32 %v7557_v32, %v13034_v15  ;;  %v13041_v37 = vadd.f32 %v7492_v20, %v13011_v0  ;;  %9606 = vtanh.f32 %v7619_v48 }
0x1816   : > { %v13043_v25 = vpop.f32.mrf.mxu0 }
0x1817   : > { %v7620_v43 = vmul.f32 0.7978846, %v7604_v9  ;;  %v7589_v31 = vmul.f32 %v7573_v58, %v13034_v15  ;;  %v7558_v16 = vmul.f32 0.044715, %v13041_v37  ;;  %v7539_v9 = vmul.f32 0.5, %v7479_v21 }
0x1818   : > { %v7498_v60 = vpop.f32.mrf.mxu0  ;;  %v7477_v21 = vadd.f32 %v13025_v51, %v13019_v18 }
0x1819   : > { %v7605_v53 = vadd.f32 %v7589_v31, %v13034_v15  ;;  %v7574_v5 = vmul.f32 %v7558_v16, %v13041_v37  ;;  %v13050_v23 = vadd.f32 %v7498_v60, %v13011_v0  ;;  %9608 = vtanh.f32 %v7620_v43 }
0x181a   : > { %v13052_v7 = vpop.f32.mrf.mxu0  ;;  %v7540_v60 = vmul.f32 0.5, %v7483_v26 }
0x181b   : > { %v7621_v19 = vmul.f32 0.7978846, %v7605_v53  ;;  %v7590_v63 = vmul.f32 %v7574_v5, %v13041_v37  ;;  %v7559_v30 = vmul.f32 0.044715, %v13050_v23 }
0x181c   : > { %v7502_v41 = vpop.f32.mrf.mxu0 }
0x181d   : > { %9610 = vtanh.f32 %v7621_v19  ;;  %v7606_v57 = vadd.f32 %v7590_v63, %v13041_v37  ;;  %v7575_v22 = vmul.f32 %v7559_v30, %v13050_v23  ;;  %v13059_v29 = vadd.f32 %v7502_v41, %v13011_v0 }
0x181e   : > { %v13061_v61 = vpop.f32.mrf.mxu0 }
0x181f   : > { %v7622_v13 = vmul.f32 0.7978846, %v7606_v57  ;;  %v7591_v47 = vmul.f32 %v7575_v22, %v13050_v23  ;;  %v7560_v8 = vmul.f32 0.044715, %v13059_v29  ;;  %v7481_v57 = vadd.f32 %v13028_v50, %v13019_v18 }
0x1820   : > { %v7508_v27 = vpop.f32.mrf.mxu0 }
0x1821   : > { %9612 = vtanh.f32 %v7622_v13  ;;  %v7607_v56 = vadd.f32 %v7591_v47, %v13050_v23  ;;  %v7576_v4 = vmul.f32 %v7560_v8, %v13059_v29  ;;  %v13068_v62 = vadd.f32 %v7508_v27, %v13011_v0 }
0x1822   : > { %v9607_v52 = vpop.eup %9606  ;;  %v13070_v14 = vpop.f32.mrf.mxu0 }
0x1823   : > { %v7623_v40 = vmul.f32 0.7978846, %v7607_v56  ;;  %v7592_v54 = vmul.f32 %v7576_v4, %v13059_v29  ;;  %v7561_v59 = vmul.f32 0.044715, %v13068_v62  ;;  %v7651_v17 = vadd.f32 1.0, %v9607_v52 }
0x1824   : > { %v7512_v35 = vpop.f32.mrf.mxu0 }
0x1825   : > { %v7608_v11 = vadd.f32 %v7592_v54, %v13059_v29  ;;  %v7577_v48 = vmul.f32 %v7561_v59, %v13068_v62  ;;  %v13077_v6 = vadd.f32 %v7512_v35, %v13011_v0  ;;  %9614 = vtanh.f32 %v7623_v40 }
0x1826   : > { %v9609_v32 = vpop.eup %9608  ;;  %v13079_v20 = vpop.f32.mrf.mxu0  ;;  %v7667_v5 = vmul.f32 %v7651_v17, %v7539_v9  ;;  %v7541_v59 = vmul.f32 0.5, %v13034_v15  ;;  %v7542_v9 = vmul.f32 0.5, %v13041_v37 }
0x1827   : > { %v7624_v58 = vmul.f32 0.7978846, %v7608_v11  ;;  %v7593_v43 = vmul.f32 %v7577_v48, %v13068_v62  ;;  %v7562_v31 = vmul.f32 0.044715, %v13077_v6  ;;  %v7652_v53 = vadd.f32 1.0, %v9609_v32 }
0x1828   : > { %v7518_v16 = vpop.f32.mrf.mxu0  ;;  %v7683_v56 = vmul.f32 %v7667_v5, %v7477_v21  ;;  %v7487_v5 = vadd.f32 %v13031_v36, %v13019_v18 }
0x1829   : > { %v7609_v19 = vadd.f32 %v7593_v43, %v13068_v62  ;;  %v7578_v63 = vmul.f32 %v7562_v31, %v13077_v6  ;;  %v13086_v30 = vadd.f32 %v7518_v16, %v13011_v0  ;;  %9616 = vtanh.f32 %v7624_v58 }
0x182a   : > { %v9611_v41 = vpop.eup %9610  ;;  %v13092_v22 = vpop.f32.mrf.mxu0  ;;  %v7668_v26 = vmul.f32 %v7652_v53, %v7540_v60 }
0x182b   : > { %v7625_v13 = vmul.f32 0.7978846, %v7609_v19  ;;  %v7594_v47 = vmul.f32 %v7578_v63, %v13077_v6  ;;  %v7563_v8 = vmul.f32 0.044715, %v13086_v30  ;;  %v7653_v52 = vadd.f32 1.0, %v9611_v41 }
0x182c   : > { %v7522_v27 = vpop.f32.mrf.mxu0  ;;  %v7684_v4 = vmul.f32 %v7668_v26, %v7481_v57  ;;  %v7491_v19 = vadd.f32 %v13036_v28, %v13019_v18 }
0x182d   : > { %9618 = vtanh.f32 %v7625_v13  ;;  %v7610_v40 = vadd.f32 %v7594_v47, %v13077_v6  ;;  %v7579_v51 = vmul.f32 %v7563_v8, %v13086_v30  ;;  %v13099_v54 = vadd.f32 %v7522_v27, %v13011_v0 }
0x182e   : > { %v9613_v50 = vpop.eup %9612  ;;  %v13102_v35 = vpop.f32.mrf.mxu0  ;;  %v7697_v17 = vpack.c.bf16 %v7684_v4, %v7683_v56  ;;  %v7669_v31 = vmul.f32 %v7653_v52, %v7541_v59  ;;  %v7543_v52 = vmul.f32 0.5, %v13050_v23  ;;  %v7544_v59 = vmul.f32 0.5, %v13059_v29 }
0x182f   : > { %v7626_v11 = vmul.f32 0.7978846, %v7610_v40  ;;  %v7595_v48 = vmul.f32 %v7579_v51, %v13086_v30  ;;  %v7564_v32 = vmul.f32 0.044715, %v13099_v54  ;;  %v7654_v43 = vadd.f32 1.0, %v9613_v50 }
0x1830   : > { %8999 = vmatprep.mubr.bf16.mxu1 %v7697_v17  ;;  %v7528_v58 = vpop.f32.mrf.mxu0  ;;  %v7685_v13 = vmul.f32 %v7669_v31, %v7487_v5  ;;  %v7501_v23 = vadd.f32 %v13052_v7, %v13019_v18  ;;  %v7545_v29 = vmul.f32 0.5, %v13068_v62  ;;  %v7507_v7 = vadd.f32 %v13061_v61, %v13019_v18 }
0x1831   : > { %9620 = vtanh.f32 %v7626_v11  ;;  %v7611_v16 = vadd.f32 %v7595_v48, %v13086_v30  ;;  %v7580_v60 = vmul.f32 %v7564_v32, %v13099_v54  ;;  %v13110_v15 = vadd.f32 %v7528_v58, %v13011_v0 }
0x1832   : > { %v9615_v53 = vpop.eup %9614  ;;  %v13116_v37 = vpop.f32.mrf.mxu0  ;;  %v7670_v63 = vmul.f32 %v7654_v43, %v7542_v9  ;;  %v7517_v61 = vadd.f32 %v13079_v20, %v13019_v18  ;;  %v7527_v20 = vadd.f32 %v13102_v35, %v13019_v18 }
0x1833   : > { %v7627_v41 = vmul.f32 0.7978846, %v7611_v16  ;;  %v7596_v21 = vmul.f32 %v7580_v60, %v13099_v54  ;;  %v7565_v57 = vmul.f32 0.044715, %v13110_v15  ;;  %v7655_v8 = vadd.f32 1.0, %v9615_v53 }
0x1834   : > { %v7532_v26 = vpop.f32.mrf.mxu0  ;;  %v7686_v47 = vmul.f32 %v7670_v63, %v7491_v19 }
0x1835   : > { %v7612_v27 = vadd.f32 %v7596_v21, %v13099_v54  ;;  %v7581_v56 = vmul.f32 %v7565_v57, %v13110_v15  ;;  %v7533_v36 = vadd.f32 %v7532_v26, %v13011_v0  ;;  %9622 = vtanh.f32 %v7627_v41 }
0x1836   : > { %v9617_v28 = vpop.eup %9616  ;;  %v7698_v4 = vpack.c.bf16 %v7686_v47, %v7685_v13  ;;  %v7671_v11 = vmul.f32 %v7655_v8, %v7543_v52  ;;  %v7497_v0 = vadd.f32 %v13043_v25, %v13019_v18  ;;  %v7546_v41 = vmul.f32 0.5, %v13077_v6 }
0x1837   : > { %v7628_v40 = vmul.f32 0.7978846, %v7612_v27  ;;  %v7597_v51 = vmul.f32 %v7581_v56, %v13110_v15  ;;  %v7566_v50 = vmul.f32 0.044715, %v7533_v36  ;;  %v7656_v17 = vadd.f32 1.0, %v9617_v28 }
0x1838   : > { %9000 = vmatmul.mubr.bf16.gmra.mxu1 %v7698_v4  ;;  %v7687_v60 = vmul.f32 %v7671_v11, %v7497_v0  ;;  %v7511_v26 = vadd.f32 %v13070_v14, %v13019_v18  ;;  %v7547_v28 = vmul.f32 0.5, %v13086_v30  ;;  %v7548_v4 = vmul.f32 0.5, %v13099_v54 }
0x1839   : > { %v7613_v48 = vadd.f32 %v7597_v51, %v13110_v15  ;;  %v7582_v32 = vmul.f32 %v7566_v50, %v7533_v36  ;;  %9624 = vtanh.f32 %v7628_v40  ;;  %v7672_v58 = vmul.f32 %v7656_v17, %v7544_v59 }
0x183a   : > { %v9619_v9 = vpop.eup %9618  ;;  %v7521_v14 = vadd.f32 %v13092_v22, %v13019_v18  ;;  %v7531_v22 = vadd.f32 %v13116_v37, %v13019_v18 }
0x183b   : > { %v7629_v43 = vmul.f32 0.7978846, %v7613_v48  ;;  %v7598_v31 = vmul.f32 %v7582_v32, %v7533_v36  ;;  %v7657_v16 = vadd.f32 1.0, %v9619_v9  ;;  %v7688_v53 = vmul.f32 %v7672_v58, %v7501_v23 }
0x183c   : > { %v7549_v48 = vmul.f32 0.5, %v13110_v15  ;;  %v7550_v9 = vmul.f32 0.5, %v7533_v36  ;;  %v13151_v15 = vld [vmem:[%s13389_s20] ss:$0 sm:$0xff] }
0x183d   : > { %9626 = vtanh.f32 %v7629_v43  ;;  %v7614_v5 = vadd.f32 %v7598_v31, %v7533_v36  ;;  %v7699_v63 = vpack.c.bf16 %v7688_v53, %v7687_v60  ;;  %v7673_v25 = vmul.f32 %v7657_v16, %v7545_v29 }
0x183e   : > { %v9621_v19 = vpop.eup %9620 }
0x183f   : > { %v7630_v21 = vmul.f32 0.7978846, %v7614_v5  ;;  %v7658_v57 = vadd.f32 1.0, %v9621_v19  ;;  %9003 = vmatprep.mubr.bf16.mxu1 %v7699_v63  ;;  %v7689_v62 = vmul.f32 %v7673_v25, %v7507_v7 }
0x1841   : > { %9628 = vtanh.f32 %v7630_v21  ;;  %v7674_v13 = vmul.f32 %v7658_v57, %v7546_v41 }
0x1842   : > { %v9623_v47 = vpop.eup %9622 }
0x1843   : > { %v7690_v8 = vmul.f32 %v7674_v13, %v7511_v26  ;;  %v7659_v27 = vadd.f32 1.0, %v9623_v47 }
0x1845   : > { %v7700_v56 = vpack.c.bf16 %v7690_v8, %v7689_v62  ;;  %v7675_v40 = vmul.f32 %v7659_v27, %v7547_v28 }
0x1846   : > { %v9625_v6 = vpop.eup %9624 }
0x1847   : > { %9004 = vmatmul.mubr.bf16.gmra.mxu1 %v7700_v56  ;;  %v7660_v52 = vadd.f32 1.0, %v9625_v6  ;;  %v7691_v59 = vmul.f32 %v7675_v40, %v7517_v61 }
0x1849   : > { %v7676_v51 = vmul.f32 %v7660_v52, %v7548_v4 }
0x184a   : > { %v9627_v50 = vpop.eup %9626 }
0x184b   : > { %v7692_v17 = vmul.f32 %v7676_v51, %v7521_v14  ;;  %v7661_v11 = vadd.f32 1.0, %v9627_v50 }
0x184d   : > { %v7701_v30 = vpack.c.bf16 %v7692_v17, %v7691_v59  ;;  %v7677_v0 = vmul.f32 %v7661_v11, %v7549_v48 }
0x184e   : > { %v9629_v32 = vpop.eup %9628 }
0x184f   : > { %9007 = vmatprep.mubr.bf16.mxu1 %v7701_v30  ;;  %v7662_v54 = vadd.f32 1.0, %v9629_v32  ;;  %v7693_v58 = vmul.f32 %v7677_v0, %v7527_v20 }
0x1851   : > { %v7678_v23 = vmul.f32 %v7662_v54, %v7550_v9 }
0x1853   : > { %v7694_v43 = vmul.f32 %v7678_v23, %v7531_v22 }
0x1855   : > { %v7702_v31 = vpack.c.bf16 %v7694_v43, %v7693_v58 }
0x1857   : > { %9008 = vmatmul.mubr.bf16.gmra.mxu1 %v7702_v31 }
0x18c2   : > { %v8997_v36 = vpop.f32.mrf.mxu1 }
0x18c3   : > { %v7817_v16 = vadd.f32 %v8997_v36, %v13151_v15 }
0x18c4   : > { %v7808_v60 = vpop.f32.mrf.mxu1 }
0x18c5   : > { %v7873_v53 = vadd.f32 %v7817_v16, %v12711_v46  ;;  %v7809_v35 = vadd.f32 %v13151_v15, %v7808_v60 }
0x18c6   : > { %v8998_v29 = vpop.f32.mrf.mxu1 }
0x18c7   : > { %7889 = vst.msk [vmem:[%s13158_s1 + $0x10] sm:$0xff] %vm668_vm0, %v7873_v53  ;;  %v7871_v18 = vadd.f32 %v7809_v35, %v12708_v2  ;;  %v7820_v37 = vadd.f32 %v8998_v29, %v13151_v15 }
0x18c8   : > { %v7811_v5 = vpop.f32.mrf.mxu1 }
0x18c9   : > { %7887 = vst.msk [vmem:[%s13158_s1] sm:$0xff] %vm668_vm0, %v7871_v18  ;;  %v7874_v46 = vadd.f32 %v7820_v37, %v12721_v44  ;;  %v7812_v19 = vadd.f32 %v13151_v15, %v7811_v5 }
0x18cb   : > { %7890 = vst.msk [vmem:[%s13158_s1 + $0x18] sm:$0xff] %vm668_vm0, %v7874_v46  ;;  %v7872_v63 = vadd.f32 %v7812_v19, %v12718_v10 }
0x18cd   : > { %7888 = vst.msk [vmem:[%s13158_s1 + $0x8] sm:$0xff] %vm668_vm0, %v7872_v63 }
0x18f8   : > { %v9001_v41 = vpop.f32.mrf.mxu1 }
0x18f9   : > { %v7833_v2 = vadd.f32 %v9001_v41, %v13151_v15 }
0x18fa   : > { %v7824_v21 = vpop.f32.mrf.mxu1 }
0x18fb   : > { %v7877_v57 = vadd.f32 %v7833_v2, %v12735_v1  ;;  %v7825_v25 = vadd.f32 %v13151_v15, %v7824_v21 }
0x18fc   : > { %v9002_v7 = vpop.f32.mrf.mxu1 }
0x18fd   : > { %7893 = vst.msk [vmem:[%s13158_s1 + $0x30] sm:$0xff] %vm668_vm0, %v7877_v57  ;;  %v7875_v44 = vadd.f32 %v7825_v25, %v12732_v39  ;;  %v7836_v26 = vadd.f32 %v9002_v7, %v13151_v15 }
0x18fe   : > { %v7827_v10 = vpop.f32.mrf.mxu1 }
0x18ff   : > { %7891 = vst.msk [vmem:[%s13158_s1 + $0x20] sm:$0xff] %vm668_vm0, %v7875_v44  ;;  %v7878_v13 = vadd.f32 %v7836_v26, %v12745_v33  ;;  %v7828_v47 = vadd.f32 %v13151_v15, %v7827_v10 }
0x1901   : > { %7894 = vst.msk [vmem:[%s13158_s1 + $0x38] sm:$0xff] %vm668_vm0, %v7878_v13  ;;  %v7876_v1 = vadd.f32 %v7828_v47, %v12742_v12 }
0x1903   : > { %7892 = vst.msk [vmem:[%s13158_s1 + $0x28] sm:$0xff] %vm668_vm0, %v7876_v1 }
0x1907   : > { %v9005_v62 = vpop.f32.mrf.mxu1 }
0x1908   : > { %v7849_v39 = vadd.f32 %v9005_v62, %v13151_v15 }
0x1909   : > { %v7840_v8 = vpop.f32.mrf.mxu1 }
0x190a   : > { %v7881_v27 = vadd.f32 %v7849_v39, %v12759_v38  ;;  %v7841_v56 = vadd.f32 %v13151_v15, %v7840_v8 }
0x190b   : > { %v9006_v28 = vpop.f32.mrf.mxu1 }
0x190c   : > { %7897 = vst.msk [vmem:[%s13158_s1 + $0x50] sm:$0xff] %vm668_vm0, %v7881_v27  ;;  %v7879_v33 = vadd.f32 %v7841_v56, %v12756_v55  ;;  %v7852_v6 = vadd.f32 %v9006_v28, %v13151_v15 }
0x190d   : > { %v7843_v12 = vpop.f32.mrf.mxu1 }
0x190e   : > { %7895 = vst.msk [vmem:[%s13158_s1 + $0x40] sm:$0xff] %vm668_vm0, %v7879_v33  ;;  %v7882_v4 = vadd.f32 %v7852_v6, %v12769_v34  ;;  %v7844_v52 = vadd.f32 %v13151_v15, %v7843_v12 }
0x1910   : > { %7898 = vst.msk [vmem:[%s13158_s1 + $0x58] sm:$0xff] %vm668_vm0, %v7882_v4  ;;  %v7880_v38 = vadd.f32 %v7844_v52, %v12766_v3 }
0x1912   : > { %7896 = vst.msk [vmem:[%s13158_s1 + $0x48] sm:$0xff] %vm668_vm0, %v7880_v38 }
0x1917   : > { %v9009_v40 = vpop.f32.mrf.mxu1 }
0x1918   : > { %v7865_v55 = vadd.f32 %v9009_v40, %v13151_v15 }
0x1919   : > { %v7856_v61 = vpop.f32.mrf.mxu1 }
0x191a   : > { %v7885_v14 = vadd.f32 %v7865_v55, %v12783_v49  ;;  %v7857_v51 = vadd.f32 %v13151_v15, %v7856_v61 }
0x191b   : > { %v9010_v34 = vpop.f32.mrf.mxu1 }
0x191c   : > { %7901 = vst.msk [vmem:[%s13158_s1 + $0x70] sm:$0xff] %vm668_vm0, %v7885_v14  ;;  %v7883_v50 = vadd.f32 %v7857_v51, %v12778_v24  ;;  %v7868_v3 = vadd.f32 %v9010_v34, %v13151_v15 }
0x191d   : > { %v7859_v59 = vpop.f32.mrf.mxu1 }
0x191e   : > { %7899 = vst.msk [vmem:[%s13158_s1 + $0x60] sm:$0xff] %vm668_vm0, %v7883_v50  ;;  %v7886_v17 = vadd.f32 %v7868_v3, %v12793_v45  ;;  %v7860_v49 = vadd.f32 %v13151_v15, %v7859_v59 }
0x1920   : > { %7902 = vst.msk [vmem:[%s13158_s1 + $0x78] sm:$0xff] %vm668_vm0, %v7886_v17  ;;  %v7884_v24 = vadd.f32 %v7860_v49, %v12790_v42 }
0x1922   : > { %7900 = vst.msk [vmem:[%s13158_s1 + $0x68] sm:$0xff] %vm668_vm0, %v7884_v24 }
0x1923   : > { %9776 = shalt.err (!%p9773_p6)
}
0x1924   : > { %s9777_s20 = scalar_lea.hbm %s13221_s21, 2048  ;;  %s9781_s8 = scalar_lea.hbm %s13390_s6, 4096 }
0x1925   : > { %p9778_p7 = scmp.ne.s32.totalorder %s13221_s21, %s9777_s20  ;;  %p9782_p0 = scmp.lt.s32.totalorder %s13221_s21, %s13390_s6 }
0x1926   : > { %p9783_p2 = scmp.lt.s32.totalorder %s9781_s8, %s9777_s20 }
0x1927   : > { %p9779_p4 = pnand %p9778_p7, %p13391_p10 }
0x1928   : > { %p9784_p1 = por %p9783_p2, %p9782_p0 }
0x1929   : > { %p9780_p8 = pneg %p9779_p4 }
0x192b   : > { %p9785_p12 = pnand %p9784_p1, %p9780_p8 }
0x192d   : > { %9788 = shalt.err (!%p9785_p12)
}
0x192e   : > { %s9857_s23 = smov 128   ;;  %s9858_s15 = smov 8  }
0x192f   : > { %9033 = dma.vmem_to_hbm [thread:$0]  (%p13391_p10), %s13223_s26, 2048, %s13221_s21, %s7904_s0, %s9857_s23, %s9857_s23, %s9858_s15  }
0x1930 PF: > { %s13392_s18 = sld [smem:[#allocation18_spill]]  ;;  %p13395_p9 = scmp.ge.s32.totalorder %s9839_s30, 2 }
0x1931   : > { %s13393_s1 = sld [smem:[#allocation19_spill]] }
0x1936   : > { %s7933_s22 = sand.u32 1, %s13392_s18  }
0x1937   : > { %p13394_p13 = scmp.ne.s32.totalorder %s13393_s1, 0  ;;  %s7934_s20 = scalar_lea.sflag [#allocation4], %s7933_s22 }
0x1939   : > { %p9053_p11 = pnand %p13395_p9, %p13394_p13 }
0x193b   : > { %p9054_p5 = pneg %p9053_p11 }
0x193d   : > { %9822 = dma.done.wait (%p9054_p5), %s7934_s20, 2048  }
0x193e   : > { %9824 = vsyncadd (%p9054_p5), %s7934_s20, 4294965248  ;;  %s13396_s8 = sld [smem:[#allocation20_spill]]  ;;  %s13397_s2 = smov %s10047_s27 }
0x193f   : > { %p34_p3 = scmp.ge.s32.totalorder %s10047_s27, 4   ;;  %s13398_s27 = smov %s9831_s28 }
0x1940   : > { %s13399_s28 = smov %s9835_s29  ;;  %s13401_s30 = smov %s13397_s2 }
0x1941   :  { %36 = sbr.rel (!%p34_p3) target bundleno = 19 (0x13), region = 154 }
0x1944   : > { %s13400_s29 = smov %s13396_s8 }
0x1946   :  { %7939 = vsyncpa [#allocation3], 1 }
0x1947   :  { %7941 = vsyncpa [#allocation3 + $0x1], 1 }
0x1948   :  { %7942 = vsyncpa [#allocation8], 1 }
0x1949   :  { %7943 = vsyncpa [#allocation11], 1 }
0x194a   :  { %7944 = vsyncpa [#allocation4], 1 }
0x194b   :  { %7946 = vsyncpa [#allocation4 + $0x1], 1 }
0x194c   :  { %7947 = vsyncpa [#allocation5], 1 }
0x194d   :  { %7949 = vsyncpa [#allocation5 + $0x1], 1 }

</bundles_post_ra>
